<compile_context>
chip_gen: v7x
topology: tpu7x:2x2x1
jax: 0.10.0
libtpu: 0.0.40
codegen_flags: <defaults>
</compile_context>

<pallas_src>
import jax
import jax.numpy as jnp
import numpy as np
from jax.experimental import pallas as pl
from jax.experimental.pallas import tpu as pltpu

# Matches the repo's constant: linear3 / layer1 width = 21 - 5 = 16
FACTORS_NOT_USED_FOR_FM = [11, 13, 14, 16, 19]
N_FM = 21 - len(FACTORS_NOT_USED_FOR_FM)
DENSE = 20  # encoder_dense_scale

# Packed small-weight slab (width 80 lanes): name -> (row0, n_rows, n_cols); row0 % 8 == 0.
_WC = {"w2": (0, 40, 80), "w3a": (40, 16, 40), "w3b": (56, 16, 40),
       "l1": (72, 32, 16), "l2": (104, 32, 32), "l3": (136, 32, 32), "l4": (168, 1, 32)}
_WC_ROWS = 176
# Packed bias column slab: name -> (row0, n); row0 % 8 == 0.
_TB = {"bhl": (0, 256), "bp": (256, 40), "b1": (296, 80), "b2": (376, 40),
       "b3": (416, 16), "l1b": (432, 32), "l2b": (464, 32), "l3b": (496, 32),
       "l4b": (528, 1)}
_TB_ROWS = 536


# ----------------------------------------------------------------------------------------
# Pallas kernel
# ----------------------------------------------------------------------------------------
def supervised_kernel(xs_ref, rw_ref, wa_ref, w1_ref, wc_ref, tb_ref, out_ref, hbuf_ref):
    T = xs_ref.shape[0]
    B = xs_ref.shape[2]                       # batch tile (lane axis)

    def mm(a, b):                             # tail matmuls: default (fast) MXU precision
        return jnp.dot(a, b, preferred_element_type=jnp.float32)

    def mmh(a, b):                            # recurrence matmuls: exact-f32 multi-pass
        return jnp.dot(a, b, preferred_element_type=jnp.float32,
                       precision=jax.lax.Precision.HIGHEST)

    def wc(name):                             # static, 8-aligned slab views
        r0, nr, nc = _WC[name]
        return wc_ref[r0:r0 + nr, 0:nc]

    def bias(name):
        r0, n = _TB[name]
        return tb_ref[r0:r0 + n, :]           # (n, 1) -> broadcasts over lanes on add

    # ---- fused 2-channel, 2-layer LSTM recurrence (hidden size 4 per channel) ----------
    # Gate rows: i 0:8 | f 8:16 | o 16:24 | g 24:32 ; within each block rows 0:4 = H, 4:8 = L.
    W0 = rw_ref[0:32, 0:16]                   # gates0 <- [x8 ; h1]   (x8 row 2 == 1 -> bias)
    W1 = rw_ref[32:64, :]                     # gates1 <- [x8 ; h1 ; h2]

    def cell(gates, c):
        sg = jnp.tanh(0.5 * gates[0:24, :]) * 0.5 + 0.5      # sigmoid via tanh: 1 EUP pass
        g = jnp.tanh(gates[24:32, :])
        c = sg[8:16, :] * c + sg[0:8, :] * g
        h = sg[16:24, :] * jnp.tanh(c)
        return h, c

    def step(t, carry):
        h1, c1, h2, c2 = carry
        x8 = xs_ref[t]                                        # (8, B): x_H, x_L, 1, 0...
        g0 = mmh(W0, jnp.concatenate([x8, h1], axis=0))       # (32, B)
        h1, c1 = cell(g0, c1)
        g1 = mmh(W1, jnp.concatenate([x8, h1, h2], axis=0))   # (32, B)
        h2, c2 = cell(g1, c2)
        hbuf_ref[t] = h2                                      # 8-row aligned store
        return h1, c1, h2, c2

    z8 = jnp.zeros((8, B), jnp.float32)
    carry = (z8, z8, z8, z8)
    if T <= 32:                                               # short sequences: full unroll
        for t in range(T):
            carry = step(t, carry)
    else:                                                     # long sequences: bounded unroll
        carry = jax.lax.fori_loop(0, T, step, carry, unroll=4)

    # ---- dense tail, all on the MXU, activations kept (features, batch) ----------------
    hflat = hbuf_ref[...].reshape(8 * T, B)                   # free view: (T,8,B) -> (8T,B)
    xflat = xs_ref[...].reshape(8 * T, B)

    other = mm(wa_ref[256:296, :], xflat) + bias("bp")                    # linear_passthrough
    hx_lx = jnp.tanh(mm(wa_ref[0:256, :], hflat) + bias("bhl"))           # [tanh(linH);tanh(linL)]
    z = jnp.tanh(mm(w1_ref[...], hx_lx) + bias("b1"))                     # linear1  (80, B)
    z = jnp.tanh(mm(wc("w2"), z) + bias("b2"))                            # linear2  (40, B)
    z = jax.nn.relu(mm(wc("w3a"), z) + mm(wc("w3b"), other) + bias("b3"))  # linear3 (16, B)
    z = jax.nn.relu(mm(wc("l1"), z) + bias("l1b"))                        # layer1   (32, B)
    z = jax.nn.relu(mm(wc("l2"), z) + bias("l2b"))                        # layer2   (32, B)
    z = jax.nn.relu(mm(wc("l3"), z) + bias("l3b"))                        # layer3   (32, B)
    out_ref[...] = jax.nn.sigmoid(mm(wc("l4"), z) + bias("l4b"))          # (1, B) lane-dense


# ----------------------------------------------------------------------------------------
# Wrapper: parameter packing + pallas_call
# ----------------------------------------------------------------------------------------
def pack_params(P, seq_len):
    """Repack PyTorch-layout parameters into the kernel's fused / slab layout."""
    T = seq_len
    f32 = np.float32

    def npa(a):
        return np.asarray(a, f32)

    # Fused recurrence weights.  Gate-row order i|f|o|g, each block = [H rows 0:4, L rows 4:8].
    GATE_DST = {"i": 0, "f": 8, "o": 16, "g": 24}
    GATE_SRC = {"i": slice(0, 4), "f": slice(4, 8), "g": slice(8, 12), "o": slice(12, 16)}
    W0 = np.zeros((32, 16), f32)              # @ [x_H, x_L, 1, 0..0 | h1_H, h1_L]
    W1 = np.zeros((32, 24), f32)              # @ [x8 | h1_H, h1_L | h2_H, h2_L]
    for c, lp in enumerate((P["lstm_H"], P["lstm_L"])):        # c = 0 -> H, 1 -> L
        wih0, whh0 = npa(lp["w_ih0"]), npa(lp["w_hh0"])
        wih1, whh1 = npa(lp["w_ih1"]), npa(lp["w_hh1"])
        b0 = npa(lp["b_ih0"]) + npa(lp["b_hh0"])
        b1 = npa(lp["b_ih1"]) + npa(lp["b_hh1"])
        for gname in ("i", "f", "o", "g"):
            src = GATE_SRC[gname]
            dst = slice(GATE_DST[gname] + 4 * c, GATE_DST[gname] + 4 * c + 4)
            W0[dst, c] = wih0[src, 0]                          # x_H -> col 0, x_L -> col 1
            W0[dst, 2] = b0[src]                               # bias via the constant-1 row
            W0[dst, 8 + 4 * c:12 + 4 * c] = whh0[src, :]
            W1[dst, 2] = b1[src]
            W1[dst, 8 + 4 * c:12 + 4 * c] = wih1[src, :]
            W1[dst, 16 + 4 * c:20 + 4 * c] = whh1[src, :]
    rw = np.zeros((64, 24), f32)
    rw[0:32, 0:16] = W0
    rw[32:64, :] = W1

    # Wide slab A: block-interleaved [linearH | linearL] fusion + repacked passthrough.
    wA = np.zeros((296, 8 * T), f32)
    WH, WL, Wp = npa(P["WH"]), npa(P["WL"]), npa(P["Wp"])
    for t in range(T):
        wA[0:128, 8 * t:8 * t + 4] = WH[:, 4 * t:4 * t + 4]
        wA[128:256, 8 * t + 4:8 * t + 8] = WL[:, 4 * t:4 * t + 4]
        wA[256:296, 8 * t] = Wp[:, t]                          # H part of x_flat
        wA[256:296, 8 * t + 1] = Wp[:, T + t]                  # L part of x_flat

    w1 = npa(P["W1"])                                          # (80, 256), [Hx | Lx] cols

    wC = np.zeros((_WC_ROWS, 80), f32)
    wC[0:40, 0:80] = npa(P["W2"])
    wC[40:56, 0:40] = npa(P["W3"])[:, 0:40]
    wC[56:72, 0:40] = npa(P["W3"])[:, 40:80]
    wC[72:104, 0:16] = npa(P["L1"])
    wC[104:136, 0:32] = npa(P["L2"])
    wC[136:168, 0:32] = npa(P["L3"])
    wC[168:169, 0:32] = npa(P["L4"])

    tb = np.zeros((_TB_ROWS, 1), f32)
    tb[0:128, 0] = npa(P["bH"])
    tb[128:256, 0] = npa(P["bL"])
    tb[256:296, 0] = npa(P["bp"])
    tb[296:376, 0] = npa(P["b1"])
    tb[376:416, 0] = npa(P["b2"])
    tb[416:432, 0] = npa(P["b3"])
    tb[432:464, 0] = npa(P["l1b"])
    tb[464:496, 0] = npa(P["l2b"])
    tb[496:528, 0] = npa(P["l3b"])
    tb[528, 0] = npa(P["l4b"]).reshape(-1)[0]

    return tuple(jnp.asarray(a) for a in (rw, wA, w1, wC, tb))


def _round_up(n, m):
    return ((n + m - 1) // m) * m


def _choose_batch_tile(Bp):
    """Bp is a multiple of 128.  Keep >=128 lanes per step (lane-dense) and give the 1-D
    grid >=2 steps when the batch is large enough (v7x megacore); on v5e/v6e the extra
    grid steps are a cheap short serial loop."""
    n = Bp // 128
    if n <= 1:
        return Bp
    for d in (4, 3, 2):                       # prefer 512 / 384 / 256-lane tiles
        if n % d == 0 and n // d >= 2:
            return 128 * d
    if n % 2 == 0:
        return Bp // 2
    return 128 if n > 4 else Bp


def supervised_forward(x, packed):
    B, _, T = x.shape
    x = x.astype(jnp.float32)
    rw, wA, w1, wC, tb = packed

    Bp = _round_up(B, 128)                    # lane-dense batch padding
    bt = _choose_batch_tile(Bp)
    grid = (Bp // bt,)

    # Padded, feature-major input: (T, 8, Bp); rows 0/1 = H/L samples, row 2 = 1.0 (bias row).
    xs_p = jnp.zeros((T, 8, Bp), jnp.float32)
    xs_p = xs_p.at[:, 0, :B].set(jnp.transpose(x[:, 0, :]))
    xs_p = xs_p.at[:, 1, :B].set(jnp.transpose(x[:, 1, :]))
    xs_p = xs_p.at[:, 2, :].set(1.0)

    def full(a):                              # whole-array block, constant across the grid
        nd = a.ndim
        return pl.BlockSpec(a.shape, lambda i, _n=nd: (0,) * _n)

    out_fm = pl.pallas_call(
        supervised_kernel,
        out_shape=jax.ShapeDtypeStruct((1, Bp), jnp.float32),
        grid=grid,
        in_specs=[pl.BlockSpec((T, 8, bt), lambda i: (0, 0, i)),
                  full(rw), full(wA), full(w1), full(wC), full(tb)],
        out_specs=pl.BlockSpec((1, bt), lambda i: (0, i)),
        scratch_shapes=[pltpu.VMEM((T, 8, bt), jnp.float32)],
        compiler_params=pltpu.CompilerParams(dimension_semantics=("parallel",)),
    )(xs_p, rw, wA, w1, wC, tb)

    return jnp.transpose(out_fm[:, :B])                        # (B, 1)


# ----------------------------------------------------------------------------------------
# Synthetic parameters (PyTorch layout) + plain-JAX reference with PyTorch semantics
# ----------------------------------------------------------------------------------------
def init_params(key, seq_len):
    keys = iter(jax.random.split(key, 64))

    def w(shape, scale=0.2):
        return (scale * jax.random.normal(next(keys), shape)).astype(jnp.float32)

    def lstm():
        return dict(w_ih0=w((16, 1)), w_hh0=w((16, 4)), b_ih0=w((16,)), b_hh0=w((16,)),
                    w_ih1=w((16, 4)), w_hh1=w((16, 4)), b_ih1=w((16,)), b_hh1=w((16,)))

    T = seq_len
    return dict(
        lstm_H=lstm(), lstm_L=lstm(),
        Wp=w((2 * DENSE, 2 * T)), bp=w((2 * DENSE,)),
        WH=w((128, 4 * T)), bH=w((128,)),
        WL=w((128, 4 * T)), bL=w((128,)),
        W1=w((4 * DENSE, 256)), b1=w((4 * DENSE,)),
        W2=w((2 * DENSE, 4 * DENSE)), b2=w((2 * DENSE,)),
        W3=w((N_FM, 4 * DENSE)), b3=w((N_FM,)),
        L1=w((32, N_FM)), l1b=w((32,)),
        L2=w((32, 32)), l2b=w((32,)),
        L3=w((32, 32)), l3b=w((32,)),
        L4=w((1, 32)), l4b=w((1,)),
    )


def _dense(x, W, bias):
    return jnp.dot(x, W.T, precision=jax.lax.Precision.HIGHEST) + bias


def _lstm2_ref(x, p):
    """PyTorch nn.LSTM(input_size=1, hidden_size=4, num_layers=2, batch_first=True)."""
    B, T = x.shape
    h1 = c1 = h2 = c2 = jnp.zeros((B, 4), jnp.float32)
    outs = []

    def act(g):  # PyTorch gate order [i, f, g, o]
        return (jax.nn.sigmoid(g[:, 0:4]), jax.nn.sigmoid(g[:, 4:8]),
                jnp.tanh(g[:, 8:12]), jax.nn.sigmoid(g[:, 12:16]))

    for t in range(T):
        xt = x[:, t:t + 1]
        g = _dense(xt, p["w_ih0"], p["b_ih0"]) + _dense(h1, p["w_hh0"], p["b_hh0"])
        i, f, gg, o = act(g)
        c1 = f * c1 + i * gg
        h1 = o * jnp.tanh(c1)
        g = _dense(h1, p["w_ih1"], p["b_ih1"]) + _dense(h2, p["w_hh1"], p["b_hh1"])
        i, f, gg, o = act(g)
        c2 = f * c2 + i * gg
        h2 = o * jnp.tanh(c2)
        outs.append(h2)
    return jnp.stack(outs, axis=1).reshape(B, 4 * T)


def reference_forward(x, P):
    """Faithful JAX port of SupervisedModel.forward (the PyTorch spec)."""
    B, _, T = x.shape
    x = x.astype(jnp.float32)
    other = _dense(x.reshape(B, 2 * T), P["Wp"], P["bp"])
    Hx = jnp.tanh(_dense(_lstm2_ref(x[:, 0, :], P["lstm_H"]), P["WH"], P["bH"]))
    Lx = jnp.tanh(_dense(_lstm2_ref(x[:, 1, :], P["lstm_L"]), P["WL"], P["bL"]))
    z = jnp.tanh(_dense(jnp.concatenate([Hx, Lx], axis=1), P["W1"], P["b1"]))
    z = jnp.tanh(_dense(z, P["W2"], P["b2"]))
    z = jax.nn.relu(_dense(jnp.concatenate([z, other], axis=1), P["W3"], P["b3"]))
    z = jax.nn.relu(_dense(z, P["L1"], P["l1b"]))
    z = jax.nn.relu(_dense(z, P["L2"], P["l2b"]))
    z = jax.nn.relu(_dense(z, P["L3"], P["l3b"]))
    return jax.nn.sigmoid(_dense(z, P["L4"], P["l4b"]))


if __name__ == "__main__":
    seq_len, batch = 16, 2
    key = jax.random.PRNGKey(0)
    kx, kp = jax.random.split(key)
    x = jax.random.normal(kx, (batch, 2, seq_len), dtype=jnp.float32)
    P = init_params(kp, seq_len)
    packed = pack_params(P, seq_len)

    out = jax.block_until_ready(supervised_forward(x, packed))
    assert out.shape == (batch, 1)
    assert bool(jnp.all(jnp.isfinite(out)))

    ref = jax.block_until_ready(jax.jit(reference_forward)(x, P))
    np.testing.assert_allclose(np.asarray(out), np.asarray(ref), atol=2e-3, rtol=2e-3)

    print("KERNEL_OK")
</pallas_src>

<mosaic_0001>
module attributes {stable_mosaic.version = 11 : i64} {
  func.func @supervised_kernel(%arg0: i32, %arg1: memref<16x8x128xf32, #tpu.memory_space<vmem>>, %arg2: memref<64x24xf32, #tpu.memory_space<vmem>>, %arg3: memref<296x128xf32, #tpu.memory_space<vmem>>, %arg4: memref<80x256xf32, #tpu.memory_space<vmem>>, %arg5: memref<176x80xf32, #tpu.memory_space<vmem>>, %arg6: memref<536x1xf32, #tpu.memory_space<vmem>>, %arg7: memref<1x128xf32, #tpu.memory_space<vmem>>, %arg8: memref<16x8x128xf32, #tpu.memory_space<vmem>>) attributes {dimension_semantics = [#tpu.dimension_semantics<parallel>], iteration_bounds = array<i64: 1>, scalar_prefetch = 0 : i64, scratch_operands = 1 : i64, tpu.core_type = #tpu.core_type<tc>, window_params = [{transform_indices = @transform_0, window_bounds = array<i64: 16, 8, 128>}, {pipeline_mode = #tpu.pipeline_mode<synchronous>, transform_indices = @transform_1, window_bounds = array<i64: 64, 24>}, {pipeline_mode = #tpu.pipeline_mode<synchronous>, transform_indices = @transform_2, window_bounds = array<i64: 296, 128>}, {pipeline_mode = #tpu.pipeline_mode<synchronous>, transform_indices = @transform_3, window_bounds = array<i64: 80, 256>}, {pipeline_mode = #tpu.pipeline_mode<synchronous>, transform_indices = @transform_4, window_bounds = array<i64: 176, 80>}, {pipeline_mode = #tpu.pipeline_mode<synchronous>, transform_indices = @transform_5, window_bounds = array<i64: 536, 1>}, {transform_indices = @transform_6, window_bounds = array<i64: 1, 128>}]} {
    %c0 = arith.constant 0 : index
    %c0_0 = arith.constant 0 : index
    %0 = vector.load %arg2[%c0, %c0_0] : memref<64x24xf32, #tpu.memory_space<vmem>>, vector<32x16xf32>
    %c32 = arith.constant 32 : index
    %c0_1 = arith.constant 0 : index
    %1 = vector.load %arg2[%c32, %c0_1] : memref<64x24xf32, #tpu.memory_space<vmem>>, vector<32x24xf32>
    %cst = arith.constant 0.000000e+00 : f32
    %2 = vector.broadcast %cst : f32 to vector<8x128xf32>
    %c0_2 = arith.constant 0 : index
    %c0_3 = arith.constant 0 : index
    %c0_4 = arith.constant 0 : index
    %3 = vector.load %arg1[%c0_2, %c0_3, %c0_4] : memref<16x8x128xf32, #tpu.memory_space<vmem>>, vector<1x8x128xf32>
    %4 = vector.shape_cast %3 : vector<1x8x128xf32> to vector<8x128xf32>
    %5 = tpu.concatenate %4, %2 in 0 : vector<8x128xf32>, vector<8x128xf32> -> vector<16x128xf32>
    %cst_5 = arith.constant dense<0.000000e+00> : vector<32x128xf32>
    %6 = tpu.matmul %0, %5, %cst_5 {dimension_numbers = #tpu.dot_dimension_numbers<[1], [0], [0], [1], [0, 0, 1, 1], [], []>, precision = #tpu.contract_precision<fp32>} : vector<32x16xf32>, vector<16x128xf32>, vector<32x128xf32> -> vector<32x128xf32>
    %7 = vector.extract_strided_slice %6 {offsets = [0, 0], sizes = [24, 128], strides = [1, 1]} : vector<32x128xf32> to vector<24x128xf32>
    %cst_6 = arith.constant 5.000000e-01 : f32
    %8 = vector.broadcast %cst_6 : f32 to vector<24x128xf32>
    %9 = arith.mulf %8, %7 : vector<24x128xf32>
    %10 = math.tanh %9 : vector<24x128xf32>
    %cst_7 = arith.constant 5.000000e-01 : f32
    %11 = vector.broadcast %cst_7 : f32 to vector<24x128xf32>
    %12 = arith.mulf %10, %11 : vector<24x128xf32>
    %cst_8 = arith.constant 5.000000e-01 : f32
    %13 = vector.broadcast %cst_8 : f32 to vector<24x128xf32>
    %14 = arith.addf %12, %13 : vector<24x128xf32>
    %15 = vector.extract_strided_slice %6 {offsets = [24, 0], sizes = [8, 128], strides = [1, 1]} : vector<32x128xf32> to vector<8x128xf32>
    %16 = math.tanh %15 : vector<8x128xf32>
    %17 = vector.extract_strided_slice %14 {offsets = [8, 0], sizes = [8, 128], strides = [1, 1]} : vector<24x128xf32> to vector<8x128xf32>
    %18 = arith.mulf %17, %2 : vector<8x128xf32>
    %19 = vector.extract_strided_slice %14 {offsets = [0, 0], sizes = [8, 128], strides = [1, 1]} : vector<24x128xf32> to vector<8x128xf32>
    %20 = arith.mulf %19, %16 : vector<8x128xf32>
    %21 = arith.addf %18, %20 : vector<8x128xf32>
    %22 = vector.extract_strided_slice %14 {offsets = [16, 0], sizes = [8, 128], strides = [1, 1]} : vector<24x128xf32> to vector<8x128xf32>
    %23 = math.tanh %21 : vector<8x128xf32>
    %24 = arith.mulf %22, %23 : vector<8x128xf32>
    %25 = tpu.concatenate %4, %24, %2 in 0 : vector<8x128xf32>, vector<8x128xf32>, vector<8x128xf32> -> vector<24x128xf32>
    %cst_9 = arith.constant dense<0.000000e+00> : vector<32x128xf32>
    %26 = tpu.matmul %1, %25, %cst_9 {dimension_numbers = #tpu.dot_dimension_numbers<[1], [0], [0], [1], [0, 0, 1, 1], [], []>, precision = #tpu.contract_precision<fp32>} : vector<32x24xf32>, vector<24x128xf32>, vector<32x128xf32> -> vector<32x128xf32>
    %27 = vector.extract_strided_slice %26 {offsets = [0, 0], sizes = [24, 128], strides = [1, 1]} : vector<32x128xf32> to vector<24x128xf32>
    %cst_10 = arith.constant 5.000000e-01 : f32
    %28 = vector.broadcast %cst_10 : f32 to vector<24x128xf32>
    %29 = arith.mulf %28, %27 : vector<24x128xf32>
    %30 = math.tanh %29 : vector<24x128xf32>
    %cst_11 = arith.constant 5.000000e-01 : f32
    %31 = vector.broadcast %cst_11 : f32 to vector<24x128xf32>
    %32 = arith.mulf %30, %31 : vector<24x128xf32>
    %cst_12 = arith.constant 5.000000e-01 : f32
    %33 = vector.broadcast %cst_12 : f32 to vector<24x128xf32>
    %34 = arith.addf %32, %33 : vector<24x128xf32>
    %35 = vector.extract_strided_slice %26 {offsets = [24, 0], sizes = [8, 128], strides = [1, 1]} : vector<32x128xf32> to vector<8x128xf32>
    %36 = math.tanh %35 : vector<8x128xf32>
    %37 = vector.extract_strided_slice %34 {offsets = [8, 0], sizes = [8, 128], strides = [1, 1]} : vector<24x128xf32> to vector<8x128xf32>
    %38 = arith.mulf %37, %2 : vector<8x128xf32>
    %39 = vector.extract_strided_slice %34 {offsets = [0, 0], sizes = [8, 128], strides = [1, 1]} : vector<24x128xf32> to vector<8x128xf32>
    %40 = arith.mulf %39, %36 : vector<8x128xf32>
    %41 = arith.addf %38, %40 : vector<8x128xf32>
    %42 = vector.extract_strided_slice %34 {offsets = [16, 0], sizes = [8, 128], strides = [1, 1]} : vector<24x128xf32> to vector<8x128xf32>
    %43 = math.tanh %41 : vector<8x128xf32>
    %44 = arith.mulf %42, %43 : vector<8x128xf32>
    %c0_13 = arith.constant 0 : index
    %c0_14 = arith.constant 0 : index
    %c0_15 = arith.constant 0 : index
    %45 = vector.load %arg8[%c0_13, %c0_14, %c0_15] : memref<16x8x128xf32, #tpu.memory_space<vmem>>, vector<1x8x128xf32>
    %46 = vector.shape_cast %45 : vector<1x8x128xf32> to vector<8x128xf32>
    %47 = vector.shape_cast %44 : vector<8x128xf32> to vector<1x8x128xf32>
    tpu.vector_store %arg8[%c0_13, %c0_14, %c0_15], %47 {strides = array<i32>} : memref<16x8x128xf32, #tpu.memory_space<vmem>>, vector<1x8x128xf32>,
    %c1 = arith.constant 1 : index
    %c0_16 = arith.constant 0 : index
    %c0_17 = arith.constant 0 : index
    %48 = vector.load %arg1[%c1, %c0_16, %c0_17] : memref<16x8x128xf32, #tpu.memory_space<vmem>>, vector<1x8x128xf32>
    %49 = vector.shape_cast %48 : vector<1x8x128xf32> to vector<8x128xf32>
    %50 = tpu.concatenate %49, %24 in 0 : vector<8x128xf32>, vector<8x128xf32> -> vector<16x128xf32>
    %cst_18 = arith.constant dense<0.000000e+00> : vector<32x128xf32>
    %51 = tpu.matmul %0, %50, %cst_18 {dimension_numbers = #tpu.dot_dimension_numbers<[1], [0], [0], [1], [0, 0, 1, 1], [], []>, precision = #tpu.contract_precision<fp32>} : vector<32x16xf32>, vector<16x128xf32>, vector<32x128xf32> -> vector<32x128xf32>
    %52 = vector.extract_strided_slice %51 {offsets = [0, 0], sizes = [24, 128], strides = [1, 1]} : vector<32x128xf32> to vector<24x128xf32>
    %cst_19 = arith.constant 5.000000e-01 : f32
    %53 = vector.broadcast %cst_19 : f32 to vector<24x128xf32>
    %54 = arith.mulf %53, %52 : vector<24x128xf32>
    %55 = math.tanh %54 : vector<24x128xf32>
    %cst_20 = arith.constant 5.000000e-01 : f32
    %56 = vector.broadcast %cst_20 : f32 to vector<24x128xf32>
    %57 = arith.mulf %55, %56 : vector<24x128xf32>
    %cst_21 = arith.constant 5.000000e-01 : f32
    %58 = vector.broadcast %cst_21 : f32 to vector<24x128xf32>
    %59 = arith.addf %57, %58 : vector<24x128xf32>
    %60 = vector.extract_strided_slice %51 {offsets = [24, 0], sizes = [8, 128], strides = [1, 1]} : vector<32x128xf32> to vector<8x128xf32>
    %61 = math.tanh %60 : vector<8x128xf32>
    %62 = vector.extract_strided_slice %59 {offsets = [8, 0], sizes = [8, 128], strides = [1, 1]} : vector<24x128xf32> to vector<8x128xf32>
    %63 = arith.mulf %62, %21 : vector<8x128xf32>
    %64 = vector.extract_strided_slice %59 {offsets = [0, 0], sizes = [8, 128], strides = [1, 1]} : vector<24x128xf32> to vector<8x128xf32>
    %65 = arith.mulf %64, %61 : vector<8x128xf32>
    %66 = arith.addf %63, %65 : vector<8x128xf32>
    %67 = vector.extract_strided_slice %59 {offsets = [16, 0], sizes = [8, 128], strides = [1, 1]} : vector<24x128xf32> to vector<8x128xf32>
    %68 = math.tanh %66 : vector<8x128xf32>
    %69 = arith.mulf %67, %68 : vector<8x128xf32>
    %70 = tpu.concatenate %49, %69, %44 in 0 : vector<8x128xf32>, vector<8x128xf32>, vector<8x128xf32> -> vector<24x128xf32>
    %cst_22 = arith.constant dense<0.000000e+00> : vector<32x128xf32>
    %71 = tpu.matmul %1, %70, %cst_22 {dimension_numbers = #tpu.dot_dimension_numbers<[1], [0], [0], [1], [0, 0, 1, 1], [], []>, precision = #tpu.contract_precision<fp32>} : vector<32x24xf32>, vector<24x128xf32>, vector<32x128xf32> -> vector<32x128xf32>
    %72 = vector.extract_strided_slice %71 {offsets = [0, 0], sizes = [24, 128], strides = [1, 1]} : vector<32x128xf32> to vector<24x128xf32>
    %cst_23 = arith.constant 5.000000e-01 : f32
    %73 = vector.broadcast %cst_23 : f32 to vector<24x128xf32>
    %74 = arith.mulf %73, %72 : vector<24x128xf32>
    %75 = math.tanh %74 : vector<24x128xf32>
    %cst_24 = arith.constant 5.000000e-01 : f32
    %76 = vector.broadcast %cst_24 : f32 to vector<24x128xf32>
    %77 = arith.mulf %75, %76 : vector<24x128xf32>
    %cst_25 = arith.constant 5.000000e-01 : f32
    %78 = vector.broadcast %cst_25 : f32 to vector<24x128xf32>
    %79 = arith.addf %77, %78 : vector<24x128xf32>
    %80 = vector.extract_strided_slice %71 {offsets = [24, 0], sizes = [8, 128], strides = [1, 1]} : vector<32x128xf32> to vector<8x128xf32>
    %81 = math.tanh %80 : vector<8x128xf32>
    %82 = vector.extract_strided_slice %79 {offsets = [8, 0], sizes = [8, 128], strides = [1, 1]} : vector<24x128xf32> to vector<8x128xf32>
    %83 = arith.mulf %82, %41 : vector<8x128xf32>
    %84 = vector.extract_strided_slice %79 {offsets = [0, 0], sizes = [8, 128], strides = [1, 1]} : vector<24x128xf32> to vector<8x128xf32>
    %85 = arith.mulf %84, %81 : vector<8x128xf32>
    %86 = arith.addf %83, %85 : vector<8x128xf32>
    %87 = vector.extract_strided_slice %79 {offsets = [16, 0], sizes = [8, 128], strides = [1, 1]} : vector<24x128xf32> to vector<8x128xf32>
    %88 = math.tanh %86 : vector<8x128xf32>
    %89 = arith.mulf %87, %88 : vector<8x128xf32>
    %c1_26 = arith.constant 1 : index
    %c0_27 = arith.constant 0 : index
    %c0_28 = arith.constant 0 : index
    %90 = vector.load %arg8[%c1_26, %c0_27, %c0_28] : memref<16x8x128xf32, #tpu.memory_space<vmem>>, vector<1x8x128xf32>
    %91 = vector.shape_cast %90 : vector<1x8x128xf32> to vector<8x128xf32>
    %92 = vector.shape_cast %89 : vector<8x128xf32> to vector<1x8x128xf32>
    tpu.vector_store %arg8[%c1_26, %c0_27, %c0_28], %92 {strides = array<i32>} : memref<16x8x128xf32, #tpu.memory_space<vmem>>, vector<1x8x128xf32>,
    %c2 = arith.constant 2 : index
    %c0_29 = arith.constant 0 : index
    %c0_30 = arith.constant 0 : index
    %93 = vector.load %arg1[%c2, %c0_29, %c0_30] : memref<16x8x128xf32, #tpu.memory_space<vmem>>, vector<1x8x128xf32>
    %94 = vector.shape_cast %93 : vector<1x8x128xf32> to vector<8x128xf32>
    %95 = tpu.concatenate %94, %69 in 0 : vector<8x128xf32>, vector<8x128xf32> -> vector<16x128xf32>
    %cst_31 = arith.constant dense<0.000000e+00> : vector<32x128xf32>
    %96 = tpu.matmul %0, %95, %cst_31 {dimension_numbers = #tpu.dot_dimension_numbers<[1], [0], [0], [1], [0, 0, 1, 1], [], []>, precision = #tpu.contract_precision<fp32>} : vector<32x16xf32>, vector<16x128xf32>, vector<32x128xf32> -> vector<32x128xf32>
    %97 = vector.extract_strided_slice %96 {offsets = [0, 0], sizes = [24, 128], strides = [1, 1]} : vector<32x128xf32> to vector<24x128xf32>
    %cst_32 = arith.constant 5.000000e-01 : f32
    %98 = vector.broadcast %cst_32 : f32 to vector<24x128xf32>
    %99 = arith.mulf %98, %97 : vector<24x128xf32>
    %100 = math.tanh %99 : vector<24x128xf32>
    %cst_33 = arith.constant 5.000000e-01 : f32
    %101 = vector.broadcast %cst_33 : f32 to vector<24x128xf32>
    %102 = arith.mulf %100, %101 : vector<24x128xf32>
    %cst_34 = arith.constant 5.000000e-01 : f32
    %103 = vector.broadcast %cst_34 : f32 to vector<24x128xf32>
    %104 = arith.addf %102, %103 : vector<24x128xf32>
    %105 = vector.extract_strided_slice %96 {offsets = [24, 0], sizes = [8, 128], strides = [1, 1]} : vector<32x128xf32> to vector<8x128xf32>
    %106 = math.tanh %105 : vector<8x128xf32>
    %107 = vector.extract_strided_slice %104 {offsets = [8, 0], sizes = [8, 128], strides = [1, 1]} : vector<24x128xf32> to vector<8x128xf32>
    %108 = arith.mulf %107, %66 : vector<8x128xf32>
    %109 = vector.extract_strided_slice %104 {offsets = [0, 0], sizes = [8, 128], strides = [1, 1]} : vector<24x128xf32> to vector<8x128xf32>
    %110 = arith.mulf %109, %106 : vector<8x128xf32>
    %111 = arith.addf %108, %110 : vector<8x128xf32>
    %112 = vector.extract_strided_slice %104 {offsets = [16, 0], sizes = [8, 128], strides = [1, 1]} : vector<24x128xf32> to vector<8x128xf32>
    %113 = math.tanh %111 : vector<8x128xf32>
    %114 = arith.mulf %112, %113 : vector<8x128xf32>
    %115 = tpu.concatenate %94, %114, %89 in 0 : vector<8x128xf32>, vector<8x128xf32>, vector<8x128xf32> -> vector<24x128xf32>
    %cst_35 = arith.constant dense<0.000000e+00> : vector<32x128xf32>
    %116 = tpu.matmul %1, %115, %cst_35 {dimension_numbers = #tpu.dot_dimension_numbers<[1], [0], [0], [1], [0, 0, 1, 1], [], []>, precision = #tpu.contract_precision<fp32>} : vector<32x24xf32>, vector<24x128xf32>, vector<32x128xf32> -> vector<32x128xf32>
    %117 = vector.extract_strided_slice %116 {offsets = [0, 0], sizes = [24, 128], strides = [1, 1]} : vector<32x128xf32> to vector<24x128xf32>
    %cst_36 = arith.constant 5.000000e-01 : f32
    %118 = vector.broadcast %cst_36 : f32 to vector<24x128xf32>
    %119 = arith.mulf %118, %117 : vector<24x128xf32>
    %120 = math.tanh %119 : vector<24x128xf32>
    %cst_37 = arith.constant 5.000000e-01 : f32
    %121 = vector.broadcast %cst_37 : f32 to vector<24x128xf32>
    %122 = arith.mulf %120, %121 : vector<24x128xf32>
    %cst_38 = arith.constant 5.000000e-01 : f32
    %123 = vector.broadcast %cst_38 : f32 to vector<24x128xf32>
    %124 = arith.addf %122, %123 : vector<24x128xf32>
    %125 = vector.extract_strided_slice %116 {offsets = [24, 0], sizes = [8, 128], strides = [1, 1]} : vector<32x128xf32> to vector<8x128xf32>
    %126 = math.tanh %125 : vector<8x128xf32>
    %127 = vector.extract_strided_slice %124 {offsets = [8, 0], sizes = [8, 128], strides = [1, 1]} : vector<24x128xf32> to vector<8x128xf32>
    %128 = arith.mulf %127, %86 : vector<8x128xf32>
    %129 = vector.extract_strided_slice %124 {offsets = [0, 0], sizes = [8, 128], strides = [1, 1]} : vector<24x128xf32> to vector<8x128xf32>
    %130 = arith.mulf %129, %126 : vector<8x128xf32>
    %131 = arith.addf %128, %130 : vector<8x128xf32>
    %132 = vector.extract_strided_slice %124 {offsets = [16, 0], sizes = [8, 128], strides = [1, 1]} : vector<24x128xf32> to vector<8x128xf32>
    %133 = math.tanh %131 : vector<8x128xf32>
    %134 = arith.mulf %132, %133 : vector<8x128xf32>
    %c2_39 = arith.constant 2 : index
    %c0_40 = arith.constant 0 : index
    %c0_41 = arith.constant 0 : index
    %135 = vector.load %arg8[%c2_39, %c0_40, %c0_41] : memref<16x8x128xf32, #tpu.memory_space<vmem>>, vector<1x8x128xf32>
    %136 = vector.shape_cast %135 : vector<1x8x128xf32> to vector<8x128xf32>
    %137 = vector.shape_cast %134 : vector<8x128xf32> to vector<1x8x128xf32>
    tpu.vector_store %arg8[%c2_39, %c0_40, %c0_41], %137 {strides = array<i32>} : memref<16x8x128xf32, #tpu.memory_space<vmem>>, vector<1x8x128xf32>,
    %c3 = arith.constant 3 : index
    %c0_42 = arith.constant 0 : index
    %c0_43 = arith.constant 0 : index
    %138 = vector.load %arg1[%c3, %c0_42, %c0_43] : memref<16x8x128xf32, #tpu.memory_space<vmem>>, vector<1x8x128xf32>
    %139 = vector.shape_cast %138 : vector<1x8x128xf32> to vector<8x128xf32>
    %140 = tpu.concatenate %139, %114 in 0 : vector<8x128xf32>, vector<8x128xf32> -> vector<16x128xf32>
    %cst_44 = arith.constant dense<0.000000e+00> : vector<32x128xf32>
    %141 = tpu.matmul %0, %140, %cst_44 {dimension_numbers = #tpu.dot_dimension_numbers<[1], [0], [0], [1], [0, 0, 1, 1], [], []>, precision = #tpu.contract_precision<fp32>} : vector<32x16xf32>, vector<16x128xf32>, vector<32x128xf32> -> vector<32x128xf32>
    %142 = vector.extract_strided_slice %141 {offsets = [0, 0], sizes = [24, 128], strides = [1, 1]} : vector<32x128xf32> to vector<24x128xf32>
    %cst_45 = arith.constant 5.000000e-01 : f32
    %143 = vector.broadcast %cst_45 : f32 to vector<24x128xf32>
    %144 = arith.mulf %143, %142 : vector<24x128xf32>
    %145 = math.tanh %144 : vector<24x128xf32>
    %cst_46 = arith.constant 5.000000e-01 : f32
    %146 = vector.broadcast %cst_46 : f32 to vector<24x128xf32>
    %147 = arith.mulf %145, %146 : vector<24x128xf32>
    %cst_47 = arith.constant 5.000000e-01 : f32
    %148 = vector.broadcast %cst_47 : f32 to vector<24x128xf32>
    %149 = arith.addf %147, %148 : vector<24x128xf32>
    %150 = vector.extract_strided_slice %141 {offsets = [24, 0], sizes = [8, 128], strides = [1, 1]} : vector<32x128xf32> to vector<8x128xf32>
    %151 = math.tanh %150 : vector<8x128xf32>
    %152 = vector.extract_strided_slice %149 {offsets = [8, 0], sizes = [8, 128], strides = [1, 1]} : vector<24x128xf32> to vector<8x128xf32>
    %153 = arith.mulf %152, %111 : vector<8x128xf32>
    %154 = vector.extract_strided_slice %149 {offsets = [0, 0], sizes = [8, 128], strides = [1, 1]} : vector<24x128xf32> to vector<8x128xf32>
    %155 = arith.mulf %154, %151 : vector<8x128xf32>
    %156 = arith.addf %153, %155 : vector<8x128xf32>
    %157 = vector.extract_strided_slice %149 {offsets = [16, 0], sizes = [8, 128], strides = [1, 1]} : vector<24x128xf32> to vector<8x128xf32>
    %158 = math.tanh %156 : vector<8x128xf32>
    %159 = arith.mulf %157, %158 : vector<8x128xf32>
    %160 = tpu.concatenate %139, %159, %134 in 0 : vector<8x128xf32>, vector<8x128xf32>, vector<8x128xf32> -> vector<24x128xf32>
    %cst_48 = arith.constant dense<0.000000e+00> : vector<32x128xf32>
    %161 = tpu.matmul %1, %160, %cst_48 {dimension_numbers = #tpu.dot_dimension_numbers<[1], [0], [0], [1], [0, 0, 1, 1], [], []>, precision = #tpu.contract_precision<fp32>} : vector<32x24xf32>, vector<24x128xf32>, vector<32x128xf32> -> vector<32x128xf32>
    %162 = vector.extract_strided_slice %161 {offsets = [0, 0], sizes = [24, 128], strides = [1, 1]} : vector<32x128xf32> to vector<24x128xf32>
    %cst_49 = arith.constant 5.000000e-01 : f32
    %163 = vector.broadcast %cst_49 : f32 to vector<24x128xf32>
    %164 = arith.mulf %163, %162 : vector<24x128xf32>
    %165 = math.tanh %164 : vector<24x128xf32>
    %cst_50 = arith.constant 5.000000e-01 : f32
    %166 = vector.broadcast %cst_50 : f32 to vector<24x128xf32>
    %167 = arith.mulf %165, %166 : vector<24x128xf32>
    %cst_51 = arith.constant 5.000000e-01 : f32
    %168 = vector.broadcast %cst_51 : f32 to vector<24x128xf32>
    %169 = arith.addf %167, %168 : vector<24x128xf32>
    %170 = vector.extract_strided_slice %161 {offsets = [24, 0], sizes = [8, 128], strides = [1, 1]} : vector<32x128xf32> to vector<8x128xf32>
    %171 = math.tanh %170 : vector<8x128xf32>
    %172 = vector.extract_strided_slice %169 {offsets = [8, 0], sizes = [8, 128], strides = [1, 1]} : vector<24x128xf32> to vector<8x128xf32>
    %173 = arith.mulf %172, %131 : vector<8x128xf32>
    %174 = vector.extract_strided_slice %169 {offsets = [0, 0], sizes = [8, 128], strides = [1, 1]} : vector<24x128xf32> to vector<8x128xf32>
    %175 = arith.mulf %174, %171 : vector<8x128xf32>
    %176 = arith.addf %173, %175 : vector<8x128xf32>
    %177 = vector.extract_strided_slice %169 {offsets = [16, 0], sizes = [8, 128], strides = [1, 1]} : vector<24x128xf32> to vector<8x128xf32>
    %178 = math.tanh %176 : vector<8x128xf32>
    %179 = arith.mulf %177, %178 : vector<8x128xf32>
    %c3_52 = arith.constant 3 : index
    %c0_53 = arith.constant 0 : index
    %c0_54 = arith.constant 0 : index
    %180 = vector.load %arg8[%c3_52, %c0_53, %c0_54] : memref<16x8x128xf32, #tpu.memory_space<vmem>>, vector<1x8x128xf32>
    %181 = vector.shape_cast %180 : vector<1x8x128xf32> to vector<8x128xf32>
    %182 = vector.shape_cast %179 : vector<8x128xf32> to vector<1x8x128xf32>
    tpu.vector_store %arg8[%c3_52, %c0_53, %c0_54], %182 {strides = array<i32>} : memref<16x8x128xf32, #tpu.memory_space<vmem>>, vector<1x8x128xf32>,
    %c4 = arith.constant 4 : index
    %c0_55 = arith.constant 0 : index
    %c0_56 = arith.constant 0 : index
    %183 = vector.load %arg1[%c4, %c0_55, %c0_56] : memref<16x8x128xf32, #tpu.memory_space<vmem>>, vector<1x8x128xf32>
    %184 = vector.shape_cast %183 : vector<1x8x128xf32> to vector<8x128xf32>
    %185 = tpu.concatenate %184, %159 in 0 : vector<8x128xf32>, vector<8x128xf32> -> vector<16x128xf32>
    %cst_57 = arith.constant dense<0.000000e+00> : vector<32x128xf32>
    %186 = tpu.matmul %0, %185, %cst_57 {dimension_numbers = #tpu.dot_dimension_numbers<[1], [0], [0], [1], [0, 0, 1, 1], [], []>, precision = #tpu.contract_precision<fp32>} : vector<32x16xf32>, vector<16x128xf32>, vector<32x128xf32> -> vector<32x128xf32>
    %187 = vector.extract_strided_slice %186 {offsets = [0, 0], sizes = [24, 128], strides = [1, 1]} : vector<32x128xf32> to vector<24x128xf32>
    %cst_58 = arith.constant 5.000000e-01 : f32
    %188 = vector.broadcast %cst_58 : f32 to vector<24x128xf32>
    %189 = arith.mulf %188, %187 : vector<24x128xf32>
    %190 = math.tanh %189 : vector<24x128xf32>
    %cst_59 = arith.constant 5.000000e-01 : f32
    %191 = vector.broadcast %cst_59 : f32 to vector<24x128xf32>
    %192 = arith.mulf %190, %191 : vector<24x128xf32>
    %cst_60 = arith.constant 5.000000e-01 : f32
    %193 = vector.broadcast %cst_60 : f32 to vector<24x128xf32>
    %194 = arith.addf %192, %193 : vector<24x128xf32>
    %195 = vector.extract_strided_slice %186 {offsets = [24, 0], sizes = [8, 128], strides = [1, 1]} : vector<32x128xf32> to vector<8x128xf32>
    %196 = math.tanh %195 : vector<8x128xf32>
    %197 = vector.extract_strided_slice %194 {offsets = [8, 0], sizes = [8, 128], strides = [1, 1]} : vector<24x128xf32> to vector<8x128xf32>
    %198 = arith.mulf %197, %156 : vector<8x128xf32>
    %199 = vector.extract_strided_slice %194 {offsets = [0, 0], sizes = [8, 128], strides = [1, 1]} : vector<24x128xf32> to vector<8x128xf32>
    %200 = arith.mulf %199, %196 : vector<8x128xf32>
    %201 = arith.addf %198, %200 : vector<8x128xf32>
    %202 = vector.extract_strided_slice %194 {offsets = [16, 0], sizes = [8, 128], strides = [1, 1]} : vector<24x128xf32> to vector<8x128xf32>
    %203 = math.tanh %201 : vector<8x128xf32>
    %204 = arith.mulf %202, %203 : vector<8x128xf32>
    %205 = tpu.concatenate %184, %204, %179 in 0 : vector<8x128xf32>, vector<8x128xf32>, vector<8x128xf32> -> vector<24x128xf32>
    %cst_61 = arith.constant dense<0.000000e+00> : vector<32x128xf32>
    %206 = tpu.matmul %1, %205, %cst_61 {dimension_numbers = #tpu.dot_dimension_numbers<[1], [0], [0], [1], [0, 0, 1, 1], [], []>, precision = #tpu.contract_precision<fp32>} : vector<32x24xf32>, vector<24x128xf32>, vector<32x128xf32> -> vector<32x128xf32>
    %207 = vector.extract_strided_slice %206 {offsets = [0, 0], sizes = [24, 128], strides = [1, 1]} : vector<32x128xf32> to vector<24x128xf32>
    %cst_62 = arith.constant 5.000000e-01 : f32
    %208 = vector.broadcast %cst_62 : f32 to vector<24x128xf32>
    %209 = arith.mulf %208, %207 : vector<24x128xf32>
    %210 = math.tanh %209 : vector<24x128xf32>
    %cst_63 = arith.constant 5.000000e-01 : f32
    %211 = vector.broadcast %cst_63 : f32 to vector<24x128xf32>
    %212 = arith.mulf %210, %211 : vector<24x128xf32>
    %cst_64 = arith.constant 5.000000e-01 : f32
    %213 = vector.broadcast %cst_64 : f32 to vector<24x128xf32>
    %214 = arith.addf %212, %213 : vector<24x128xf32>
    %215 = vector.extract_strided_slice %206 {offsets = [24, 0], sizes = [8, 128], strides = [1, 1]} : vector<32x128xf32> to vector<8x128xf32>
    %216 = math.tanh %215 : vector<8x128xf32>
    %217 = vector.extract_strided_slice %214 {offsets = [8, 0], sizes = [8, 128], strides = [1, 1]} : vector<24x128xf32> to vector<8x128xf32>
    %218 = arith.mulf %217, %176 : vector<8x128xf32>
    %219 = vector.extract_strided_slice %214 {offsets = [0, 0], sizes = [8, 128], strides = [1, 1]} : vector<24x128xf32> to vector<8x128xf32>
    %220 = arith.mulf %219, %216 : vector<8x128xf32>
    %221 = arith.addf %218, %220 : vector<8x128xf32>
    %222 = vector.extract_strided_slice %214 {offsets = [16, 0], sizes = [8, 128], strides = [1, 1]} : vector<24x128xf32> to vector<8x128xf32>
    %223 = math.tanh %221 : vector<8x128xf32>
    %224 = arith.mulf %222, %223 : vector<8x128xf32>
    %c4_65 = arith.constant 4 : index
    %c0_66 = arith.constant 0 : index
    %c0_67 = arith.constant 0 : index
    %225 = vector.load %arg8[%c4_65, %c0_66, %c0_67] : memref<16x8x128xf32, #tpu.memory_space<vmem>>, vector<1x8x128xf32>
    %226 = vector.shape_cast %225 : vector<1x8x128xf32> to vector<8x128xf32>
    %227 = vector.shape_cast %224 : vector<8x128xf32> to vector<1x8x128xf32>
    tpu.vector_store %arg8[%c4_65, %c0_66, %c0_67], %227 {strides = array<i32>} : memref<16x8x128xf32, #tpu.memory_space<vmem>>, vector<1x8x128xf32>,
    %c5 = arith.constant 5 : index
    %c0_68 = arith.constant 0 : index
    %c0_69 = arith.constant 0 : index
    %228 = vector.load %arg1[%c5, %c0_68, %c0_69] : memref<16x8x128xf32, #tpu.memory_space<vmem>>, vector<1x8x128xf32>
    %229 = vector.shape_cast %228 : vector<1x8x128xf32> to vector<8x128xf32>
    %230 = tpu.concatenate %229, %204 in 0 : vector<8x128xf32>, vector<8x128xf32> -> vector<16x128xf32>
    %cst_70 = arith.constant dense<0.000000e+00> : vector<32x128xf32>
    %231 = tpu.matmul %0, %230, %cst_70 {dimension_numbers = #tpu.dot_dimension_numbers<[1], [0], [0], [1], [0, 0, 1, 1], [], []>, precision = #tpu.contract_precision<fp32>} : vector<32x16xf32>, vector<16x128xf32>, vector<32x128xf32> -> vector<32x128xf32>
    %232 = vector.extract_strided_slice %231 {offsets = [0, 0], sizes = [24, 128], strides = [1, 1]} : vector<32x128xf32> to vector<24x128xf32>
    %cst_71 = arith.constant 5.000000e-01 : f32
    %233 = vector.broadcast %cst_71 : f32 to vector<24x128xf32>
    %234 = arith.mulf %233, %232 : vector<24x128xf32>
    %235 = math.tanh %234 : vector<24x128xf32>
    %cst_72 = arith.constant 5.000000e-01 : f32
    %236 = vector.broadcast %cst_72 : f32 to vector<24x128xf32>
    %237 = arith.mulf %235, %236 : vector<24x128xf32>
    %cst_73 = arith.constant 5.000000e-01 : f32
    %238 = vector.broadcast %cst_73 : f32 to vector<24x128xf32>
    %239 = arith.addf %237, %238 : vector<24x128xf32>
    %240 = vector.extract_strided_slice %231 {offsets = [24, 0], sizes = [8, 128], strides = [1, 1]} : vector<32x128xf32> to vector<8x128xf32>
    %241 = math.tanh %240 : vector<8x128xf32>
    %242 = vector.extract_strided_slice %239 {offsets = [8, 0], sizes = [8, 128], strides = [1, 1]} : vector<24x128xf32> to vector<8x128xf32>
    %243 = arith.mulf %242, %201 : vector<8x128xf32>
    %244 = vector.extract_strided_slice %239 {offsets = [0, 0], sizes = [8, 128], strides = [1, 1]} : vector<24x128xf32> to vector<8x128xf32>
    %245 = arith.mulf %244, %241 : vector<8x128xf32>
    %246 = arith.addf %243, %245 : vector<8x128xf32>
    %247 = vector.extract_strided_slice %239 {offsets = [16, 0], sizes = [8, 128], strides = [1, 1]} : vector<24x128xf32> to vector<8x128xf32>
    %248 = math.tanh %246 : vector<8x128xf32>
    %249 = arith.mulf %247, %248 : vector<8x128xf32>
    %250 = tpu.concatenate %229, %249, %224 in 0 : vector<8x128xf32>, vector<8x128xf32>, vector<8x128xf32> -> vector<24x128xf32>
    %cst_74 = arith.constant dense<0.000000e+00> : vector<32x128xf32>
    %251 = tpu.matmul %1, %250, %cst_74 {dimension_numbers = #tpu.dot_dimension_numbers<[1], [0], [0], [1], [0, 0, 1, 1], [], []>, precision = #tpu.contract_precision<fp32>} : vector<32x24xf32>, vector<24x128xf32>, vector<32x128xf32> -> vector<32x128xf32>
    %252 = vector.extract_strided_slice %251 {offsets = [0, 0], sizes = [24, 128], strides = [1, 1]} : vector<32x128xf32> to vector<24x128xf32>
    %cst_75 = arith.constant 5.000000e-01 : f32
    %253 = vector.broadcast %cst_75 : f32 to vector<24x128xf32>
    %254 = arith.mulf %253, %252 : vector<24x128xf32>
    %255 = math.tanh %254 : vector<24x128xf32>
    %cst_76 = arith.constant 5.000000e-01 : f32
    %256 = vector.broadcast %cst_76 : f32 to vector<24x128xf32>
    %257 = arith.mulf %255, %256 : vector<24x128xf32>
    %cst_77 = arith.constant 5.000000e-01 : f32
    %258 = vector.broadcast %cst_77 : f32 to vector<24x128xf32>
    %259 = arith.addf %257, %258 : vector<24x128xf32>
    %260 = vector.extract_strided_slice %251 {offsets = [24, 0], sizes = [8, 128], strides = [1, 1]} : vector<32x128xf32> to vector<8x128xf32>
    %261 = math.tanh %260 : vector<8x128xf32>
    %262 = vector.extract_strided_slice %259 {offsets = [8, 0], sizes = [8, 128], strides = [1, 1]} : vector<24x128xf32> to vector<8x128xf32>
    %263 = arith.mulf %262, %221 : vector<8x128xf32>
    %264 = vector.extract_strided_slice %259 {offsets = [0, 0], sizes = [8, 128], strides = [1, 1]} : vector<24x128xf32> to vector<8x128xf32>
    %265 = arith.mulf %264, %261 : vector<8x128xf32>
    %266 = arith.addf %263, %265 : vector<8x128xf32>
    %267 = vector.extract_strided_slice %259 {offsets = [16, 0], sizes = [8, 128], strides = [1, 1]} : vector<24x128xf32> to vector<8x128xf32>
    %268 = math.tanh %266 : vector<8x128xf32>
    %269 = arith.mulf %267, %268 : vector<8x128xf32>
    %c5_78 = arith.constant 5 : index
    %c0_79 = arith.constant 0 : index
    %c0_80 = arith.constant 0 : index
    %270 = vector.load %arg8[%c5_78, %c0_79, %c0_80] : memref<16x8x128xf32, #tpu.memory_space<vmem>>, vector<1x8x128xf32>
    %271 = vector.shape_cast %270 : vector<1x8x128xf32> to vector<8x128xf32>
    %272 = vector.shape_cast %269 : vector<8x128xf32> to vector<1x8x128xf32>
    tpu.vector_store %arg8[%c5_78, %c0_79, %c0_80], %272 {strides = array<i32>} : memref<16x8x128xf32, #tpu.memory_space<vmem>>, vector<1x8x128xf32>,
    %c6 = arith.constant 6 : index
    %c0_81 = arith.constant 0 : index
    %c0_82 = arith.constant 0 : index
    %273 = vector.load %arg1[%c6, %c0_81, %c0_82] : memref<16x8x128xf32, #tpu.memory_space<vmem>>, vector<1x8x128xf32>
    %274 = vector.shape_cast %273 : vector<1x8x128xf32> to vector<8x128xf32>
    %275 = tpu.concatenate %274, %249 in 0 : vector<8x128xf32>, vector<8x128xf32> -> vector<16x128xf32>
    %cst_83 = arith.constant dense<0.000000e+00> : vector<32x128xf32>
    %276 = tpu.matmul %0, %275, %cst_83 {dimension_numbers = #tpu.dot_dimension_numbers<[1], [0], [0], [1], [0, 0, 1, 1], [], []>, precision = #tpu.contract_precision<fp32>} : vector<32x16xf32>, vector<16x128xf32>, vector<32x128xf32> -> vector<32x128xf32>
    %277 = vector.extract_strided_slice %276 {offsets = [0, 0], sizes = [24, 128], strides = [1, 1]} : vector<32x128xf32> to vector<24x128xf32>
    %cst_84 = arith.constant 5.000000e-01 : f32
    %278 = vector.broadcast %cst_84 : f32 to vector<24x128xf32>
    %279 = arith.mulf %278, %277 : vector<24x128xf32>
    %280 = math.tanh %279 : vector<24x128xf32>
    %cst_85 = arith.constant 5.000000e-01 : f32
    %281 = vector.broadcast %cst_85 : f32 to vector<24x128xf32>
    %282 = arith.mulf %280, %281 : vector<24x128xf32>
    %cst_86 = arith.constant 5.000000e-01 : f32
    %283 = vector.broadcast %cst_86 : f32 to vector<24x128xf32>
    %284 = arith.addf %282, %283 : vector<24x128xf32>
    %285 = vector.extract_strided_slice %276 {offsets = [24, 0], sizes = [8, 128], strides = [1, 1]} : vector<32x128xf32> to vector<8x128xf32>
    %286 = math.tanh %285 : vector<8x128xf32>
    %287 = vector.extract_strided_slice %284 {offsets = [8, 0], sizes = [8, 128], strides = [1, 1]} : vector<24x128xf32> to vector<8x128xf32>
    %288 = arith.mulf %287, %246 : vector<8x128xf32>
    %289 = vector.extract_strided_slice %284 {offsets = [0, 0], sizes = [8, 128], strides = [1, 1]} : vector<24x128xf32> to vector<8x128xf32>
    %290 = arith.mulf %289, %286 : vector<8x128xf32>
    %291 = arith.addf %288, %290 : vector<8x128xf32>
    %292 = vector.extract_strided_slice %284 {offsets = [16, 0], sizes = [8, 128], strides = [1, 1]} : vector<24x128xf32> to vector<8x128xf32>
    %293 = math.tanh %291 : vector<8x128xf32>
    %294 = arith.mulf %292, %293 : vector<8x128xf32>
    %295 = tpu.concatenate %274, %294, %269 in 0 : vector<8x128xf32>, vector<8x128xf32>, vector<8x128xf32> -> vector<24x128xf32>
    %cst_87 = arith.constant dense<0.000000e+00> : vector<32x128xf32>
    %296 = tpu.matmul %1, %295, %cst_87 {dimension_numbers = #tpu.dot_dimension_numbers<[1], [0], [0], [1], [0, 0, 1, 1], [], []>, precision = #tpu.contract_precision<fp32>} : vector<32x24xf32>, vector<24x128xf32>, vector<32x128xf32> -> vector<32x128xf32>
    %297 = vector.extract_strided_slice %296 {offsets = [0, 0], sizes = [24, 128], strides = [1, 1]} : vector<32x128xf32> to vector<24x128xf32>
    %cst_88 = arith.constant 5.000000e-01 : f32
    %298 = vector.broadcast %cst_88 : f32 to vector<24x128xf32>
    %299 = arith.mulf %298, %297 : vector<24x128xf32>
    %300 = math.tanh %299 : vector<24x128xf32>
    %cst_89 = arith.constant 5.000000e-01 : f32
    %301 = vector.broadcast %cst_89 : f32 to vector<24x128xf32>
    %302 = arith.mulf %300, %301 : vector<24x128xf32>
    %cst_90 = arith.constant 5.000000e-01 : f32
    %303 = vector.broadcast %cst_90 : f32 to vector<24x128xf32>
    %304 = arith.addf %302, %303 : vector<24x128xf32>
    %305 = vector.extract_strided_slice %296 {offsets = [24, 0], sizes = [8, 128], strides = [1, 1]} : vector<32x128xf32> to vector<8x128xf32>
    %306 = math.tanh %305 : vector<8x128xf32>
    %307 = vector.extract_strided_slice %304 {offsets = [8, 0], sizes = [8, 128], strides = [1, 1]} : vector<24x128xf32> to vector<8x128xf32>
    %308 = arith.mulf %307, %266 : vector<8x128xf32>
    %309 = vector.extract_strided_slice %304 {offsets = [0, 0], sizes = [8, 128], strides = [1, 1]} : vector<24x128xf32> to vector<8x128xf32>
    %310 = arith.mulf %309, %306 : vector<8x128xf32>
    %311 = arith.addf %308, %310 : vector<8x128xf32>
    %312 = vector.extract_strided_slice %304 {offsets = [16, 0], sizes = [8, 128], strides = [1, 1]} : vector<24x128xf32> to vector<8x128xf32>
    %313 = math.tanh %311 : vector<8x128xf32>
    %314 = arith.mulf %312, %313 : vector<8x128xf32>
    %c6_91 = arith.constant 6 : index
    %c0_92 = arith.constant 0 : index
    %c0_93 = arith.constant 0 : index
    %315 = vector.load %arg8[%c6_91, %c0_92, %c0_93] : memref<16x8x128xf32, #tpu.memory_space<vmem>>, vector<1x8x128xf32>
    %316 = vector.shape_cast %315 : vector<1x8x128xf32> to vector<8x128xf32>
    %317 = vector.shape_cast %314 : vector<8x128xf32> to vector<1x8x128xf32>
    tpu.vector_store %arg8[%c6_91, %c0_92, %c0_93], %317 {strides = array<i32>} : memref<16x8x128xf32, #tpu.memory_space<vmem>>, vector<1x8x128xf32>,
    %c7 = arith.constant 7 : index
    %c0_94 = arith.constant 0 : index
    %c0_95 = arith.constant 0 : index
    %318 = vector.load %arg1[%c7, %c0_94, %c0_95] : memref<16x8x128xf32, #tpu.memory_space<vmem>>, vector<1x8x128xf32>
    %319 = vector.shape_cast %318 : vector<1x8x128xf32> to vector<8x128xf32>
    %320 = tpu.concatenate %319, %294 in 0 : vector<8x128xf32>, vector<8x128xf32> -> vector<16x128xf32>
    %cst_96 = arith.constant dense<0.000000e+00> : vector<32x128xf32>
    %321 = tpu.matmul %0, %320, %cst_96 {dimension_numbers = #tpu.dot_dimension_numbers<[1], [0], [0], [1], [0, 0, 1, 1], [], []>, precision = #tpu.contract_precision<fp32>} : vector<32x16xf32>, vector<16x128xf32>, vector<32x128xf32> -> vector<32x128xf32>
    %322 = vector.extract_strided_slice %321 {offsets = [0, 0], sizes = [24, 128], strides = [1, 1]} : vector<32x128xf32> to vector<24x128xf32>
    %cst_97 = arith.constant 5.000000e-01 : f32
    %323 = vector.broadcast %cst_97 : f32 to vector<24x128xf32>
    %324 = arith.mulf %323, %322 : vector<24x128xf32>
    %325 = math.tanh %324 : vector<24x128xf32>
    %cst_98 = arith.constant 5.000000e-01 : f32
    %326 = vector.broadcast %cst_98 : f32 to vector<24x128xf32>
    %327 = arith.mulf %325, %326 : vector<24x128xf32>
    %cst_99 = arith.constant 5.000000e-01 : f32
    %328 = vector.broadcast %cst_99 : f32 to vector<24x128xf32>
    %329 = arith.addf %327, %328 : vector<24x128xf32>
    %330 = vector.extract_strided_slice %321 {offsets = [24, 0], sizes = [8, 128], strides = [1, 1]} : vector<32x128xf32> to vector<8x128xf32>
    %331 = math.tanh %330 : vector<8x128xf32>
    %332 = vector.extract_strided_slice %329 {offsets = [8, 0], sizes = [8, 128], strides = [1, 1]} : vector<24x128xf32> to vector<8x128xf32>
    %333 = arith.mulf %332, %291 : vector<8x128xf32>
    %334 = vector.extract_strided_slice %329 {offsets = [0, 0], sizes = [8, 128], strides = [1, 1]} : vector<24x128xf32> to vector<8x128xf32>
    %335 = arith.mulf %334, %331 : vector<8x128xf32>
    %336 = arith.addf %333, %335 : vector<8x128xf32>
    %337 = vector.extract_strided_slice %329 {offsets = [16, 0], sizes = [8, 128], strides = [1, 1]} : vector<24x128xf32> to vector<8x128xf32>
    %338 = math.tanh %336 : vector<8x128xf32>
    %339 = arith.mulf %337, %338 : vector<8x128xf32>
    %340 = tpu.concatenate %319, %339, %314 in 0 : vector<8x128xf32>, vector<8x128xf32>, vector<8x128xf32> -> vector<24x128xf32>
    %cst_100 = arith.constant dense<0.000000e+00> : vector<32x128xf32>
    %341 = tpu.matmul %1, %340, %cst_100 {dimension_numbers = #tpu.dot_dimension_numbers<[1], [0], [0], [1], [0, 0, 1, 1], [], []>, precision = #tpu.contract_precision<fp32>} : vector<32x24xf32>, vector<24x128xf32>, vector<32x128xf32> -> vector<32x128xf32>
    %342 = vector.extract_strided_slice %341 {offsets = [0, 0], sizes = [24, 128], strides = [1, 1]} : vector<32x128xf32> to vector<24x128xf32>
    %cst_101 = arith.constant 5.000000e-01 : f32
    %343 = vector.broadcast %cst_101 : f32 to vector<24x128xf32>
    %344 = arith.mulf %343, %342 : vector<24x128xf32>
    %345 = math.tanh %344 : vector<24x128xf32>
    %cst_102 = arith.constant 5.000000e-01 : f32
    %346 = vector.broadcast %cst_102 : f32 to vector<24x128xf32>
    %347 = arith.mulf %345, %346 : vector<24x128xf32>
    %cst_103 = arith.constant 5.000000e-01 : f32
    %348 = vector.broadcast %cst_103 : f32 to vector<24x128xf32>
    %349 = arith.addf %347, %348 : vector<24x128xf32>
    %350 = vector.extract_strided_slice %341 {offsets = [24, 0], sizes = [8, 128], strides = [1, 1]} : vector<32x128xf32> to vector<8x128xf32>
    %351 = math.tanh %350 : vector<8x128xf32>
    %352 = vector.extract_strided_slice %349 {offsets = [8, 0], sizes = [8, 128], strides = [1, 1]} : vector<24x128xf32> to vector<8x128xf32>
    %353 = arith.mulf %352, %311 : vector<8x128xf32>
    %354 = vector.extract_strided_slice %349 {offsets = [0, 0], sizes = [8, 128], strides = [1, 1]} : vector<24x128xf32> to vector<8x128xf32>
    %355 = arith.mulf %354, %351 : vector<8x128xf32>
    %356 = arith.addf %353, %355 : vector<8x128xf32>
    %357 = vector.extract_strided_slice %349 {offsets = [16, 0], sizes = [8, 128], strides = [1, 1]} : vector<24x128xf32> to vector<8x128xf32>
    %358 = math.tanh %356 : vector<8x128xf32>
    %359 = arith.mulf %357, %358 : vector<8x128xf32>
    %c7_104 = arith.constant 7 : index
    %c0_105 = arith.constant 0 : index
    %c0_106 = arith.constant 0 : index
    %360 = vector.load %arg8[%c7_104, %c0_105, %c0_106] : memref<16x8x128xf32, #tpu.memory_space<vmem>>, vector<1x8x128xf32>
    %361 = vector.shape_cast %360 : vector<1x8x128xf32> to vector<8x128xf32>
    %362 = vector.shape_cast %359 : vector<8x128xf32> to vector<1x8x128xf32>
    tpu.vector_store %arg8[%c7_104, %c0_105, %c0_106], %362 {strides = array<i32>} : memref<16x8x128xf32, #tpu.memory_space<vmem>>, vector<1x8x128xf32>,
    %c8 = arith.constant 8 : index
    %c0_107 = arith.constant 0 : index
    %c0_108 = arith.constant 0 : index
    %363 = vector.load %arg1[%c8, %c0_107, %c0_108] : memref<16x8x128xf32, #tpu.memory_space<vmem>>, vector<1x8x128xf32>
    %364 = vector.shape_cast %363 : vector<1x8x128xf32> to vector<8x128xf32>
    %365 = tpu.concatenate %364, %339 in 0 : vector<8x128xf32>, vector<8x128xf32> -> vector<16x128xf32>
    %cst_109 = arith.constant dense<0.000000e+00> : vector<32x128xf32>
    %366 = tpu.matmul %0, %365, %cst_109 {dimension_numbers = #tpu.dot_dimension_numbers<[1], [0], [0], [1], [0, 0, 1, 1], [], []>, precision = #tpu.contract_precision<fp32>} : vector<32x16xf32>, vector<16x128xf32>, vector<32x128xf32> -> vector<32x128xf32>
    %367 = vector.extract_strided_slice %366 {offsets = [0, 0], sizes = [24, 128], strides = [1, 1]} : vector<32x128xf32> to vector<24x128xf32>
    %cst_110 = arith.constant 5.000000e-01 : f32
    %368 = vector.broadcast %cst_110 : f32 to vector<24x128xf32>
    %369 = arith.mulf %368, %367 : vector<24x128xf32>
    %370 = math.tanh %369 : vector<24x128xf32>
    %cst_111 = arith.constant 5.000000e-01 : f32
    %371 = vector.broadcast %cst_111 : f32 to vector<24x128xf32>
    %372 = arith.mulf %370, %371 : vector<24x128xf32>
    %cst_112 = arith.constant 5.000000e-01 : f32
    %373 = vector.broadcast %cst_112 : f32 to vector<24x128xf32>
    %374 = arith.addf %372, %373 : vector<24x128xf32>
    %375 = vector.extract_strided_slice %366 {offsets = [24, 0], sizes = [8, 128], strides = [1, 1]} : vector<32x128xf32> to vector<8x128xf32>
    %376 = math.tanh %375 : vector<8x128xf32>
    %377 = vector.extract_strided_slice %374 {offsets = [8, 0], sizes = [8, 128], strides = [1, 1]} : vector<24x128xf32> to vector<8x128xf32>
    %378 = arith.mulf %377, %336 : vector<8x128xf32>
    %379 = vector.extract_strided_slice %374 {offsets = [0, 0], sizes = [8, 128], strides = [1, 1]} : vector<24x128xf32> to vector<8x128xf32>
    %380 = arith.mulf %379, %376 : vector<8x128xf32>
    %381 = arith.addf %378, %380 : vector<8x128xf32>
    %382 = vector.extract_strided_slice %374 {offsets = [16, 0], sizes = [8, 128], strides = [1, 1]} : vector<24x128xf32> to vector<8x128xf32>
    %383 = math.tanh %381 : vector<8x128xf32>
    %384 = arith.mulf %382, %383 : vector<8x128xf32>
    %385 = tpu.concatenate %364, %384, %359 in 0 : vector<8x128xf32>, vector<8x128xf32>, vector<8x128xf32> -> vector<24x128xf32>
    %cst_113 = arith.constant dense<0.000000e+00> : vector<32x128xf32>
    %386 = tpu.matmul %1, %385, %cst_113 {dimension_numbers = #tpu.dot_dimension_numbers<[1], [0], [0], [1], [0, 0, 1, 1], [], []>, precision = #tpu.contract_precision<fp32>} : vector<32x24xf32>, vector<24x128xf32>, vector<32x128xf32> -> vector<32x128xf32>
    %387 = vector.extract_strided_slice %386 {offsets = [0, 0], sizes = [24, 128], strides = [1, 1]} : vector<32x128xf32> to vector<24x128xf32>
    %cst_114 = arith.constant 5.000000e-01 : f32
    %388 = vector.broadcast %cst_114 : f32 to vector<24x128xf32>
    %389 = arith.mulf %388, %387 : vector<24x128xf32>
    %390 = math.tanh %389 : vector<24x128xf32>
    %cst_115 = arith.constant 5.000000e-01 : f32
    %391 = vector.broadcast %cst_115 : f32 to vector<24x128xf32>
    %392 = arith.mulf %390, %391 : vector<24x128xf32>
    %cst_116 = arith.constant 5.000000e-01 : f32
    %393 = vector.broadcast %cst_116 : f32 to vector<24x128xf32>
    %394 = arith.addf %392, %393 : vector<24x128xf32>
    %395 = vector.extract_strided_slice %386 {offsets = [24, 0], sizes = [8, 128], strides = [1, 1]} : vector<32x128xf32> to vector<8x128xf32>
    %396 = math.tanh %395 : vector<8x128xf32>
    %397 = vector.extract_strided_slice %394 {offsets = [8, 0], sizes = [8, 128], strides = [1, 1]} : vector<24x128xf32> to vector<8x128xf32>
    %398 = arith.mulf %397, %356 : vector<8x128xf32>
    %399 = vector.extract_strided_slice %394 {offsets = [0, 0], sizes = [8, 128], strides = [1, 1]} : vector<24x128xf32> to vector<8x128xf32>
    %400 = arith.mulf %399, %396 : vector<8x128xf32>
    %401 = arith.addf %398, %400 : vector<8x128xf32>
    %402 = vector.extract_strided_slice %394 {offsets = [16, 0], sizes = [8, 128], strides = [1, 1]} : vector<24x128xf32> to vector<8x128xf32>
    %403 = math.tanh %401 : vector<8x128xf32>
    %404 = arith.mulf %402, %403 : vector<8x128xf32>
    %c8_117 = arith.constant 8 : index
    %c0_118 = arith.constant 0 : index
    %c0_119 = arith.constant 0 : index
    %405 = vector.load %arg8[%c8_117, %c0_118, %c0_119] : memref<16x8x128xf32, #tpu.memory_space<vmem>>, vector<1x8x128xf32>
    %406 = vector.shape_cast %405 : vector<1x8x128xf32> to vector<8x128xf32>
    %407 = vector.shape_cast %404 : vector<8x128xf32> to vector<1x8x128xf32>
    tpu.vector_store %arg8[%c8_117, %c0_118, %c0_119], %407 {strides = array<i32>} : memref<16x8x128xf32, #tpu.memory_space<vmem>>, vector<1x8x128xf32>,
    %c9 = arith.constant 9 : index
    %c0_120 = arith.constant 0 : index
    %c0_121 = arith.constant 0 : index
    %408 = vector.load %arg1[%c9, %c0_120, %c0_121] : memref<16x8x128xf32, #tpu.memory_space<vmem>>, vector<1x8x128xf32>
    %409 = vector.shape_cast %408 : vector<1x8x128xf32> to vector<8x128xf32>
    %410 = tpu.concatenate %409, %384 in 0 : vector<8x128xf32>, vector<8x128xf32> -> vector<16x128xf32>
    %cst_122 = arith.constant dense<0.000000e+00> : vector<32x128xf32>
    %411 = tpu.matmul %0, %410, %cst_122 {dimension_numbers = #tpu.dot_dimension_numbers<[1], [0], [0], [1], [0, 0, 1, 1], [], []>, precision = #tpu.contract_precision<fp32>} : vector<32x16xf32>, vector<16x128xf32>, vector<32x128xf32> -> vector<32x128xf32>
    %412 = vector.extract_strided_slice %411 {offsets = [0, 0], sizes = [24, 128], strides = [1, 1]} : vector<32x128xf32> to vector<24x128xf32>
    %cst_123 = arith.constant 5.000000e-01 : f32
    %413 = vector.broadcast %cst_123 : f32 to vector<24x128xf32>
    %414 = arith.mulf %413, %412 : vector<24x128xf32>
    %415 = math.tanh %414 : vector<24x128xf32>
    %cst_124 = arith.constant 5.000000e-01 : f32
    %416 = vector.broadcast %cst_124 : f32 to vector<24x128xf32>
    %417 = arith.mulf %415, %416 : vector<24x128xf32>
    %cst_125 = arith.constant 5.000000e-01 : f32
    %418 = vector.broadcast %cst_125 : f32 to vector<24x128xf32>
    %419 = arith.addf %417, %418 : vector<24x128xf32>
    %420 = vector.extract_strided_slice %411 {offsets = [24, 0], sizes = [8, 128], strides = [1, 1]} : vector<32x128xf32> to vector<8x128xf32>
    %421 = math.tanh %420 : vector<8x128xf32>
    %422 = vector.extract_strided_slice %419 {offsets = [8, 0], sizes = [8, 128], strides = [1, 1]} : vector<24x128xf32> to vector<8x128xf32>
    %423 = arith.mulf %422, %381 : vector<8x128xf32>
    %424 = vector.extract_strided_slice %419 {offsets = [0, 0], sizes = [8, 128], strides = [1, 1]} : vector<24x128xf32> to vector<8x128xf32>
    %425 = arith.mulf %424, %421 : vector<8x128xf32>
    %426 = arith.addf %423, %425 : vector<8x128xf32>
    %427 = vector.extract_strided_slice %419 {offsets = [16, 0], sizes = [8, 128], strides = [1, 1]} : vector<24x128xf32> to vector<8x128xf32>
    %428 = math.tanh %426 : vector<8x128xf32>
    %429 = arith.mulf %427, %428 : vector<8x128xf32>
    %430 = tpu.concatenate %409, %429, %404 in 0 : vector<8x128xf32>, vector<8x128xf32>, vector<8x128xf32> -> vector<24x128xf32>
    %cst_126 = arith.constant dense<0.000000e+00> : vector<32x128xf32>
    %431 = tpu.matmul %1, %430, %cst_126 {dimension_numbers = #tpu.dot_dimension_numbers<[1], [0], [0], [1], [0, 0, 1, 1], [], []>, precision = #tpu.contract_precision<fp32>} : vector<32x24xf32>, vector<24x128xf32>, vector<32x128xf32> -> vector<32x128xf32>
    %432 = vector.extract_strided_slice %431 {offsets = [0, 0], sizes = [24, 128], strides = [1, 1]} : vector<32x128xf32> to vector<24x128xf32>
    %cst_127 = arith.constant 5.000000e-01 : f32
    %433 = vector.broadcast %cst_127 : f32 to vector<24x128xf32>
    %434 = arith.mulf %433, %432 : vector<24x128xf32>
    %435 = math.tanh %434 : vector<24x128xf32>
    %cst_128 = arith.constant 5.000000e-01 : f32
    %436 = vector.broadcast %cst_128 : f32 to vector<24x128xf32>
    %437 = arith.mulf %435, %436 : vector<24x128xf32>
    %cst_129 = arith.constant 5.000000e-01 : f32
    %438 = vector.broadcast %cst_129 : f32 to vector<24x128xf32>
    %439 = arith.addf %437, %438 : vector<24x128xf32>
    %440 = vector.extract_strided_slice %431 {offsets = [24, 0], sizes = [8, 128], strides = [1, 1]} : vector<32x128xf32> to vector<8x128xf32>
    %441 = math.tanh %440 : vector<8x128xf32>
    %442 = vector.extract_strided_slice %439 {offsets = [8, 0], sizes = [8, 128], strides = [1, 1]} : vector<24x128xf32> to vector<8x128xf32>
    %443 = arith.mulf %442, %401 : vector<8x128xf32>
    %444 = vector.extract_strided_slice %439 {offsets = [0, 0], sizes = [8, 128], strides = [1, 1]} : vector<24x128xf32> to vector<8x128xf32>
    %445 = arith.mulf %444, %441 : vector<8x128xf32>
    %446 = arith.addf %443, %445 : vector<8x128xf32>
    %447 = vector.extract_strided_slice %439 {offsets = [16, 0], sizes = [8, 128], strides = [1, 1]} : vector<24x128xf32> to vector<8x128xf32>
    %448 = math.tanh %446 : vector<8x128xf32>
    %449 = arith.mulf %447, %448 : vector<8x128xf32>
    %c9_130 = arith.constant 9 : index
    %c0_131 = arith.constant 0 : index
    %c0_132 = arith.constant 0 : index
    %450 = vector.load %arg8[%c9_130, %c0_131, %c0_132] : memref<16x8x128xf32, #tpu.memory_space<vmem>>, vector<1x8x128xf32>
    %451 = vector.shape_cast %450 : vector<1x8x128xf32> to vector<8x128xf32>
    %452 = vector.shape_cast %449 : vector<8x128xf32> to vector<1x8x128xf32>
    tpu.vector_store %arg8[%c9_130, %c0_131, %c0_132], %452 {strides = array<i32>} : memref<16x8x128xf32, #tpu.memory_space<vmem>>, vector<1x8x128xf32>,
    %c10 = arith.constant 10 : index
    %c0_133 = arith.constant 0 : index
    %c0_134 = arith.constant 0 : index
    %453 = vector.load %arg1[%c10, %c0_133, %c0_134] : memref<16x8x128xf32, #tpu.memory_space<vmem>>, vector<1x8x128xf32>
    %454 = vector.shape_cast %453 : vector<1x8x128xf32> to vector<8x128xf32>
    %455 = tpu.concatenate %454, %429 in 0 : vector<8x128xf32>, vector<8x128xf32> -> vector<16x128xf32>
    %cst_135 = arith.constant dense<0.000000e+00> : vector<32x128xf32>
    %456 = tpu.matmul %0, %455, %cst_135 {dimension_numbers = #tpu.dot_dimension_numbers<[1], [0], [0], [1], [0, 0, 1, 1], [], []>, precision = #tpu.contract_precision<fp32>} : vector<32x16xf32>, vector<16x128xf32>, vector<32x128xf32> -> vector<32x128xf32>
    %457 = vector.extract_strided_slice %456 {offsets = [0, 0], sizes = [24, 128], strides = [1, 1]} : vector<32x128xf32> to vector<24x128xf32>
    %cst_136 = arith.constant 5.000000e-01 : f32
    %458 = vector.broadcast %cst_136 : f32 to vector<24x128xf32>
    %459 = arith.mulf %458, %457 : vector<24x128xf32>
    %460 = math.tanh %459 : vector<24x128xf32>
    %cst_137 = arith.constant 5.000000e-01 : f32
    %461 = vector.broadcast %cst_137 : f32 to vector<24x128xf32>
    %462 = arith.mulf %460, %461 : vector<24x128xf32>
    %cst_138 = arith.constant 5.000000e-01 : f32
    %463 = vector.broadcast %cst_138 : f32 to vector<24x128xf32>
    %464 = arith.addf %462, %463 : vector<24x128xf32>
    %465 = vector.extract_strided_slice %456 {offsets = [24, 0], sizes = [8, 128], strides = [1, 1]} : vector<32x128xf32> to vector<8x128xf32>
    %466 = math.tanh %465 : vector<8x128xf32>
    %467 = vector.extract_strided_slice %464 {offsets = [8, 0], sizes = [8, 128], strides = [1, 1]} : vector<24x128xf32> to vector<8x128xf32>
    %468 = arith.mulf %467, %426 : vector<8x128xf32>
    %469 = vector.extract_strided_slice %464 {offsets = [0, 0], sizes = [8, 128], strides = [1, 1]} : vector<24x128xf32> to vector<8x128xf32>
    %470 = arith.mulf %469, %466 : vector<8x128xf32>
    %471 = arith.addf %468, %470 : vector<8x128xf32>
    %472 = vector.extract_strided_slice %464 {offsets = [16, 0], sizes = [8, 128], strides = [1, 1]} : vector<24x128xf32> to vector<8x128xf32>
    %473 = math.tanh %471 : vector<8x128xf32>
    %474 = arith.mulf %472, %473 : vector<8x128xf32>
    %475 = tpu.concatenate %454, %474, %449 in 0 : vector<8x128xf32>, vector<8x128xf32>, vector<8x128xf32> -> vector<24x128xf32>
    %cst_139 = arith.constant dense<0.000000e+00> : vector<32x128xf32>
    %476 = tpu.matmul %1, %475, %cst_139 {dimension_numbers = #tpu.dot_dimension_numbers<[1], [0], [0], [1], [0, 0, 1, 1], [], []>, precision = #tpu.contract_precision<fp32>} : vector<32x24xf32>, vector<24x128xf32>, vector<32x128xf32> -> vector<32x128xf32>
    %477 = vector.extract_strided_slice %476 {offsets = [0, 0], sizes = [24, 128], strides = [1, 1]} : vector<32x128xf32> to vector<24x128xf32>
    %cst_140 = arith.constant 5.000000e-01 : f32
    %478 = vector.broadcast %cst_140 : f32 to vector<24x128xf32>
    %479 = arith.mulf %478, %477 : vector<24x128xf32>
    %480 = math.tanh %479 : vector<24x128xf32>
    %cst_141 = arith.constant 5.000000e-01 : f32
    %481 = vector.broadcast %cst_141 : f32 to vector<24x128xf32>
    %482 = arith.mulf %480, %481 : vector<24x128xf32>
    %cst_142 = arith.constant 5.000000e-01 : f32
    %483 = vector.broadcast %cst_142 : f32 to vector<24x128xf32>
    %484 = arith.addf %482, %483 : vector<24x128xf32>
    %485 = vector.extract_strided_slice %476 {offsets = [24, 0], sizes = [8, 128], strides = [1, 1]} : vector<32x128xf32> to vector<8x128xf32>
    %486 = math.tanh %485 : vector<8x128xf32>
    %487 = vector.extract_strided_slice %484 {offsets = [8, 0], sizes = [8, 128], strides = [1, 1]} : vector<24x128xf32> to vector<8x128xf32>
    %488 = arith.mulf %487, %446 : vector<8x128xf32>
    %489 = vector.extract_strided_slice %484 {offsets = [0, 0], sizes = [8, 128], strides = [1, 1]} : vector<24x128xf32> to vector<8x128xf32>
    %490 = arith.mulf %489, %486 : vector<8x128xf32>
    %491 = arith.addf %488, %490 : vector<8x128xf32>
    %492 = vector.extract_strided_slice %484 {offsets = [16, 0], sizes = [8, 128], strides = [1, 1]} : vector<24x128xf32> to vector<8x128xf32>
    %493 = math.tanh %491 : vector<8x128xf32>
    %494 = arith.mulf %492, %493 : vector<8x128xf32>
    %c10_143 = arith.constant 10 : index
    %c0_144 = arith.constant 0 : index
    %c0_145 = arith.constant 0 : index
    %495 = vector.load %arg8[%c10_143, %c0_144, %c0_145] : memref<16x8x128xf32, #tpu.memory_space<vmem>>, vector<1x8x128xf32>
    %496 = vector.shape_cast %495 : vector<1x8x128xf32> to vector<8x128xf32>
    %497 = vector.shape_cast %494 : vector<8x128xf32> to vector<1x8x128xf32>
    tpu.vector_store %arg8[%c10_143, %c0_144, %c0_145], %497 {strides = array<i32>} : memref<16x8x128xf32, #tpu.memory_space<vmem>>, vector<1x8x128xf32>,
    %c11 = arith.constant 11 : index
    %c0_146 = arith.constant 0 : index
    %c0_147 = arith.constant 0 : index
    %498 = vector.load %arg1[%c11, %c0_146, %c0_147] : memref<16x8x128xf32, #tpu.memory_space<vmem>>, vector<1x8x128xf32>
    %499 = vector.shape_cast %498 : vector<1x8x128xf32> to vector<8x128xf32>
    %500 = tpu.concatenate %499, %474 in 0 : vector<8x128xf32>, vector<8x128xf32> -> vector<16x128xf32>
    %cst_148 = arith.constant dense<0.000000e+00> : vector<32x128xf32>
    %501 = tpu.matmul %0, %500, %cst_148 {dimension_numbers = #tpu.dot_dimension_numbers<[1], [0], [0], [1], [0, 0, 1, 1], [], []>, precision = #tpu.contract_precision<fp32>} : vector<32x16xf32>, vector<16x128xf32>, vector<32x128xf32> -> vector<32x128xf32>
    %502 = vector.extract_strided_slice %501 {offsets = [0, 0], sizes = [24, 128], strides = [1, 1]} : vector<32x128xf32> to vector<24x128xf32>
    %cst_149 = arith.constant 5.000000e-01 : f32
    %503 = vector.broadcast %cst_149 : f32 to vector<24x128xf32>
    %504 = arith.mulf %503, %502 : vector<24x128xf32>
    %505 = math.tanh %504 : vector<24x128xf32>
    %cst_150 = arith.constant 5.000000e-01 : f32
    %506 = vector.broadcast %cst_150 : f32 to vector<24x128xf32>
    %507 = arith.mulf %505, %506 : vector<24x128xf32>
    %cst_151 = arith.constant 5.000000e-01 : f32
    %508 = vector.broadcast %cst_151 : f32 to vector<24x128xf32>
    %509 = arith.addf %507, %508 : vector<24x128xf32>
    %510 = vector.extract_strided_slice %501 {offsets = [24, 0], sizes = [8, 128], strides = [1, 1]} : vector<32x128xf32> to vector<8x128xf32>
    %511 = math.tanh %510 : vector<8x128xf32>
    %512 = vector.extract_strided_slice %509 {offsets = [8, 0], sizes = [8, 128], strides = [1, 1]} : vector<24x128xf32> to vector<8x128xf32>
    %513 = arith.mulf %512, %471 : vector<8x128xf32>
    %514 = vector.extract_strided_slice %509 {offsets = [0, 0], sizes = [8, 128], strides = [1, 1]} : vector<24x128xf32> to vector<8x128xf32>
    %515 = arith.mulf %514, %511 : vector<8x128xf32>
    %516 = arith.addf %513, %515 : vector<8x128xf32>
    %517 = vector.extract_strided_slice %509 {offsets = [16, 0], sizes = [8, 128], strides = [1, 1]} : vector<24x128xf32> to vector<8x128xf32>
    %518 = math.tanh %516 : vector<8x128xf32>
    %519 = arith.mulf %517, %518 : vector<8x128xf32>
    %520 = tpu.concatenate %499, %519, %494 in 0 : vector<8x128xf32>, vector<8x128xf32>, vector<8x128xf32> -> vector<24x128xf32>
    %cst_152 = arith.constant dense<0.000000e+00> : vector<32x128xf32>
    %521 = tpu.matmul %1, %520, %cst_152 {dimension_numbers = #tpu.dot_dimension_numbers<[1], [0], [0], [1], [0, 0, 1, 1], [], []>, precision = #tpu.contract_precision<fp32>} : vector<32x24xf32>, vector<24x128xf32>, vector<32x128xf32> -> vector<32x128xf32>
    %522 = vector.extract_strided_slice %521 {offsets = [0, 0], sizes = [24, 128], strides = [1, 1]} : vector<32x128xf32> to vector<24x128xf32>
    %cst_153 = arith.constant 5.000000e-01 : f32
    %523 = vector.broadcast %cst_153 : f32 to vector<24x128xf32>
    %524 = arith.mulf %523, %522 : vector<24x128xf32>
    %525 = math.tanh %524 : vector<24x128xf32>
    %cst_154 = arith.constant 5.000000e-01 : f32
    %526 = vector.broadcast %cst_154 : f32 to vector<24x128xf32>
    %527 = arith.mulf %525, %526 : vector<24x128xf32>
    %cst_155 = arith.constant 5.000000e-01 : f32
    %528 = vector.broadcast %cst_155 : f32 to vector<24x128xf32>
    %529 = arith.addf %527, %528 : vector<24x128xf32>
    %530 = vector.extract_strided_slice %521 {offsets = [24, 0], sizes = [8, 128], strides = [1, 1]} : vector<32x128xf32> to vector<8x128xf32>
    %531 = math.tanh %530 : vector<8x128xf32>
    %532 = vector.extract_strided_slice %529 {offsets = [8, 0], sizes = [8, 128], strides = [1, 1]} : vector<24x128xf32> to vector<8x128xf32>
    %533 = arith.mulf %532, %491 : vector<8x128xf32>
    %534 = vector.extract_strided_slice %529 {offsets = [0, 0], sizes = [8, 128], strides = [1, 1]} : vector<24x128xf32> to vector<8x128xf32>
    %535 = arith.mulf %534, %531 : vector<8x128xf32>
    %536 = arith.addf %533, %535 : vector<8x128xf32>
    %537 = vector.extract_strided_slice %529 {offsets = [16, 0], sizes = [8, 128], strides = [1, 1]} : vector<24x128xf32> to vector<8x128xf32>
    %538 = math.tanh %536 : vector<8x128xf32>
    %539 = arith.mulf %537, %538 : vector<8x128xf32>
    %c11_156 = arith.constant 11 : index
    %c0_157 = arith.constant 0 : index
    %c0_158 = arith.constant 0 : index
    %540 = vector.load %arg8[%c11_156, %c0_157, %c0_158] : memref<16x8x128xf32, #tpu.memory_space<vmem>>, vector<1x8x128xf32>
    %541 = vector.shape_cast %540 : vector<1x8x128xf32> to vector<8x128xf32>
    %542 = vector.shape_cast %539 : vector<8x128xf32> to vector<1x8x128xf32>
    tpu.vector_store %arg8[%c11_156, %c0_157, %c0_158], %542 {strides = array<i32>} : memref<16x8x128xf32, #tpu.memory_space<vmem>>, vector<1x8x128xf32>,
    %c12 = arith.constant 12 : index
    %c0_159 = arith.constant 0 : index
    %c0_160 = arith.constant 0 : index
    %543 = vector.load %arg1[%c12, %c0_159, %c0_160] : memref<16x8x128xf32, #tpu.memory_space<vmem>>, vector<1x8x128xf32>
    %544 = vector.shape_cast %543 : vector<1x8x128xf32> to vector<8x128xf32>
    %545 = tpu.concatenate %544, %519 in 0 : vector<8x128xf32>, vector<8x128xf32> -> vector<16x128xf32>
    %cst_161 = arith.constant dense<0.000000e+00> : vector<32x128xf32>
    %546 = tpu.matmul %0, %545, %cst_161 {dimension_numbers = #tpu.dot_dimension_numbers<[1], [0], [0], [1], [0, 0, 1, 1], [], []>, precision = #tpu.contract_precision<fp32>} : vector<32x16xf32>, vector<16x128xf32>, vector<32x128xf32> -> vector<32x128xf32>
    %547 = vector.extract_strided_slice %546 {offsets = [0, 0], sizes = [24, 128], strides = [1, 1]} : vector<32x128xf32> to vector<24x128xf32>
    %cst_162 = arith.constant 5.000000e-01 : f32
    %548 = vector.broadcast %cst_162 : f32 to vector<24x128xf32>
    %549 = arith.mulf %548, %547 : vector<24x128xf32>
    %550 = math.tanh %549 : vector<24x128xf32>
    %cst_163 = arith.constant 5.000000e-01 : f32
    %551 = vector.broadcast %cst_163 : f32 to vector<24x128xf32>
    %552 = arith.mulf %550, %551 : vector<24x128xf32>
    %cst_164 = arith.constant 5.000000e-01 : f32
    %553 = vector.broadcast %cst_164 : f32 to vector<24x128xf32>
    %554 = arith.addf %552, %553 : vector<24x128xf32>
    %555 = vector.extract_strided_slice %546 {offsets = [24, 0], sizes = [8, 128], strides = [1, 1]} : vector<32x128xf32> to vector<8x128xf32>
    %556 = math.tanh %555 : vector<8x128xf32>
    %557 = vector.extract_strided_slice %554 {offsets = [8, 0], sizes = [8, 128], strides = [1, 1]} : vector<24x128xf32> to vector<8x128xf32>
    %558 = arith.mulf %557, %516 : vector<8x128xf32>
    %559 = vector.extract_strided_slice %554 {offsets = [0, 0], sizes = [8, 128], strides = [1, 1]} : vector<24x128xf32> to vector<8x128xf32>
    %560 = arith.mulf %559, %556 : vector<8x128xf32>
    %561 = arith.addf %558, %560 : vector<8x128xf32>
    %562 = vector.extract_strided_slice %554 {offsets = [16, 0], sizes = [8, 128], strides = [1, 1]} : vector<24x128xf32> to vector<8x128xf32>
    %563 = math.tanh %561 : vector<8x128xf32>
    %564 = arith.mulf %562, %563 : vector<8x128xf32>
    %565 = tpu.concatenate %544, %564, %539 in 0 : vector<8x128xf32>, vector<8x128xf32>, vector<8x128xf32> -> vector<24x128xf32>
    %cst_165 = arith.constant dense<0.000000e+00> : vector<32x128xf32>
    %566 = tpu.matmul %1, %565, %cst_165 {dimension_numbers = #tpu.dot_dimension_numbers<[1], [0], [0], [1], [0, 0, 1, 1], [], []>, precision = #tpu.contract_precision<fp32>} : vector<32x24xf32>, vector<24x128xf32>, vector<32x128xf32> -> vector<32x128xf32>
    %567 = vector.extract_strided_slice %566 {offsets = [0, 0], sizes = [24, 128], strides = [1, 1]} : vector<32x128xf32> to vector<24x128xf32>
    %cst_166 = arith.constant 5.000000e-01 : f32
    %568 = vector.broadcast %cst_166 : f32 to vector<24x128xf32>
    %569 = arith.mulf %568, %567 : vector<24x128xf32>
    %570 = math.tanh %569 : vector<24x128xf32>
    %cst_167 = arith.constant 5.000000e-01 : f32
    %571 = vector.broadcast %cst_167 : f32 to vector<24x128xf32>
    %572 = arith.mulf %570, %571 : vector<24x128xf32>
    %cst_168 = arith.constant 5.000000e-01 : f32
    %573 = vector.broadcast %cst_168 : f32 to vector<24x128xf32>
    %574 = arith.addf %572, %573 : vector<24x128xf32>
    %575 = vector.extract_strided_slice %566 {offsets = [24, 0], sizes = [8, 128], strides = [1, 1]} : vector<32x128xf32> to vector<8x128xf32>
    %576 = math.tanh %575 : vector<8x128xf32>
    %577 = vector.extract_strided_slice %574 {offsets = [8, 0], sizes = [8, 128], strides = [1, 1]} : vector<24x128xf32> to vector<8x128xf32>
    %578 = arith.mulf %577, %536 : vector<8x128xf32>
    %579 = vector.extract_strided_slice %574 {offsets = [0, 0], sizes = [8, 128], strides = [1, 1]} : vector<24x128xf32> to vector<8x128xf32>
    %580 = arith.mulf %579, %576 : vector<8x128xf32>
    %581 = arith.addf %578, %580 : vector<8x128xf32>
    %582 = vector.extract_strided_slice %574 {offsets = [16, 0], sizes = [8, 128], strides = [1, 1]} : vector<24x128xf32> to vector<8x128xf32>
    %583 = math.tanh %581 : vector<8x128xf32>
    %584 = arith.mulf %582, %583 : vector<8x128xf32>
    %c12_169 = arith.constant 12 : index
    %c0_170 = arith.constant 0 : index
    %c0_171 = arith.constant 0 : index
    %585 = vector.load %arg8[%c12_169, %c0_170, %c0_171] : memref<16x8x128xf32, #tpu.memory_space<vmem>>, vector<1x8x128xf32>
    %586 = vector.shape_cast %585 : vector<1x8x128xf32> to vector<8x128xf32>
    %587 = vector.shape_cast %584 : vector<8x128xf32> to vector<1x8x128xf32>
    tpu.vector_store %arg8[%c12_169, %c0_170, %c0_171], %587 {strides = array<i32>} : memref<16x8x128xf32, #tpu.memory_space<vmem>>, vector<1x8x128xf32>,
    %c13 = arith.constant 13 : index
    %c0_172 = arith.constant 0 : index
    %c0_173 = arith.constant 0 : index
    %588 = vector.load %arg1[%c13, %c0_172, %c0_173] : memref<16x8x128xf32, #tpu.memory_space<vmem>>, vector<1x8x128xf32>
    %589 = vector.shape_cast %588 : vector<1x8x128xf32> to vector<8x128xf32>
    %590 = tpu.concatenate %589, %564 in 0 : vector<8x128xf32>, vector<8x128xf32> -> vector<16x128xf32>
    %cst_174 = arith.constant dense<0.000000e+00> : vector<32x128xf32>
    %591 = tpu.matmul %0, %590, %cst_174 {dimension_numbers = #tpu.dot_dimension_numbers<[1], [0], [0], [1], [0, 0, 1, 1], [], []>, precision = #tpu.contract_precision<fp32>} : vector<32x16xf32>, vector<16x128xf32>, vector<32x128xf32> -> vector<32x128xf32>
    %592 = vector.extract_strided_slice %591 {offsets = [0, 0], sizes = [24, 128], strides = [1, 1]} : vector<32x128xf32> to vector<24x128xf32>
    %cst_175 = arith.constant 5.000000e-01 : f32
    %593 = vector.broadcast %cst_175 : f32 to vector<24x128xf32>
    %594 = arith.mulf %593, %592 : vector<24x128xf32>
    %595 = math.tanh %594 : vector<24x128xf32>
    %cst_176 = arith.constant 5.000000e-01 : f32
    %596 = vector.broadcast %cst_176 : f32 to vector<24x128xf32>
    %597 = arith.mulf %595, %596 : vector<24x128xf32>
    %cst_177 = arith.constant 5.000000e-01 : f32
    %598 = vector.broadcast %cst_177 : f32 to vector<24x128xf32>
    %599 = arith.addf %597, %598 : vector<24x128xf32>
    %600 = vector.extract_strided_slice %591 {offsets = [24, 0], sizes = [8, 128], strides = [1, 1]} : vector<32x128xf32> to vector<8x128xf32>
    %601 = math.tanh %600 : vector<8x128xf32>
    %602 = vector.extract_strided_slice %599 {offsets = [8, 0], sizes = [8, 128], strides = [1, 1]} : vector<24x128xf32> to vector<8x128xf32>
    %603 = arith.mulf %602, %561 : vector<8x128xf32>
    %604 = vector.extract_strided_slice %599 {offsets = [0, 0], sizes = [8, 128], strides = [1, 1]} : vector<24x128xf32> to vector<8x128xf32>
    %605 = arith.mulf %604, %601 : vector<8x128xf32>
    %606 = arith.addf %603, %605 : vector<8x128xf32>
    %607 = vector.extract_strided_slice %599 {offsets = [16, 0], sizes = [8, 128], strides = [1, 1]} : vector<24x128xf32> to vector<8x128xf32>
    %608 = math.tanh %606 : vector<8x128xf32>
    %609 = arith.mulf %607, %608 : vector<8x128xf32>
    %610 = tpu.concatenate %589, %609, %584 in 0 : vector<8x128xf32>, vector<8x128xf32>, vector<8x128xf32> -> vector<24x128xf32>
    %cst_178 = arith.constant dense<0.000000e+00> : vector<32x128xf32>
    %611 = tpu.matmul %1, %610, %cst_178 {dimension_numbers = #tpu.dot_dimension_numbers<[1], [0], [0], [1], [0, 0, 1, 1], [], []>, precision = #tpu.contract_precision<fp32>} : vector<32x24xf32>, vector<24x128xf32>, vector<32x128xf32> -> vector<32x128xf32>
    %612 = vector.extract_strided_slice %611 {offsets = [0, 0], sizes = [24, 128], strides = [1, 1]} : vector<32x128xf32> to vector<24x128xf32>
    %cst_179 = arith.constant 5.000000e-01 : f32
    %613 = vector.broadcast %cst_179 : f32 to vector<24x128xf32>
    %614 = arith.mulf %613, %612 : vector<24x128xf32>
    %615 = math.tanh %614 : vector<24x128xf32>
    %cst_180 = arith.constant 5.000000e-01 : f32
    %616 = vector.broadcast %cst_180 : f32 to vector<24x128xf32>
    %617 = arith.mulf %615, %616 : vector<24x128xf32>
    %cst_181 = arith.constant 5.000000e-01 : f32
    %618 = vector.broadcast %cst_181 : f32 to vector<24x128xf32>
    %619 = arith.addf %617, %618 : vector<24x128xf32>
    %620 = vector.extract_strided_slice %611 {offsets = [24, 0], sizes = [8, 128], strides = [1, 1]} : vector<32x128xf32> to vector<8x128xf32>
    %621 = math.tanh %620 : vector<8x128xf32>
    %622 = vector.extract_strided_slice %619 {offsets = [8, 0], sizes = [8, 128], strides = [1, 1]} : vector<24x128xf32> to vector<8x128xf32>
    %623 = arith.mulf %622, %581 : vector<8x128xf32>
    %624 = vector.extract_strided_slice %619 {offsets = [0, 0], sizes = [8, 128], strides = [1, 1]} : vector<24x128xf32> to vector<8x128xf32>
    %625 = arith.mulf %624, %621 : vector<8x128xf32>
    %626 = arith.addf %623, %625 : vector<8x128xf32>
    %627 = vector.extract_strided_slice %619 {offsets = [16, 0], sizes = [8, 128], strides = [1, 1]} : vector<24x128xf32> to vector<8x128xf32>
    %628 = math.tanh %626 : vector<8x128xf32>
    %629 = arith.mulf %627, %628 : vector<8x128xf32>
    %c13_182 = arith.constant 13 : index
    %c0_183 = arith.constant 0 : index
    %c0_184 = arith.constant 0 : index
    %630 = vector.load %arg8[%c13_182, %c0_183, %c0_184] : memref<16x8x128xf32, #tpu.memory_space<vmem>>, vector<1x8x128xf32>
    %631 = vector.shape_cast %630 : vector<1x8x128xf32> to vector<8x128xf32>
    %632 = vector.shape_cast %629 : vector<8x128xf32> to vector<1x8x128xf32>
    tpu.vector_store %arg8[%c13_182, %c0_183, %c0_184], %632 {strides = array<i32>} : memref<16x8x128xf32, #tpu.memory_space<vmem>>, vector<1x8x128xf32>,
    %c14 = arith.constant 14 : index
    %c0_185 = arith.constant 0 : index
    %c0_186 = arith.constant 0 : index
    %633 = vector.load %arg1[%c14, %c0_185, %c0_186] : memref<16x8x128xf32, #tpu.memory_space<vmem>>, vector<1x8x128xf32>
    %634 = vector.shape_cast %633 : vector<1x8x128xf32> to vector<8x128xf32>
    %635 = tpu.concatenate %634, %609 in 0 : vector<8x128xf32>, vector<8x128xf32> -> vector<16x128xf32>
    %cst_187 = arith.constant dense<0.000000e+00> : vector<32x128xf32>
    %636 = tpu.matmul %0, %635, %cst_187 {dimension_numbers = #tpu.dot_dimension_numbers<[1], [0], [0], [1], [0, 0, 1, 1], [], []>, precision = #tpu.contract_precision<fp32>} : vector<32x16xf32>, vector<16x128xf32>, vector<32x128xf32> -> vector<32x128xf32>
    %637 = vector.extract_strided_slice %636 {offsets = [0, 0], sizes = [24, 128], strides = [1, 1]} : vector<32x128xf32> to vector<24x128xf32>
    %cst_188 = arith.constant 5.000000e-01 : f32
    %638 = vector.broadcast %cst_188 : f32 to vector<24x128xf32>
    %639 = arith.mulf %638, %637 : vector<24x128xf32>
    %640 = math.tanh %639 : vector<24x128xf32>
    %cst_189 = arith.constant 5.000000e-01 : f32
    %641 = vector.broadcast %cst_189 : f32 to vector<24x128xf32>
    %642 = arith.mulf %640, %641 : vector<24x128xf32>
    %cst_190 = arith.constant 5.000000e-01 : f32
    %643 = vector.broadcast %cst_190 : f32 to vector<24x128xf32>
    %644 = arith.addf %642, %643 : vector<24x128xf32>
    %645 = vector.extract_strided_slice %636 {offsets = [24, 0], sizes = [8, 128], strides = [1, 1]} : vector<32x128xf32> to vector<8x128xf32>
    %646 = math.tanh %645 : vector<8x128xf32>
    %647 = vector.extract_strided_slice %644 {offsets = [8, 0], sizes = [8, 128], strides = [1, 1]} : vector<24x128xf32> to vector<8x128xf32>
    %648 = arith.mulf %647, %606 : vector<8x128xf32>
    %649 = vector.extract_strided_slice %644 {offsets = [0, 0], sizes = [8, 128], strides = [1, 1]} : vector<24x128xf32> to vector<8x128xf32>
    %650 = arith.mulf %649, %646 : vector<8x128xf32>
    %651 = arith.addf %648, %650 : vector<8x128xf32>
    %652 = vector.extract_strided_slice %644 {offsets = [16, 0], sizes = [8, 128], strides = [1, 1]} : vector<24x128xf32> to vector<8x128xf32>
    %653 = math.tanh %651 : vector<8x128xf32>
    %654 = arith.mulf %652, %653 : vector<8x128xf32>
    %655 = tpu.concatenate %634, %654, %629 in 0 : vector<8x128xf32>, vector<8x128xf32>, vector<8x128xf32> -> vector<24x128xf32>
    %cst_191 = arith.constant dense<0.000000e+00> : vector<32x128xf32>
    %656 = tpu.matmul %1, %655, %cst_191 {dimension_numbers = #tpu.dot_dimension_numbers<[1], [0], [0], [1], [0, 0, 1, 1], [], []>, precision = #tpu.contract_precision<fp32>} : vector<32x24xf32>, vector<24x128xf32>, vector<32x128xf32> -> vector<32x128xf32>
    %657 = vector.extract_strided_slice %656 {offsets = [0, 0], sizes = [24, 128], strides = [1, 1]} : vector<32x128xf32> to vector<24x128xf32>
    %cst_192 = arith.constant 5.000000e-01 : f32
    %658 = vector.broadcast %cst_192 : f32 to vector<24x128xf32>
    %659 = arith.mulf %658, %657 : vector<24x128xf32>
    %660 = math.tanh %659 : vector<24x128xf32>
    %cst_193 = arith.constant 5.000000e-01 : f32
    %661 = vector.broadcast %cst_193 : f32 to vector<24x128xf32>
    %662 = arith.mulf %660, %661 : vector<24x128xf32>
    %cst_194 = arith.constant 5.000000e-01 : f32
    %663 = vector.broadcast %cst_194 : f32 to vector<24x128xf32>
    %664 = arith.addf %662, %663 : vector<24x128xf32>
    %665 = vector.extract_strided_slice %656 {offsets = [24, 0], sizes = [8, 128], strides = [1, 1]} : vector<32x128xf32> to vector<8x128xf32>
    %666 = math.tanh %665 : vector<8x128xf32>
    %667 = vector.extract_strided_slice %664 {offsets = [8, 0], sizes = [8, 128], strides = [1, 1]} : vector<24x128xf32> to vector<8x128xf32>
    %668 = arith.mulf %667, %626 : vector<8x128xf32>
    %669 = vector.extract_strided_slice %664 {offsets = [0, 0], sizes = [8, 128], strides = [1, 1]} : vector<24x128xf32> to vector<8x128xf32>
    %670 = arith.mulf %669, %666 : vector<8x128xf32>
    %671 = arith.addf %668, %670 : vector<8x128xf32>
    %672 = vector.extract_strided_slice %664 {offsets = [16, 0], sizes = [8, 128], strides = [1, 1]} : vector<24x128xf32> to vector<8x128xf32>
    %673 = math.tanh %671 : vector<8x128xf32>
    %674 = arith.mulf %672, %673 : vector<8x128xf32>
    %c14_195 = arith.constant 14 : index
    %c0_196 = arith.constant 0 : index
    %c0_197 = arith.constant 0 : index
    %675 = vector.load %arg8[%c14_195, %c0_196, %c0_197] : memref<16x8x128xf32, #tpu.memory_space<vmem>>, vector<1x8x128xf32>
    %676 = vector.shape_cast %675 : vector<1x8x128xf32> to vector<8x128xf32>
    %677 = vector.shape_cast %674 : vector<8x128xf32> to vector<1x8x128xf32>
    tpu.vector_store %arg8[%c14_195, %c0_196, %c0_197], %677 {strides = array<i32>} : memref<16x8x128xf32, #tpu.memory_space<vmem>>, vector<1x8x128xf32>,
    %c15 = arith.constant 15 : index
    %c0_198 = arith.constant 0 : index
    %c0_199 = arith.constant 0 : index
    %678 = vector.load %arg1[%c15, %c0_198, %c0_199] : memref<16x8x128xf32, #tpu.memory_space<vmem>>, vector<1x8x128xf32>
    %679 = vector.shape_cast %678 : vector<1x8x128xf32> to vector<8x128xf32>
    %680 = tpu.concatenate %679, %654 in 0 : vector<8x128xf32>, vector<8x128xf32> -> vector<16x128xf32>
    %cst_200 = arith.constant dense<0.000000e+00> : vector<32x128xf32>
    %681 = tpu.matmul %0, %680, %cst_200 {dimension_numbers = #tpu.dot_dimension_numbers<[1], [0], [0], [1], [0, 0, 1, 1], [], []>, precision = #tpu.contract_precision<fp32>} : vector<32x16xf32>, vector<16x128xf32>, vector<32x128xf32> -> vector<32x128xf32>
    %682 = vector.extract_strided_slice %681 {offsets = [0, 0], sizes = [24, 128], strides = [1, 1]} : vector<32x128xf32> to vector<24x128xf32>
    %cst_201 = arith.constant 5.000000e-01 : f32
    %683 = vector.broadcast %cst_201 : f32 to vector<24x128xf32>
    %684 = arith.mulf %683, %682 : vector<24x128xf32>
    %685 = math.tanh %684 : vector<24x128xf32>
    %cst_202 = arith.constant 5.000000e-01 : f32
    %686 = vector.broadcast %cst_202 : f32 to vector<24x128xf32>
    %687 = arith.mulf %685, %686 : vector<24x128xf32>
    %cst_203 = arith.constant 5.000000e-01 : f32
    %688 = vector.broadcast %cst_203 : f32 to vector<24x128xf32>
    %689 = arith.addf %687, %688 : vector<24x128xf32>
    %690 = vector.extract_strided_slice %681 {offsets = [24, 0], sizes = [8, 128], strides = [1, 1]} : vector<32x128xf32> to vector<8x128xf32>
    %691 = math.tanh %690 : vector<8x128xf32>
    %692 = vector.extract_strided_slice %689 {offsets = [8, 0], sizes = [8, 128], strides = [1, 1]} : vector<24x128xf32> to vector<8x128xf32>
    %693 = arith.mulf %692, %651 : vector<8x128xf32>
    %694 = vector.extract_strided_slice %689 {offsets = [0, 0], sizes = [8, 128], strides = [1, 1]} : vector<24x128xf32> to vector<8x128xf32>
    %695 = arith.mulf %694, %691 : vector<8x128xf32>
    %696 = arith.addf %693, %695 : vector<8x128xf32>
    %697 = vector.extract_strided_slice %689 {offsets = [16, 0], sizes = [8, 128], strides = [1, 1]} : vector<24x128xf32> to vector<8x128xf32>
    %698 = math.tanh %696 : vector<8x128xf32>
    %699 = arith.mulf %697, %698 : vector<8x128xf32>
    %700 = tpu.concatenate %679, %699, %674 in 0 : vector<8x128xf32>, vector<8x128xf32>, vector<8x128xf32> -> vector<24x128xf32>
    %cst_204 = arith.constant dense<0.000000e+00> : vector<32x128xf32>
    %701 = tpu.matmul %1, %700, %cst_204 {dimension_numbers = #tpu.dot_dimension_numbers<[1], [0], [0], [1], [0, 0, 1, 1], [], []>, precision = #tpu.contract_precision<fp32>} : vector<32x24xf32>, vector<24x128xf32>, vector<32x128xf32> -> vector<32x128xf32>
    %702 = vector.extract_strided_slice %701 {offsets = [0, 0], sizes = [24, 128], strides = [1, 1]} : vector<32x128xf32> to vector<24x128xf32>
    %cst_205 = arith.constant 5.000000e-01 : f32
    %703 = vector.broadcast %cst_205 : f32 to vector<24x128xf32>
    %704 = arith.mulf %703, %702 : vector<24x128xf32>
    %705 = math.tanh %704 : vector<24x128xf32>
    %cst_206 = arith.constant 5.000000e-01 : f32
    %706 = vector.broadcast %cst_206 : f32 to vector<24x128xf32>
    %707 = arith.mulf %705, %706 : vector<24x128xf32>
    %cst_207 = arith.constant 5.000000e-01 : f32
    %708 = vector.broadcast %cst_207 : f32 to vector<24x128xf32>
    %709 = arith.addf %707, %708 : vector<24x128xf32>
    %710 = vector.extract_strided_slice %701 {offsets = [24, 0], sizes = [8, 128], strides = [1, 1]} : vector<32x128xf32> to vector<8x128xf32>
    %711 = math.tanh %710 : vector<8x128xf32>
    %712 = vector.extract_strided_slice %709 {offsets = [8, 0], sizes = [8, 128], strides = [1, 1]} : vector<24x128xf32> to vector<8x128xf32>
    %713 = arith.mulf %712, %671 : vector<8x128xf32>
    %714 = vector.extract_strided_slice %709 {offsets = [0, 0], sizes = [8, 128], strides = [1, 1]} : vector<24x128xf32> to vector<8x128xf32>
    %715 = arith.mulf %714, %711 : vector<8x128xf32>
    %716 = arith.addf %713, %715 : vector<8x128xf32>
    %717 = vector.extract_strided_slice %709 {offsets = [16, 0], sizes = [8, 128], strides = [1, 1]} : vector<24x128xf32> to vector<8x128xf32>
    %718 = math.tanh %716 : vector<8x128xf32>
    %719 = arith.mulf %717, %718 : vector<8x128xf32>
    %c15_208 = arith.constant 15 : index
    %c0_209 = arith.constant 0 : index
    %c0_210 = arith.constant 0 : index
    %720 = vector.load %arg8[%c15_208, %c0_209, %c0_210] : memref<16x8x128xf32, #tpu.memory_space<vmem>>, vector<1x8x128xf32>
    %721 = vector.shape_cast %720 : vector<1x8x128xf32> to vector<8x128xf32>
    %722 = vector.shape_cast %719 : vector<8x128xf32> to vector<1x8x128xf32>
    tpu.vector_store %arg8[%c15_208, %c0_209, %c0_210], %722 {strides = array<i32>} : memref<16x8x128xf32, #tpu.memory_space<vmem>>, vector<1x8x128xf32>,
    %c0_211 = arith.constant 0 : index
    %c0_212 = arith.constant 0 : index
    %c0_213 = arith.constant 0 : index
    %723 = vector.load %arg8[%c0_211, %c0_212, %c0_213] : memref<16x8x128xf32, #tpu.memory_space<vmem>>, vector<16x8x128xf32>
    %724 = vector.shape_cast %723 : vector<16x8x128xf32> to vector<128x128xf32>
    %c0_214 = arith.constant 0 : index
    %c0_215 = arith.constant 0 : index
    %c0_216 = arith.constant 0 : index
    %725 = vector.load %arg1[%c0_214, %c0_215, %c0_216] : memref<16x8x128xf32, #tpu.memory_space<vmem>>, vector<16x8x128xf32>
    %726 = vector.shape_cast %725 : vector<16x8x128xf32> to vector<128x128xf32>
    %c256 = arith.constant 256 : index
    %c0_217 = arith.constant 0 : index
    %727 = vector.load %arg3[%c256, %c0_217] : memref<296x128xf32, #tpu.memory_space<vmem>>, vector<40x128xf32>
    %cst_218 = arith.constant dense<0.000000e+00> : vector<40x128xf32>
    %728 = tpu.matmul %727, %726, %cst_218 {dimension_numbers = #tpu.dot_dimension_numbers<[1], [0], [0], [1], [0, 0, 1, 1], [], []>} : vector<40x128xf32>, vector<128x128xf32>, vector<40x128xf32> -> vector<40x128xf32>
    %c256_219 = arith.constant 256 : index
    %c0_220 = arith.constant 0 : index
    %729 = vector.load %arg6[%c256_219, %c0_220] : memref<536x1xf32, #tpu.memory_space<vmem>>, vector<40x1xf32>
    %730 = vector.broadcast %729 : vector<40x1xf32> to vector<40x128xf32>
    %731 = arith.addf %728, %730 : vector<40x128xf32>
    %c0_221 = arith.constant 0 : index
    %c0_222 = arith.constant 0 : index
    %732 = vector.load %arg3[%c0_221, %c0_222] : memref<296x128xf32, #tpu.memory_space<vmem>>, vector<256x128xf32>
    %cst_223 = arith.constant dense<0.000000e+00> : vector<256x128xf32>
    %733 = tpu.matmul %732, %724, %cst_223 {dimension_numbers = #tpu.dot_dimension_numbers<[1], [0], [0], [1], [0, 0, 1, 1], [], []>} : vector<256x128xf32>, vector<128x128xf32>, vector<256x128xf32> -> vector<256x128xf32>
    %c0_224 = arith.constant 0 : index
    %c0_225 = arith.constant 0 : index
    %734 = vector.load %arg6[%c0_224, %c0_225] : memref<536x1xf32, #tpu.memory_space<vmem>>, vector<256x1xf32>
    %735 = vector.broadcast %734 : vector<256x1xf32> to vector<256x128xf32>
    %736 = arith.addf %733, %735 : vector<256x128xf32>
    %737 = math.tanh %736 : vector<256x128xf32>
    %c0_226 = arith.constant 0 : index
    %c0_227 = arith.constant 0 : index
    %738 = vector.load %arg4[%c0_226, %c0_227] : memref<80x256xf32, #tpu.memory_space<vmem>>, vector<80x256xf32>
    %cst_228 = arith.constant dense<0.000000e+00> : vector<80x128xf32>
    %739 = tpu.matmul %738, %737, %cst_228 {dimension_numbers = #tpu.dot_dimension_numbers<[1], [0], [0], [1], [0, 0, 1, 1], [], []>} : vector<80x256xf32>, vector<256x128xf32>, vector<80x128xf32> -> vector<80x128xf32>
    %c296 = arith.constant 296 : index
    %c0_229 = arith.constant 0 : index
    %740 = vector.load %arg6[%c296, %c0_229] : memref<536x1xf32, #tpu.memory_space<vmem>>, vector<80x1xf32>
    %741 = vector.broadcast %740 : vector<80x1xf32> to vector<80x128xf32>
    %742 = arith.addf %739, %741 : vector<80x128xf32>
    %743 = math.tanh %742 : vector<80x128xf32>
    %c0_230 = arith.constant 0 : index
    %c0_231 = arith.constant 0 : index
    %744 = vector.load %arg5[%c0_230, %c0_231] : memref<176x80xf32, #tpu.memory_space<vmem>>, vector<40x80xf32>
    %cst_232 = arith.constant dense<0.000000e+00> : vector<40x128xf32>
    %745 = tpu.matmul %744, %743, %cst_232 {dimension_numbers = #tpu.dot_dimension_numbers<[1], [0], [0], [1], [0, 0, 1, 1], [], []>} : vector<40x80xf32>, vector<80x128xf32>, vector<40x128xf32> -> vector<40x128xf32>
    %c376 = arith.constant 376 : index
    %c0_233 = arith.constant 0 : index
    %746 = vector.load %arg6[%c376, %c0_233] : memref<536x1xf32, #tpu.memory_space<vmem>>, vector<40x1xf32>
    %747 = vector.broadcast %746 : vector<40x1xf32> to vector<40x128xf32>
    %748 = arith.addf %745, %747 : vector<40x128xf32>
    %749 = math.tanh %748 : vector<40x128xf32>
    %c40 = arith.constant 40 : index
    %c0_234 = arith.constant 0 : index
    %750 = vector.load %arg5[%c40, %c0_234] : memref<176x80xf32, #tpu.memory_space<vmem>>, vector<16x40xf32>
    %cst_235 = arith.constant dense<0.000000e+00> : vector<16x128xf32>
    %751 = tpu.matmul %750, %749, %cst_235 {dimension_numbers = #tpu.dot_dimension_numbers<[1], [0], [0], [1], [0, 0, 1, 1], [], []>} : vector<16x40xf32>, vector<40x128xf32>, vector<16x128xf32> -> vector<16x128xf32>
    %c56 = arith.constant 56 : index
    %c0_236 = arith.constant 0 : index
    %752 = vector.load %arg5[%c56, %c0_236] : memref<176x80xf32, #tpu.memory_space<vmem>>, vector<16x40xf32>
    %cst_237 = arith.constant dense<0.000000e+00> : vector<16x128xf32>
    %753 = tpu.matmul %752, %731, %cst_237 {dimension_numbers = #tpu.dot_dimension_numbers<[1], [0], [0], [1], [0, 0, 1, 1], [], []>} : vector<16x40xf32>, vector<40x128xf32>, vector<16x128xf32> -> vector<16x128xf32>
    %754 = arith.addf %751, %753 : vector<16x128xf32>
    %c416 = arith.constant 416 : index
    %c0_238 = arith.constant 0 : index
    %755 = vector.load %arg6[%c416, %c0_238] : memref<536x1xf32, #tpu.memory_space<vmem>>, vector<16x1xf32>
    %756 = vector.broadcast %755 : vector<16x1xf32> to vector<16x128xf32>
    %757 = arith.addf %754, %756 : vector<16x128xf32>
    %cst_239 = arith.constant 0.000000e+00 : f32
    %758 = vector.broadcast %cst_239 : f32 to vector<16x128xf32>
    %759 = arith.maximumf %757, %758 : vector<16x128xf32>
    %c72 = arith.constant 72 : index
    %c0_240 = arith.constant 0 : index
    %760 = vector.load %arg5[%c72, %c0_240] : memref<176x80xf32, #tpu.memory_space<vmem>>, vector<32x16xf32>
    %cst_241 = arith.constant dense<0.000000e+00> : vector<32x128xf32>
    %761 = tpu.matmul %760, %759, %cst_241 {dimension_numbers = #tpu.dot_dimension_numbers<[1], [0], [0], [1], [0, 0, 1, 1], [], []>} : vector<32x16xf32>, vector<16x128xf32>, vector<32x128xf32> -> vector<32x128xf32>
    %c432 = arith.constant 432 : index
    %c0_242 = arith.constant 0 : index
    %762 = vector.load %arg6[%c432, %c0_242] : memref<536x1xf32, #tpu.memory_space<vmem>>, vector<32x1xf32>
    %763 = vector.broadcast %762 : vector<32x1xf32> to vector<32x128xf32>
    %764 = arith.addf %761, %763 : vector<32x128xf32>
    %cst_243 = arith.constant 0.000000e+00 : f32
    %765 = vector.broadcast %cst_243 : f32 to vector<32x128xf32>
    %766 = arith.maximumf %764, %765 : vector<32x128xf32>
    %c104 = arith.constant 104 : index
    %c0_244 = arith.constant 0 : index
    %767 = vector.load %arg5[%c104, %c0_244] : memref<176x80xf32, #tpu.memory_space<vmem>>, vector<32x32xf32>
    %cst_245 = arith.constant dense<0.000000e+00> : vector<32x128xf32>
    %768 = tpu.matmul %767, %766, %cst_245 {dimension_numbers = #tpu.dot_dimension_numbers<[1], [0], [0], [1], [0, 0, 1, 1], [], []>} : vector<32x32xf32>, vector<32x128xf32>, vector<32x128xf32> -> vector<32x128xf32>
    %c464 = arith.constant 464 : index
    %c0_246 = arith.constant 0 : index
    %769 = vector.load %arg6[%c464, %c0_246] : memref<536x1xf32, #tpu.memory_space<vmem>>, vector<32x1xf32>
    %770 = vector.broadcast %769 : vector<32x1xf32> to vector<32x128xf32>
    %771 = arith.addf %768, %770 : vector<32x128xf32>
    %cst_247 = arith.constant 0.000000e+00 : f32
    %772 = vector.broadcast %cst_247 : f32 to vector<32x128xf32>
    %773 = arith.maximumf %771, %772 : vector<32x128xf32>
    %c136 = arith.constant 136 : index
    %c0_248 = arith.constant 0 : index
    %774 = vector.load %arg5[%c136, %c0_248] : memref<176x80xf32, #tpu.memory_space<vmem>>, vector<32x32xf32>
    %cst_249 = arith.constant dense<0.000000e+00> : vector<32x128xf32>
    %775 = tpu.matmul %774, %773, %cst_249 {dimension_numbers = #tpu.dot_dimension_numbers<[1], [0], [0], [1], [0, 0, 1, 1], [], []>} : vector<32x32xf32>, vector<32x128xf32>, vector<32x128xf32> -> vector<32x128xf32>
    %c496 = arith.constant 496 : index
    %c0_250 = arith.constant 0 : index
    %776 = vector.load %arg6[%c496, %c0_250] : memref<536x1xf32, #tpu.memory_space<vmem>>, vector<32x1xf32>
    %777 = vector.broadcast %776 : vector<32x1xf32> to vector<32x128xf32>
    %778 = arith.addf %775, %777 : vector<32x128xf32>
    %cst_251 = arith.constant 0.000000e+00 : f32
    %779 = vector.broadcast %cst_251 : f32 to vector<32x128xf32>
    %780 = arith.maximumf %778, %779 : vector<32x128xf32>
    %c168 = arith.constant 168 : index
    %c0_252 = arith.constant 0 : index
    %781 = vector.load %arg5[%c168, %c0_252] : memref<176x80xf32, #tpu.memory_space<vmem>>, vector<1x32xf32>
    %cst_253 = arith.constant dense<0.000000e+00> : vector<1x128xf32>
    %782 = tpu.matmul %781, %780, %cst_253 {dimension_numbers = #tpu.dot_dimension_numbers<[1], [0], [0], [1], [0, 0, 1, 1], [], []>} : vector<1x32xf32>, vector<32x128xf32>, vector<1x128xf32> -> vector<1x128xf32>
    %c528 = arith.constant 528 : index
    %c0_254 = arith.constant 0 : index
    %783 = vector.load %arg6[%c528, %c0_254] : memref<536x1xf32, #tpu.memory_space<vmem>>, vector<1x1xf32>
    %784 = vector.broadcast %783 : vector<1x1xf32> to vector<1x128xf32>
    %785 = arith.addf %782, %784 : vector<1x128xf32>
    %786 = arith.negf %785 : vector<1x128xf32>
    %787 = math.exp %786 : vector<1x128xf32>
    %cst_255 = arith.constant 1.000000e+00 : f32
    %788 = vector.broadcast %cst_255 : f32 to vector<1x128xf32>
    %789 = arith.addf %788, %787 : vector<1x128xf32>
    %790 = arith.divf %788, %789 : vector<1x128xf32>
    %c0_256 = arith.constant 0 : index
    %c0_257 = arith.constant 0 : index
    %791 = vector.load %arg7[%c0_256, %c0_257] : memref<1x128xf32, #tpu.memory_space<vmem>>, vector<1x128xf32>
    tpu.vector_store %arg7[%c0_256, %c0_257], %790 {strides = array<i32>} : memref<1x128xf32, #tpu.memory_space<vmem>>, vector<1x128xf32>,
    return
  }
  func.func @transform_0(%arg0: i32) -> (i32, i32, i32) {
    %c0_i32 = arith.constant 0 : i32
    %c0_i32_0 = arith.constant 0 : i32
    %c0_i32_1 = arith.constant 0 : i32
    return %c0_i32, %c0_i32_0, %arg0 : i32, i32, i32
  }
  func.func @transform_1(%arg0: i32) -> (i32, i32) {
    %c0_i32 = arith.constant 0 : i32
    %c0_i32_0 = arith.constant 0 : i32
    %c0_i32_1 = arith.constant 0 : i32
    return %c0_i32, %c0_i32_0 : i32, i32
  }
  func.func @transform_2(%arg0: i32) -> (i32, i32) {
    %c0_i32 = arith.constant 0 : i32
    %c0_i32_0 = arith.constant 0 : i32
    %c0_i32_1 = arith.constant 0 : i32
    return %c0_i32, %c0_i32_0 : i32, i32
  }
  func.func @transform_3(%arg0: i32) -> (i32, i32) {
    %c0_i32 = arith.constant 0 : i32
    %c0_i32_0 = arith.constant 0 : i32
    %c0_i32_1 = arith.constant 0 : i32
    return %c0_i32, %c0_i32_0 : i32, i32
  }
  func.func @transform_4(%arg0: i32) -> (i32, i32) {
    %c0_i32 = arith.constant 0 : i32
    %c0_i32_0 = arith.constant 0 : i32
    %c0_i32_1 = arith.constant 0 : i32
    return %c0_i32, %c0_i32_0 : i32, i32
  }
  func.func @transform_5(%arg0: i32) -> (i32, i32) {
    %c0_i32 = arith.constant 0 : i32
    %c0_i32_0 = arith.constant 0 : i32
    %c0_i32_1 = arith.constant 0 : i32
    return %c0_i32, %c0_i32_0 : i32, i32
  }
  func.func @transform_6(%arg0: i32) -> (i32, i32) {
    %c0_i32 = arith.constant 0 : i32
    %c0_i32_0 = arith.constant 0 : i32
    return %c0_i32, %arg0 : i32, i32
  }
}

</mosaic_0001>

<bundles_post_ra>
// kernel: tpu_custom_call.1
= control target key start
LH: loop header
LB: loop body
LE: loop exit
PB: predicated region body
PF: predicated region fallthrough
CT: control target
= control target key end

     0   :  { %vm33_vm0 = vcmask 130048   ;;  %s29845_s0 = inlined_call_operand.vmem [shape: f32[16,8,128], index: 0, kind: input, shape index: {}]   ;;  %s29846_s1 = inlined_call_operand.vmem [shape: f32[64,24], index: 1, kind: input, shape index: {}]   ;;  %s29847_s2 = inlined_call_operand.vmem [shape: f32[296,128], index: 2, kind: input, shape index: {}]   ;;  %s29848_s3 = inlined_call_operand.vmem [shape: f32[80,256], index: 3, kind: input, shape index: {}]   ;;  %s29849_s4 = inlined_call_operand.vmem [shape: f32[176,80], index: 4, kind: input, shape index: {}]   ;;  %s29850_s5 = inlined_call_operand.vmem [shape: f32[536,1], index: 5, kind: input, shape index: {}]   ;;  %s29851_s6 = inlined_call_operand.hbm [shape: f32[1,128], index: 6, kind: output, shape index: {}]  }
   0x1   :  { %v32_v0 = vld [vmem:[%s29845_s0] sm:$0xff]  ;;  %v26_v2 = vld [vmem:[%s29846_s1 + $0x10] sm:$0xff]  ;;  %v27_v4 = vld [vmem:[%s29846_s1 + $0x18] sm:$0xff] }
   0x2   :  { %v24_v1 = vld [vmem:[%s29846_s1] sm:$0xff]  ;;  %v27172_v3 = vand.u32 4294901760, %v32_v0  ;;  %v41_v6 = vsel %vm33_vm0, %v26_v2, 0  ;;  %v25_v7 = vld [vmem:[%s29846_s1 + $0x8] sm:$0xff]  ;;  %v44_v8 = vsel %vm33_vm0, %v27_v4, 0 }
   0x3   :  { %v35_v5 = vsel %vm33_vm0, %v24_v1, 0  ;;  %v27185_v10 = vand.u32 4294901760, %v41_v6  ;;  %v38_v11 = vsel %vm33_vm0, %v25_v7, 0 }
   0x4   :  { %v27183_v9 = vand.u32 4294901760, %v35_v5 }
   0x5   :  { %11 = vsyncpa [#allocation4], 0  ;;  %22816 = vmatprep.subr.mxu0 %v27172_v3  ;;  %v27189_v12 = vand.u32 4294901760, %v44_v8  ;;  %v27191_v13 = vand.u32 4294901760, %v38_v11  ;;  %v27194_v14 = vsub.f32 %v32_v0, %v27172_v3  ;;  %26030 = vmatprep.subr.mxu1 %v27172_v3  ;;  %v27202_v16 = vsub.f32 %v41_v6, %v27185_v10  ;;  %v28_v34 = vld [vmem:[%s29846_s1 + $0x20] sm:$0xff]  ;;  %v29_v60 = vld [vmem:[%s29846_s1 + $0x28] sm:$0xff] }
   0x6   :  { %22817 = vmatpush3.msra.mxu0 %v27172_v3  ;;  %v27199_v15 = vsub.f32 %v35_v5, %v27183_v9  ;;  %26031 = vmatpush3.msra.mxu1 %v27172_v3  ;;  %vm639_vm1 = vcmask 195584   ;;  %v30_v62 = vld [vmem:[%s29846_s1 + $0x30] sm:$0xff]  ;;  %v31_v2 = vld [vmem:[%s29846_s1 + $0x38] sm:$0xff]  ;;  %v21355_v4 = vld [vmem:[%s29845_s0 + $0x8] sm:$0xff]  ;;  %vm27125_vm2 = vmmov 0   ;;  %vm20572_vm3 = vcmask 654336  }
   0x7   :  { %v27206_v17 = vsub.f32 %v38_v11, %v27191_v13  ;;  %v27209_v18 = vand.u32 4294901760, %v27194_v14  ;;  %v27212_v19 = vsub.f32 %v44_v8, %v27189_v12  ;;  %v27218_v21 = vand.u32 4294901760, %v27202_v16  ;;  %s27127_s18 = smov [#allocation3]  }
   0x8   :  { %v27215_v20 = vand.u32 4294901760, %v27199_v15  ;;  %v641_v35 = vsel %vm639_vm1, %v28_v34, 0  ;;  %v644_v0 = vsel %vm639_vm1, %v29_v60, 0  ;;  %v647_v1 = vsel %vm639_vm1, %v30_v62, 0  ;;  %s21347_s19 = sshll.u32 %s27127_s18, 4  ;;  %s21348_s19 = int_to_ptr.vmem [resolvable:$true] %s21347_s19 }
   0x9   :  { %v27221_v22 = vand.u32 4294901760, %v27206_v17  ;;  %v156_v23 = vsub.f32 %v27194_v14, %v27209_v18  ;;  %v27226_v24 = vand.u32 4294901760, %v27212_v19  ;;  %v135_v26 = vsub.f32 %v27202_v16, %v27218_v21  ;;  %s27103_s20 = scalar_lea.vmem %s21348_s19, 32  ;;  %p27104_p1 = scmp.lt.s32.totalorder %s21348_s19, %s21348_s19 }
   0xa   :  { %v115_v25 = vsub.f32 %v27199_v15, %v27215_v20  ;;  %v27285_v36 = vand.u32 4294901760, %v641_v35  ;;  %v27315_v5 = vand.u32 4294901760, %v644_v0  ;;  %v27317_v7 = vand.u32 4294901760, %v647_v1 }
   0xb   :  { %v125_v27 = vsub.f32 %v27206_v17, %v27221_v22  ;;  %v27234_v28 = vand.u32 4294901760, %v156_v23  ;;  %v145_v29 = vsub.f32 %v27212_v19, %v27226_v24  ;;  %v27240_v31 = vand.u32 4294901760, %v135_v26 }
   0xc   :  { %v27238_v30 = vand.u32 4294901760, %v115_v25  ;;  %v27288_v37 = vsub.f32 %v641_v35, %v27285_v36  ;;  %v650_v8 = vsel %vm639_vm1, %v31_v2, 0  ;;  %v27320_v11 = vand.u32 4294901760, %v21355_v4 }
   0xd   :  { %v27242_v32 = vand.u32 4294901760, %v125_v27  ;;  %22824 = vmatprep.subr.mxu0 %v27234_v28  ;;  %v27245_v33 = vand.u32 4294901760, %v145_v29  ;;  %22821 = vmatprep.mubr.f32.mxu1 %v27240_v31  ;;  %v27323_v25 = vsub.f32 %v644_v0, %v27315_v5  ;;  %v27325_v26 = vand.u32 4294901760, %v650_v8 }
   0xe   :  { %22818 = vmatprep.mubr.f32.mxu0 %v27238_v30  ;;  %v27291_v38 = vand.u32 4294901760, %v27288_v37  ;;  %v27328_v27 = vsub.f32 %v647_v1, %v27317_v7  ;;  %v27331_v29 = vsub.f32 %v21355_v4, %v27320_v11  ;;  %vm20687_vm4 = vcmask 326656  }
   0xf   :  { %22819 = vmatmul.mubr.f32.vlgmr.msra.gmra.mrb[0].mxu0 %v27242_v32  ;;  %22822 = vmatmul.mubr.f32.vlgmr.msra.gmra.mrb[0].mxu1 %v27245_v33  ;;  %v27334_v35 = vand.u32 4294901760, %v27323_v25  ;;  %vm21023_vm5 = vcmask 261120  }
  0x10   :  { %22825 = vmatpush3.msra.mxu0 %v27234_v28  ;;  %22826 = vmatprep.mubr.f32.mxu0 %v27183_v9  ;;  %v722_v39 = vsub.f32 %v27288_v37, %v27291_v38 }
  0x11   :  { %22832 = vmatprep.subr.mxu0 %v27194_v14 }
  0x12   :  { %v27295_v40 = vand.u32 4294901760, %v722_v39  ;;  %v27337_v39 = vsub.f32 %v650_v8, %v27325_v26 }
  0x14   :  { %22868 = vmatprep.mubr.f32.mxu1 %v27295_v40 }
  0x17   :  { %22827 = vmatmul.mubr.f32.vlgmr.msra.gmra.mrb[0].mxu0 %v27191_v13 }
  0x18   :  { %22829 = vmatprep.mubr.f32.mxu0 %v27185_v10  ;;  %22833 = vmatpush3.msra.mxu0 %v27194_v14 }
  0x19   :  { %22840 = vmatprep.subr.mxu0 %v27172_v3 }
  0x1b   :  { %22830 = vmatmul.mubr.f32.gmra.mrb[2].mxu0 %v27189_v12 }
  0x1c   :  { %22834 = vmatprep.mubr.f32.mxu0 %v27199_v15 }
  0x1f   :  { %22835 = vmatmul.mubr.f32.vlgmr.msra.gmra.mrb[0].mxu0 %v27206_v17 }
  0x20   :  { %22837 = vmatprep.mubr.f32.mxu0 %v27202_v16  ;;  %22841 = vmatpush3.msra.mxu0 %v27172_v3 }
  0x21   :  { %22848 = vmatprep.subr.mxu0 %v27209_v18 }
  0x23   :  { %22838 = vmatmul.mubr.f32.gmra.mrb[2].mxu0 %v27212_v19 }
  0x24   :  { %22842 = vmatprep.mubr.f32.mxu0 %v27215_v20 }
  0x27   :  { %22843 = vmatmul.mubr.f32.vlgmr.msra.gmra.mrb[0].mxu0 %v27221_v22 }
  0x28   :  { %22845 = vmatprep.mubr.f32.mxu0 %v27218_v21  ;;  %22849 = vmatpush3.msra.mxu0 %v27209_v18 }
  0x29   :  { %22856 = vmatprep.subr.mxu0 %v27172_v3 }
  0x2b   :  { %22846 = vmatmul.mubr.f32.gmra.mrb[2].mxu0 %v27226_v24 }
  0x2c   :  { %22850 = vmatprep.mubr.f32.mxu0 %v27183_v9 }
  0x2f   :  { %22851 = vmatmul.mubr.f32.vlgmr.msra.gmra.mrb[0].mxu0 %v27191_v13 }
  0x30   :  { %22853 = vmatprep.mubr.f32.mxu0 %v27185_v10  ;;  %22857 = vmatpush3.msra.mxu0 %v27172_v3 }
  0x33   :  { %22854 = vmatmul.mubr.f32.gmra.mrb[2].mxu0 %v27189_v12 }
  0x34   :  { %22858 = vmatprep.mubr.f32.mxu0 %v27183_v9 }
  0x37   :  { %22859 = vmatmul.mubr.f32.vlgmr.msra.gmra.mrb[0].mxu0 %v27191_v13 }
  0x38   :  { %22861 = vmatprep.mubr.f32.mxu0 %v27185_v10 }
  0x3b   :  { %22862 = vmatmul.mubr.f32.gmra.mrb[2].mxu0 %v27189_v12 }
  0x3c   :  { %22928 = vmatprep.mubr.f32.mxu0 %v27238_v30 }
  0xe2   :  { %v22823_v41 = vpop.f32.mrb[0].mxu1 }
  0xe3   :  { %v138_v42 = vpop.f32.mrb[1].mxu1 }
 0x10a   :  { %v22860_v43 = vpop.f32.mrb[0].mxu0 }
 0x10b   :  { %v622_v44 = vmul.f32 0.5, %v22860_v43  ;;  %v599_v45 = vpop.f32.mrb[1].mxu0 }
 0x10c   :  { %v621_v46 = vmul.f32 0.5, %v599_v45 }
 0x10d   :  { %26681 = vtanh.f32 %v622_v44  ;;  %v27343_v44 = vand.u32 4294901760, %v27331_v29 }
 0x10e   :  { %26683 = vtanh.f32 %v621_v46  ;;  %v22863_v47 = vpop.f32.mrb[2].mxu0  ;;  %v732_v46 = vsub.f32 %v27323_v25, %v27334_v35 }
 0x10f   :  { %v26032_v48 = vadd.f32 %v22863_v47, %v22823_v41  ;;  %v611_v49 = vpop.f32.mrb[3].mxu0  ;;  %v27348_v47 = vand.u32 4294901760, %v27337_v39 }
 0x110   :  { %v26033_v50 = vadd.f32 %v611_v49, %v138_v42  ;;  %v27340_v42 = vand.u32 4294901760, %v27328_v27 }
 0x111   :  { %26685 = vtanh.f32 %v26032_v48 }
 0x112   :  { %v623_v51 = vmul.f32 0.5, %v26033_v50  ;;  %v742_v48 = vsub.f32 %v27328_v27, %v27340_v42 }
 0x114   :  { %26687 = vtanh.f32 %v623_v51 }
 0x117   :  { %v26682_v52 = vpop.eup %26681 }
 0x118   :  { %v26684_v53 = vpop.eup %26683  ;;  %v628_v54 = vmul.f32 0.5, %v26682_v52  ;;  %v1372_v52 = vsub.f32 %v27331_v29, %v27343_v44 }
 0x119   :  { %v627_v55 = vmul.f32 0.5, %v26684_v53  ;;  %v27362_v53 = vand.u32 4294901760, %v732_v46 }
 0x11a   :  { %v631_v56 = vadd.f32 0.5, %v628_v54  ;;  %v752_v54 = vsub.f32 %v27337_v39, %v27348_v47 }
 0x11b   :  { %v26686_v57 = vpop.eup %26685  ;;  %v630_v58 = vadd.f32 0.5, %v627_v55 }
 0x11c   :  { %v634_v59 = vmul.f32 0.0, %v631_v56 }
 0x11d   :  { %v635_v61 = vmul.f32 %v26686_v57, %v630_v58  ;;  %v27370_v57 = vand.u32 4294901760, %v1372_v52  ;;  %v27374_v58 = vand.u32 4294901760, %v752_v54 }
 0x11e   :  { %v26688_v6 = vpop.eup %26687 }
 0x11f   :  { %v27304_v63 = vadd.f32 %v635_v61, %v634_v59  ;;  %v629_v23 = vmul.f32 0.5, %v26688_v6 }
 0x121   :  { %26689 = vtanh.f32 %v27304_v63  ;;  %v632_v34 = vadd.f32 0.5, %v629_v23 }
 0x12b   :  { %v26690_v41 = vpop.eup %26689 }
 0x12c   :  { %v638_v43 = vmul.f32 %v26690_v41, %v632_v34 }
 0x12e   :  { %v656_v45 = vand.u32 4294901760, %v638_v43 }
 0x130   :  { %v27353_v49 = vpack.c.bf16 %v656_v45, %v27172_v3  ;;  %v768_v50 = vsub.f32 %v638_v43, %v656_v45  ;;  %v27356_v51 = vpack.c.bf16 %v656_v45, %v27320_v11  ;;  %v27368_v3 = vand.u32 4294901760, %v742_v48 }
 0x132   :  { %25142 = vmatprep.subr.bf16.mxu1 %v27353_v49  ;;  %25166 = vmatprep.subr.bf16.mxu0 %v27356_v51  ;;  %v769_v55 = vand.u32 4294901760, %v768_v50  ;;  %v25149_v62 = vpack.c.bf16 %v768_v50, %v27194_v14  ;;  %v25173_v0 = vpack.c.bf16 %v768_v50, %v27331_v29 }
 0x133   :  { %25144 = vmatpush3.bf16.msra.mxu1 %v27353_v49  ;;  %25168 = vmatpush3.bf16.msra.mxu0 %v27356_v51 }
 0x134   :  { %v770_v56 = vsub.f32 %v768_v50, %v769_v55  ;;  %v25157_v14 = vpack.c.bf16 %v769_v55, %v27209_v18 }
 0x136   :  { %22869 = vmatmul.mubr.f32.vlgmr.msra.gmra.mrb[2].mxu1 %v27362_v53  ;;  %22929 = vmatmul.mubr.f32.vlgmr.msra.gmra.mrb[4].mxu0 %v27242_v32  ;;  %v771_v59 = vand.u32 4294901760, %v770_v56 }
 0x137   :  { %22871 = vmatprep.mubr.f32.mxu1 %v27368_v3  ;;  %22931 = vmatprep.mubr.f32.mxu0 %v27240_v31 }
 0x138   :  { %v25145_v60 = vpack.c.bf16 %v771_v59, %v27234_v28  ;;  %v25169_v61 = vpack.c.bf16 %v771_v59, %v27370_v57  ;;  %v25181_v28 = vpack.c.bf16 %v769_v55, %v27343_v44 }
 0x13a   :  { %22872 = vmatmul.mubr.f32.gmra.mrb[4].mxu1 %v27374_v58  ;;  %25146 = vmatprep.subr.bf16.mxu1 %v25145_v60 }
 0x13b   :  { %22932 = vmatmul.mubr.f32.gmra.mrb[6].mxu0 %v27245_v33  ;;  %25170 = vmatprep.subr.bf16.mxu0 %v25169_v61 }
 0x13c   :  { %25148 = vmatpush3.bf16.msra.mxu1 %v25145_v60  ;;  %25172 = vmatpush3.bf16.msra.mxu0 %v25169_v61 }
 0x13d   :  { %25150 = vmatprep.subr.bf16.mxu1 %v25149_v62  ;;  %25174 = vmatprep.subr.bf16.mxu0 %v25173_v0 }
 0x13e   :  { %22878 = vmatprep.mubr.f32.mxu1 %v27285_v36  ;;  %22938 = vmatprep.mubr.f32.mxu0 %v27183_v9 }
 0x13f   :  { %22879 = vmatmul.mubr.f32.vlgmr.msra.gmra.mrb[2].mxu1 %v27315_v5  ;;  %22939 = vmatmul.mubr.f32.vlgmr.msra.gmra.mrb[4].mxu0 %v27191_v13 }
 0x140   :  { %25152 = vmatpush3.bf16.msra.mxu1 %v25149_v62  ;;  %25176 = vmatpush3.bf16.msra.mxu0 %v25173_v0 }
 0x141   :  { %25154 = vmatprep.subr.bf16.mxu1 %v27353_v49  ;;  %25178 = vmatprep.subr.bf16.mxu0 %v27356_v51 }
 0x142   :  { %22881 = vmatprep.mubr.f32.mxu1 %v27317_v7  ;;  %22941 = vmatprep.mubr.f32.mxu0 %v27185_v10 }
 0x143   :  { %22882 = vmatmul.mubr.f32.gmra.mrb[4].mxu1 %v27325_v26  ;;  %22942 = vmatmul.mubr.f32.gmra.mrb[6].mxu0 %v27189_v12 }
 0x144   :  { %22888 = vmatprep.mubr.f32.mxu1 %v27288_v37  ;;  %22948 = vmatprep.mubr.f32.mxu0 %v27199_v15 }
 0x147   :  { %22889 = vmatmul.mubr.f32.vlgmr.msra.gmra.mrb[2].mxu1 %v27323_v25  ;;  %22949 = vmatmul.mubr.f32.vlgmr.msra.gmra.mrb[4].mxu0 %v27206_v17 }
 0x148   :  { %25156 = vmatpush3.bf16.msra.mxu1 %v27353_v49  ;;  %25180 = vmatpush3.bf16.msra.mxu0 %v27356_v51 }
 0x149   :  { %25158 = vmatprep.subr.bf16.mxu1 %v25157_v14  ;;  %25182 = vmatprep.subr.bf16.mxu0 %v25181_v28 }
 0x14a   :  { %22891 = vmatprep.mubr.f32.mxu1 %v27328_v27  ;;  %22951 = vmatprep.mubr.f32.mxu0 %v27202_v16 }
 0x14b   :  { %22892 = vmatmul.mubr.f32.gmra.mrb[4].mxu1 %v27337_v39  ;;  %22952 = vmatmul.mubr.f32.gmra.mrb[6].mxu0 %v27212_v19 }
 0x14c   :  { %22898 = vmatprep.mubr.f32.mxu1 %v27291_v38  ;;  %22958 = vmatprep.mubr.f32.mxu0 %v27215_v20 }
 0x14f   :  { %22899 = vmatmul.mubr.f32.vlgmr.msra.gmra.mrb[2].mxu1 %v27334_v35  ;;  %22959 = vmatmul.mubr.f32.vlgmr.msra.gmra.mrb[4].mxu0 %v27221_v22 }
 0x150   :  { %25160 = vmatpush3.bf16.msra.mxu1 %v25157_v14  ;;  %25184 = vmatpush3.bf16.msra.mxu0 %v25181_v28 }
 0x151   :  { %25162 = vmatprep.subr.bf16.mxu1 %v27353_v49  ;;  %25186 = vmatprep.subr.bf16.mxu0 %v27356_v51 }
 0x152   :  { %22901 = vmatprep.mubr.f32.mxu1 %v27340_v42  ;;  %22961 = vmatprep.mubr.f32.mxu0 %v27218_v21 }
 0x153   :  { %22902 = vmatmul.mubr.f32.gmra.mrb[4].mxu1 %v27348_v47  ;;  %22962 = vmatmul.mubr.f32.gmra.mrb[6].mxu0 %v27226_v24 }
 0x154   :  { %22908 = vmatprep.mubr.f32.mxu1 %v27285_v36  ;;  %22968 = vmatprep.mubr.f32.mxu0 %v27183_v9 }
 0x157   :  { %22909 = vmatmul.mubr.f32.vlgmr.msra.gmra.mrb[2].mxu1 %v27315_v5  ;;  %22969 = vmatmul.mubr.f32.vlgmr.msra.gmra.mrb[4].mxu0 %v27191_v13 }
 0x158   :  { %25164 = vmatpush3.bf16.msra.mxu1 %v27353_v49  ;;  %25188 = vmatpush3.bf16.msra.mxu0 %v27356_v51 }
 0x159   :  { %22971 = vmatprep.mubr.f32.mxu0 %v27185_v10  ;;  %22911 = vmatprep.mubr.f32.mxu1 %v27317_v7 }
 0x15b   :  { %22972 = vmatmul.mubr.f32.gmra.mrb[6].mxu0 %v27189_v12  ;;  %22912 = vmatmul.mubr.f32.gmra.mrb[4].mxu1 %v27325_v26 }
 0x15c   :  { %22978 = vmatprep.mubr.f32.mxu0 %v27183_v9  ;;  %22918 = vmatprep.mubr.f32.mxu1 %v27285_v36 }
 0x15f   :  { %22979 = vmatmul.mubr.f32.vlgmr.msra.gmra.mrb[4].mxu0 %v27191_v13  ;;  %22919 = vmatmul.mubr.f32.vlgmr.msra.gmra.mrb[2].mxu1 %v27315_v5 }
 0x160   :  { %22981 = vmatprep.mubr.f32.mxu0 %v27185_v10  ;;  %22921 = vmatprep.mubr.f32.mxu1 %v27317_v7 }
 0x163   :  { %22982 = vmatmul.mubr.f32.gmra.mrb[6].mxu0 %v27189_v12  ;;  %22922 = vmatmul.mubr.f32.gmra.mrb[4].mxu1 %v27325_v26 }
 0x164   :  { %23060 = vmatprep.mubr.f32.mxu0 %v27238_v30  ;;  %22990 = vmatprep.mubr.f32.mxu1 %v27295_v40 }
 0x232   :  { %v22980_v18 = vpop.f32.mrb[4].mxu0  ;;  %v22920_v1 = vpop.f32.mrb[2].mxu1 }
 0x233   :  { %v1850_v2 = vmul.f32 0.5, %v22980_v18  ;;  %v1827_v4 = vpop.f32.mrb[5].mxu0  ;;  %v1218_v6 = vpop.f32.mrb[3].mxu1  ;;  %v1241_v23 = vmul.f32 0.5, %v22920_v1 }
 0x234   :  { %v1849_v8 = vmul.f32 0.5, %v1827_v4  ;;  %v1240_v34 = vmul.f32 0.5, %v1218_v6 }
 0x235   :  { %26691 = vtanh.f32 %v1850_v2 }
 0x236   :  { %26693 = vtanh.f32 %v1849_v8  ;;  %v22983_v41 = vpop.f32.mrb[6].mxu0  ;;  %v22923_v43 = vpop.f32.mrb[4].mxu1 }
 0x237   :  { %v1839_v45 = vpop.f32.mrb[7].mxu0  ;;  %v1230_v46 = vpop.f32.mrb[5].mxu1  ;;  %26695 = vtanh.f32 %v1241_v23  ;;  %v21356_v23 = vld [vmem:[%s29845_s0 + $0x10] sm:$0xff] }
 0x238   :  { %26697 = vtanh.f32 %v1240_v34  ;;  %v1851_v48 = vmul.f32 0.5, %v1839_v45  ;;  %v1242_v49 = vmul.f32 0.5, %v1230_v46 }
 0x239   :  { %26699 = vtanh.f32 %v22983_v41 }
 0x23a   :  { %26701 = vtanh.f32 %v22923_v43 }
 0x23b   :  { %26703 = vtanh.f32 %v1851_v48 }
 0x23c   :  { %26705 = vtanh.f32 %v1242_v49 }
 0x23f   :  { %v26692_v50 = vpop.eup %26691 }
 0x240   :  { %v26694_v51 = vpop.eup %26693  ;;  %v1856_v52 = vmul.f32 0.5, %v26692_v50 }
 0x241   :  { %v1855_v54 = vmul.f32 0.5, %v26694_v51  ;;  %v26696_v55 = vpop.eup %26695 }
 0x242   :  { %v1859_v56 = vadd.f32 0.5, %v1856_v52  ;;  %v26698_v59 = vpop.eup %26697  ;;  %v1247_v61 = vmul.f32 0.5, %v26696_v55 }
 0x243   :  { %v1858_v60 = vadd.f32 0.5, %v1855_v54  ;;  %v26700_v62 = vpop.eup %26699  ;;  %v1246_v14 = vmul.f32 0.5, %v26698_v59 }
 0x244   :  { %v1862_v0 = vmul.f32 %v1859_v56, %v27304_v63  ;;  %v26702_v28 = vpop.eup %26701  ;;  %v1250_v1 = vadd.f32 0.5, %v1247_v61  ;;  %v27445_v63 = vand.u32 4294901760, %v21356_v23 }
 0x245   :  { %v1863_v18 = vmul.f32 %v26700_v62, %v1858_v60  ;;  %v1249_v2 = vadd.f32 0.5, %v1246_v14  ;;  %v26704_v41 = vpop.eup %26703 }
 0x246   :  { %v1253_v6 = vmul.f32 0.0, %v1250_v1  ;;  %v26706_v43 = vpop.eup %26705  ;;  %v1857_v45 = vmul.f32 0.5, %v26704_v41  ;;  %v27449_v48 = vsub.f32 %v21356_v23, %v27445_v63 }
 0x247   :  { %v27437_v4 = vadd.f32 %v1863_v18, %v1862_v0  ;;  %v1254_v8 = vmul.f32 %v26702_v28, %v1249_v2  ;;  %v1248_v46 = vmul.f32 0.5, %v26706_v43 }
 0x248   :  { %v1860_v49 = vadd.f32 0.5, %v1857_v45  ;;  %v27452_v54 = vand.u32 4294901760, %v27449_v48 }
 0x249   :  { %26707 = vtanh.f32 %v27437_v4  ;;  %v27443_v34 = vadd.f32 %v1254_v8, %v1253_v6  ;;  %v1251_v51 = vadd.f32 0.5, %v1248_v46 }
 0x24a   :  { %v2601_v0 = vsub.f32 %v27449_v48, %v27452_v54 }
 0x24b   :  { %26709 = vtanh.f32 %v27443_v34 }
 0x24c   :  { %v27474_v1 = vand.u32 4294901760, %v2601_v0 }
 0x253   :  { %v26708_v50 = vpop.eup %26707 }
 0x254   :  { %v1866_v52 = vmul.f32 %v26708_v50, %v1860_v49 }
 0x255   :  { %v26710_v55 = vpop.eup %26709 }
 0x256   :  { %v1871_v56 = vand.u32 4294901760, %v1866_v52  ;;  %v27454_v59 = vmul.f32 %v26710_v55, %v1251_v51 }
 0x258   :  { %v27457_v60 = vpack.c.bf16 %v1871_v56, %v27320_v11  ;;  %v1984_v61 = vsub.f32 %v1866_v52, %v1871_v56  ;;  %v27460_v62 = vpack.c.bf16 %v1871_v56, %v27445_v63  ;;  %v27465_v14 = vand.u32 4294901760, %v27454_v59 }
 0x25a   :  { %25190 = vmatprep.subr.bf16.mxu1 %v27457_v60  ;;  %25214 = vmatprep.subr.bf16.mxu0 %v27460_v62  ;;  %v1985_v28 = vand.u32 4294901760, %v1984_v61  ;;  %v1991_v18 = vsub.f32 %v27454_v59, %v27465_v14  ;;  %v25221_v45 = vpack.c.bf16 %v1984_v61, %v27449_v48 }
 0x25b   :  { %25192 = vmatpush3.bf16.msra.mxu1 %v27457_v60  ;;  %25216 = vmatpush3.bf16.msra.mxu0 %v27460_v62 }
 0x25c   :  { %22988 = vmatprep.subr.mxu1 %v27465_v14  ;;  %v1986_v11 = vsub.f32 %v1984_v61, %v1985_v28  ;;  %v27476_v2 = vand.u32 4294901760, %v1991_v18  ;;  %v25205_v46 = vpack.c.bf16 %v1985_v28, %v27343_v44 }
 0x25e   :  { %23061 = vmatmul.mubr.f32.vlgmr.msra.gmra.mrb[8].mxu0 %v27242_v32  ;;  %v1987_v6 = vand.u32 4294901760, %v1986_v11  ;;  %v1993_v8 = vsub.f32 %v1991_v18, %v27476_v2 }
 0x25f   :  { %22989 = vmatpush3.msra.mxu1 %v27465_v14  ;;  %23063 = vmatprep.mubr.f32.mxu0 %v27240_v31 }
 0x260   :  { %22991 = vmatmul.mubr.f32.vlgmr.msra.gmra.mrb[6].mxu1 %v27362_v53  ;;  %v25193_v23 = vpack.c.bf16 %v1987_v6, %v27370_v57  ;;  %v25217_v41 = vpack.c.bf16 %v1987_v6, %v27474_v1  ;;  %v1994_v43 = vand.u32 4294901760, %v1993_v8  ;;  %v25197_v57 = vpack.c.bf16 %v1984_v61, %v27331_v29 }
 0x261   :  { %22993 = vmatprep.mubr.f32.mxu1 %v27368_v3  ;;  %v25229_v29 = vpack.c.bf16 %v1985_v28, %v27452_v54 }
 0x262   :  { %25194 = vmatprep.subr.bf16.mxu1 %v25193_v23  ;;  %23064 = vmatmul.mubr.f32.gmra.mrb[10].mxu0 %v27245_v33 }
 0x263   :  { %25218 = vmatprep.subr.bf16.mxu0 %v25217_v41  ;;  %25196 = vmatpush3.bf16.msra.mxu1 %v25193_v23 }
 0x264   :  { %25220 = vmatpush3.bf16.msra.mxu0 %v25217_v41  ;;  %22994 = vmatmul.mubr.f32.gmra.mrb[8].mxu1 %v27374_v58 }
 0x265   :  { %25222 = vmatprep.subr.bf16.mxu0 %v25221_v45  ;;  %23070 = vmatprep.mubr.f32.mxu0 %v27183_v9 }
 0x266   :  { %23000 = vmatprep.subr.mxu1 %v1994_v43  ;;  %23002 = vmatprep.mubr.f32.mxu1 %v27285_v36 }
 0x267   :  { %23071 = vmatmul.mubr.f32.vlgmr.msra.gmra.mrb[8].mxu0 %v27191_v13  ;;  %23001 = vmatpush3.msra.mxu1 %v1994_v43 }
 0x268   :  { %25224 = vmatpush3.bf16.msra.mxu0 %v25221_v45  ;;  %23003 = vmatmul.mubr.f32.vlgmr.msra.gmra.mrb[6].mxu1 %v27315_v5 }
 0x269   :  { %25198 = vmatprep.subr.bf16.mxu1 %v25197_v57  ;;  %25226 = vmatprep.subr.bf16.mxu0 %v27460_v62 }
 0x26a   :  { %25200 = vmatpush3.bf16.msra.mxu1 %v25197_v57  ;;  %23073 = vmatprep.mubr.f32.mxu0 %v27185_v10 }
 0x26b   :  { %23012 = vmatprep.subr.mxu1 %v1991_v18  ;;  %23074 = vmatmul.mubr.f32.gmra.mrb[10].mxu0 %v27189_v12 }
 0x26c   :  { %23005 = vmatprep.mubr.f32.mxu1 %v27317_v7  ;;  %23080 = vmatprep.mubr.f32.mxu0 %v27199_v15 }
 0x26d   :  { %23006 = vmatmul.mubr.f32.gmra.mrb[8].mxu1 %v27325_v26 }
 0x26e   :  { %23013 = vmatpush3.msra.mxu1 %v1991_v18  ;;  %23014 = vmatprep.mubr.f32.mxu1 %v27288_v37 }
 0x26f   :  { %25202 = vmatprep.subr.bf16.mxu1 %v27457_v60  ;;  %23081 = vmatmul.mubr.f32.vlgmr.msra.gmra.mrb[8].mxu0 %v27206_v17 }
 0x270   :  { %25228 = vmatpush3.bf16.msra.mxu0 %v27460_v62  ;;  %23083 = vmatprep.mubr.f32.mxu0 %v27202_v16 }
 0x271   :  { %25230 = vmatprep.subr.bf16.mxu0 %v25229_v29  ;;  %23015 = vmatmul.mubr.f32.vlgmr.msra.gmra.mrb[6].mxu1 %v27323_v25 }
 0x272   :  { %25204 = vmatpush3.bf16.msra.mxu1 %v27457_v60  ;;  %23017 = vmatprep.mubr.f32.mxu1 %v27328_v27 }
 0x273   :  { %23024 = vmatprep.subr.mxu1 %v27465_v14  ;;  %23084 = vmatmul.mubr.f32.gmra.mrb[10].mxu0 %v27212_v19 }
 0x274   :  { %23090 = vmatprep.mubr.f32.mxu0 %v27215_v20 }
 0x275   :  { %23018 = vmatmul.mubr.f32.gmra.mrb[8].mxu1 %v27337_v39 }
 0x276   :  { %23025 = vmatpush3.msra.mxu1 %v27465_v14  ;;  %23026 = vmatprep.mubr.f32.mxu1 %v27291_v38 }
 0x277   :  { %25206 = vmatprep.subr.bf16.mxu1 %v25205_v46  ;;  %23091 = vmatmul.mubr.f32.vlgmr.msra.gmra.mrb[8].mxu0 %v27221_v22 }
 0x278   :  { %25232 = vmatpush3.bf16.msra.mxu0 %v25229_v29  ;;  %23093 = vmatprep.mubr.f32.mxu0 %v27218_v21 }
 0x279   :  { %25234 = vmatprep.subr.bf16.mxu0 %v27460_v62  ;;  %23027 = vmatmul.mubr.f32.vlgmr.msra.gmra.mrb[6].mxu1 %v27334_v35 }
 0x27a   :  { %25208 = vmatpush3.bf16.msra.mxu1 %v25205_v46  ;;  %23029 = vmatprep.mubr.f32.mxu1 %v27340_v42 }
 0x27b   :  { %23036 = vmatprep.subr.mxu1 %v27476_v2  ;;  %23094 = vmatmul.mubr.f32.gmra.mrb[10].mxu0 %v27226_v24 }
 0x27c   :  { %23100 = vmatprep.mubr.f32.mxu0 %v27183_v9 }
 0x27d   :  { %23030 = vmatmul.mubr.f32.gmra.mrb[8].mxu1 %v27348_v47 }
 0x27e   :  { %23037 = vmatpush3.msra.mxu1 %v27476_v2  ;;  %23038 = vmatprep.mubr.f32.mxu1 %v27285_v36 }
 0x27f   :  { %25210 = vmatprep.subr.bf16.mxu1 %v27457_v60  ;;  %23101 = vmatmul.mubr.f32.vlgmr.msra.gmra.mrb[8].mxu0 %v27191_v13 }
 0x280   :  { %25236 = vmatpush3.bf16.msra.mxu0 %v27460_v62  ;;  %23103 = vmatprep.mubr.f32.mxu0 %v27185_v10 }
 0x281   :  { %23039 = vmatmul.mubr.f32.vlgmr.msra.gmra.mrb[6].mxu1 %v27315_v5 }
 0x282   :  { %25212 = vmatpush3.bf16.msra.mxu1 %v27457_v60  ;;  %23041 = vmatprep.mubr.f32.mxu1 %v27317_v7 }
 0x283   :  { %23048 = vmatprep.subr.mxu1 %v27465_v14  ;;  %23104 = vmatmul.mubr.f32.gmra.mrb[10].mxu0 %v27189_v12 }
 0x284   :  { %23110 = vmatprep.mubr.f32.mxu0 %v27183_v9 }
 0x285   :  { %23042 = vmatmul.mubr.f32.gmra.mrb[8].mxu1 %v27325_v26 }
 0x286   :  { %23049 = vmatpush3.msra.mxu1 %v27465_v14  ;;  %23050 = vmatprep.mubr.f32.mxu1 %v27285_v36 }
 0x287   :  { %23111 = vmatmul.mubr.f32.vlgmr.msra.gmra.mrb[8].mxu0 %v27191_v13 }
 0x288   :  { %23113 = vmatprep.mubr.f32.mxu0 %v27185_v10 }
 0x289   :  { %23051 = vmatmul.mubr.f32.vlgmr.msra.gmra.mrb[6].mxu1 %v27315_v5 }
 0x28a   :  { %23053 = vmatprep.mubr.f32.mxu1 %v27317_v7 }
 0x28b   :  { %23114 = vmatmul.mubr.f32.gmra.mrb[10].mxu0 %v27189_v12 }
 0x28c   :  { %23192 = vmatprep.mubr.f32.mxu0 %v27238_v30 }
 0x28d   :  { %23054 = vmatmul.mubr.f32.gmra.mrb[8].mxu1 %v27325_v26 }
 0x28e   :  { %23122 = vmatprep.mubr.f32.mxu1 %v27295_v40 }
 0x35a   :  { %v23112_v44 = vpop.f32.mrb[8].mxu0 }
 0x35b   :  { %v3079_v49 = vmul.f32 0.5, %v23112_v44  ;;  %v3056_v50 = vpop.f32.mrb[9].mxu0 }
 0x35c   :  { %v3078_v51 = vmul.f32 0.5, %v3056_v50  ;;  %v23052_v52 = vpop.f32.mrb[6].mxu1 }
 0x35d   :  { %26711 = vtanh.f32 %v3079_v49  ;;  %v2469_v55 = vmul.f32 0.5, %v23052_v52  ;;  %v2446_v56 = vpop.f32.mrb[7].mxu1 }
 0x35e   :  { %26713 = vtanh.f32 %v3078_v51  ;;  %v2468_v60 = vmul.f32 0.5, %v2446_v56  ;;  %v23115_v61 = vpop.f32.mrb[10].mxu0 }
 0x35f   :  { %26715 = vtanh.f32 %v2469_v55  ;;  %v3068_v62 = vpop.f32.mrb[11].mxu0 }
 0x360   :  { %26717 = vtanh.f32 %v2468_v60  ;;  %v23055_v0 = vpop.f32.mrb[8].mxu1  ;;  %v3080_v28 = vmul.f32 0.5, %v3068_v62 }
 0x361   :  { %v2458_v14 = vpop.f32.mrb[9].mxu1  ;;  %26719 = vtanh.f32 %v23115_v61  ;;  %v21357_v61 = vld [vmem:[%s29845_s0 + $0x18] sm:$0xff] }
 0x362   :  { %26721 = vtanh.f32 %v23055_v0  ;;  %v2470_v18 = vmul.f32 0.5, %v2458_v14 }
 0x363   :  { %26723 = vtanh.f32 %v3080_v28 }
 0x364   :  { %26725 = vtanh.f32 %v2470_v18 }
 0x367   :  { %v26712_v11 = vpop.eup %26711 }
 0x368   :  { %v26714_v2 = vpop.eup %26713  ;;  %v3085_v6 = vmul.f32 0.5, %v26712_v11 }
 0x369   :  { %v26716_v8 = vpop.eup %26715  ;;  %v3084_v23 = vmul.f32 0.5, %v26714_v2 }
 0x36a   :  { %v26718_v41 = vpop.eup %26717  ;;  %v3088_v43 = vadd.f32 0.5, %v3085_v6  ;;  %v2475_v45 = vmul.f32 0.5, %v26716_v8 }
 0x36b   :  { %v3087_v57 = vadd.f32 0.5, %v3084_v23  ;;  %v2474_v29 = vmul.f32 0.5, %v26718_v41  ;;  %v26720_v46 = vpop.eup %26719 }
 0x36c   :  { %v3091_v44 = vmul.f32 %v3088_v43, %v27437_v4  ;;  %v2478_v49 = vadd.f32 0.5, %v2475_v45  ;;  %v26722_v50 = vpop.eup %26721  ;;  %v27558_v4 = vand.u32 4294901760, %v21357_v61 }
 0x36d   :  { %v2477_v51 = vadd.f32 0.5, %v2474_v29  ;;  %v3092_v52 = vmul.f32 %v26720_v46, %v3087_v57  ;;  %v26724_v0 = vpop.eup %26723 }
 0x36e   :  { %v2481_v55 = vmul.f32 %v2478_v49, %v27443_v34  ;;  %v26726_v14 = vpop.eup %26725  ;;  %v3086_v28 = vmul.f32 0.5, %v26724_v0  ;;  %v27562_v34 = vsub.f32 %v21357_v61, %v27558_v4 }
 0x36f   :  { %v27550_v56 = vadd.f32 %v3092_v52, %v3091_v44  ;;  %v2482_v60 = vmul.f32 %v26722_v50, %v2477_v51  ;;  %v2476_v18 = vmul.f32 0.5, %v26726_v14 }
 0x370   :  { %v3089_v11 = vadd.f32 0.5, %v3086_v28  ;;  %v27565_v8 = vand.u32 4294901760, %v27562_v34 }
 0x371   :  { %26727 = vtanh.f32 %v27550_v56  ;;  %v27556_v62 = vadd.f32 %v2482_v60, %v2481_v55  ;;  %v2479_v2 = vadd.f32 0.5, %v2476_v18 }
 0x372   :  { %v3830_v57 = vsub.f32 %v27562_v34, %v27565_v8 }
 0x373   :  { %26729 = vtanh.f32 %v27556_v62 }
 0x374   :  { %v27587_v52 = vand.u32 4294901760, %v3830_v57 }
 0x37b   :  { %v26728_v6 = vpop.eup %26727 }
 0x37c   :  { %v3095_v23 = vmul.f32 %v26728_v6, %v3089_v11 }
 0x37d   :  { %v26730_v41 = vpop.eup %26729 }
 0x37e   :  { %v3100_v43 = vand.u32 4294901760, %v3095_v23  ;;  %v27567_v45 = vmul.f32 %v26730_v41, %v2479_v2 }
 0x380   :  { %v27572_v29 = vpack.c.bf16 %v3100_v43, %v27445_v63  ;;  %v3213_v46 = vsub.f32 %v3095_v23, %v3100_v43  ;;  %v27575_v44 = vpack.c.bf16 %v3100_v43, %v27558_v4  ;;  %v27578_v49 = vand.u32 4294901760, %v27567_v45 }
 0x382   :  { %v3220_v50 = vsub.f32 %v27567_v45, %v27578_v49  ;;  %25238 = vmatprep.subr.bf16.mxu1 %v27572_v29  ;;  %25262 = vmatprep.subr.bf16.mxu0 %v27575_v44  ;;  %v3214_v51 = vand.u32 4294901760, %v3213_v46  ;;  %v25269_v18 = vpack.c.bf16 %v3213_v46, %v27562_v34 }
 0x383   :  { %25240 = vmatpush3.bf16.msra.mxu1 %v27572_v29  ;;  %25264 = vmatpush3.bf16.msra.mxu0 %v27575_v44 }
 0x384   :  { %23120 = vmatprep.subr.mxu1 %v27578_v49  ;;  %v3215_v63 = vsub.f32 %v3213_v46, %v3214_v51  ;;  %v27589_v55 = vand.u32 4294901760, %v3220_v50  ;;  %v25253_v11 = vpack.c.bf16 %v3214_v51, %v27452_v54 }
 0x386   :  { %23193 = vmatmul.mubr.f32.vlgmr.msra.gmra.mrb[12].mxu0 %v27242_v32  ;;  %v3216_v60 = vand.u32 4294901760, %v3215_v63  ;;  %v3222_v61 = vsub.f32 %v3220_v50, %v27589_v55 }
 0x387   :  { %23121 = vmatpush3.msra.mxu1 %v27578_v49  ;;  %23195 = vmatprep.mubr.f32.mxu0 %v27240_v31 }
 0x388   :  { %23123 = vmatmul.mubr.f32.vlgmr.msra.gmra.mrb[10].mxu1 %v27362_v53  ;;  %v25241_v0 = vpack.c.bf16 %v3216_v60, %v27474_v1  ;;  %v25265_v14 = vpack.c.bf16 %v3216_v60, %v27587_v52  ;;  %v3223_v28 = vand.u32 4294901760, %v3222_v61  ;;  %v25245_v1 = vpack.c.bf16 %v3213_v46, %v27449_v48 }
 0x389   :  { %23125 = vmatprep.mubr.f32.mxu1 %v27368_v3  ;;  %v25277_v48 = vpack.c.bf16 %v3214_v51, %v27565_v8 }
 0x38a   :  { %25242 = vmatprep.subr.bf16.mxu1 %v25241_v0  ;;  %23196 = vmatmul.mubr.f32.gmra.mrb[14].mxu0 %v27245_v33 }
 0x38b   :  { %25266 = vmatprep.subr.bf16.mxu0 %v25265_v14  ;;  %25244 = vmatpush3.bf16.msra.mxu1 %v25241_v0 }
 0x38c   :  { %25268 = vmatpush3.bf16.msra.mxu0 %v25265_v14  ;;  %23126 = vmatmul.mubr.f32.gmra.mrb[12].mxu1 %v27374_v58 }
 0x38d   :  { %23132 = vmatprep.subr.mxu1 %v3223_v28  ;;  %25270 = vmatprep.subr.bf16.mxu0 %v25269_v18 }
 0x38e   :  { %23202 = vmatprep.mubr.f32.mxu0 %v27183_v9  ;;  %23134 = vmatprep.mubr.f32.mxu1 %v27285_v36 }
 0x38f   :  { %23203 = vmatmul.mubr.f32.vlgmr.msra.gmra.mrb[12].mxu0 %v27191_v13  ;;  %23133 = vmatpush3.msra.mxu1 %v3223_v28 }
 0x390   :  { %25272 = vmatpush3.bf16.msra.mxu0 %v25269_v18  ;;  %23135 = vmatmul.mubr.f32.vlgmr.msra.gmra.mrb[10].mxu1 %v27315_v5 }
 0x391   :  { %25246 = vmatprep.subr.bf16.mxu1 %v25245_v1  ;;  %25274 = vmatprep.subr.bf16.mxu0 %v27575_v44 }
 0x392   :  { %25248 = vmatpush3.bf16.msra.mxu1 %v25245_v1  ;;  %23205 = vmatprep.mubr.f32.mxu0 %v27185_v10 }
 0x393   :  { %23144 = vmatprep.subr.mxu1 %v3220_v50  ;;  %23206 = vmatmul.mubr.f32.gmra.mrb[14].mxu0 %v27189_v12 }
 0x394   :  { %23137 = vmatprep.mubr.f32.mxu1 %v27317_v7  ;;  %23212 = vmatprep.mubr.f32.mxu0 %v27199_v15 }
 0x395   :  { %23138 = vmatmul.mubr.f32.gmra.mrb[12].mxu1 %v27325_v26 }
 0x396   :  { %23145 = vmatpush3.msra.mxu1 %v3220_v50  ;;  %23146 = vmatprep.mubr.f32.mxu1 %v27288_v37 }
 0x397   :  { %25250 = vmatprep.subr.bf16.mxu1 %v27572_v29  ;;  %23213 = vmatmul.mubr.f32.vlgmr.msra.gmra.mrb[12].mxu0 %v27206_v17 }
 0x398   :  { %25276 = vmatpush3.bf16.msra.mxu0 %v27575_v44  ;;  %23215 = vmatprep.mubr.f32.mxu0 %v27202_v16 }
 0x399   :  { %25278 = vmatprep.subr.bf16.mxu0 %v25277_v48  ;;  %23147 = vmatmul.mubr.f32.vlgmr.msra.gmra.mrb[10].mxu1 %v27323_v25 }
 0x39a   :  { %25252 = vmatpush3.bf16.msra.mxu1 %v27572_v29  ;;  %23149 = vmatprep.mubr.f32.mxu1 %v27328_v27 }
 0x39b   :  { %23156 = vmatprep.subr.mxu1 %v27578_v49  ;;  %23216 = vmatmul.mubr.f32.gmra.mrb[14].mxu0 %v27212_v19 }
 0x39c   :  { %23222 = vmatprep.mubr.f32.mxu0 %v27215_v20 }
 0x39d   :  { %23150 = vmatmul.mubr.f32.gmra.mrb[12].mxu1 %v27337_v39 }
 0x39e   :  { %23157 = vmatpush3.msra.mxu1 %v27578_v49  ;;  %23158 = vmatprep.mubr.f32.mxu1 %v27291_v38 }
 0x39f   :  { %25254 = vmatprep.subr.bf16.mxu1 %v25253_v11  ;;  %23223 = vmatmul.mubr.f32.vlgmr.msra.gmra.mrb[12].mxu0 %v27221_v22 }
 0x3a0   :  { %25280 = vmatpush3.bf16.msra.mxu0 %v25277_v48  ;;  %23225 = vmatprep.mubr.f32.mxu0 %v27218_v21 }
 0x3a1   :  { %25282 = vmatprep.subr.bf16.mxu0 %v27575_v44  ;;  %23159 = vmatmul.mubr.f32.vlgmr.msra.gmra.mrb[10].mxu1 %v27334_v35 }
 0x3a2   :  { %25256 = vmatpush3.bf16.msra.mxu1 %v25253_v11  ;;  %23161 = vmatprep.mubr.f32.mxu1 %v27340_v42 }
 0x3a3   :  { %23168 = vmatprep.subr.mxu1 %v27589_v55  ;;  %23226 = vmatmul.mubr.f32.gmra.mrb[14].mxu0 %v27226_v24 }
 0x3a4   :  { %23232 = vmatprep.mubr.f32.mxu0 %v27183_v9 }
 0x3a5   :  { %23162 = vmatmul.mubr.f32.gmra.mrb[12].mxu1 %v27348_v47 }
 0x3a6   :  { %23169 = vmatpush3.msra.mxu1 %v27589_v55  ;;  %23170 = vmatprep.mubr.f32.mxu1 %v27285_v36 }
 0x3a7   :  { %25258 = vmatprep.subr.bf16.mxu1 %v27572_v29  ;;  %23233 = vmatmul.mubr.f32.vlgmr.msra.gmra.mrb[12].mxu0 %v27191_v13 }
 0x3a8   :  { %25284 = vmatpush3.bf16.msra.mxu0 %v27575_v44  ;;  %23235 = vmatprep.mubr.f32.mxu0 %v27185_v10 }
 0x3a9   :  { %23171 = vmatmul.mubr.f32.vlgmr.msra.gmra.mrb[10].mxu1 %v27315_v5 }
 0x3aa   :  { %25260 = vmatpush3.bf16.msra.mxu1 %v27572_v29  ;;  %23173 = vmatprep.mubr.f32.mxu1 %v27317_v7 }
 0x3ab   :  { %23180 = vmatprep.subr.mxu1 %v27578_v49  ;;  %23236 = vmatmul.mubr.f32.gmra.mrb[14].mxu0 %v27189_v12 }
 0x3ac   :  { %23242 = vmatprep.mubr.f32.mxu0 %v27183_v9 }
 0x3ad   :  { %23174 = vmatmul.mubr.f32.gmra.mrb[12].mxu1 %v27325_v26 }
 0x3ae   :  { %23181 = vmatpush3.msra.mxu1 %v27578_v49  ;;  %23182 = vmatprep.mubr.f32.mxu1 %v27285_v36 }
 0x3af   :  { %23243 = vmatmul.mubr.f32.vlgmr.msra.gmra.mrb[12].mxu0 %v27191_v13 }
 0x3b0   :  { %23245 = vmatprep.mubr.f32.mxu0 %v27185_v10 }
 0x3b1   :  { %23183 = vmatmul.mubr.f32.vlgmr.msra.gmra.mrb[10].mxu1 %v27315_v5 }
 0x3b2   :  { %23185 = vmatprep.mubr.f32.mxu1 %v27317_v7 }
 0x3b3   :  { %23246 = vmatmul.mubr.f32.gmra.mrb[14].mxu0 %v27189_v12 }
 0x3b4   :  { %23324 = vmatprep.mubr.f32.mxu0 %v27238_v30 }
 0x3b5   :  { %23186 = vmatmul.mubr.f32.gmra.mrb[12].mxu1 %v27325_v26 }
 0x3b6   :  { %23254 = vmatprep.mubr.f32.mxu1 %v27295_v40 }
 0x482   :  { %v23244_v54 = vpop.f32.mrb[12].mxu0 }
 0x483   :  { %v4308_v2 = vmul.f32 0.5, %v23244_v54  ;;  %v4285_v6 = vpop.f32.mrb[13].mxu0 }
 0x484   :  { %v4307_v23 = vmul.f32 0.5, %v4285_v6  ;;  %v23184_v41 = vpop.f32.mrb[10].mxu1 }
 0x485   :  { %26731 = vtanh.f32 %v4308_v2  ;;  %v3698_v43 = vmul.f32 0.5, %v23184_v41  ;;  %v3675_v57 = vpop.f32.mrb[11].mxu1 }
 0x486   :  { %26733 = vtanh.f32 %v4307_v23  ;;  %v3697_v29 = vmul.f32 0.5, %v3675_v57  ;;  %v23247_v46 = vpop.f32.mrb[14].mxu0 }
 0x487   :  { %26735 = vtanh.f32 %v3698_v43  ;;  %v4297_v44 = vpop.f32.mrb[15].mxu0 }
 0x488   :  { %26737 = vtanh.f32 %v3697_v29  ;;  %v23187_v49 = vpop.f32.mrb[12].mxu1  ;;  %v4309_v51 = vmul.f32 0.5, %v4297_v44  ;;  %v21358_v44 = vld [vmem:[%s29845_s0 + $0x20] sm:$0xff] }
 0x489   :  { %v3687_v50 = vpop.f32.mrb[13].mxu1  ;;  %26739 = vtanh.f32 %v23247_v46 }
 0x48a   :  { %26741 = vtanh.f32 %v23187_v49  ;;  %v3699_v63 = vmul.f32 0.5, %v3687_v50 }
 0x48b   :  { %26743 = vtanh.f32 %v4309_v51 }
 0x48c   :  { %26745 = vtanh.f32 %v3699_v63 }
 0x48f   :  { %v26732_v55 = vpop.eup %26731 }
 0x490   :  { %v26734_v60 = vpop.eup %26733  ;;  %v4314_v61 = vmul.f32 0.5, %v26732_v55 }
 0x491   :  { %v26736_v0 = vpop.eup %26735  ;;  %v4313_v14 = vmul.f32 0.5, %v26734_v60 }
 0x492   :  { %v26738_v28 = vpop.eup %26737  ;;  %v4317_v18 = vadd.f32 0.5, %v4314_v61  ;;  %v3704_v1 = vmul.f32 0.5, %v26736_v0 }
 0x493   :  { %v4316_v48 = vadd.f32 0.5, %v4313_v14  ;;  %v3703_v11 = vmul.f32 0.5, %v26738_v28  ;;  %v26740_v54 = vpop.eup %26739 }
 0x494   :  { %v4320_v2 = vmul.f32 %v4317_v18, %v27550_v56  ;;  %v3707_v6 = vadd.f32 0.5, %v3704_v1  ;;  %v26742_v23 = vpop.eup %26741  ;;  %v27671_v56 = vand.u32 4294901760, %v21358_v44 }
 0x495   :  { %v3706_v41 = vadd.f32 0.5, %v3703_v11  ;;  %v4321_v43 = vmul.f32 %v26740_v54, %v4316_v48  ;;  %v26744_v50 = vpop.eup %26743 }
 0x496   :  { %v3710_v57 = vmul.f32 %v3707_v6, %v27556_v62  ;;  %v26746_v51 = vpop.eup %26745  ;;  %v4315_v63 = vmul.f32 0.5, %v26744_v50  ;;  %v27675_v62 = vsub.f32 %v21358_v44, %v27671_v56 }
 0x497   :  { %v27663_v29 = vadd.f32 %v4321_v43, %v4320_v2  ;;  %v3711_v46 = vmul.f32 %v26742_v23, %v3706_v41  ;;  %v3705_v55 = vmul.f32 0.5, %v26746_v51 }
 0x498   :  { %v4318_v60 = vadd.f32 0.5, %v4315_v63  ;;  %v27678_v14 = vand.u32 4294901760, %v27675_v62 }
 0x499   :  { %26747 = vtanh.f32 %v27663_v29  ;;  %v27669_v49 = vadd.f32 %v3711_v46, %v3710_v57  ;;  %v3708_v61 = vadd.f32 0.5, %v3705_v55 }
 0x49a   :  { %v5059_v11 = vsub.f32 %v27675_v62, %v27678_v14 }
 0x49b   :  { %26749 = vtanh.f32 %v27669_v49 }
 0x49c   :  { %v27700_v57 = vand.u32 4294901760, %v5059_v11 }
 0x4a3   :  { %v26748_v0 = vpop.eup %26747 }
 0x4a4   :  { %v4324_v28 = vmul.f32 %v26748_v0, %v4318_v60 }
 0x4a5   :  { %v26750_v18 = vpop.eup %26749 }
 0x4a6   :  { %v4329_v1 = vand.u32 4294901760, %v4324_v28  ;;  %v27680_v48 = vmul.f32 %v26750_v18, %v3708_v61 }
 0x4a8   :  { %v27685_v54 = vpack.c.bf16 %v4329_v1, %v27558_v4  ;;  %v4442_v2 = vsub.f32 %v4324_v28, %v4329_v1  ;;  %v27688_v6 = vpack.c.bf16 %v4329_v1, %v27671_v56  ;;  %v27691_v23 = vand.u32 4294901760, %v27680_v48 }
 0x4aa   :  { %v4449_v41 = vsub.f32 %v27680_v48, %v27691_v23  ;;  %25286 = vmatprep.subr.bf16.mxu1 %v27685_v54  ;;  %25310 = vmatprep.subr.bf16.mxu0 %v27688_v6  ;;  %v4443_v43 = vand.u32 4294901760, %v4442_v2  ;;  %v25317_v60 = vpack.c.bf16 %v4442_v2, %v27675_v62 }
 0x4ab   :  { %25288 = vmatpush3.bf16.msra.mxu1 %v27685_v54  ;;  %25312 = vmatpush3.bf16.msra.mxu0 %v27688_v6 }
 0x4ac   :  { %23252 = vmatprep.subr.mxu1 %v27691_v23  ;;  %v4444_v4 = vsub.f32 %v4442_v2, %v4443_v43  ;;  %v27702_v46 = vand.u32 4294901760, %v4449_v41  ;;  %v25301_v61 = vpack.c.bf16 %v4443_v43, %v27565_v8 }
 0x4ae   :  { %23325 = vmatmul.mubr.f32.vlgmr.msra.gmra.mrb[16].mxu0 %v27242_v32  ;;  %v4445_v44 = vand.u32 4294901760, %v4444_v4  ;;  %v4451_v50 = vsub.f32 %v4449_v41, %v27702_v46 }
 0x4af   :  { %23253 = vmatpush3.msra.mxu1 %v27691_v23  ;;  %23327 = vmatprep.mubr.f32.mxu0 %v27240_v31 }
 0x4b0   :  { %23255 = vmatmul.mubr.f32.vlgmr.msra.gmra.mrb[14].mxu1 %v27362_v53  ;;  %v25289_v51 = vpack.c.bf16 %v4445_v44, %v27587_v52  ;;  %v25313_v63 = vpack.c.bf16 %v4445_v44, %v27700_v57  ;;  %v4452_v55 = vand.u32 4294901760, %v4451_v50  ;;  %v25293_v52 = vpack.c.bf16 %v4442_v2, %v27562_v34 }
 0x4b1   :  { %23257 = vmatprep.mubr.f32.mxu1 %v27368_v3  ;;  %v25325_v34 = vpack.c.bf16 %v4443_v43, %v27678_v14 }
 0x4b2   :  { %25290 = vmatprep.subr.bf16.mxu1 %v25289_v51  ;;  %23328 = vmatmul.mubr.f32.gmra.mrb[18].mxu0 %v27245_v33 }
 0x4b3   :  { %25314 = vmatprep.subr.bf16.mxu0 %v25313_v63  ;;  %25292 = vmatpush3.bf16.msra.mxu1 %v25289_v51 }
 0x4b4   :  { %25316 = vmatpush3.bf16.msra.mxu0 %v25313_v63  ;;  %23258 = vmatmul.mubr.f32.gmra.mrb[16].mxu1 %v27374_v58 }
 0x4b5   :  { %23264 = vmatprep.subr.mxu1 %v4452_v55  ;;  %25318 = vmatprep.subr.bf16.mxu0 %v25317_v60 }
 0x4b6   :  { %23334 = vmatprep.mubr.f32.mxu0 %v27183_v9  ;;  %23266 = vmatprep.mubr.f32.mxu1 %v27285_v36 }
 0x4b7   :  { %23335 = vmatmul.mubr.f32.vlgmr.msra.gmra.mrb[16].mxu0 %v27191_v13  ;;  %23265 = vmatpush3.msra.mxu1 %v4452_v55 }
 0x4b8   :  { %25320 = vmatpush3.bf16.msra.mxu0 %v25317_v60  ;;  %23267 = vmatmul.mubr.f32.vlgmr.msra.gmra.mrb[14].mxu1 %v27315_v5 }
 0x4b9   :  { %25294 = vmatprep.subr.bf16.mxu1 %v25293_v52  ;;  %25322 = vmatprep.subr.bf16.mxu0 %v27688_v6 }
 0x4ba   :  { %25296 = vmatpush3.bf16.msra.mxu1 %v25293_v52  ;;  %23337 = vmatprep.mubr.f32.mxu0 %v27185_v10 }
 0x4bb   :  { %23276 = vmatprep.subr.mxu1 %v4449_v41  ;;  %23338 = vmatmul.mubr.f32.gmra.mrb[18].mxu0 %v27189_v12 }
 0x4bc   :  { %23269 = vmatprep.mubr.f32.mxu1 %v27317_v7  ;;  %23344 = vmatprep.mubr.f32.mxu0 %v27199_v15 }
 0x4bd   :  { %23270 = vmatmul.mubr.f32.gmra.mrb[16].mxu1 %v27325_v26 }
 0x4be   :  { %23277 = vmatpush3.msra.mxu1 %v4449_v41  ;;  %23278 = vmatprep.mubr.f32.mxu1 %v27288_v37 }
 0x4bf   :  { %25298 = vmatprep.subr.bf16.mxu1 %v27685_v54  ;;  %23345 = vmatmul.mubr.f32.vlgmr.msra.gmra.mrb[16].mxu0 %v27206_v17 }
 0x4c0   :  { %25324 = vmatpush3.bf16.msra.mxu0 %v27688_v6  ;;  %23347 = vmatprep.mubr.f32.mxu0 %v27202_v16 }
 0x4c1   :  { %25326 = vmatprep.subr.bf16.mxu0 %v25325_v34  ;;  %23279 = vmatmul.mubr.f32.vlgmr.msra.gmra.mrb[14].mxu1 %v27323_v25 }
 0x4c2   :  { %25300 = vmatpush3.bf16.msra.mxu1 %v27685_v54  ;;  %23281 = vmatprep.mubr.f32.mxu1 %v27328_v27 }
 0x4c3   :  { %23288 = vmatprep.subr.mxu1 %v27691_v23  ;;  %23348 = vmatmul.mubr.f32.gmra.mrb[18].mxu0 %v27212_v19 }
 0x4c4   :  { %23354 = vmatprep.mubr.f32.mxu0 %v27215_v20 }
 0x4c5   :  { %23282 = vmatmul.mubr.f32.gmra.mrb[16].mxu1 %v27337_v39 }
 0x4c6   :  { %23289 = vmatpush3.msra.mxu1 %v27691_v23  ;;  %23290 = vmatprep.mubr.f32.mxu1 %v27291_v38 }
 0x4c7   :  { %25302 = vmatprep.subr.bf16.mxu1 %v25301_v61  ;;  %23355 = vmatmul.mubr.f32.vlgmr.msra.gmra.mrb[16].mxu0 %v27221_v22 }
 0x4c8   :  { %25328 = vmatpush3.bf16.msra.mxu0 %v25325_v34  ;;  %23357 = vmatprep.mubr.f32.mxu0 %v27218_v21 }
 0x4c9   :  { %25330 = vmatprep.subr.bf16.mxu0 %v27688_v6  ;;  %23291 = vmatmul.mubr.f32.vlgmr.msra.gmra.mrb[14].mxu1 %v27334_v35 }
 0x4ca   :  { %25304 = vmatpush3.bf16.msra.mxu1 %v25301_v61  ;;  %23293 = vmatprep.mubr.f32.mxu1 %v27340_v42 }
 0x4cb   :  { %23300 = vmatprep.subr.mxu1 %v27702_v46  ;;  %23358 = vmatmul.mubr.f32.gmra.mrb[18].mxu0 %v27226_v24 }
 0x4cc   :  { %23364 = vmatprep.mubr.f32.mxu0 %v27183_v9 }
 0x4cd   :  { %23294 = vmatmul.mubr.f32.gmra.mrb[16].mxu1 %v27348_v47 }
 0x4ce   :  { %23301 = vmatpush3.msra.mxu1 %v27702_v46  ;;  %23302 = vmatprep.mubr.f32.mxu1 %v27285_v36 }
 0x4cf   :  { %25306 = vmatprep.subr.bf16.mxu1 %v27685_v54  ;;  %23365 = vmatmul.mubr.f32.vlgmr.msra.gmra.mrb[16].mxu0 %v27191_v13 }
 0x4d0   :  { %25332 = vmatpush3.bf16.msra.mxu0 %v27688_v6  ;;  %23367 = vmatprep.mubr.f32.mxu0 %v27185_v10 }
 0x4d1   :  { %23303 = vmatmul.mubr.f32.vlgmr.msra.gmra.mrb[14].mxu1 %v27315_v5 }
 0x4d2   :  { %25308 = vmatpush3.bf16.msra.mxu1 %v27685_v54  ;;  %23305 = vmatprep.mubr.f32.mxu1 %v27317_v7 }
 0x4d3   :  { %23312 = vmatprep.subr.mxu1 %v27691_v23  ;;  %23368 = vmatmul.mubr.f32.gmra.mrb[18].mxu0 %v27189_v12 }
 0x4d4   :  { %23374 = vmatprep.mubr.f32.mxu0 %v27183_v9 }
 0x4d5   :  { %23306 = vmatmul.mubr.f32.gmra.mrb[16].mxu1 %v27325_v26 }
 0x4d6   :  { %23313 = vmatpush3.msra.mxu1 %v27691_v23  ;;  %23314 = vmatprep.mubr.f32.mxu1 %v27285_v36 }
 0x4d7   :  { %23375 = vmatmul.mubr.f32.vlgmr.msra.gmra.mrb[16].mxu0 %v27191_v13 }
 0x4d8   :  { %23377 = vmatprep.mubr.f32.mxu0 %v27185_v10 }
 0x4d9   :  { %23315 = vmatmul.mubr.f32.vlgmr.msra.gmra.mrb[14].mxu1 %v27315_v5 }
 0x4da   :  { %23317 = vmatprep.mubr.f32.mxu1 %v27317_v7 }
 0x4db   :  { %23378 = vmatmul.mubr.f32.gmra.mrb[18].mxu0 %v27189_v12 }
 0x4dc   :  { %23456 = vmatprep.mubr.f32.mxu0 %v27238_v30 }
 0x4dd   :  { %23318 = vmatmul.mubr.f32.gmra.mrb[16].mxu1 %v27325_v26 }
 0x4de   :  { %23386 = vmatprep.mubr.f32.mxu1 %v27295_v40 }
 0x5aa   :  { %v23376_v8 = vpop.f32.mrb[16].mxu0 }
 0x5ab   :  { %v5537_v0 = vmul.f32 0.5, %v23376_v8  ;;  %v5514_v28 = vpop.f32.mrb[17].mxu0 }
 0x5ac   :  { %v5536_v18 = vmul.f32 0.5, %v5514_v28  ;;  %v23316_v1 = vpop.f32.mrb[14].mxu1 }
 0x5ad   :  { %26751 = vtanh.f32 %v5537_v0  ;;  %v4927_v11 = vmul.f32 0.5, %v23316_v1  ;;  %v4904_v54 = vpop.f32.mrb[15].mxu1 }
 0x5ae   :  { %26753 = vtanh.f32 %v5536_v18  ;;  %v4926_v2 = vmul.f32 0.5, %v4904_v54  ;;  %v23379_v6 = vpop.f32.mrb[18].mxu0 }
 0x5af   :  { %26755 = vtanh.f32 %v4927_v11  ;;  %v5526_v23 = vpop.f32.mrb[19].mxu0 }
 0x5b0   :  { %26757 = vtanh.f32 %v4926_v2  ;;  %v23319_v41 = vpop.f32.mrb[16].mxu1  ;;  %v5538_v4 = vmul.f32 0.5, %v5526_v23 }
 0x5b1   :  { %v4916_v43 = vpop.f32.mrb[17].mxu1  ;;  %26759 = vtanh.f32 %v23379_v6 }
 0x5b2   :  { %26761 = vtanh.f32 %v23319_v41  ;;  %v4928_v44 = vmul.f32 0.5, %v4916_v43  ;;  %v21359_v41 = vld [vmem:[%s29845_s0 + $0x28] sm:$0xff] }
 0x5b3   :  { %26763 = vtanh.f32 %v5538_v4 }
 0x5b4   :  { %26765 = vtanh.f32 %v4928_v44 }
 0x5b7   :  { %v26752_v46 = vpop.eup %26751 }
 0x5b8   :  { %v26754_v50 = vpop.eup %26753  ;;  %v5543_v51 = vmul.f32 0.5, %v26752_v46  ;;  %v27784_v46 = vand.u32 4294901760, %v21359_v41 }
 0x5b9   :  { %v26756_v63 = vpop.eup %26755  ;;  %v5542_v55 = vmul.f32 0.5, %v26754_v50 }
 0x5ba   :  { %v26758_v60 = vpop.eup %26757  ;;  %v5546_v52 = vadd.f32 0.5, %v5543_v51  ;;  %v4933_v34 = vmul.f32 0.5, %v26756_v63 }
 0x5bb   :  { %v5545_v61 = vadd.f32 0.5, %v5542_v55  ;;  %v4932_v8 = vmul.f32 0.5, %v26758_v60  ;;  %v26760_v0 = vpop.eup %26759 }
 0x5bc   :  { %v5549_v28 = vmul.f32 %v5546_v52, %v27663_v29  ;;  %v4936_v18 = vadd.f32 0.5, %v4933_v34  ;;  %v26762_v1 = vpop.eup %26761 }
 0x5bd   :  { %v4935_v11 = vadd.f32 0.5, %v4932_v8  ;;  %v5550_v54 = vmul.f32 %v26760_v0, %v5545_v61  ;;  %v26764_v4 = vpop.eup %26763 }
 0x5be   :  { %v4939_v2 = vmul.f32 %v4936_v18, %v27669_v49  ;;  %v26766_v29 = vpop.eup %26765  ;;  %v5544_v44 = vmul.f32 0.5, %v26764_v4  ;;  %v27788_v49 = vsub.f32 %v21359_v41, %v27784_v46 }
 0x5bf   :  { %v27776_v6 = vadd.f32 %v5550_v54, %v5549_v28  ;;  %v4940_v23 = vmul.f32 %v26762_v1, %v4935_v11  ;;  %v4934_v50 = vmul.f32 0.5, %v26766_v29 }
 0x5c0   :  { %v5547_v51 = vadd.f32 0.5, %v5544_v44  ;;  %v27791_v55 = vand.u32 4294901760, %v27788_v49 }
 0x5c1   :  { %26767 = vtanh.f32 %v27776_v6  ;;  %v27782_v43 = vadd.f32 %v4940_v23, %v4939_v2  ;;  %v4937_v52 = vadd.f32 0.5, %v4934_v50 }
 0x5c2   :  { %v6288_v0 = vsub.f32 %v27788_v49, %v27791_v55 }
 0x5c3   :  { %26769 = vtanh.f32 %v27782_v43 }
 0x5c4   :  { %v27813_v23 = vand.u32 4294901760, %v6288_v0 }
 0x5cb   :  { %v26768_v63 = vpop.eup %26767 }
 0x5cc   :  { %v5553_v60 = vmul.f32 %v26768_v63, %v5547_v51 }
 0x5cd   :  { %v26770_v34 = vpop.eup %26769 }
 0x5ce   :  { %v5558_v61 = vand.u32 4294901760, %v5553_v60  ;;  %v27793_v8 = vmul.f32 %v26770_v34, %v4937_v52 }
 0x5d0   :  { %v27798_v28 = vpack.c.bf16 %v5558_v61, %v27671_v56  ;;  %v5671_v18 = vsub.f32 %v5553_v60, %v5558_v61  ;;  %v27801_v1 = vpack.c.bf16 %v5558_v61, %v27784_v46  ;;  %v27804_v11 = vand.u32 4294901760, %v27793_v8 }
 0x5d2   :  { %v5678_v54 = vsub.f32 %v27793_v8, %v27804_v11  ;;  %25334 = vmatprep.subr.bf16.mxu1 %v27798_v28  ;;  %25358 = vmatprep.subr.bf16.mxu0 %v27801_v1  ;;  %v5672_v2 = vand.u32 4294901760, %v5671_v18  ;;  %v25365_v63 = vpack.c.bf16 %v5671_v18, %v27788_v49 }
 0x5d3   :  { %25336 = vmatpush3.bf16.msra.mxu1 %v27798_v28  ;;  %25360 = vmatpush3.bf16.msra.mxu0 %v27801_v1 }
 0x5d4   :  { %23384 = vmatprep.subr.mxu1 %v27804_v11  ;;  %v5673_v56 = vsub.f32 %v5671_v18, %v5672_v2  ;;  %v27815_v41 = vand.u32 4294901760, %v5678_v54  ;;  %v25349_v60 = vpack.c.bf16 %v5672_v2, %v27678_v14 }
 0x5d6   :  { %23457 = vmatmul.mubr.f32.vlgmr.msra.gmra.mrb[20].mxu0 %v27242_v32  ;;  %v5674_v4 = vand.u32 4294901760, %v5673_v56  ;;  %v5680_v29 = vsub.f32 %v5678_v54, %v27815_v41 }
 0x5d7   :  { %23385 = vmatpush3.msra.mxu1 %v27804_v11  ;;  %23459 = vmatprep.mubr.f32.mxu0 %v27240_v31 }
 0x5d8   :  { %23387 = vmatmul.mubr.f32.vlgmr.msra.gmra.mrb[18].mxu1 %v27362_v53  ;;  %v25337_v44 = vpack.c.bf16 %v5674_v4, %v27700_v57  ;;  %v25361_v50 = vpack.c.bf16 %v5674_v4, %v27813_v23  ;;  %v5681_v51 = vand.u32 4294901760, %v5680_v29  ;;  %v25341_v57 = vpack.c.bf16 %v5671_v18, %v27675_v62 }
 0x5d9   :  { %23389 = vmatprep.mubr.f32.mxu1 %v27368_v3  ;;  %v25373_v62 = vpack.c.bf16 %v5672_v2, %v27791_v55 }
 0x5da   :  { %25338 = vmatprep.subr.bf16.mxu1 %v25337_v44  ;;  %23460 = vmatmul.mubr.f32.gmra.mrb[22].mxu0 %v27245_v33 }
 0x5db   :  { %25362 = vmatprep.subr.bf16.mxu0 %v25361_v50  ;;  %25340 = vmatpush3.bf16.msra.mxu1 %v25337_v44 }
 0x5dc   :  { %25364 = vmatpush3.bf16.msra.mxu0 %v25361_v50  ;;  %23390 = vmatmul.mubr.f32.gmra.mrb[20].mxu1 %v27374_v58 }
 0x5dd   :  { %23396 = vmatprep.subr.mxu1 %v5681_v51  ;;  %25366 = vmatprep.subr.bf16.mxu0 %v25365_v63 }
 0x5de   :  { %23466 = vmatprep.mubr.f32.mxu0 %v27183_v9  ;;  %23398 = vmatprep.mubr.f32.mxu1 %v27285_v36 }
 0x5df   :  { %23467 = vmatmul.mubr.f32.vlgmr.msra.gmra.mrb[20].mxu0 %v27191_v13  ;;  %23397 = vmatpush3.msra.mxu1 %v5681_v51 }
 0x5e0   :  { %25368 = vmatpush3.bf16.msra.mxu0 %v25365_v63  ;;  %23399 = vmatmul.mubr.f32.vlgmr.msra.gmra.mrb[18].mxu1 %v27315_v5 }
 0x5e1   :  { %25342 = vmatprep.subr.bf16.mxu1 %v25341_v57  ;;  %25370 = vmatprep.subr.bf16.mxu0 %v27801_v1 }
 0x5e2   :  { %25344 = vmatpush3.bf16.msra.mxu1 %v25341_v57  ;;  %23469 = vmatprep.mubr.f32.mxu0 %v27185_v10 }
 0x5e3   :  { %23408 = vmatprep.subr.mxu1 %v5678_v54  ;;  %23470 = vmatmul.mubr.f32.gmra.mrb[22].mxu0 %v27189_v12 }
 0x5e4   :  { %23401 = vmatprep.mubr.f32.mxu1 %v27317_v7  ;;  %23476 = vmatprep.mubr.f32.mxu0 %v27199_v15 }
 0x5e5   :  { %23402 = vmatmul.mubr.f32.gmra.mrb[20].mxu1 %v27325_v26 }
 0x5e6   :  { %23409 = vmatpush3.msra.mxu1 %v5678_v54  ;;  %23410 = vmatprep.mubr.f32.mxu1 %v27288_v37 }
 0x5e7   :  { %25346 = vmatprep.subr.bf16.mxu1 %v27798_v28  ;;  %23477 = vmatmul.mubr.f32.vlgmr.msra.gmra.mrb[20].mxu0 %v27206_v17 }
 0x5e8   :  { %25372 = vmatpush3.bf16.msra.mxu0 %v27801_v1  ;;  %23479 = vmatprep.mubr.f32.mxu0 %v27202_v16 }
 0x5e9   :  { %25374 = vmatprep.subr.bf16.mxu0 %v25373_v62  ;;  %23411 = vmatmul.mubr.f32.vlgmr.msra.gmra.mrb[18].mxu1 %v27323_v25 }
 0x5ea   :  { %25348 = vmatpush3.bf16.msra.mxu1 %v27798_v28  ;;  %23413 = vmatprep.mubr.f32.mxu1 %v27328_v27 }
 0x5eb   :  { %23420 = vmatprep.subr.mxu1 %v27804_v11  ;;  %23480 = vmatmul.mubr.f32.gmra.mrb[22].mxu0 %v27212_v19 }
 0x5ec   :  { %23486 = vmatprep.mubr.f32.mxu0 %v27215_v20 }
 0x5ed   :  { %23414 = vmatmul.mubr.f32.gmra.mrb[20].mxu1 %v27337_v39 }
 0x5ee   :  { %23421 = vmatpush3.msra.mxu1 %v27804_v11  ;;  %23422 = vmatprep.mubr.f32.mxu1 %v27291_v38 }
 0x5ef   :  { %25350 = vmatprep.subr.bf16.mxu1 %v25349_v60  ;;  %23487 = vmatmul.mubr.f32.vlgmr.msra.gmra.mrb[20].mxu0 %v27221_v22 }
 0x5f0   :  { %25376 = vmatpush3.bf16.msra.mxu0 %v25373_v62  ;;  %23489 = vmatprep.mubr.f32.mxu0 %v27218_v21 }
 0x5f1   :  { %25378 = vmatprep.subr.bf16.mxu0 %v27801_v1  ;;  %23423 = vmatmul.mubr.f32.vlgmr.msra.gmra.mrb[18].mxu1 %v27334_v35 }
 0x5f2   :  { %25352 = vmatpush3.bf16.msra.mxu1 %v25349_v60  ;;  %23425 = vmatprep.mubr.f32.mxu1 %v27340_v42 }
 0x5f3   :  { %23432 = vmatprep.subr.mxu1 %v27815_v41  ;;  %23490 = vmatmul.mubr.f32.gmra.mrb[22].mxu0 %v27226_v24 }
 0x5f4   :  { %23496 = vmatprep.mubr.f32.mxu0 %v27183_v9 }
 0x5f5   :  { %23426 = vmatmul.mubr.f32.gmra.mrb[20].mxu1 %v27348_v47 }
 0x5f6   :  { %23433 = vmatpush3.msra.mxu1 %v27815_v41  ;;  %23434 = vmatprep.mubr.f32.mxu1 %v27285_v36 }
 0x5f7   :  { %25354 = vmatprep.subr.bf16.mxu1 %v27798_v28  ;;  %23497 = vmatmul.mubr.f32.vlgmr.msra.gmra.mrb[20].mxu0 %v27191_v13 }
 0x5f8   :  { %25380 = vmatpush3.bf16.msra.mxu0 %v27801_v1  ;;  %23499 = vmatprep.mubr.f32.mxu0 %v27185_v10 }
 0x5f9   :  { %23435 = vmatmul.mubr.f32.vlgmr.msra.gmra.mrb[18].mxu1 %v27315_v5 }
 0x5fa   :  { %25356 = vmatpush3.bf16.msra.mxu1 %v27798_v28  ;;  %23437 = vmatprep.mubr.f32.mxu1 %v27317_v7 }
 0x5fb   :  { %23444 = vmatprep.subr.mxu1 %v27804_v11  ;;  %23500 = vmatmul.mubr.f32.gmra.mrb[22].mxu0 %v27189_v12 }
 0x5fc   :  { %23506 = vmatprep.mubr.f32.mxu0 %v27183_v9 }
 0x5fd   :  { %23438 = vmatmul.mubr.f32.gmra.mrb[20].mxu1 %v27325_v26 }
 0x5fe   :  { %23445 = vmatpush3.msra.mxu1 %v27804_v11  ;;  %23446 = vmatprep.mubr.f32.mxu1 %v27285_v36 }
 0x5ff   :  { %23507 = vmatmul.mubr.f32.vlgmr.msra.gmra.mrb[20].mxu0 %v27191_v13 }
 0x600   :  { %23509 = vmatprep.mubr.f32.mxu0 %v27185_v10 }
 0x601   :  { %23447 = vmatmul.mubr.f32.vlgmr.msra.gmra.mrb[18].mxu1 %v27315_v5 }
 0x602   :  { %23449 = vmatprep.mubr.f32.mxu1 %v27317_v7 }
 0x603   :  { %23510 = vmatmul.mubr.f32.gmra.mrb[22].mxu0 %v27189_v12 }
 0x604   :  { %23588 = vmatprep.mubr.f32.mxu0 %v27238_v30 }
 0x605   :  { %23450 = vmatmul.mubr.f32.gmra.mrb[20].mxu1 %v27325_v26 }
 0x606   :  { %23518 = vmatprep.mubr.f32.mxu1 %v27295_v40 }
 0x6d2   :  { %v23508_v14 = vpop.f32.mrb[20].mxu0 }
 0x6d3   :  { %v6766_v52 = vmul.f32 0.5, %v23508_v14  ;;  %v6743_v34 = vpop.f32.mrb[21].mxu0 }
 0x6d4   :  { %v6765_v61 = vmul.f32 0.5, %v6743_v34  ;;  %v23448_v0 = vpop.f32.mrb[18].mxu1 }
 0x6d5   :  { %26771 = vtanh.f32 %v6766_v52  ;;  %v6156_v28 = vmul.f32 0.5, %v23448_v0  ;;  %v6133_v18 = vpop.f32.mrb[19].mxu1 }
 0x6d6   :  { %26773 = vtanh.f32 %v6765_v61  ;;  %v6155_v1 = vmul.f32 0.5, %v6133_v18  ;;  %v23511_v11 = vpop.f32.mrb[22].mxu0 }
 0x6d7   :  { %26775 = vtanh.f32 %v6156_v28  ;;  %v6755_v54 = vpop.f32.mrb[23].mxu0 }
 0x6d8   :  { %26777 = vtanh.f32 %v6155_v1  ;;  %v23451_v2 = vpop.f32.mrb[20].mxu1  ;;  %v6767_v41 = vmul.f32 0.5, %v6755_v54 }
 0x6d9   :  { %v6145_v56 = vpop.f32.mrb[21].mxu1  ;;  %26779 = vtanh.f32 %v23511_v11 }
 0x6da   :  { %26781 = vtanh.f32 %v23451_v2  ;;  %v6157_v29 = vmul.f32 0.5, %v6145_v56  ;;  %v21360_v56 = vld [vmem:[%s29845_s0 + $0x30] sm:$0xff] }
 0x6db   :  { %26783 = vtanh.f32 %v6767_v41 }
 0x6dc   :  { %26785 = vtanh.f32 %v6157_v29  ;;  %v27897_v29 = vand.u32 4294901760, %v21360_v56 }
 0x6df   :  { %v26772_v4 = vpop.eup %26771 }
 0x6e0   :  { %v26774_v44 = vpop.eup %26773  ;;  %v6772_v50 = vmul.f32 0.5, %v26772_v4 }
 0x6e1   :  { %v26776_v51 = vpop.eup %26775  ;;  %v6771_v63 = vmul.f32 0.5, %v26774_v44 }
 0x6e2   :  { %v26778_v57 = vpop.eup %26777  ;;  %v6775_v62 = vadd.f32 0.5, %v6772_v50  ;;  %v6162_v60 = vmul.f32 0.5, %v26776_v51 }
 0x6e3   :  { %v6774_v14 = vadd.f32 0.5, %v6771_v63  ;;  %v6161_v52 = vmul.f32 0.5, %v26778_v57  ;;  %v26780_v34 = vpop.eup %26779 }
 0x6e4   :  { %v6778_v61 = vmul.f32 %v6775_v62, %v27776_v6  ;;  %v6165_v0 = vadd.f32 0.5, %v6162_v60  ;;  %v26782_v28 = vpop.eup %26781 }
 0x6e5   :  { %v6164_v18 = vadd.f32 0.5, %v6161_v52  ;;  %v6779_v1 = vmul.f32 %v26780_v34, %v6774_v14  ;;  %v26784_v4 = vpop.eup %26783 }
 0x6e6   :  { %v6168_v11 = vmul.f32 %v6165_v0, %v27782_v43  ;;  %v26786_v6 = vpop.eup %26785  ;;  %v6773_v44 = vmul.f32 0.5, %v26784_v4  ;;  %v27901_v43 = vsub.f32 %v21360_v56, %v27897_v29 }
 0x6e7   :  { %v27889_v54 = vadd.f32 %v6779_v1, %v6778_v61  ;;  %v6169_v2 = vmul.f32 %v26782_v28, %v6164_v18  ;;  %v6163_v50 = vmul.f32 0.5, %v26786_v6 }
 0x6e8   :  { %v6776_v51 = vadd.f32 0.5, %v6773_v44  ;;  %v27904_v57 = vand.u32 4294901760, %v27901_v43 }
 0x6e9   :  { %26787 = vtanh.f32 %v27889_v54  ;;  %v27895_v41 = vadd.f32 %v6169_v2, %v6168_v11  ;;  %v6166_v60 = vadd.f32 0.5, %v6163_v50 }
 0x6ea   :  { %v7517_v61 = vsub.f32 %v27901_v43, %v27904_v57 }
 0x6eb   :  { %26789 = vtanh.f32 %v27895_v41 }
 0x6ec   :  { %v27926_v56 = vand.u32 4294901760, %v7517_v61 }
 0x6f3   :  { %v26788_v63 = vpop.eup %26787 }
 0x6f4   :  { %v6782_v62 = vmul.f32 %v26788_v63, %v6776_v51 }
 0x6f5   :  { %v26790_v14 = vpop.eup %26789 }
 0x6f6   :  { %v6787_v52 = vand.u32 4294901760, %v6782_v62  ;;  %v27906_v34 = vmul.f32 %v26790_v14, %v6166_v60 }
 0x6f8   :  { %v27911_v0 = vpack.c.bf16 %v6787_v52, %v27784_v46  ;;  %v6900_v28 = vsub.f32 %v6782_v62, %v6787_v52  ;;  %v27914_v18 = vpack.c.bf16 %v6787_v52, %v27897_v29  ;;  %v27917_v1 = vand.u32 4294901760, %v27906_v34 }
 0x6fa   :  { %v6907_v11 = vsub.f32 %v27906_v34, %v27917_v1  ;;  %25382 = vmatprep.subr.bf16.mxu1 %v27911_v0  ;;  %25406 = vmatprep.subr.bf16.mxu0 %v27914_v18  ;;  %v6901_v2 = vand.u32 4294901760, %v6900_v28  ;;  %v25413_v62 = vpack.c.bf16 %v6900_v28, %v27901_v43 }
 0x6fb   :  { %25384 = vmatpush3.bf16.msra.mxu1 %v27911_v0  ;;  %25408 = vmatpush3.bf16.msra.mxu0 %v27914_v18 }
 0x6fc   :  { %23516 = vmatprep.subr.mxu1 %v27917_v1  ;;  %v6902_v46 = vsub.f32 %v6900_v28, %v6901_v2  ;;  %v27928_v4 = vand.u32 4294901760, %v6907_v11  ;;  %v25397_v60 = vpack.c.bf16 %v6901_v2, %v27791_v55 }
 0x6fe   :  { %23589 = vmatmul.mubr.f32.vlgmr.msra.gmra.mrb[24].mxu0 %v27242_v32  ;;  %v6903_v6 = vand.u32 4294901760, %v6902_v46  ;;  %v6909_v44 = vsub.f32 %v6907_v11, %v27928_v4 }
 0x6ff   :  { %23517 = vmatpush3.msra.mxu1 %v27917_v1  ;;  %23591 = vmatprep.mubr.f32.mxu0 %v27240_v31 }
 0x700   :  { %23519 = vmatmul.mubr.f32.vlgmr.msra.gmra.mrb[22].mxu1 %v27362_v53  ;;  %v25385_v50 = vpack.c.bf16 %v6903_v6, %v27813_v23  ;;  %v25409_v51 = vpack.c.bf16 %v6903_v6, %v27926_v56  ;;  %v6910_v63 = vand.u32 4294901760, %v6909_v44  ;;  %v25389_v23 = vpack.c.bf16 %v6900_v28, %v27788_v49 }
 0x701   :  { %23521 = vmatprep.mubr.f32.mxu1 %v27368_v3  ;;  %v25421_v49 = vpack.c.bf16 %v6901_v2, %v27904_v57 }
 0x702   :  { %25386 = vmatprep.subr.bf16.mxu1 %v25385_v50  ;;  %23592 = vmatmul.mubr.f32.gmra.mrb[26].mxu0 %v27245_v33 }
 0x703   :  { %25410 = vmatprep.subr.bf16.mxu0 %v25409_v51  ;;  %25388 = vmatpush3.bf16.msra.mxu1 %v25385_v50 }
 0x704   :  { %25412 = vmatpush3.bf16.msra.mxu0 %v25409_v51  ;;  %23522 = vmatmul.mubr.f32.gmra.mrb[24].mxu1 %v27374_v58 }
 0x705   :  { %23528 = vmatprep.subr.mxu1 %v6910_v63  ;;  %25414 = vmatprep.subr.bf16.mxu0 %v25413_v62 }
 0x706   :  { %23598 = vmatprep.mubr.f32.mxu0 %v27183_v9  ;;  %23530 = vmatprep.mubr.f32.mxu1 %v27285_v36 }
 0x707   :  { %23599 = vmatmul.mubr.f32.vlgmr.msra.gmra.mrb[24].mxu0 %v27191_v13  ;;  %23529 = vmatpush3.msra.mxu1 %v6910_v63 }
 0x708   :  { %25416 = vmatpush3.bf16.msra.mxu0 %v25413_v62  ;;  %23531 = vmatmul.mubr.f32.vlgmr.msra.gmra.mrb[22].mxu1 %v27315_v5 }
 0x709   :  { %25390 = vmatprep.subr.bf16.mxu1 %v25389_v23  ;;  %25418 = vmatprep.subr.bf16.mxu0 %v27914_v18 }
 0x70a   :  { %25392 = vmatpush3.bf16.msra.mxu1 %v25389_v23  ;;  %23601 = vmatprep.mubr.f32.mxu0 %v27185_v10 }
 0x70b   :  { %23540 = vmatprep.subr.mxu1 %v6907_v11  ;;  %23602 = vmatmul.mubr.f32.gmra.mrb[26].mxu0 %v27189_v12 }
 0x70c   :  { %23533 = vmatprep.mubr.f32.mxu1 %v27317_v7  ;;  %23608 = vmatprep.mubr.f32.mxu0 %v27199_v15 }
 0x70d   :  { %23534 = vmatmul.mubr.f32.gmra.mrb[24].mxu1 %v27325_v26 }
 0x70e   :  { %23541 = vmatpush3.msra.mxu1 %v6907_v11  ;;  %23542 = vmatprep.mubr.f32.mxu1 %v27288_v37 }
 0x70f   :  { %25394 = vmatprep.subr.bf16.mxu1 %v27911_v0  ;;  %23609 = vmatmul.mubr.f32.vlgmr.msra.gmra.mrb[24].mxu0 %v27206_v17 }
 0x710   :  { %25420 = vmatpush3.bf16.msra.mxu0 %v27914_v18  ;;  %23611 = vmatprep.mubr.f32.mxu0 %v27202_v16 }
 0x711   :  { %25422 = vmatprep.subr.bf16.mxu0 %v25421_v49  ;;  %23543 = vmatmul.mubr.f32.vlgmr.msra.gmra.mrb[22].mxu1 %v27323_v25 }
 0x712   :  { %25396 = vmatpush3.bf16.msra.mxu1 %v27911_v0  ;;  %23545 = vmatprep.mubr.f32.mxu1 %v27328_v27 }
 0x713   :  { %23552 = vmatprep.subr.mxu1 %v27917_v1  ;;  %23612 = vmatmul.mubr.f32.gmra.mrb[26].mxu0 %v27212_v19 }
 0x714   :  { %23618 = vmatprep.mubr.f32.mxu0 %v27215_v20 }
 0x715   :  { %23546 = vmatmul.mubr.f32.gmra.mrb[24].mxu1 %v27337_v39 }
 0x716   :  { %23553 = vmatpush3.msra.mxu1 %v27917_v1  ;;  %23554 = vmatprep.mubr.f32.mxu1 %v27291_v38 }
 0x717   :  { %25398 = vmatprep.subr.bf16.mxu1 %v25397_v60  ;;  %23619 = vmatmul.mubr.f32.vlgmr.msra.gmra.mrb[24].mxu0 %v27221_v22 }
 0x718   :  { %25424 = vmatpush3.bf16.msra.mxu0 %v25421_v49  ;;  %23621 = vmatprep.mubr.f32.mxu0 %v27218_v21 }
 0x719   :  { %25426 = vmatprep.subr.bf16.mxu0 %v27914_v18  ;;  %23555 = vmatmul.mubr.f32.vlgmr.msra.gmra.mrb[22].mxu1 %v27334_v35 }
 0x71a   :  { %25400 = vmatpush3.bf16.msra.mxu1 %v25397_v60  ;;  %23557 = vmatprep.mubr.f32.mxu1 %v27340_v42 }
 0x71b   :  { %23564 = vmatprep.subr.mxu1 %v27928_v4  ;;  %23622 = vmatmul.mubr.f32.gmra.mrb[26].mxu0 %v27226_v24 }
 0x71c   :  { %23628 = vmatprep.mubr.f32.mxu0 %v27183_v9 }
 0x71d   :  { %23558 = vmatmul.mubr.f32.gmra.mrb[24].mxu1 %v27348_v47 }
 0x71e   :  { %23565 = vmatpush3.msra.mxu1 %v27928_v4  ;;  %23566 = vmatprep.mubr.f32.mxu1 %v27285_v36 }
 0x71f   :  { %25402 = vmatprep.subr.bf16.mxu1 %v27911_v0  ;;  %23629 = vmatmul.mubr.f32.vlgmr.msra.gmra.mrb[24].mxu0 %v27191_v13 }
 0x720   :  { %25428 = vmatpush3.bf16.msra.mxu0 %v27914_v18  ;;  %23631 = vmatprep.mubr.f32.mxu0 %v27185_v10 }
 0x721   :  { %23567 = vmatmul.mubr.f32.vlgmr.msra.gmra.mrb[22].mxu1 %v27315_v5 }
 0x722   :  { %25404 = vmatpush3.bf16.msra.mxu1 %v27911_v0  ;;  %23569 = vmatprep.mubr.f32.mxu1 %v27317_v7 }
 0x723   :  { %23576 = vmatprep.subr.mxu1 %v27917_v1  ;;  %23632 = vmatmul.mubr.f32.gmra.mrb[26].mxu0 %v27189_v12 }
 0x724   :  { %23638 = vmatprep.mubr.f32.mxu0 %v27183_v9 }
 0x725   :  { %23570 = vmatmul.mubr.f32.gmra.mrb[24].mxu1 %v27325_v26 }
 0x726   :  { %23577 = vmatpush3.msra.mxu1 %v27917_v1  ;;  %23578 = vmatprep.mubr.f32.mxu1 %v27285_v36 }
 0x727   :  { %23639 = vmatmul.mubr.f32.vlgmr.msra.gmra.mrb[24].mxu0 %v27191_v13 }
 0x728   :  { %23641 = vmatprep.mubr.f32.mxu0 %v27185_v10 }
 0x729   :  { %23579 = vmatmul.mubr.f32.vlgmr.msra.gmra.mrb[22].mxu1 %v27315_v5 }
 0x72a   :  { %23581 = vmatprep.mubr.f32.mxu1 %v27317_v7 }
 0x72b   :  { %23642 = vmatmul.mubr.f32.gmra.mrb[26].mxu0 %v27189_v12 }
 0x72c   :  { %23720 = vmatprep.mubr.f32.mxu0 %v27238_v30 }
 0x72d   :  { %23582 = vmatmul.mubr.f32.gmra.mrb[24].mxu1 %v27325_v26 }
 0x72e   :  { %23650 = vmatprep.mubr.f32.mxu1 %v27295_v40 }
 0x7fa   :  { %v23640_v55 = vpop.f32.mrb[24].mxu0 }
 0x7fb   :  { %v7995_v14 = vmul.f32 0.5, %v23640_v55  ;;  %v7972_v52 = vpop.f32.mrb[25].mxu0 }
 0x7fc   :  { %v7994_v61 = vmul.f32 0.5, %v7972_v52  ;;  %v23580_v0 = vpop.f32.mrb[22].mxu1 }
 0x7fd   :  { %26791 = vtanh.f32 %v7995_v14  ;;  %v7385_v28 = vmul.f32 0.5, %v23580_v0  ;;  %v7362_v18 = vpop.f32.mrb[23].mxu1 }
 0x7fe   :  { %26793 = vtanh.f32 %v7994_v61  ;;  %v7384_v1 = vmul.f32 0.5, %v7362_v18  ;;  %v23643_v11 = vpop.f32.mrb[26].mxu0 }
 0x7ff   :  { %26795 = vtanh.f32 %v7385_v28  ;;  %v7984_v2 = vpop.f32.mrb[27].mxu0 }
 0x800   :  { %26797 = vtanh.f32 %v7384_v1  ;;  %v23583_v46 = vpop.f32.mrb[24].mxu1  ;;  %v7996_v6 = vmul.f32 0.5, %v7984_v2 }
 0x801   :  { %v7374_v4 = vpop.f32.mrb[25].mxu1  ;;  %26799 = vtanh.f32 %v23643_v11 }
 0x802   :  { %26801 = vtanh.f32 %v23583_v46  ;;  %v7386_v50 = vmul.f32 0.5, %v7374_v4 }
 0x803   :  { %26803 = vtanh.f32 %v7996_v6  ;;  %v21361_v6 = vld [vmem:[%s29845_s0 + $0x38] sm:$0xff] }
 0x804   :  { %26805 = vtanh.f32 %v7386_v50 }
 0x807   :  { %v26792_v44 = vpop.eup %26791 }
 0x808   :  { %v26794_v51 = vpop.eup %26793  ;;  %v8001_v63 = vmul.f32 0.5, %v26792_v44 }
 0x809   :  { %v26796_v62 = vpop.eup %26795  ;;  %v8000_v23 = vmul.f32 0.5, %v26794_v51  ;;  %v28010_v51 = vand.u32 4294901760, %v21361_v6 }
 0x80a   :  { %v26798_v49 = vpop.eup %26797  ;;  %v8004_v60 = vadd.f32 0.5, %v8001_v63  ;;  %v7391_v55 = vmul.f32 0.5, %v26796_v62 }
 0x80b   :  { %v8003_v14 = vadd.f32 0.5, %v8000_v23  ;;  %v7390_v52 = vmul.f32 0.5, %v26798_v49  ;;  %v26800_v61 = vpop.eup %26799 }
 0x80c   :  { %v8007_v0 = vmul.f32 %v8004_v60, %v27889_v54  ;;  %v7394_v28 = vadd.f32 0.5, %v7391_v55  ;;  %v26802_v11 = vpop.eup %26801 }
 0x80d   :  { %v7393_v18 = vadd.f32 0.5, %v7390_v52  ;;  %v8008_v1 = vmul.f32 %v26800_v61, %v8003_v14  ;;  %v26804_v50 = vpop.eup %26803 }
 0x80e   :  { %v7397_v2 = vmul.f32 %v7394_v28, %v27895_v41  ;;  %v26806_v54 = vpop.eup %26805  ;;  %v8002_v63 = vmul.f32 0.5, %v26804_v50  ;;  %v28014_v41 = vsub.f32 %v21361_v6, %v28010_v51 }
 0x80f   :  { %v28002_v46 = vadd.f32 %v8008_v1, %v8007_v0  ;;  %v7398_v4 = vmul.f32 %v26802_v11, %v7393_v18  ;;  %v7392_v62 = vmul.f32 0.5, %v26806_v54 }
 0x810   :  { %v8005_v23 = vadd.f32 0.5, %v8002_v63  ;;  %v28017_v60 = vand.u32 4294901760, %v28014_v41 }
 0x811   :  { %26807 = vtanh.f32 %v28002_v46  ;;  %v28008_v44 = vadd.f32 %v7398_v4, %v7397_v2  ;;  %v7395_v14 = vadd.f32 0.5, %v7392_v62 }
 0x812   :  { %v8746_v28 = vsub.f32 %v28014_v41, %v28017_v60 }
 0x813   :  { %26809 = vtanh.f32 %v28008_v44 }
 0x814   :  { %v28039_v50 = vand.u32 4294901760, %v8746_v28 }
 0x81b   :  { %v26808_v49 = vpop.eup %26807 }
 0x81c   :  { %v8011_v55 = vmul.f32 %v26808_v49, %v8005_v23 }
 0x81d   :  { %v26810_v52 = vpop.eup %26809 }
 0x81e   :  { %v8016_v61 = vand.u32 4294901760, %v8011_v55  ;;  %v28019_v0 = vmul.f32 %v26810_v52, %v7395_v14 }
 0x820   :  { %v28024_v18 = vpack.c.bf16 %v8016_v61, %v27897_v29  ;;  %v8129_v1 = vsub.f32 %v8011_v55, %v8016_v61  ;;  %v28027_v11 = vpack.c.bf16 %v8016_v61, %v28010_v51  ;;  %v28030_v2 = vand.u32 4294901760, %v28019_v0 }
 0x822   :  { %v8136_v4 = vsub.f32 %v28019_v0, %v28030_v2  ;;  %25430 = vmatprep.subr.bf16.mxu1 %v28024_v18  ;;  %25454 = vmatprep.subr.bf16.mxu0 %v28027_v11  ;;  %v8130_v6 = vand.u32 4294901760, %v8129_v1  ;;  %v25461_v14 = vpack.c.bf16 %v8129_v1, %v28014_v41 }
 0x823   :  { %25432 = vmatpush3.bf16.msra.mxu1 %v28024_v18  ;;  %25456 = vmatpush3.bf16.msra.mxu0 %v28027_v11 }
 0x824   :  { %23648 = vmatprep.subr.mxu1 %v28030_v2  ;;  %v8131_v29 = vsub.f32 %v8129_v1, %v8130_v6  ;;  %v28041_v54 = vand.u32 4294901760, %v8136_v4  ;;  %v25445_v52 = vpack.c.bf16 %v8130_v6, %v27904_v57 }
 0x826   :  { %23721 = vmatmul.mubr.f32.vlgmr.msra.gmra.mrb[28].mxu0 %v27242_v32  ;;  %v8132_v63 = vand.u32 4294901760, %v8131_v29  ;;  %v8138_v62 = vsub.f32 %v8136_v4, %v28041_v54 }
 0x827   :  { %23649 = vmatpush3.msra.mxu1 %v28030_v2  ;;  %23723 = vmatprep.mubr.f32.mxu0 %v27240_v31 }
 0x828   :  { %23651 = vmatmul.mubr.f32.vlgmr.msra.gmra.mrb[26].mxu1 %v27362_v53  ;;  %v25433_v23 = vpack.c.bf16 %v8132_v63, %v27926_v56  ;;  %v25457_v49 = vpack.c.bf16 %v8132_v63, %v28039_v50  ;;  %v8139_v55 = vand.u32 4294901760, %v8138_v62  ;;  %v25437_v56 = vpack.c.bf16 %v8129_v1, %v27901_v43 }
 0x829   :  { %23653 = vmatprep.mubr.f32.mxu1 %v27368_v3  ;;  %v25469_v43 = vpack.c.bf16 %v8130_v6, %v28017_v60 }
 0x82a   :  { %25434 = vmatprep.subr.bf16.mxu1 %v25433_v23  ;;  %23724 = vmatmul.mubr.f32.gmra.mrb[30].mxu0 %v27245_v33 }
 0x82b   :  { %25458 = vmatprep.subr.bf16.mxu0 %v25457_v49  ;;  %25436 = vmatpush3.bf16.msra.mxu1 %v25433_v23 }
 0x82c   :  { %25460 = vmatpush3.bf16.msra.mxu0 %v25457_v49  ;;  %23654 = vmatmul.mubr.f32.gmra.mrb[28].mxu1 %v27374_v58 }
 0x82d   :  { %23660 = vmatprep.subr.mxu1 %v8139_v55  ;;  %25462 = vmatprep.subr.bf16.mxu0 %v25461_v14 }
 0x82e   :  { %23730 = vmatprep.mubr.f32.mxu0 %v27183_v9  ;;  %23662 = vmatprep.mubr.f32.mxu1 %v27285_v36 }
 0x82f   :  { %23731 = vmatmul.mubr.f32.vlgmr.msra.gmra.mrb[28].mxu0 %v27191_v13  ;;  %23661 = vmatpush3.msra.mxu1 %v8139_v55 }
 0x830   :  { %25464 = vmatpush3.bf16.msra.mxu0 %v25461_v14  ;;  %23663 = vmatmul.mubr.f32.vlgmr.msra.gmra.mrb[26].mxu1 %v27315_v5 }
 0x831   :  { %25438 = vmatprep.subr.bf16.mxu1 %v25437_v56  ;;  %25466 = vmatprep.subr.bf16.mxu0 %v28027_v11 }
 0x832   :  { %25440 = vmatpush3.bf16.msra.mxu1 %v25437_v56  ;;  %23733 = vmatprep.mubr.f32.mxu0 %v27185_v10 }
 0x833   :  { %23672 = vmatprep.subr.mxu1 %v8136_v4  ;;  %23734 = vmatmul.mubr.f32.gmra.mrb[30].mxu0 %v27189_v12 }
 0x834   :  { %23665 = vmatprep.mubr.f32.mxu1 %v27317_v7  ;;  %23740 = vmatprep.mubr.f32.mxu0 %v27199_v15 }
 0x835   :  { %23666 = vmatmul.mubr.f32.gmra.mrb[28].mxu1 %v27325_v26 }
 0x836   :  { %23673 = vmatpush3.msra.mxu1 %v8136_v4  ;;  %23674 = vmatprep.mubr.f32.mxu1 %v27288_v37 }
 0x837   :  { %25442 = vmatprep.subr.bf16.mxu1 %v28024_v18  ;;  %23741 = vmatmul.mubr.f32.vlgmr.msra.gmra.mrb[28].mxu0 %v27206_v17 }
 0x838   :  { %25468 = vmatpush3.bf16.msra.mxu0 %v28027_v11  ;;  %23743 = vmatprep.mubr.f32.mxu0 %v27202_v16 }
 0x839   :  { %25470 = vmatprep.subr.bf16.mxu0 %v25469_v43  ;;  %23675 = vmatmul.mubr.f32.vlgmr.msra.gmra.mrb[26].mxu1 %v27323_v25 }
 0x83a   :  { %25444 = vmatpush3.bf16.msra.mxu1 %v28024_v18  ;;  %23677 = vmatprep.mubr.f32.mxu1 %v27328_v27 }
 0x83b   :  { %23684 = vmatprep.subr.mxu1 %v28030_v2  ;;  %23744 = vmatmul.mubr.f32.gmra.mrb[30].mxu0 %v27212_v19 }
 0x83c   :  { %23750 = vmatprep.mubr.f32.mxu0 %v27215_v20 }
 0x83d   :  { %23678 = vmatmul.mubr.f32.gmra.mrb[28].mxu1 %v27337_v39 }
 0x83e   :  { %23685 = vmatpush3.msra.mxu1 %v28030_v2  ;;  %23686 = vmatprep.mubr.f32.mxu1 %v27291_v38 }
 0x83f   :  { %25446 = vmatprep.subr.bf16.mxu1 %v25445_v52  ;;  %23751 = vmatmul.mubr.f32.vlgmr.msra.gmra.mrb[28].mxu0 %v27221_v22 }
 0x840   :  { %25472 = vmatpush3.bf16.msra.mxu0 %v25469_v43  ;;  %23753 = vmatprep.mubr.f32.mxu0 %v27218_v21 }
 0x841   :  { %25474 = vmatprep.subr.bf16.mxu0 %v28027_v11  ;;  %23687 = vmatmul.mubr.f32.vlgmr.msra.gmra.mrb[26].mxu1 %v27334_v35 }
 0x842   :  { %25448 = vmatpush3.bf16.msra.mxu1 %v25445_v52  ;;  %23689 = vmatprep.mubr.f32.mxu1 %v27340_v42 }
 0x843   :  { %23696 = vmatprep.subr.mxu1 %v28041_v54  ;;  %23754 = vmatmul.mubr.f32.gmra.mrb[30].mxu0 %v27226_v24 }
 0x844   :  { %23760 = vmatprep.mubr.f32.mxu0 %v27183_v9 }
 0x845   :  { %23690 = vmatmul.mubr.f32.gmra.mrb[28].mxu1 %v27348_v47 }
 0x846   :  { %23697 = vmatpush3.msra.mxu1 %v28041_v54  ;;  %23698 = vmatprep.mubr.f32.mxu1 %v27285_v36 }
 0x847   :  { %25450 = vmatprep.subr.bf16.mxu1 %v28024_v18  ;;  %23761 = vmatmul.mubr.f32.vlgmr.msra.gmra.mrb[28].mxu0 %v27191_v13 }
 0x848   :  { %25476 = vmatpush3.bf16.msra.mxu0 %v28027_v11  ;;  %23763 = vmatprep.mubr.f32.mxu0 %v27185_v10 }
 0x849   :  { %23699 = vmatmul.mubr.f32.vlgmr.msra.gmra.mrb[26].mxu1 %v27315_v5 }
 0x84a   :  { %25452 = vmatpush3.bf16.msra.mxu1 %v28024_v18  ;;  %23701 = vmatprep.mubr.f32.mxu1 %v27317_v7 }
 0x84b   :  { %23708 = vmatprep.subr.mxu1 %v28030_v2  ;;  %23764 = vmatmul.mubr.f32.gmra.mrb[30].mxu0 %v27189_v12 }
 0x84c   :  { %23770 = vmatprep.mubr.f32.mxu0 %v27183_v9 }
 0x84d   :  { %23702 = vmatmul.mubr.f32.gmra.mrb[28].mxu1 %v27325_v26 }
 0x84e   :  { %23709 = vmatpush3.msra.mxu1 %v28030_v2  ;;  %23710 = vmatprep.mubr.f32.mxu1 %v27285_v36 }
 0x84f   :  { %23771 = vmatmul.mubr.f32.vlgmr.msra.gmra.mrb[28].mxu0 %v27191_v13 }
 0x850   :  { %23773 = vmatprep.mubr.f32.mxu0 %v27185_v10 }
 0x851   :  { %23711 = vmatmul.mubr.f32.vlgmr.msra.gmra.mrb[26].mxu1 %v27315_v5 }
 0x852   :  { %23713 = vmatprep.mubr.f32.mxu1 %v27317_v7 }
 0x853   :  { %23774 = vmatmul.mubr.f32.gmra.mrb[30].mxu0 %v27189_v12 }
 0x854   :  { %23852 = vmatprep.mubr.f32.mxu0 %v27238_v30 }
 0x855   :  { %23714 = vmatmul.mubr.f32.gmra.mrb[28].mxu1 %v27325_v26 }
 0x856   :  { %23782 = vmatprep.mubr.f32.mxu1 %v27295_v40 }
 0x922   :  { %v23772_v57 = vpop.f32.mrb[28].mxu0 }
 0x923   :  { %v9224_v61 = vmul.f32 0.5, %v23772_v57  ;;  %v9201_v28 = vpop.f32.mrb[29].mxu0 }
 0x924   :  { %v9223_v18 = vmul.f32 0.5, %v9201_v28  ;;  %v23712_v1 = vpop.f32.mrb[26].mxu1 }
 0x925   :  { %26811 = vtanh.f32 %v9224_v61  ;;  %v8614_v11 = vmul.f32 0.5, %v23712_v1  ;;  %v8591_v2 = vpop.f32.mrb[27].mxu1 }
 0x926   :  { %26813 = vtanh.f32 %v9223_v18  ;;  %v8613_v4 = vmul.f32 0.5, %v8591_v2  ;;  %v23775_v6 = vpop.f32.mrb[30].mxu0 }
 0x927   :  { %26815 = vtanh.f32 %v8614_v11  ;;  %v9213_v29 = vpop.f32.mrb[31].mxu0 }
 0x928   :  { %26817 = vtanh.f32 %v8613_v4  ;;  %v23715_v54 = vpop.f32.mrb[28].mxu1  ;;  %v9225_v62 = vmul.f32 0.5, %v9213_v29 }
 0x929   :  { %v8603_v63 = vpop.f32.mrb[29].mxu1  ;;  %26819 = vtanh.f32 %v23775_v6 }
 0x92a   :  { %26821 = vtanh.f32 %v23715_v54  ;;  %v8615_v49 = vmul.f32 0.5, %v8603_v63 }
 0x92b   :  { %26823 = vtanh.f32 %v9225_v62  ;;  %v21362_v62 = vld [vmem:[%s29845_s0 + $0x40] sm:$0xff] }
 0x92c   :  { %26825 = vtanh.f32 %v8615_v49 }
 0x92f   :  { %v26812_v23 = vpop.eup %26811 }
 0x930   :  { %v26814_v55 = vpop.eup %26813  ;;  %v9230_v14 = vmul.f32 0.5, %v26812_v23 }
 0x931   :  { %v26816_v56 = vpop.eup %26815  ;;  %v9229_v43 = vmul.f32 0.5, %v26814_v55 }
 0x932   :  { %v26818_v52 = vpop.eup %26817  ;;  %v9233_v57 = vadd.f32 0.5, %v9230_v14  ;;  %v8620_v61 = vmul.f32 0.5, %v26816_v56  ;;  %v28123_v14 = vand.u32 4294901760, %v21362_v62 }
 0x933   :  { %v9232_v28 = vadd.f32 0.5, %v9229_v43  ;;  %v8619_v18 = vmul.f32 0.5, %v26818_v52  ;;  %v26820_v1 = vpop.eup %26819 }
 0x934   :  { %v9236_v11 = vmul.f32 %v9233_v57, %v28002_v46  ;;  %v8623_v2 = vadd.f32 0.5, %v8620_v61  ;;  %v26822_v29 = vpop.eup %26821 }
 0x935   :  { %v8622_v4 = vadd.f32 0.5, %v8619_v18  ;;  %v9237_v6 = vmul.f32 %v26820_v1, %v9232_v28  ;;  %v26824_v49 = vpop.eup %26823 }
 0x936   :  { %v8626_v54 = vmul.f32 %v8623_v2, %v28008_v44  ;;  %v26826_v46 = vpop.eup %26825  ;;  %v9231_v56 = vmul.f32 0.5, %v26824_v49  ;;  %v28127_v44 = vsub.f32 %v21362_v62, %v28123_v14 }
 0x937   :  { %v28115_v63 = vadd.f32 %v9237_v6, %v9236_v11  ;;  %v8627_v23 = vmul.f32 %v26822_v29, %v8622_v4  ;;  %v8621_v43 = vmul.f32 0.5, %v26826_v46 }
 0x938   :  { %v9234_v52 = vadd.f32 0.5, %v9231_v56  ;;  %v28130_v61 = vand.u32 4294901760, %v28127_v44 }
 0x939   :  { %26827 = vtanh.f32 %v28115_v63  ;;  %v28121_v55 = vadd.f32 %v8627_v23, %v8626_v54  ;;  %v8624_v18 = vadd.f32 0.5, %v8621_v43 }
 0x93a   :  { %v9975_v4 = vsub.f32 %v28127_v44, %v28130_v61 }
 0x93b   :  { %26829 = vtanh.f32 %v28121_v55 }
 0x93c   :  { %v28152_v46 = vand.u32 4294901760, %v9975_v4 }
 0x943   :  { %v26828_v57 = vpop.eup %26827 }
 0x944   :  { %v9240_v28 = vmul.f32 %v26828_v57, %v9234_v52 }
 0x945   :  { %v26830_v1 = vpop.eup %26829 }
 0x946   :  { %v9245_v11 = vand.u32 4294901760, %v9240_v28  ;;  %v28132_v2 = vmul.f32 %v26830_v1, %v8624_v18 }
 0x948   :  { %29863 = vst [vmem:[#allocation6_spill] sm:$0xff] %v28132_v2  ;;  %v28137_v6 = vpack.c.bf16 %v9245_v11, %v28010_v51  ;;  %v9358_v29 = vsub.f32 %v9240_v28, %v9245_v11  ;;  %v28140_v54 = vpack.c.bf16 %v9245_v11, %v28123_v14  ;;  %v28143_v23 = vand.u32 4294901760, %v28132_v2 }
 0x94a   :  { %v9365_v62 = vsub.f32 %v28132_v2, %v28143_v23  ;;  %25478 = vmatprep.subr.bf16.mxu1 %v28137_v6  ;;  %25502 = vmatprep.subr.bf16.mxu0 %v28140_v54  ;;  %v9359_v49 = vand.u32 4294901760, %v9358_v29  ;;  %v25509_v1 = vpack.c.bf16 %v9358_v29, %v28127_v44 }
 0x94b   :  { %25480 = vmatpush3.bf16.msra.mxu1 %v28137_v6  ;;  %25504 = vmatpush3.bf16.msra.mxu0 %v28140_v54 }
 0x94c   :  { %23780 = vmatprep.subr.mxu1 %v28143_v23  ;;  %v9360_v51 = vsub.f32 %v9358_v29, %v9359_v49  ;;  %v28154_v56 = vand.u32 4294901760, %v9365_v62  ;;  %v25493_v11 = vpack.c.bf16 %v9359_v49, %v28017_v60 }
 0x94e   :  { %23853 = vmatmul.mubr.f32.vlgmr.msra.gmra.mrb[32].mxu0 %v27242_v32  ;;  %v9361_v43 = vand.u32 4294901760, %v9360_v51  ;;  %v9367_v52 = vsub.f32 %v9365_v62, %v28154_v56 }
 0x94f   :  { %23781 = vmatpush3.msra.mxu1 %v28143_v23  ;;  %23855 = vmatprep.mubr.f32.mxu0 %v27240_v31 }
 0x950   :  { %23783 = vmatmul.mubr.f32.vlgmr.msra.gmra.mrb[30].mxu1 %v27362_v53  ;;  %v25481_v57 = vpack.c.bf16 %v9361_v43, %v28039_v50  ;;  %v25505_v28 = vpack.c.bf16 %v9361_v43, %v28152_v46  ;;  %v9368_v18 = vand.u32 4294901760, %v9367_v52  ;;  %v25485_v50 = vpack.c.bf16 %v9358_v29, %v28014_v41 }
 0x951   :  { %23785 = vmatprep.mubr.f32.mxu1 %v27368_v3  ;;  %v25517_v41 = vpack.c.bf16 %v9359_v49, %v28130_v61 }
 0x952   :  { %25482 = vmatprep.subr.bf16.mxu1 %v25481_v57  ;;  %23856 = vmatmul.mubr.f32.gmra.mrb[34].mxu0 %v27245_v33 }
 0x953   :  { %25506 = vmatprep.subr.bf16.mxu0 %v25505_v28  ;;  %25484 = vmatpush3.bf16.msra.mxu1 %v25481_v57 }
 0x954   :  { %25508 = vmatpush3.bf16.msra.mxu0 %v25505_v28  ;;  %23786 = vmatmul.mubr.f32.gmra.mrb[32].mxu1 %v27374_v58 }
 0x955   :  { %23792 = vmatprep.subr.mxu1 %v9368_v18  ;;  %25510 = vmatprep.subr.bf16.mxu0 %v25509_v1 }
 0x956   :  { %23862 = vmatprep.mubr.f32.mxu0 %v27183_v9  ;;  %23794 = vmatprep.mubr.f32.mxu1 %v27285_v36 }
 0x957   :  { %23863 = vmatmul.mubr.f32.vlgmr.msra.gmra.mrb[32].mxu0 %v27191_v13  ;;  %23793 = vmatpush3.msra.mxu1 %v9368_v18 }
 0x958   :  { %25512 = vmatpush3.bf16.msra.mxu0 %v25509_v1  ;;  %23795 = vmatmul.mubr.f32.vlgmr.msra.gmra.mrb[30].mxu1 %v27315_v5 }
 0x959   :  { %25486 = vmatprep.subr.bf16.mxu1 %v25485_v50  ;;  %25514 = vmatprep.subr.bf16.mxu0 %v28140_v54 }
 0x95a   :  { %25488 = vmatpush3.bf16.msra.mxu1 %v25485_v50  ;;  %23865 = vmatprep.mubr.f32.mxu0 %v27185_v10 }
 0x95b   :  { %23804 = vmatprep.subr.mxu1 %v9365_v62  ;;  %23866 = vmatmul.mubr.f32.gmra.mrb[34].mxu0 %v27189_v12 }
 0x95c   :  { %23797 = vmatprep.mubr.f32.mxu1 %v27317_v7  ;;  %23872 = vmatprep.mubr.f32.mxu0 %v27199_v15 }
 0x95d   :  { %23798 = vmatmul.mubr.f32.gmra.mrb[32].mxu1 %v27325_v26 }
 0x95e   :  { %23805 = vmatpush3.msra.mxu1 %v9365_v62  ;;  %23806 = vmatprep.mubr.f32.mxu1 %v27288_v37 }
 0x95f   :  { %25490 = vmatprep.subr.bf16.mxu1 %v28137_v6  ;;  %23873 = vmatmul.mubr.f32.vlgmr.msra.gmra.mrb[32].mxu0 %v27206_v17 }
 0x960   :  { %25516 = vmatpush3.bf16.msra.mxu0 %v28140_v54  ;;  %23875 = vmatprep.mubr.f32.mxu0 %v27202_v16 }
 0x961   :  { %25518 = vmatprep.subr.bf16.mxu0 %v25517_v41  ;;  %23807 = vmatmul.mubr.f32.vlgmr.msra.gmra.mrb[30].mxu1 %v27323_v25 }
 0x962   :  { %25492 = vmatpush3.bf16.msra.mxu1 %v28137_v6  ;;  %23809 = vmatprep.mubr.f32.mxu1 %v27328_v27 }
 0x963   :  { %23816 = vmatprep.subr.mxu1 %v28143_v23  ;;  %23876 = vmatmul.mubr.f32.gmra.mrb[34].mxu0 %v27212_v19 }
 0x964   :  { %23882 = vmatprep.mubr.f32.mxu0 %v27215_v20 }
 0x965   :  { %23810 = vmatmul.mubr.f32.gmra.mrb[32].mxu1 %v27337_v39 }
 0x966   :  { %23817 = vmatpush3.msra.mxu1 %v28143_v23  ;;  %23818 = vmatprep.mubr.f32.mxu1 %v27291_v38 }
 0x967   :  { %25494 = vmatprep.subr.bf16.mxu1 %v25493_v11  ;;  %23883 = vmatmul.mubr.f32.vlgmr.msra.gmra.mrb[32].mxu0 %v27221_v22 }
 0x968   :  { %25520 = vmatpush3.bf16.msra.mxu0 %v25517_v41  ;;  %23885 = vmatprep.mubr.f32.mxu0 %v27218_v21 }
 0x969   :  { %25522 = vmatprep.subr.bf16.mxu0 %v28140_v54  ;;  %23819 = vmatmul.mubr.f32.vlgmr.msra.gmra.mrb[30].mxu1 %v27334_v35 }
 0x96a   :  { %25496 = vmatpush3.bf16.msra.mxu1 %v25493_v11  ;;  %23821 = vmatprep.mubr.f32.mxu1 %v27340_v42 }
 0x96b   :  { %23828 = vmatprep.subr.mxu1 %v28154_v56  ;;  %23886 = vmatmul.mubr.f32.gmra.mrb[34].mxu0 %v27226_v24 }
 0x96c   :  { %23892 = vmatprep.mubr.f32.mxu0 %v27183_v9 }
 0x96d   :  { %23822 = vmatmul.mubr.f32.gmra.mrb[32].mxu1 %v27348_v47 }
 0x96e   :  { %23829 = vmatpush3.msra.mxu1 %v28154_v56  ;;  %23830 = vmatprep.mubr.f32.mxu1 %v27285_v36 }
 0x96f   :  { %25498 = vmatprep.subr.bf16.mxu1 %v28137_v6  ;;  %23893 = vmatmul.mubr.f32.vlgmr.msra.gmra.mrb[32].mxu0 %v27191_v13 }
 0x970   :  { %25524 = vmatpush3.bf16.msra.mxu0 %v28140_v54  ;;  %23895 = vmatprep.mubr.f32.mxu0 %v27185_v10 }
 0x971   :  { %23831 = vmatmul.mubr.f32.vlgmr.msra.gmra.mrb[30].mxu1 %v27315_v5 }
 0x972   :  { %25500 = vmatpush3.bf16.msra.mxu1 %v28137_v6  ;;  %23833 = vmatprep.mubr.f32.mxu1 %v27317_v7 }
 0x973   :  { %23840 = vmatprep.subr.mxu1 %v28143_v23  ;;  %23896 = vmatmul.mubr.f32.gmra.mrb[34].mxu0 %v27189_v12 }
 0x974   :  { %23902 = vmatprep.mubr.f32.mxu0 %v27183_v9 }
 0x975   :  { %23834 = vmatmul.mubr.f32.gmra.mrb[32].mxu1 %v27325_v26 }
 0x976   :  { %23841 = vmatpush3.msra.mxu1 %v28143_v23  ;;  %23842 = vmatprep.mubr.f32.mxu1 %v27285_v36 }
 0x977   :  { %23903 = vmatmul.mubr.f32.vlgmr.msra.gmra.mrb[32].mxu0 %v27191_v13 }
 0x978   :  { %23905 = vmatprep.mubr.f32.mxu0 %v27185_v10 }
 0x979   :  { %23843 = vmatmul.mubr.f32.vlgmr.msra.gmra.mrb[30].mxu1 %v27315_v5 }
 0x97a   :  { %23845 = vmatprep.mubr.f32.mxu1 %v27317_v7 }
 0x97b   :  { %23906 = vmatmul.mubr.f32.gmra.mrb[34].mxu0 %v27189_v12 }
 0x97c   :  { %23984 = vmatprep.mubr.f32.mxu0 %v27238_v30 }
 0x97d   :  { %23846 = vmatmul.mubr.f32.gmra.mrb[32].mxu1 %v27325_v26 }
 0x97e   :  { %23914 = vmatprep.mubr.f32.mxu1 %v27295_v40 }
 0xa4a   :  { %v23904_v60 = vpop.f32.mrb[32].mxu0 }
 0xa4b   :  { %v10453_v4 = vmul.f32 0.5, %v23904_v60  ;;  %v10430_v6 = vpop.f32.mrb[33].mxu0 }
 0xa4c   :  { %v10452_v29 = vmul.f32 0.5, %v10430_v6  ;;  %v23844_v54 = vpop.f32.mrb[30].mxu1 }
 0xa4d   :  { %26831 = vtanh.f32 %v10453_v4  ;;  %v9843_v23 = vmul.f32 0.5, %v23844_v54  ;;  %v9820_v62 = vpop.f32.mrb[31].mxu1 }
 0xa4e   :  { %26833 = vtanh.f32 %v10452_v29  ;;  %v9842_v49 = vmul.f32 0.5, %v9820_v62  ;;  %v23907_v51 = vpop.f32.mrb[34].mxu0 }
 0xa4f   :  { %26835 = vtanh.f32 %v9843_v23  ;;  %v10442_v56 = vpop.f32.mrb[35].mxu0 }
 0xa50   :  { %26837 = vtanh.f32 %v9842_v49  ;;  %v23847_v43 = vpop.f32.mrb[32].mxu1  ;;  %v10454_v57 = vmul.f32 0.5, %v10442_v56 }
 0xa51   :  { %v9832_v52 = vpop.f32.mrb[33].mxu1  ;;  %26839 = vtanh.f32 %v23907_v51 }
 0xa52   :  { %26841 = vtanh.f32 %v23847_v43  ;;  %v9844_v18 = vmul.f32 0.5, %v9832_v52 }
 0xa53   :  { %26843 = vtanh.f32 %v10454_v57  ;;  %v21363_v57 = vld [vmem:[%s29845_s0 + $0x48] sm:$0xff] }
 0xa54   :  { %26845 = vtanh.f32 %v9844_v18 }
 0xa57   :  { %v26832_v28 = vpop.eup %26831 }
 0xa58   :  { %v26834_v1 = vpop.eup %26833  ;;  %v10459_v50 = vmul.f32 0.5, %v26832_v28 }
 0xa59   :  { %v26836_v41 = vpop.eup %26835  ;;  %v10458_v11 = vmul.f32 0.5, %v26834_v1 }
 0xa5a   :  { %v26838_v60 = vpop.eup %26837  ;;  %v10462_v4 = vadd.f32 0.5, %v10459_v50  ;;  %v9849_v6 = vmul.f32 0.5, %v26836_v41  ;;  %v28236_v50 = vand.u32 4294901760, %v21363_v57 }
 0xa5b   :  { %v10461_v29 = vadd.f32 0.5, %v10458_v11  ;;  %v9848_v54 = vmul.f32 0.5, %v26838_v60  ;;  %v26840_v23 = vpop.eup %26839 }
 0xa5c   :  { %v10465_v62 = vmul.f32 %v10462_v4, %v28115_v63  ;;  %v9852_v49 = vadd.f32 0.5, %v9849_v6  ;;  %v26842_v56 = vpop.eup %26841 }
 0xa5d   :  { %v9851_v51 = vadd.f32 0.5, %v9848_v54  ;;  %v10466_v43 = vmul.f32 %v26840_v23, %v10461_v29  ;;  %v26844_v18 = vpop.eup %26843 }
 0xa5e   :  { %v9855_v52 = vmul.f32 %v9852_v49, %v28121_v55  ;;  %v26846_v63 = vpop.eup %26845  ;;  %v10460_v41 = vmul.f32 0.5, %v26844_v18  ;;  %v28240_v55 = vsub.f32 %v21363_v57, %v28236_v50 }
 0xa5f   :  { %v28228_v2 = vadd.f32 %v10466_v43, %v10465_v62  ;;  %v9856_v28 = vmul.f32 %v26842_v56, %v9851_v51  ;;  %v9850_v11 = vmul.f32 0.5, %v26846_v63 }
 0xa60   :  { %v10463_v60 = vadd.f32 0.5, %v10460_v41  ;;  %v28243_v6 = vand.u32 4294901760, %v28240_v55 }
 0xa61   :  { %26847 = vtanh.f32 %v28228_v2  ;;  %v28234_v1 = vadd.f32 %v9856_v28, %v9855_v52  ;;  %v9853_v54 = vadd.f32 0.5, %v9850_v11 }
 0xa62   :  { %v11204_v51 = vsub.f32 %v28240_v55, %v28243_v6 }
 0xa63   :  { %26849 = vtanh.f32 %v28234_v1 }
 0xa64   :  { %v28265_v63 = vand.u32 4294901760, %v11204_v51 }
 0xa6b   :  { %v26848_v4 = vpop.eup %26847 }
 0xa6c   :  { %v10469_v29 = vmul.f32 %v26848_v4, %v10463_v60 }
 0xa6d   :  { %v26850_v23 = vpop.eup %26849 }
 0xa6e   :  { %v10474_v62 = vand.u32 4294901760, %v10469_v29  ;;  %v28245_v49 = vmul.f32 %v26850_v23, %v9853_v54 }
 0xa70   :  { %29864 = vst [vmem:[#allocation7_spill] sm:$0xff] %v28245_v49  ;;  %v28250_v43 = vpack.c.bf16 %v10474_v62, %v28123_v14  ;;  %v10587_v56 = vsub.f32 %v10469_v29, %v10474_v62  ;;  %v28253_v52 = vpack.c.bf16 %v10474_v62, %v28236_v50  ;;  %v28256_v28 = vand.u32 4294901760, %v28245_v49 }
 0xa72   :  { %v10594_v57 = vsub.f32 %v28245_v49, %v28256_v28  ;;  %25526 = vmatprep.subr.bf16.mxu1 %v28250_v43  ;;  %25550 = vmatprep.subr.bf16.mxu0 %v28253_v52  ;;  %v10588_v18 = vand.u32 4294901760, %v10587_v56  ;;  %v25557_v23 = vpack.c.bf16 %v10587_v56, %v28240_v55 }
 0xa73   :  { %25528 = vmatpush3.bf16.msra.mxu1 %v28250_v43  ;;  %25552 = vmatpush3.bf16.msra.mxu0 %v28253_v52 }
 0xa74   :  { %23912 = vmatprep.subr.mxu1 %v28256_v28  ;;  %v10589_v14 = vsub.f32 %v10587_v56, %v10588_v18  ;;  %v28267_v41 = vand.u32 4294901760, %v10594_v57  ;;  %v25541_v62 = vpack.c.bf16 %v10588_v18, %v28130_v61 }
 0xa76   :  { %23985 = vmatmul.mubr.f32.vlgmr.msra.gmra.mrb[36].mxu0 %v27242_v32  ;;  %v10590_v11 = vand.u32 4294901760, %v10589_v14  ;;  %v10596_v60 = vsub.f32 %v10594_v57, %v28267_v41 }
 0xa77   :  { %23913 = vmatpush3.msra.mxu1 %v28256_v28  ;;  %23987 = vmatprep.mubr.f32.mxu0 %v27240_v31 }
 0xa78   :  { %23915 = vmatmul.mubr.f32.vlgmr.msra.gmra.mrb[34].mxu1 %v27362_v53  ;;  %v25529_v4 = vpack.c.bf16 %v10590_v11, %v28152_v46  ;;  %v25553_v29 = vpack.c.bf16 %v10590_v11, %v28265_v63  ;;  %v10597_v54 = vand.u32 4294901760, %v10596_v60  ;;  %v25533_v46 = vpack.c.bf16 %v10587_v56, %v28127_v44 }
 0xa79   :  { %23917 = vmatprep.mubr.f32.mxu1 %v27368_v3  ;;  %v25565_v44 = vpack.c.bf16 %v10588_v18, %v28243_v6 }
 0xa7a   :  { %25530 = vmatprep.subr.bf16.mxu1 %v25529_v4  ;;  %23988 = vmatmul.mubr.f32.gmra.mrb[38].mxu0 %v27245_v33 }
 0xa7b   :  { %25554 = vmatprep.subr.bf16.mxu0 %v25553_v29  ;;  %25532 = vmatpush3.bf16.msra.mxu1 %v25529_v4 }
 0xa7c   :  { %25556 = vmatpush3.bf16.msra.mxu0 %v25553_v29  ;;  %23918 = vmatmul.mubr.f32.gmra.mrb[36].mxu1 %v27374_v58 }
 0xa7d   :  { %23924 = vmatprep.subr.mxu1 %v10597_v54  ;;  %25558 = vmatprep.subr.bf16.mxu0 %v25557_v23 }
 0xa7e   :  { %23994 = vmatprep.mubr.f32.mxu0 %v27183_v9  ;;  %23926 = vmatprep.mubr.f32.mxu1 %v27285_v36 }
 0xa7f   :  { %23995 = vmatmul.mubr.f32.vlgmr.msra.gmra.mrb[36].mxu0 %v27191_v13  ;;  %23925 = vmatpush3.msra.mxu1 %v10597_v54 }
 0xa80   :  { %25560 = vmatpush3.bf16.msra.mxu0 %v25557_v23  ;;  %23927 = vmatmul.mubr.f32.vlgmr.msra.gmra.mrb[34].mxu1 %v27315_v5 }
 0xa81   :  { %25534 = vmatprep.subr.bf16.mxu1 %v25533_v46  ;;  %25562 = vmatprep.subr.bf16.mxu0 %v28253_v52 }
 0xa82   :  { %25536 = vmatpush3.bf16.msra.mxu1 %v25533_v46  ;;  %23997 = vmatprep.mubr.f32.mxu0 %v27185_v10 }
 0xa83   :  { %23936 = vmatprep.subr.mxu1 %v10594_v57  ;;  %23998 = vmatmul.mubr.f32.gmra.mrb[38].mxu0 %v27189_v12 }
 0xa84   :  { %23929 = vmatprep.mubr.f32.mxu1 %v27317_v7  ;;  %24004 = vmatprep.mubr.f32.mxu0 %v27199_v15 }
 0xa85   :  { %23930 = vmatmul.mubr.f32.gmra.mrb[36].mxu1 %v27325_v26 }
 0xa86   :  { %23937 = vmatpush3.msra.mxu1 %v10594_v57  ;;  %23938 = vmatprep.mubr.f32.mxu1 %v27288_v37 }
 0xa87   :  { %25538 = vmatprep.subr.bf16.mxu1 %v28250_v43  ;;  %24005 = vmatmul.mubr.f32.vlgmr.msra.gmra.mrb[36].mxu0 %v27206_v17 }
 0xa88   :  { %25564 = vmatpush3.bf16.msra.mxu0 %v28253_v52  ;;  %24007 = vmatprep.mubr.f32.mxu0 %v27202_v16 }
 0xa89   :  { %25566 = vmatprep.subr.bf16.mxu0 %v25565_v44  ;;  %23939 = vmatmul.mubr.f32.vlgmr.msra.gmra.mrb[34].mxu1 %v27323_v25 }
 0xa8a   :  { %25540 = vmatpush3.bf16.msra.mxu1 %v28250_v43  ;;  %23941 = vmatprep.mubr.f32.mxu1 %v27328_v27 }
 0xa8b   :  { %23948 = vmatprep.subr.mxu1 %v28256_v28  ;;  %24008 = vmatmul.mubr.f32.gmra.mrb[38].mxu0 %v27212_v19 }
 0xa8c   :  { %24014 = vmatprep.mubr.f32.mxu0 %v27215_v20 }
 0xa8d   :  { %23942 = vmatmul.mubr.f32.gmra.mrb[36].mxu1 %v27337_v39 }
 0xa8e   :  { %23949 = vmatpush3.msra.mxu1 %v28256_v28  ;;  %23950 = vmatprep.mubr.f32.mxu1 %v27291_v38 }
 0xa8f   :  { %25542 = vmatprep.subr.bf16.mxu1 %v25541_v62  ;;  %24015 = vmatmul.mubr.f32.vlgmr.msra.gmra.mrb[36].mxu0 %v27221_v22 }
 0xa90   :  { %25568 = vmatpush3.bf16.msra.mxu0 %v25565_v44  ;;  %24017 = vmatprep.mubr.f32.mxu0 %v27218_v21 }
 0xa91   :  { %25570 = vmatprep.subr.bf16.mxu0 %v28253_v52  ;;  %23951 = vmatmul.mubr.f32.vlgmr.msra.gmra.mrb[34].mxu1 %v27334_v35 }
 0xa92   :  { %25544 = vmatpush3.bf16.msra.mxu1 %v25541_v62  ;;  %23953 = vmatprep.mubr.f32.mxu1 %v27340_v42 }
 0xa93   :  { %23960 = vmatprep.subr.mxu1 %v28267_v41  ;;  %24018 = vmatmul.mubr.f32.gmra.mrb[38].mxu0 %v27226_v24 }
 0xa94   :  { %24024 = vmatprep.mubr.f32.mxu0 %v27183_v9 }
 0xa95   :  { %23954 = vmatmul.mubr.f32.gmra.mrb[36].mxu1 %v27348_v47 }
 0xa96   :  { %23961 = vmatpush3.msra.mxu1 %v28267_v41  ;;  %23962 = vmatprep.mubr.f32.mxu1 %v27285_v36 }
 0xa97   :  { %25546 = vmatprep.subr.bf16.mxu1 %v28250_v43  ;;  %24025 = vmatmul.mubr.f32.vlgmr.msra.gmra.mrb[36].mxu0 %v27191_v13 }
 0xa98   :  { %25572 = vmatpush3.bf16.msra.mxu0 %v28253_v52  ;;  %24027 = vmatprep.mubr.f32.mxu0 %v27185_v10 }
 0xa99   :  { %23963 = vmatmul.mubr.f32.vlgmr.msra.gmra.mrb[34].mxu1 %v27315_v5 }
 0xa9a   :  { %25548 = vmatpush3.bf16.msra.mxu1 %v28250_v43  ;;  %23965 = vmatprep.mubr.f32.mxu1 %v27317_v7 }
 0xa9b   :  { %23972 = vmatprep.subr.mxu1 %v28256_v28  ;;  %24028 = vmatmul.mubr.f32.gmra.mrb[38].mxu0 %v27189_v12 }
 0xa9c   :  { %24034 = vmatprep.mubr.f32.mxu0 %v27183_v9 }
 0xa9d   :  { %23966 = vmatmul.mubr.f32.gmra.mrb[36].mxu1 %v27325_v26 }
 0xa9e   :  { %23973 = vmatpush3.msra.mxu1 %v28256_v28  ;;  %23974 = vmatprep.mubr.f32.mxu1 %v27285_v36 }
 0xa9f   :  { %24035 = vmatmul.mubr.f32.vlgmr.msra.gmra.mrb[36].mxu0 %v27191_v13 }
 0xaa0   :  { %24037 = vmatprep.mubr.f32.mxu0 %v27185_v10 }
 0xaa1   :  { %23975 = vmatmul.mubr.f32.vlgmr.msra.gmra.mrb[34].mxu1 %v27315_v5 }
 0xaa2   :  { %23977 = vmatprep.mubr.f32.mxu1 %v27317_v7 }
 0xaa3   :  { %24038 = vmatmul.mubr.f32.gmra.mrb[38].mxu0 %v27189_v12 }
 0xaa4   :  { %24116 = vmatprep.mubr.f32.mxu0 %v27238_v30 }
 0xaa5   :  { %23978 = vmatmul.mubr.f32.gmra.mrb[36].mxu1 %v27325_v26 }
 0xaa6   :  { %24046 = vmatprep.mubr.f32.mxu1 %v27295_v40 }
 0xb72   :  { %v24036_v61 = vpop.f32.mrb[36].mxu0 }
 0xb73   :  { %v11682_v51 = vmul.f32 0.5, %v24036_v61  ;;  %v11659_v43 = vpop.f32.mrb[37].mxu0 }
 0xb74   :  { %v11681_v56 = vmul.f32 0.5, %v11659_v43  ;;  %v23976_v52 = vpop.f32.mrb[34].mxu1 }
 0xb75   :  { %26851 = vtanh.f32 %v11682_v51  ;;  %v11072_v28 = vmul.f32 0.5, %v23976_v52  ;;  %v11049_v57 = vpop.f32.mrb[35].mxu1 }
 0xb76   :  { %26853 = vtanh.f32 %v11681_v56  ;;  %v11071_v18 = vmul.f32 0.5, %v11049_v57  ;;  %v24039_v14 = vpop.f32.mrb[38].mxu0 }
 0xb77   :  { %26855 = vtanh.f32 %v11072_v28  ;;  %v11671_v41 = vpop.f32.mrb[39].mxu0 }
 0xb78   :  { %26857 = vtanh.f32 %v11071_v18  ;;  %v23979_v11 = vpop.f32.mrb[36].mxu1  ;;  %v11683_v4 = vmul.f32 0.5, %v11671_v41 }
 0xb79   :  { %v11061_v60 = vpop.f32.mrb[37].mxu1  ;;  %26859 = vtanh.f32 %v24039_v14 }
 0xb7a   :  { %26861 = vtanh.f32 %v23979_v11  ;;  %v11073_v54 = vmul.f32 0.5, %v11061_v60 }
 0xb7b   :  { %26863 = vtanh.f32 %v11683_v4  ;;  %v21364_v4 = vld [vmem:[%s29845_s0 + $0x50] sm:$0xff] }
 0xb7c   :  { %26865 = vtanh.f32 %v11073_v54 }
 0xb7f   :  { %v26852_v29 = vpop.eup %26851 }
 0xb80   :  { %v26854_v23 = vpop.eup %26853  ;;  %v11688_v46 = vmul.f32 0.5, %v26852_v29 }
 0xb81   :  { %v26856_v44 = vpop.eup %26855  ;;  %v11687_v62 = vmul.f32 0.5, %v26854_v23 }
 0xb82   :  { %v26858_v61 = vpop.eup %26857  ;;  %v11691_v51 = vadd.f32 0.5, %v11688_v46  ;;  %v11078_v43 = vmul.f32 0.5, %v26856_v44  ;;  %v28349_v46 = vand.u32 4294901760, %v21364_v4 }
 0xb83   :  { %v11690_v56 = vadd.f32 0.5, %v11687_v62  ;;  %v11077_v52 = vmul.f32 0.5, %v26858_v61  ;;  %v26860_v28 = vpop.eup %26859 }
 0xb84   :  { %v11694_v57 = vmul.f32 %v11691_v51, %v28228_v2  ;;  %v11081_v18 = vadd.f32 0.5, %v11078_v43  ;;  %v26862_v41 = vpop.eup %26861 }
 0xb85   :  { %v11080_v14 = vadd.f32 0.5, %v11077_v52  ;;  %v11695_v11 = vmul.f32 %v26860_v28, %v11690_v56  ;;  %v26864_v54 = vpop.eup %26863 }
 0xb86   :  { %v11084_v60 = vmul.f32 %v11081_v18, %v28234_v1  ;;  %v26866_v2 = vpop.eup %26865  ;;  %v11689_v44 = vmul.f32 0.5, %v26864_v54  ;;  %v28353_v1 = vsub.f32 %v21364_v4, %v28349_v46 }
 0xb87   :  { %v28341_v49 = vadd.f32 %v11695_v11, %v11694_v57  ;;  %v11085_v29 = vmul.f32 %v26862_v41, %v11080_v14  ;;  %v11079_v62 = vmul.f32 0.5, %v26866_v2 }
 0xb88   :  { %v11692_v61 = vadd.f32 0.5, %v11689_v44  ;;  %v28356_v43 = vand.u32 4294901760, %v28353_v1 }
 0xb89   :  { %26867 = vtanh.f32 %v28341_v49  ;;  %v28347_v23 = vadd.f32 %v11085_v29, %v11084_v60  ;;  %v11082_v52 = vadd.f32 0.5, %v11079_v62 }
 0xb8a   :  { %v12433_v14 = vsub.f32 %v28353_v1, %v28356_v43 }
 0xb8b   :  { %26869 = vtanh.f32 %v28347_v23 }
 0xb8c   :  { %v28378_v2 = vand.u32 4294901760, %v12433_v14 }
 0xb93   :  { %v26868_v51 = vpop.eup %26867 }
 0xb94   :  { %v11698_v56 = vmul.f32 %v26868_v51, %v11692_v61 }
 0xb95   :  { %v26870_v28 = vpop.eup %26869 }
 0xb96   :  { %v11703_v57 = vand.u32 4294901760, %v11698_v56  ;;  %v28358_v18 = vmul.f32 %v26870_v28, %v11082_v52 }
 0xb98   :  { %29865 = vst [vmem:[#allocation8_spill] sm:$0xff] %v28358_v18  ;;  %v28363_v11 = vpack.c.bf16 %v11703_v57, %v28236_v50  ;;  %v11816_v41 = vsub.f32 %v11698_v56, %v11703_v57  ;;  %v28366_v60 = vpack.c.bf16 %v11703_v57, %v28349_v46  ;;  %v28369_v29 = vand.u32 4294901760, %v28358_v18 }
 0xb9a   :  { %v11823_v4 = vsub.f32 %v28358_v18, %v28369_v29  ;;  %25574 = vmatprep.subr.bf16.mxu1 %v28363_v11  ;;  %25598 = vmatprep.subr.bf16.mxu0 %v28366_v60  ;;  %v11817_v54 = vand.u32 4294901760, %v11816_v41  ;;  %v25605_v28 = vpack.c.bf16 %v11816_v41, %v28353_v1 }
 0xb9b   :  { %25576 = vmatpush3.bf16.msra.mxu1 %v28363_v11  ;;  %25600 = vmatpush3.bf16.msra.mxu0 %v28366_v60 }
 0xb9c   :  { %24044 = vmatprep.subr.mxu1 %v28369_v29  ;;  %v11818_v50 = vsub.f32 %v11816_v41, %v11817_v54  ;;  %v28380_v44 = vand.u32 4294901760, %v11823_v4  ;;  %v25589_v57 = vpack.c.bf16 %v11817_v54, %v28243_v6 }
 0xb9e   :  { %24117 = vmatmul.mubr.f32.vlgmr.msra.gmra.mrb[40].mxu0 %v27242_v32  ;;  %v11819_v62 = vand.u32 4294901760, %v11818_v50  ;;  %v11825_v61 = vsub.f32 %v11823_v4, %v28380_v44 }
 0xb9f   :  { %24045 = vmatpush3.msra.mxu1 %v28369_v29  ;;  %24119 = vmatprep.mubr.f32.mxu0 %v27240_v31 }
 0xba0   :  { %24047 = vmatmul.mubr.f32.vlgmr.msra.gmra.mrb[38].mxu1 %v27362_v53  ;;  %v25577_v51 = vpack.c.bf16 %v11819_v62, %v28265_v63  ;;  %v25601_v56 = vpack.c.bf16 %v11819_v62, %v28378_v2  ;;  %v11826_v52 = vand.u32 4294901760, %v11825_v61  ;;  %v25581_v63 = vpack.c.bf16 %v11816_v41, %v28240_v55 }
 0xba1   :  { %24049 = vmatprep.mubr.f32.mxu1 %v27368_v3  ;;  %v25613_v55 = vpack.c.bf16 %v11817_v54, %v28356_v43 }
 0xba2   :  { %25578 = vmatprep.subr.bf16.mxu1 %v25577_v51  ;;  %24120 = vmatmul.mubr.f32.gmra.mrb[42].mxu0 %v27245_v33 }
 0xba3   :  { %25602 = vmatprep.subr.bf16.mxu0 %v25601_v56  ;;  %25580 = vmatpush3.bf16.msra.mxu1 %v25577_v51 }
 0xba4   :  { %25604 = vmatpush3.bf16.msra.mxu0 %v25601_v56  ;;  %24050 = vmatmul.mubr.f32.gmra.mrb[40].mxu1 %v27374_v58 }
 0xba5   :  { %24056 = vmatprep.subr.mxu1 %v11826_v52  ;;  %25606 = vmatprep.subr.bf16.mxu0 %v25605_v28 }
 0xba6   :  { %24126 = vmatprep.mubr.f32.mxu0 %v27183_v9  ;;  %24058 = vmatprep.mubr.f32.mxu1 %v27285_v36 }
 0xba7   :  { %24127 = vmatmul.mubr.f32.vlgmr.msra.gmra.mrb[40].mxu0 %v27191_v13  ;;  %24057 = vmatpush3.msra.mxu1 %v11826_v52 }
 0xba8   :  { %25608 = vmatpush3.bf16.msra.mxu0 %v25605_v28  ;;  %24059 = vmatmul.mubr.f32.vlgmr.msra.gmra.mrb[38].mxu1 %v27315_v5 }
 0xba9   :  { %25582 = vmatprep.subr.bf16.mxu1 %v25581_v63  ;;  %25610 = vmatprep.subr.bf16.mxu0 %v28366_v60 }
 0xbaa   :  { %25584 = vmatpush3.bf16.msra.mxu1 %v25581_v63  ;;  %24129 = vmatprep.mubr.f32.mxu0 %v27185_v10 }
 0xbab   :  { %24068 = vmatprep.subr.mxu1 %v11823_v4  ;;  %24130 = vmatmul.mubr.f32.gmra.mrb[42].mxu0 %v27189_v12 }
 0xbac   :  { %24061 = vmatprep.mubr.f32.mxu1 %v27317_v7  ;;  %24136 = vmatprep.mubr.f32.mxu0 %v27199_v15 }
 0xbad   :  { %24062 = vmatmul.mubr.f32.gmra.mrb[40].mxu1 %v27325_v26 }
 0xbae   :  { %24069 = vmatpush3.msra.mxu1 %v11823_v4  ;;  %24070 = vmatprep.mubr.f32.mxu1 %v27288_v37 }
 0xbaf   :  { %25586 = vmatprep.subr.bf16.mxu1 %v28363_v11  ;;  %24137 = vmatmul.mubr.f32.vlgmr.msra.gmra.mrb[40].mxu0 %v27206_v17 }
 0xbb0   :  { %25612 = vmatpush3.bf16.msra.mxu0 %v28366_v60  ;;  %24139 = vmatprep.mubr.f32.mxu0 %v27202_v16 }
 0xbb1   :  { %25614 = vmatprep.subr.bf16.mxu0 %v25613_v55  ;;  %24071 = vmatmul.mubr.f32.vlgmr.msra.gmra.mrb[38].mxu1 %v27323_v25 }
 0xbb2   :  { %25588 = vmatpush3.bf16.msra.mxu1 %v28363_v11  ;;  %24073 = vmatprep.mubr.f32.mxu1 %v27328_v27 }
 0xbb3   :  { %24080 = vmatprep.subr.mxu1 %v28369_v29  ;;  %24140 = vmatmul.mubr.f32.gmra.mrb[42].mxu0 %v27212_v19 }
 0xbb4   :  { %24146 = vmatprep.mubr.f32.mxu0 %v27215_v20 }
 0xbb5   :  { %24074 = vmatmul.mubr.f32.gmra.mrb[40].mxu1 %v27337_v39 }
 0xbb6   :  { %24081 = vmatpush3.msra.mxu1 %v28369_v29  ;;  %24082 = vmatprep.mubr.f32.mxu1 %v27291_v38 }
 0xbb7   :  { %25590 = vmatprep.subr.bf16.mxu1 %v25589_v57  ;;  %24147 = vmatmul.mubr.f32.vlgmr.msra.gmra.mrb[40].mxu0 %v27221_v22 }
 0xbb8   :  { %25616 = vmatpush3.bf16.msra.mxu0 %v25613_v55  ;;  %24149 = vmatprep.mubr.f32.mxu0 %v27218_v21 }
 0xbb9   :  { %25618 = vmatprep.subr.bf16.mxu0 %v28366_v60  ;;  %24083 = vmatmul.mubr.f32.vlgmr.msra.gmra.mrb[38].mxu1 %v27334_v35 }
 0xbba   :  { %25592 = vmatpush3.bf16.msra.mxu1 %v25589_v57  ;;  %24085 = vmatprep.mubr.f32.mxu1 %v27340_v42 }
 0xbbb   :  { %24092 = vmatprep.subr.mxu1 %v28380_v44  ;;  %24150 = vmatmul.mubr.f32.gmra.mrb[42].mxu0 %v27226_v24 }
 0xbbc   :  { %24156 = vmatprep.mubr.f32.mxu0 %v27183_v9 }
 0xbbd   :  { %24086 = vmatmul.mubr.f32.gmra.mrb[40].mxu1 %v27348_v47 }
 0xbbe   :  { %24093 = vmatpush3.msra.mxu1 %v28380_v44  ;;  %24094 = vmatprep.mubr.f32.mxu1 %v27285_v36 }
 0xbbf   :  { %25594 = vmatprep.subr.bf16.mxu1 %v28363_v11  ;;  %24157 = vmatmul.mubr.f32.vlgmr.msra.gmra.mrb[40].mxu0 %v27191_v13 }
 0xbc0   :  { %25620 = vmatpush3.bf16.msra.mxu0 %v28366_v60  ;;  %24159 = vmatprep.mubr.f32.mxu0 %v27185_v10 }
 0xbc1   :  { %24095 = vmatmul.mubr.f32.vlgmr.msra.gmra.mrb[38].mxu1 %v27315_v5 }
 0xbc2   :  { %25596 = vmatpush3.bf16.msra.mxu1 %v28363_v11  ;;  %24097 = vmatprep.mubr.f32.mxu1 %v27317_v7 }
 0xbc3   :  { %24104 = vmatprep.subr.mxu1 %v28369_v29  ;;  %24160 = vmatmul.mubr.f32.gmra.mrb[42].mxu0 %v27189_v12 }
 0xbc4   :  { %24166 = vmatprep.mubr.f32.mxu0 %v27183_v9 }
 0xbc5   :  { %24098 = vmatmul.mubr.f32.gmra.mrb[40].mxu1 %v27325_v26 }
 0xbc6   :  { %24105 = vmatpush3.msra.mxu1 %v28369_v29  ;;  %24106 = vmatprep.mubr.f32.mxu1 %v27285_v36 }
 0xbc7   :  { %24167 = vmatmul.mubr.f32.vlgmr.msra.gmra.mrb[40].mxu0 %v27191_v13 }
 0xbc8   :  { %24169 = vmatprep.mubr.f32.mxu0 %v27185_v10 }
 0xbc9   :  { %24107 = vmatmul.mubr.f32.vlgmr.msra.gmra.mrb[38].mxu1 %v27315_v5 }
 0xbca   :  { %24109 = vmatprep.mubr.f32.mxu1 %v27317_v7 }
 0xbcb   :  { %24170 = vmatmul.mubr.f32.gmra.mrb[42].mxu0 %v27189_v12 }
 0xbcc   :  { %24248 = vmatprep.mubr.f32.mxu0 %v27238_v30 }
 0xbcd   :  { %24110 = vmatmul.mubr.f32.gmra.mrb[40].mxu1 %v27325_v26 }
 0xbce   :  { %24178 = vmatprep.mubr.f32.mxu1 %v27295_v40 }
 0xc9a   :  { %v24168_v6 = vpop.f32.mrb[40].mxu0 }
 0xc9b   :  { %v12911_v14 = vmul.f32 0.5, %v24168_v6  ;;  %v12888_v11 = vpop.f32.mrb[41].mxu0 }
 0xc9c   :  { %v12910_v41 = vmul.f32 0.5, %v12888_v11  ;;  %v24108_v60 = vpop.f32.mrb[38].mxu1 }
 0xc9d   :  { %26871 = vtanh.f32 %v12911_v14  ;;  %v12301_v29 = vmul.f32 0.5, %v24108_v60  ;;  %v12278_v4 = vpop.f32.mrb[39].mxu1 }
 0xc9e   :  { %26873 = vtanh.f32 %v12910_v41  ;;  %v12300_v54 = vmul.f32 0.5, %v12278_v4  ;;  %v24171_v50 = vpop.f32.mrb[42].mxu0 }
 0xc9f   :  { %26875 = vtanh.f32 %v12301_v29  ;;  %v12900_v44 = vpop.f32.mrb[43].mxu0 }
 0xca0   :  { %26877 = vtanh.f32 %v12300_v54  ;;  %v24111_v62 = vpop.f32.mrb[40].mxu1  ;;  %v12912_v51 = vmul.f32 0.5, %v12900_v44 }
 0xca1   :  { %v12290_v61 = vpop.f32.mrb[41].mxu1  ;;  %26879 = vtanh.f32 %v24171_v50 }
 0xca2   :  { %26881 = vtanh.f32 %v24111_v62  ;;  %v12302_v52 = vmul.f32 0.5, %v12290_v61 }
 0xca3   :  { %26883 = vtanh.f32 %v12912_v51  ;;  %v21365_v51 = vld [vmem:[%s29845_s0 + $0x58] sm:$0xff] }
 0xca4   :  { %26885 = vtanh.f32 %v12302_v52 }
 0xca7   :  { %v26872_v56 = vpop.eup %26871 }
 0xca8   :  { %v26874_v28 = vpop.eup %26873  ;;  %v12917_v63 = vmul.f32 0.5, %v26872_v56 }
 0xca9   :  { %v26876_v55 = vpop.eup %26875  ;;  %v12916_v57 = vmul.f32 0.5, %v26874_v28 }
 0xcaa   :  { %v26878_v6 = vpop.eup %26877  ;;  %v12920_v14 = vadd.f32 0.5, %v12917_v63  ;;  %v12307_v11 = vmul.f32 0.5, %v26876_v55  ;;  %v28462_v63 = vand.u32 4294901760, %v21365_v51 }
 0xcab   :  { %v12919_v41 = vadd.f32 0.5, %v12916_v57  ;;  %v12306_v60 = vmul.f32 0.5, %v26878_v6  ;;  %v26880_v29 = vpop.eup %26879 }
 0xcac   :  { %v12923_v4 = vmul.f32 %v12920_v14, %v28341_v49  ;;  %v12310_v54 = vadd.f32 0.5, %v12307_v11  ;;  %v26882_v44 = vpop.eup %26881 }
 0xcad   :  { %v12309_v50 = vadd.f32 0.5, %v12306_v60  ;;  %v12924_v62 = vmul.f32 %v26880_v29, %v12919_v41  ;;  %v26884_v52 = vpop.eup %26883 }
 0xcae   :  { %v12313_v61 = vmul.f32 %v12310_v54, %v28347_v23  ;;  %v26886_v49 = vpop.eup %26885  ;;  %v12918_v55 = vmul.f32 0.5, %v26884_v52  ;;  %v28466_v23 = vsub.f32 %v21365_v51, %v28462_v63 }
 0xcaf   :  { %v28454_v18 = vadd.f32 %v12924_v62, %v12923_v4  ;;  %v12314_v56 = vmul.f32 %v26882_v44, %v12309_v50  ;;  %v12308_v57 = vmul.f32 0.5, %v26886_v49 }
 0xcb0   :  { %v12921_v6 = vadd.f32 0.5, %v12918_v55  ;;  %v28469_v11 = vand.u32 4294901760, %v28466_v23 }
 0xcb1   :  { %26887 = vtanh.f32 %v28454_v18  ;;  %v28460_v28 = vadd.f32 %v12314_v56, %v12313_v61  ;;  %v12311_v60 = vadd.f32 0.5, %v12308_v57 }
 0xcb2   :  { %v13662_v50 = vsub.f32 %v28466_v23, %v28469_v11 }
 0xcb3   :  { %26889 = vtanh.f32 %v28460_v28 }
 0xcb4   :  { %v28491_v49 = vand.u32 4294901760, %v13662_v50 }
 0xcbb   :  { %v26888_v14 = vpop.eup %26887 }
 0xcbc   :  { %v12927_v41 = vmul.f32 %v26888_v14, %v12921_v6 }
 0xcbd   :  { %v26890_v29 = vpop.eup %26889 }
 0xcbe   :  { %v12932_v4 = vand.u32 4294901760, %v12927_v41  ;;  %v28471_v54 = vmul.f32 %v26890_v29, %v12311_v60 }
 0xcc0   :  { %29866 = vst [vmem:[#allocation9_spill] sm:$0xff] %v28471_v54  ;;  %v28476_v62 = vpack.c.bf16 %v12932_v4, %v28349_v46  ;;  %v13045_v44 = vsub.f32 %v12927_v41, %v12932_v4  ;;  %v28479_v61 = vpack.c.bf16 %v12932_v4, %v28462_v63  ;;  %v28482_v56 = vand.u32 4294901760, %v28471_v54 }
 0xcc2   :  { %v13052_v51 = vsub.f32 %v28471_v54, %v28482_v56  ;;  %25622 = vmatprep.subr.bf16.mxu1 %v28476_v62  ;;  %25646 = vmatprep.subr.bf16.mxu0 %v28479_v61  ;;  %v13046_v52 = vand.u32 4294901760, %v13045_v44  ;;  %v25653_v29 = vpack.c.bf16 %v13045_v44, %v28466_v23 }
 0xcc3   :  { %25624 = vmatpush3.bf16.msra.mxu1 %v28476_v62  ;;  %25648 = vmatpush3.bf16.msra.mxu0 %v28479_v61 }
 0xcc4   :  { %24176 = vmatprep.subr.mxu1 %v28482_v56  ;;  %v13047_v46 = vsub.f32 %v13045_v44, %v13046_v52  ;;  %v28493_v55 = vand.u32 4294901760, %v13052_v51  ;;  %v25637_v4 = vpack.c.bf16 %v13046_v52, %v28356_v43 }
 0xcc6   :  { %24249 = vmatmul.mubr.f32.vlgmr.msra.gmra.mrb[44].mxu0 %v27242_v32  ;;  %v13048_v57 = vand.u32 4294901760, %v13047_v46  ;;  %v13054_v6 = vsub.f32 %v13052_v51, %v28493_v55 }
 0xcc7   :  { %24177 = vmatpush3.msra.mxu1 %v28482_v56  ;;  %24251 = vmatprep.mubr.f32.mxu0 %v27240_v31 }
 0xcc8   :  { %24179 = vmatmul.mubr.f32.vlgmr.msra.gmra.mrb[42].mxu1 %v27362_v53  ;;  %v25625_v14 = vpack.c.bf16 %v13048_v57, %v28378_v2  ;;  %v25649_v41 = vpack.c.bf16 %v13048_v57, %v28491_v49  ;;  %v13055_v60 = vand.u32 4294901760, %v13054_v6  ;;  %v25629_v2 = vpack.c.bf16 %v13045_v44, %v28353_v1 }
 0xcc9   :  { %24181 = vmatprep.mubr.f32.mxu1 %v27368_v3  ;;  %v25661_v1 = vpack.c.bf16 %v13046_v52, %v28469_v11 }
 0xcca   :  { %25626 = vmatprep.subr.bf16.mxu1 %v25625_v14  ;;  %24252 = vmatmul.mubr.f32.gmra.mrb[46].mxu0 %v27245_v33 }
 0xccb   :  { %25650 = vmatprep.subr.bf16.mxu0 %v25649_v41  ;;  %25628 = vmatpush3.bf16.msra.mxu1 %v25625_v14 }
 0xccc   :  { %25652 = vmatpush3.bf16.msra.mxu0 %v25649_v41  ;;  %24182 = vmatmul.mubr.f32.gmra.mrb[44].mxu1 %v27374_v58 }
 0xccd   :  { %24188 = vmatprep.subr.mxu1 %v13055_v60  ;;  %25654 = vmatprep.subr.bf16.mxu0 %v25653_v29 }
 0xcce   :  { %24258 = vmatprep.mubr.f32.mxu0 %v27183_v9  ;;  %24190 = vmatprep.mubr.f32.mxu1 %v27285_v36 }
 0xccf   :  { %24259 = vmatmul.mubr.f32.vlgmr.msra.gmra.mrb[44].mxu0 %v27191_v13  ;;  %24189 = vmatpush3.msra.mxu1 %v13055_v60 }
 0xcd0   :  { %25656 = vmatpush3.bf16.msra.mxu0 %v25653_v29  ;;  %24191 = vmatmul.mubr.f32.vlgmr.msra.gmra.mrb[42].mxu1 %v27315_v5 }
 0xcd1   :  { %25630 = vmatprep.subr.bf16.mxu1 %v25629_v2  ;;  %25658 = vmatprep.subr.bf16.mxu0 %v28479_v61 }
 0xcd2   :  { %25632 = vmatpush3.bf16.msra.mxu1 %v25629_v2  ;;  %24261 = vmatprep.mubr.f32.mxu0 %v27185_v10 }
 0xcd3   :  { %24200 = vmatprep.subr.mxu1 %v13052_v51  ;;  %24262 = vmatmul.mubr.f32.gmra.mrb[46].mxu0 %v27189_v12 }
 0xcd4   :  { %24193 = vmatprep.mubr.f32.mxu1 %v27317_v7  ;;  %24268 = vmatprep.mubr.f32.mxu0 %v27199_v15 }
 0xcd5   :  { %24194 = vmatmul.mubr.f32.gmra.mrb[44].mxu1 %v27325_v26 }
 0xcd6   :  { %24201 = vmatpush3.msra.mxu1 %v13052_v51  ;;  %24202 = vmatprep.mubr.f32.mxu1 %v27288_v37 }
 0xcd7   :  { %25634 = vmatprep.subr.bf16.mxu1 %v28476_v62  ;;  %24269 = vmatmul.mubr.f32.vlgmr.msra.gmra.mrb[44].mxu0 %v27206_v17 }
 0xcd8   :  { %25660 = vmatpush3.bf16.msra.mxu0 %v28479_v61  ;;  %24271 = vmatprep.mubr.f32.mxu0 %v27202_v16 }
 0xcd9   :  { %25662 = vmatprep.subr.bf16.mxu0 %v25661_v1  ;;  %24203 = vmatmul.mubr.f32.vlgmr.msra.gmra.mrb[42].mxu1 %v27323_v25 }
 0xcda   :  { %25636 = vmatpush3.bf16.msra.mxu1 %v28476_v62  ;;  %24205 = vmatprep.mubr.f32.mxu1 %v27328_v27 }
 0xcdb   :  { %24212 = vmatprep.subr.mxu1 %v28482_v56  ;;  %24272 = vmatmul.mubr.f32.gmra.mrb[46].mxu0 %v27212_v19 }
 0xcdc   :  { %24278 = vmatprep.mubr.f32.mxu0 %v27215_v20 }
 0xcdd   :  { %24206 = vmatmul.mubr.f32.gmra.mrb[44].mxu1 %v27337_v39 }
 0xcde   :  { %24213 = vmatpush3.msra.mxu1 %v28482_v56  ;;  %24214 = vmatprep.mubr.f32.mxu1 %v27291_v38 }
 0xcdf   :  { %25638 = vmatprep.subr.bf16.mxu1 %v25637_v4  ;;  %24279 = vmatmul.mubr.f32.vlgmr.msra.gmra.mrb[44].mxu0 %v27221_v22 }
 0xce0   :  { %25664 = vmatpush3.bf16.msra.mxu0 %v25661_v1  ;;  %24281 = vmatprep.mubr.f32.mxu0 %v27218_v21 }
 0xce1   :  { %25666 = vmatprep.subr.bf16.mxu0 %v28479_v61  ;;  %24215 = vmatmul.mubr.f32.vlgmr.msra.gmra.mrb[42].mxu1 %v27334_v35 }
 0xce2   :  { %25640 = vmatpush3.bf16.msra.mxu1 %v25637_v4  ;;  %24217 = vmatprep.mubr.f32.mxu1 %v27340_v42 }
 0xce3   :  { %24224 = vmatprep.subr.mxu1 %v28493_v55  ;;  %24282 = vmatmul.mubr.f32.gmra.mrb[46].mxu0 %v27226_v24 }
 0xce4   :  { %24288 = vmatprep.mubr.f32.mxu0 %v27183_v9 }
 0xce5   :  { %24218 = vmatmul.mubr.f32.gmra.mrb[44].mxu1 %v27348_v47 }
 0xce6   :  { %24225 = vmatpush3.msra.mxu1 %v28493_v55  ;;  %24226 = vmatprep.mubr.f32.mxu1 %v27285_v36 }
 0xce7   :  { %25642 = vmatprep.subr.bf16.mxu1 %v28476_v62  ;;  %24289 = vmatmul.mubr.f32.vlgmr.msra.gmra.mrb[44].mxu0 %v27191_v13 }
 0xce8   :  { %25668 = vmatpush3.bf16.msra.mxu0 %v28479_v61  ;;  %24291 = vmatprep.mubr.f32.mxu0 %v27185_v10 }
 0xce9   :  { %24227 = vmatmul.mubr.f32.vlgmr.msra.gmra.mrb[42].mxu1 %v27315_v5 }
 0xcea   :  { %25644 = vmatpush3.bf16.msra.mxu1 %v28476_v62  ;;  %24229 = vmatprep.mubr.f32.mxu1 %v27317_v7 }
 0xceb   :  { %24236 = vmatprep.subr.mxu1 %v28482_v56  ;;  %24292 = vmatmul.mubr.f32.gmra.mrb[46].mxu0 %v27189_v12 }
 0xcec   :  { %24298 = vmatprep.mubr.f32.mxu0 %v27183_v9 }
 0xced   :  { %24230 = vmatmul.mubr.f32.gmra.mrb[44].mxu1 %v27325_v26 }
 0xcee   :  { %24237 = vmatpush3.msra.mxu1 %v28482_v56  ;;  %24238 = vmatprep.mubr.f32.mxu1 %v27285_v36 }
 0xcef   :  { %24299 = vmatmul.mubr.f32.vlgmr.msra.gmra.mrb[44].mxu0 %v27191_v13 }
 0xcf0   :  { %24301 = vmatprep.mubr.f32.mxu0 %v27185_v10 }
 0xcf1   :  { %24239 = vmatmul.mubr.f32.vlgmr.msra.gmra.mrb[42].mxu1 %v27315_v5 }
 0xcf2   :  { %24241 = vmatprep.mubr.f32.mxu1 %v27317_v7 }
 0xcf3   :  { %24302 = vmatmul.mubr.f32.gmra.mrb[46].mxu0 %v27189_v12 }
 0xcf4   :  { %24380 = vmatprep.mubr.f32.mxu0 %v27238_v30 }
 0xcf5   :  { %24242 = vmatmul.mubr.f32.gmra.mrb[44].mxu1 %v27325_v26 }
 0xcf6   :  { %24310 = vmatprep.mubr.f32.mxu1 %v27295_v40 }
 0xdc2   :  { %v24300_v43 = vpop.f32.mrb[44].mxu0 }
 0xdc3   :  { %v14140_v50 = vmul.f32 0.5, %v24300_v43  ;;  %v14117_v62 = vpop.f32.mrb[45].mxu0 }
 0xdc4   :  { %v14139_v44 = vmul.f32 0.5, %v14117_v62  ;;  %v24240_v61 = vpop.f32.mrb[42].mxu1 }
 0xdc5   :  { %26891 = vtanh.f32 %v14140_v50  ;;  %v13530_v56 = vmul.f32 0.5, %v24240_v61  ;;  %v13507_v51 = vpop.f32.mrb[43].mxu1 }
 0xdc6   :  { %26893 = vtanh.f32 %v14139_v44  ;;  %v13529_v52 = vmul.f32 0.5, %v13507_v51  ;;  %v24303_v46 = vpop.f32.mrb[46].mxu0 }
 0xdc7   :  { %26895 = vtanh.f32 %v13530_v56  ;;  %v14129_v55 = vpop.f32.mrb[47].mxu0 }
 0xdc8   :  { %26897 = vtanh.f32 %v13529_v52  ;;  %v24243_v57 = vpop.f32.mrb[44].mxu1  ;;  %v14141_v14 = vmul.f32 0.5, %v14129_v55 }
 0xdc9   :  { %v13519_v6 = vpop.f32.mrb[45].mxu1  ;;  %26899 = vtanh.f32 %v24303_v46 }
 0xdca   :  { %26901 = vtanh.f32 %v24243_v57  ;;  %v13531_v60 = vmul.f32 0.5, %v13519_v6 }
 0xdcb   :  { %26903 = vtanh.f32 %v14141_v14  ;;  %v21366_v14 = vld [vmem:[%s29845_s0 + $0x60] sm:$0xff] }
 0xdcc   :  { %26905 = vtanh.f32 %v13531_v60 }
 0xdcf   :  { %v26892_v41 = vpop.eup %26891 }
 0xdd0   :  { %v26894_v29 = vpop.eup %26893  ;;  %v14146_v2 = vmul.f32 0.5, %v26892_v41 }
 0xdd1   :  { %v26896_v1 = vpop.eup %26895  ;;  %v14145_v4 = vmul.f32 0.5, %v26894_v29 }
 0xdd2   :  { %v26898_v43 = vpop.eup %26897  ;;  %v14149_v50 = vadd.f32 0.5, %v14146_v2  ;;  %v13536_v62 = vmul.f32 0.5, %v26896_v1  ;;  %v28575_v2 = vand.u32 4294901760, %v21366_v14 }
 0xdd3   :  { %v14148_v44 = vadd.f32 0.5, %v14145_v4  ;;  %v13535_v61 = vmul.f32 0.5, %v26898_v43  ;;  %v26900_v56 = vpop.eup %26899 }
 0xdd4   :  { %v14152_v51 = vmul.f32 %v14149_v50, %v28454_v18  ;;  %v13539_v52 = vadd.f32 0.5, %v13536_v62  ;;  %v26902_v55 = vpop.eup %26901 }
 0xdd5   :  { %v13538_v46 = vadd.f32 0.5, %v13535_v61  ;;  %v14153_v57 = vmul.f32 %v26900_v56, %v14148_v44  ;;  %v26904_v60 = vpop.eup %26903 }
 0xdd6   :  { %v13542_v6 = vmul.f32 %v13539_v52, %v28460_v28  ;;  %v26906_v18 = vpop.eup %26905  ;;  %v14147_v1 = vmul.f32 0.5, %v26904_v60  ;;  %v28579_v28 = vsub.f32 %v21366_v14, %v28575_v2 }
 0xdd7   :  { %v28567_v54 = vadd.f32 %v14153_v57, %v14152_v51  ;;  %v13543_v41 = vmul.f32 %v26902_v55, %v13538_v46  ;;  %v13537_v4 = vmul.f32 0.5, %v26906_v18 }
 0xdd8   :  { %v14150_v43 = vadd.f32 0.5, %v14147_v1  ;;  %v28582_v62 = vand.u32 4294901760, %v28579_v28 }
 0xdd9   :  { %26907 = vtanh.f32 %v28567_v54  ;;  %v28573_v29 = vadd.f32 %v13543_v41, %v13542_v6  ;;  %v13540_v61 = vadd.f32 0.5, %v13537_v4 }
 0xdda   :  { %v14891_v46 = vsub.f32 %v28579_v28, %v28582_v62 }
 0xddb   :  { %26909 = vtanh.f32 %v28573_v29 }
 0xddc   :  { %v28604_v18 = vand.u32 4294901760, %v14891_v46 }
 0xde3   :  { %v26908_v50 = vpop.eup %26907 }
 0xde4   :  { %v14156_v44 = vmul.f32 %v26908_v50, %v14150_v43 }
 0xde5   :  { %v26910_v56 = vpop.eup %26909 }
 0xde6   :  { %v14161_v51 = vand.u32 4294901760, %v14156_v44  ;;  %v28584_v52 = vmul.f32 %v26910_v56, %v13540_v61 }
 0xde8   :  { %29867 = vst [vmem:[#allocation10_spill] sm:$0xff] %v28584_v52  ;;  %v28589_v57 = vpack.c.bf16 %v14161_v51, %v28462_v63  ;;  %v14274_v55 = vsub.f32 %v14156_v44, %v14161_v51  ;;  %v28592_v6 = vpack.c.bf16 %v14161_v51, %v28575_v2  ;;  %v28595_v41 = vand.u32 4294901760, %v28584_v52 }
 0xdea   :  { %v14281_v14 = vsub.f32 %v28584_v52, %v28595_v41  ;;  %25670 = vmatprep.subr.bf16.mxu1 %v28589_v57  ;;  %25694 = vmatprep.subr.bf16.mxu0 %v28592_v6  ;;  %v14275_v60 = vand.u32 4294901760, %v14274_v55  ;;  %v25701_v56 = vpack.c.bf16 %v14274_v55, %v28579_v28 }
 0xdeb   :  { %25672 = vmatpush3.bf16.msra.mxu1 %v28589_v57  ;;  %25696 = vmatpush3.bf16.msra.mxu0 %v28592_v6 }
 0xdec   :  { %24308 = vmatprep.subr.mxu1 %v28595_v41  ;;  %v14276_v63 = vsub.f32 %v14274_v55, %v14275_v60  ;;  %v28606_v1 = vand.u32 4294901760, %v14281_v14  ;;  %v25685_v51 = vpack.c.bf16 %v14275_v60, %v28469_v11 }
 0xdee   :  { %24381 = vmatmul.mubr.f32.vlgmr.msra.gmra.mrb[48].mxu0 %v27242_v32  ;;  %v14277_v4 = vand.u32 4294901760, %v14276_v63  ;;  %v14283_v43 = vsub.f32 %v14281_v14, %v28606_v1 }
 0xdef   :  { %24309 = vmatpush3.msra.mxu1 %v28595_v41  ;;  %24383 = vmatprep.mubr.f32.mxu0 %v27240_v31 }
 0xdf0   :  { %24311 = vmatmul.mubr.f32.vlgmr.msra.gmra.mrb[46].mxu1 %v27362_v53  ;;  %v25673_v50 = vpack.c.bf16 %v14277_v4, %v28491_v49  ;;  %v25697_v44 = vpack.c.bf16 %v14277_v4, %v28604_v18  ;;  %v14284_v61 = vand.u32 4294901760, %v14283_v43  ;;  %v25677_v49 = vpack.c.bf16 %v14274_v55, %v28466_v23 }
 0xdf1   :  { %24313 = vmatprep.mubr.f32.mxu1 %v27368_v3  ;;  %v25709_v23 = vpack.c.bf16 %v14275_v60, %v28582_v62 }
 0xdf2   :  { %25674 = vmatprep.subr.bf16.mxu1 %v25673_v50  ;;  %24384 = vmatmul.mubr.f32.gmra.mrb[50].mxu0 %v27245_v33 }
 0xdf3   :  { %25698 = vmatprep.subr.bf16.mxu0 %v25697_v44  ;;  %25676 = vmatpush3.bf16.msra.mxu1 %v25673_v50 }
 0xdf4   :  { %25700 = vmatpush3.bf16.msra.mxu0 %v25697_v44  ;;  %24314 = vmatmul.mubr.f32.gmra.mrb[48].mxu1 %v27374_v58 }
 0xdf5   :  { %24320 = vmatprep.subr.mxu1 %v14284_v61  ;;  %25702 = vmatprep.subr.bf16.mxu0 %v25701_v56 }
 0xdf6   :  { %24390 = vmatprep.mubr.f32.mxu0 %v27183_v9  ;;  %24322 = vmatprep.mubr.f32.mxu1 %v27285_v36 }
 0xdf7   :  { %24391 = vmatmul.mubr.f32.vlgmr.msra.gmra.mrb[48].mxu0 %v27191_v13  ;;  %24321 = vmatpush3.msra.mxu1 %v14284_v61 }
 0xdf8   :  { %25704 = vmatpush3.bf16.msra.mxu0 %v25701_v56  ;;  %24323 = vmatmul.mubr.f32.vlgmr.msra.gmra.mrb[46].mxu1 %v27315_v5 }
 0xdf9   :  { %25678 = vmatprep.subr.bf16.mxu1 %v25677_v49  ;;  %25706 = vmatprep.subr.bf16.mxu0 %v28592_v6 }
 0xdfa   :  { %25680 = vmatpush3.bf16.msra.mxu1 %v25677_v49  ;;  %24393 = vmatprep.mubr.f32.mxu0 %v27185_v10 }
 0xdfb   :  { %24332 = vmatprep.subr.mxu1 %v14281_v14  ;;  %24394 = vmatmul.mubr.f32.gmra.mrb[50].mxu0 %v27189_v12 }
 0xdfc   :  { %24325 = vmatprep.mubr.f32.mxu1 %v27317_v7  ;;  %24400 = vmatprep.mubr.f32.mxu0 %v27199_v15 }
 0xdfd   :  { %24326 = vmatmul.mubr.f32.gmra.mrb[48].mxu1 %v27325_v26 }
 0xdfe   :  { %24333 = vmatpush3.msra.mxu1 %v14281_v14  ;;  %24334 = vmatprep.mubr.f32.mxu1 %v27288_v37 }
 0xdff   :  { %25682 = vmatprep.subr.bf16.mxu1 %v28589_v57  ;;  %24401 = vmatmul.mubr.f32.vlgmr.msra.gmra.mrb[48].mxu0 %v27206_v17 }
 0xe00   :  { %25708 = vmatpush3.bf16.msra.mxu0 %v28592_v6  ;;  %24403 = vmatprep.mubr.f32.mxu0 %v27202_v16 }
 0xe01   :  { %25710 = vmatprep.subr.bf16.mxu0 %v25709_v23  ;;  %24335 = vmatmul.mubr.f32.vlgmr.msra.gmra.mrb[46].mxu1 %v27323_v25 }
 0xe02   :  { %25684 = vmatpush3.bf16.msra.mxu1 %v28589_v57  ;;  %24337 = vmatprep.mubr.f32.mxu1 %v27328_v27 }
 0xe03   :  { %24344 = vmatprep.subr.mxu1 %v28595_v41  ;;  %24404 = vmatmul.mubr.f32.gmra.mrb[50].mxu0 %v27212_v19 }
 0xe04   :  { %24410 = vmatprep.mubr.f32.mxu0 %v27215_v20 }
 0xe05   :  { %24338 = vmatmul.mubr.f32.gmra.mrb[48].mxu1 %v27337_v39 }
 0xe06   :  { %24345 = vmatpush3.msra.mxu1 %v28595_v41  ;;  %24346 = vmatprep.mubr.f32.mxu1 %v27291_v38 }
 0xe07   :  { %25686 = vmatprep.subr.bf16.mxu1 %v25685_v51  ;;  %24411 = vmatmul.mubr.f32.vlgmr.msra.gmra.mrb[48].mxu0 %v27221_v22 }
 0xe08   :  { %25712 = vmatpush3.bf16.msra.mxu0 %v25709_v23  ;;  %24413 = vmatprep.mubr.f32.mxu0 %v27218_v21 }
 0xe09   :  { %25714 = vmatprep.subr.bf16.mxu0 %v28592_v6  ;;  %24347 = vmatmul.mubr.f32.vlgmr.msra.gmra.mrb[46].mxu1 %v27334_v35 }
 0xe0a   :  { %25688 = vmatpush3.bf16.msra.mxu1 %v25685_v51  ;;  %24349 = vmatprep.mubr.f32.mxu1 %v27340_v42 }
 0xe0b   :  { %24356 = vmatprep.subr.mxu1 %v28606_v1  ;;  %24414 = vmatmul.mubr.f32.gmra.mrb[50].mxu0 %v27226_v24 }
 0xe0c   :  { %24420 = vmatprep.mubr.f32.mxu0 %v27183_v9 }
 0xe0d   :  { %24350 = vmatmul.mubr.f32.gmra.mrb[48].mxu1 %v27348_v47 }
 0xe0e   :  { %24357 = vmatpush3.msra.mxu1 %v28606_v1  ;;  %24358 = vmatprep.mubr.f32.mxu1 %v27285_v36 }
 0xe0f   :  { %25690 = vmatprep.subr.bf16.mxu1 %v28589_v57  ;;  %24421 = vmatmul.mubr.f32.vlgmr.msra.gmra.mrb[48].mxu0 %v27191_v13 }
 0xe10   :  { %25716 = vmatpush3.bf16.msra.mxu0 %v28592_v6  ;;  %24423 = vmatprep.mubr.f32.mxu0 %v27185_v10 }
 0xe11   :  { %24359 = vmatmul.mubr.f32.vlgmr.msra.gmra.mrb[46].mxu1 %v27315_v5 }
 0xe12   :  { %25692 = vmatpush3.bf16.msra.mxu1 %v28589_v57  ;;  %24361 = vmatprep.mubr.f32.mxu1 %v27317_v7 }
 0xe13   :  { %24368 = vmatprep.subr.mxu1 %v28595_v41  ;;  %24424 = vmatmul.mubr.f32.gmra.mrb[50].mxu0 %v27189_v12 }
 0xe14   :  { %24430 = vmatprep.mubr.f32.mxu0 %v27183_v9 }
 0xe15   :  { %24362 = vmatmul.mubr.f32.gmra.mrb[48].mxu1 %v27325_v26 }
 0xe16   :  { %24369 = vmatpush3.msra.mxu1 %v28595_v41  ;;  %24370 = vmatprep.mubr.f32.mxu1 %v27285_v36 }
 0xe17   :  { %24431 = vmatmul.mubr.f32.vlgmr.msra.gmra.mrb[48].mxu0 %v27191_v13 }
 0xe18   :  { %24433 = vmatprep.mubr.f32.mxu0 %v27185_v10 }
 0xe19   :  { %24371 = vmatmul.mubr.f32.vlgmr.msra.gmra.mrb[46].mxu1 %v27315_v5 }
 0xe1a   :  { %24373 = vmatprep.mubr.f32.mxu1 %v27317_v7 }
 0xe1b   :  { %24434 = vmatmul.mubr.f32.gmra.mrb[50].mxu0 %v27189_v12 }
 0xe1c   :  { %24512 = vmatprep.mubr.f32.mxu0 %v27238_v30 }
 0xe1d   :  { %24374 = vmatmul.mubr.f32.gmra.mrb[48].mxu1 %v27325_v26 }
 0xe1e   :  { %24442 = vmatprep.mubr.f32.mxu1 %v27295_v40 }
 0xeea   :  { %v24432_v11 = vpop.f32.mrb[48].mxu0 }
 0xeeb   :  { %v15369_v46 = vmul.f32 0.5, %v24432_v11  ;;  %v15346_v57 = vpop.f32.mrb[49].mxu0 }
 0xeec   :  { %v15368_v55 = vmul.f32 0.5, %v15346_v57  ;;  %v24372_v6 = vpop.f32.mrb[46].mxu1 }
 0xeed   :  { %26911 = vtanh.f32 %v15369_v46  ;;  %v14759_v41 = vmul.f32 0.5, %v24372_v6  ;;  %v14736_v14 = vpop.f32.mrb[47].mxu1 }
 0xeee   :  { %26913 = vtanh.f32 %v15368_v55  ;;  %v14758_v60 = vmul.f32 0.5, %v14736_v14  ;;  %v24435_v63 = vpop.f32.mrb[50].mxu0 }
 0xeef   :  { %26915 = vtanh.f32 %v14759_v41  ;;  %v15358_v1 = vpop.f32.mrb[51].mxu0 }
 0xef0   :  { %26917 = vtanh.f32 %v14758_v60  ;;  %v24375_v4 = vpop.f32.mrb[48].mxu1  ;;  %v15370_v50 = vmul.f32 0.5, %v15358_v1 }
 0xef1   :  { %v14748_v43 = vpop.f32.mrb[49].mxu1  ;;  %26919 = vtanh.f32 %v24435_v63 }
 0xef2   :  { %26921 = vtanh.f32 %v24375_v4  ;;  %v14760_v61 = vmul.f32 0.5, %v14748_v43 }
 0xef3   :  { %26923 = vtanh.f32 %v15370_v50  ;;  %v21367_v50 = vld [vmem:[%s29845_s0 + $0x68] sm:$0xff] }
 0xef4   :  { %26925 = vtanh.f32 %v14760_v61 }
 0xef7   :  { %v26912_v44 = vpop.eup %26911 }
 0xef8   :  { %v26914_v56 = vpop.eup %26913  ;;  %v15375_v49 = vmul.f32 0.5, %v26912_v44 }
 0xef9   :  { %v26916_v23 = vpop.eup %26915  ;;  %v15374_v51 = vmul.f32 0.5, %v26914_v56 }
 0xefa   :  { %v26918_v11 = vpop.eup %26917  ;;  %v15378_v46 = vadd.f32 0.5, %v15375_v49  ;;  %v14765_v57 = vmul.f32 0.5, %v26916_v23  ;;  %v28688_v49 = vand.u32 4294901760, %v21367_v50 }
 0xefb   :  { %v15377_v55 = vadd.f32 0.5, %v15374_v51  ;;  %v14764_v6 = vmul.f32 0.5, %v26918_v11  ;;  %v26920_v41 = vpop.eup %26919 }
 0xefc   :  { %v15381_v14 = vmul.f32 %v15378_v46, %v28567_v54  ;;  %v14768_v60 = vadd.f32 0.5, %v14765_v57  ;;  %v26922_v1 = vpop.eup %26921 }
 0xefd   :  { %v14767_v63 = vadd.f32 0.5, %v14764_v6  ;;  %v15382_v4 = vmul.f32 %v26920_v41, %v15377_v55  ;;  %v26924_v61 = vpop.eup %26923 }
 0xefe   :  { %v14771_v43 = vmul.f32 %v14768_v60, %v28573_v29  ;;  %v26926_v54 = vpop.eup %26925  ;;  %v15376_v23 = vmul.f32 0.5, %v26924_v61  ;;  %v28692_v29 = vsub.f32 %v21367_v50, %v28688_v49 }
 0xeff   :  { %v28680_v52 = vadd.f32 %v15382_v4, %v15381_v14  ;;  %v14772_v44 = vmul.f32 %v26922_v1, %v14767_v63  ;;  %v14766_v51 = vmul.f32 0.5, %v26926_v54 }
 0xf00   :  { %v15379_v11 = vadd.f32 0.5, %v15376_v23  ;;  %v28695_v57 = vand.u32 4294901760, %v28692_v29 }
 0xf01   :  { %26927 = vtanh.f32 %v28680_v52  ;;  %v28686_v56 = vadd.f32 %v14772_v44, %v14771_v43  ;;  %v14769_v6 = vadd.f32 0.5, %v14766_v51 }
 0xf02   :  { %v16120_v63 = vsub.f32 %v28692_v29, %v28695_v57 }
 0xf03   :  { %26929 = vtanh.f32 %v28686_v56 }
 0xf04   :  { %v28717_v54 = vand.u32 4294901760, %v16120_v63 }
 0xf0b   :  { %v26928_v46 = vpop.eup %26927 }
 0xf0c   :  { %v15385_v55 = vmul.f32 %v26928_v46, %v15379_v11 }
 0xf0d   :  { %v26930_v41 = vpop.eup %26929 }
 0xf0e   :  { %v15390_v14 = vand.u32 4294901760, %v15385_v55  ;;  %v28697_v60 = vmul.f32 %v26930_v41, %v14769_v6 }
 0xf10   :  { %29868 = vst [vmem:[#allocation11_spill] sm:$0xff] %v28697_v60  ;;  %v28702_v4 = vpack.c.bf16 %v15390_v14, %v28575_v2  ;;  %v15503_v1 = vsub.f32 %v15385_v55, %v15390_v14  ;;  %v28705_v43 = vpack.c.bf16 %v15390_v14, %v28688_v49  ;;  %v28708_v44 = vand.u32 4294901760, %v28697_v60 }
 0xf12   :  { %v15510_v50 = vsub.f32 %v28697_v60, %v28708_v44  ;;  %25718 = vmatprep.subr.bf16.mxu1 %v28702_v4  ;;  %25742 = vmatprep.subr.bf16.mxu0 %v28705_v43  ;;  %v15504_v61 = vand.u32 4294901760, %v15503_v1  ;;  %v25749_v41 = vpack.c.bf16 %v15503_v1, %v28692_v29 }
 0xf13   :  { %25720 = vmatpush3.bf16.msra.mxu1 %v28702_v4  ;;  %25744 = vmatpush3.bf16.msra.mxu0 %v28705_v43 }
 0xf14   :  { %24440 = vmatprep.subr.mxu1 %v28708_v44  ;;  %v15505_v2 = vsub.f32 %v15503_v1, %v15504_v61  ;;  %v28719_v23 = vand.u32 4294901760, %v15510_v50  ;;  %v25733_v14 = vpack.c.bf16 %v15504_v61, %v28582_v62 }
 0xf16   :  { %24513 = vmatmul.mubr.f32.vlgmr.msra.gmra.mrb[52].mxu0 %v27242_v32  ;;  %v15506_v51 = vand.u32 4294901760, %v15505_v2  ;;  %v15512_v11 = vsub.f32 %v15510_v50, %v28719_v23 }
 0xf17   :  { %24441 = vmatpush3.msra.mxu1 %v28708_v44  ;;  %24515 = vmatprep.mubr.f32.mxu0 %v27240_v31 }
 0xf18   :  { %24443 = vmatmul.mubr.f32.vlgmr.msra.gmra.mrb[50].mxu1 %v27362_v53  ;;  %v25721_v46 = vpack.c.bf16 %v15506_v51, %v28604_v18  ;;  %v25745_v55 = vpack.c.bf16 %v15506_v51, %v28717_v54  ;;  %v15513_v6 = vand.u32 4294901760, %v15512_v11  ;;  %v25725_v18 = vpack.c.bf16 %v15503_v1, %v28579_v28 }
 0xf19   :  { %24445 = vmatprep.mubr.f32.mxu1 %v27368_v3  ;;  %v25757_v28 = vpack.c.bf16 %v15504_v61, %v28695_v57 }
 0xf1a   :  { %25722 = vmatprep.subr.bf16.mxu1 %v25721_v46  ;;  %24516 = vmatmul.mubr.f32.gmra.mrb[54].mxu0 %v27245_v33 }
 0xf1b   :  { %25746 = vmatprep.subr.bf16.mxu0 %v25745_v55  ;;  %25724 = vmatpush3.bf16.msra.mxu1 %v25721_v46 }
 0xf1c   :  { %25748 = vmatpush3.bf16.msra.mxu0 %v25745_v55  ;;  %24446 = vmatmul.mubr.f32.gmra.mrb[52].mxu1 %v27374_v58 }
 0xf1d   :  { %24452 = vmatprep.subr.mxu1 %v15513_v6  ;;  %25750 = vmatprep.subr.bf16.mxu0 %v25749_v41 }
 0xf1e   :  { %24522 = vmatprep.mubr.f32.mxu0 %v27183_v9  ;;  %24454 = vmatprep.mubr.f32.mxu1 %v27285_v36 }
 0xf1f   :  { %24523 = vmatmul.mubr.f32.vlgmr.msra.gmra.mrb[52].mxu0 %v27191_v13  ;;  %24453 = vmatpush3.msra.mxu1 %v15513_v6 }
 0xf20   :  { %25752 = vmatpush3.bf16.msra.mxu0 %v25749_v41  ;;  %24455 = vmatmul.mubr.f32.vlgmr.msra.gmra.mrb[50].mxu1 %v27315_v5 }
 0xf21   :  { %25726 = vmatprep.subr.bf16.mxu1 %v25725_v18  ;;  %25754 = vmatprep.subr.bf16.mxu0 %v28705_v43 }
 0xf22   :  { %25728 = vmatpush3.bf16.msra.mxu1 %v25725_v18  ;;  %24525 = vmatprep.mubr.f32.mxu0 %v27185_v10 }
 0xf23   :  { %24464 = vmatprep.subr.mxu1 %v15510_v50  ;;  %24526 = vmatmul.mubr.f32.gmra.mrb[54].mxu0 %v27189_v12 }
 0xf24   :  { %24457 = vmatprep.mubr.f32.mxu1 %v27317_v7  ;;  %24532 = vmatprep.mubr.f32.mxu0 %v27199_v15 }
 0xf25   :  { %24458 = vmatmul.mubr.f32.gmra.mrb[52].mxu1 %v27325_v26 }
 0xf26   :  { %24465 = vmatpush3.msra.mxu1 %v15510_v50  ;;  %24466 = vmatprep.mubr.f32.mxu1 %v27288_v37 }
 0xf27   :  { %25730 = vmatprep.subr.bf16.mxu1 %v28702_v4  ;;  %24533 = vmatmul.mubr.f32.vlgmr.msra.gmra.mrb[52].mxu0 %v27206_v17 }
 0xf28   :  { %25756 = vmatpush3.bf16.msra.mxu0 %v28705_v43  ;;  %24535 = vmatprep.mubr.f32.mxu0 %v27202_v16 }
 0xf29   :  { %25758 = vmatprep.subr.bf16.mxu0 %v25757_v28  ;;  %24467 = vmatmul.mubr.f32.vlgmr.msra.gmra.mrb[50].mxu1 %v27323_v25 }
 0xf2a   :  { %25732 = vmatpush3.bf16.msra.mxu1 %v28702_v4  ;;  %24469 = vmatprep.mubr.f32.mxu1 %v27328_v27 }
 0xf2b   :  { %24476 = vmatprep.subr.mxu1 %v28708_v44  ;;  %24536 = vmatmul.mubr.f32.gmra.mrb[54].mxu0 %v27212_v19 }
 0xf2c   :  { %24542 = vmatprep.mubr.f32.mxu0 %v27215_v20 }
 0xf2d   :  { %24470 = vmatmul.mubr.f32.gmra.mrb[52].mxu1 %v27337_v39 }
 0xf2e   :  { %24477 = vmatpush3.msra.mxu1 %v28708_v44  ;;  %24478 = vmatprep.mubr.f32.mxu1 %v27291_v38 }
 0xf2f   :  { %25734 = vmatprep.subr.bf16.mxu1 %v25733_v14  ;;  %24543 = vmatmul.mubr.f32.vlgmr.msra.gmra.mrb[52].mxu0 %v27221_v22 }
 0xf30   :  { %25760 = vmatpush3.bf16.msra.mxu0 %v25757_v28  ;;  %24545 = vmatprep.mubr.f32.mxu0 %v27218_v21 }
 0xf31   :  { %25762 = vmatprep.subr.bf16.mxu0 %v28705_v43  ;;  %24479 = vmatmul.mubr.f32.vlgmr.msra.gmra.mrb[50].mxu1 %v27334_v35 }
 0xf32   :  { %25736 = vmatpush3.bf16.msra.mxu1 %v25733_v14  ;;  %24481 = vmatprep.mubr.f32.mxu1 %v27340_v42 }
 0xf33   :  { %24488 = vmatprep.subr.mxu1 %v28719_v23  ;;  %24546 = vmatmul.mubr.f32.gmra.mrb[54].mxu0 %v27226_v24 }
 0xf34   :  { %24552 = vmatprep.mubr.f32.mxu0 %v27183_v9 }
 0xf35   :  { %24482 = vmatmul.mubr.f32.gmra.mrb[52].mxu1 %v27348_v47 }
 0xf36   :  { %24489 = vmatpush3.msra.mxu1 %v28719_v23  ;;  %24490 = vmatprep.mubr.f32.mxu1 %v27285_v36 }
 0xf37   :  { %25738 = vmatprep.subr.bf16.mxu1 %v28702_v4  ;;  %24553 = vmatmul.mubr.f32.vlgmr.msra.gmra.mrb[52].mxu0 %v27191_v13 }
 0xf38   :  { %25764 = vmatpush3.bf16.msra.mxu0 %v28705_v43  ;;  %24555 = vmatprep.mubr.f32.mxu0 %v27185_v10 }
 0xf39   :  { %24491 = vmatmul.mubr.f32.vlgmr.msra.gmra.mrb[50].mxu1 %v27315_v5 }
 0xf3a   :  { %25740 = vmatpush3.bf16.msra.mxu1 %v28702_v4  ;;  %24493 = vmatprep.mubr.f32.mxu1 %v27317_v7 }
 0xf3b   :  { %24500 = vmatprep.subr.mxu1 %v28708_v44  ;;  %24556 = vmatmul.mubr.f32.gmra.mrb[54].mxu0 %v27189_v12 }
 0xf3c   :  { %24562 = vmatprep.mubr.f32.mxu0 %v27183_v9 }
 0xf3d   :  { %24494 = vmatmul.mubr.f32.gmra.mrb[52].mxu1 %v27325_v26 }
 0xf3e   :  { %24501 = vmatpush3.msra.mxu1 %v28708_v44  ;;  %24502 = vmatprep.mubr.f32.mxu1 %v27285_v36 }
 0xf3f   :  { %24563 = vmatmul.mubr.f32.vlgmr.msra.gmra.mrb[52].mxu0 %v27191_v13 }
 0xf40   :  { %24565 = vmatprep.mubr.f32.mxu0 %v27185_v10 }
 0xf41   :  { %24503 = vmatmul.mubr.f32.vlgmr.msra.gmra.mrb[50].mxu1 %v27315_v5 }
 0xf42   :  { %24505 = vmatprep.mubr.f32.mxu1 %v27317_v7 }
 0xf43   :  { %24566 = vmatmul.mubr.f32.gmra.mrb[54].mxu0 %v27189_v12 }
 0xf44   :  { %24644 = vmatprep.mubr.f32.mxu0 %v27238_v30 }
 0xf45   :  { %24506 = vmatmul.mubr.f32.gmra.mrb[52].mxu1 %v27325_v26 }
 0xf46   :  { %24574 = vmatprep.mubr.f32.mxu1 %v27295_v40 }
0x1012   :  { %v24564_v62 = vpop.f32.mrb[52].mxu0 }
0x1013   :  { %v16598_v63 = vmul.f32 0.5, %v24564_v62  ;;  %v16575_v4 = vpop.f32.mrb[53].mxu0 }
0x1014   :  { %v16597_v1 = vmul.f32 0.5, %v16575_v4  ;;  %v24504_v43 = vpop.f32.mrb[50].mxu1 }
0x1015   :  { %26931 = vtanh.f32 %v16598_v63  ;;  %v15988_v44 = vmul.f32 0.5, %v24504_v43  ;;  %v15965_v50 = vpop.f32.mrb[51].mxu1 }
0x1016   :  { %26933 = vtanh.f32 %v16597_v1  ;;  %v15987_v61 = vmul.f32 0.5, %v15965_v50  ;;  %v24567_v2 = vpop.f32.mrb[54].mxu0 }
0x1017   :  { %26935 = vtanh.f32 %v15988_v44  ;;  %v16587_v23 = vpop.f32.mrb[55].mxu0 }
0x1018   :  { %26937 = vtanh.f32 %v15987_v61  ;;  %v24507_v51 = vpop.f32.mrb[52].mxu1  ;;  %v16599_v46 = vmul.f32 0.5, %v16587_v23 }
0x1019   :  { %v15977_v11 = vpop.f32.mrb[53].mxu1  ;;  %26939 = vtanh.f32 %v24567_v2 }
0x101a   :  { %26941 = vtanh.f32 %v24507_v51  ;;  %v15989_v6 = vmul.f32 0.5, %v15977_v11 }
0x101b   :  { %26943 = vtanh.f32 %v16599_v46  ;;  %v28798_v46 = vld [vmem:[%s29845_s0 + $0x70] sm:$0xff] }
0x101c   :  { %26945 = vtanh.f32 %v15989_v6  ;;  %29869 = vst [vmem:[#allocation12_spill] sm:$0xff] %v28798_v46 }
0x101f   :  { %v26932_v55 = vpop.eup %26931 }
0x1020   :  { %v26934_v41 = vpop.eup %26933  ;;  %v16604_v18 = vmul.f32 0.5, %v26932_v55 }
0x1021   :  { %v26936_v28 = vpop.eup %26935  ;;  %v16603_v14 = vmul.f32 0.5, %v26934_v41 }
0x1022   :  { %v26938_v62 = vpop.eup %26937  ;;  %v16607_v63 = vadd.f32 0.5, %v16604_v18  ;;  %v15994_v4 = vmul.f32 0.5, %v26936_v28 }
0x1023   :  { %v16606_v1 = vadd.f32 0.5, %v16603_v14  ;;  %v15993_v43 = vmul.f32 0.5, %v26938_v62  ;;  %v26940_v44 = vpop.eup %26939 }
0x1024   :  { %v16610_v50 = vmul.f32 %v16607_v63, %v28680_v52  ;;  %v15997_v61 = vadd.f32 0.5, %v15994_v4  ;;  %v26942_v23 = vpop.eup %26941  ;;  %v28804_v52 = vand.u32 4294901760, %v28798_v46 }
0x1025   :  { %v15996_v2 = vadd.f32 0.5, %v15993_v43  ;;  %v16611_v51 = vmul.f32 %v26940_v44, %v16606_v1  ;;  %v26944_v41 = vpop.eup %26943 }
0x1026   :  { %v16000_v11 = vmul.f32 %v15997_v61, %v28686_v56  ;;  %v26946_v18 = vpop.eup %26945  ;;  %v16605_v56 = vmul.f32 0.5, %v26944_v41  ;;  %v28809_v28 = vsub.f32 %v28798_v46, %v28804_v52 }
0x1027   :  { %v28793_v60 = vadd.f32 %v16611_v51, %v16610_v50  ;;  %v16001_v55 = vmul.f32 %v26942_v23, %v15996_v2  ;;  %v15995_v14 = vmul.f32 0.5, %v26946_v18 }
0x1028   :  { %v16608_v62 = vadd.f32 0.5, %v16605_v56  ;;  %v28812_v4 = vand.u32 4294901760, %v28809_v28 }
0x1029   :  { %26947 = vtanh.f32 %v28793_v60  ;;  %v28801_v6 = vadd.f32 %v16001_v55, %v16000_v11  ;;  %v15998_v43 = vadd.f32 0.5, %v15995_v14 }
0x102a   :  { %v17349_v2 = vsub.f32 %v28809_v28, %v28812_v4 }
0x102b   :  { %26949 = vtanh.f32 %v28801_v6 }
0x102c   :  { %v28834_v56 = vand.u32 4294901760, %v17349_v2 }
0x1033   :  { %v26948_v63 = vpop.eup %26947 }
0x1034   :  { %v16614_v1 = vmul.f32 %v26948_v63, %v16608_v62 }
0x1035   :  { %v26950_v44 = vpop.eup %26949 }
0x1036   :  { %v16619_v50 = vand.u32 4294901760, %v16614_v1  ;;  %v28814_v61 = vmul.f32 %v26950_v44, %v15998_v43 }
0x1038   :  { %v28819_v51 = vpack.c.bf16 %v16619_v50, %v28688_v49  ;;  %v16732_v23 = vsub.f32 %v16614_v1, %v16619_v50  ;;  %v28822_v11 = vpack.c.bf16 %v16619_v50, %v28804_v52  ;;  %v28825_v55 = vand.u32 4294901760, %v28814_v61 }
0x103a   :  { %v16739_v41 = vsub.f32 %v28814_v61, %v28825_v55  ;;  %25766 = vmatprep.subr.bf16.mxu1 %v28819_v51  ;;  %25790 = vmatprep.subr.bf16.mxu0 %v28822_v11  ;;  %v16733_v18 = vand.u32 4294901760, %v16732_v23  ;;  %v25797_v50 = vpack.c.bf16 %v16732_v23, %v28809_v28 }
0x103b   :  { %25768 = vmatpush3.bf16.msra.mxu1 %v28819_v51  ;;  %25792 = vmatpush3.bf16.msra.mxu0 %v28822_v11 }
0x103c   :  { %24572 = vmatprep.subr.mxu1 %v28825_v55  ;;  %v16734_v49 = vsub.f32 %v16732_v23, %v16733_v18  ;;  %v28836_v14 = vand.u32 4294901760, %v16739_v41  ;;  %v25781_v2 = vpack.c.bf16 %v16733_v18, %v28695_v57 }
0x103e   :  { %24645 = vmatmul.mubr.f32.vlgmr.msra.gmra.mrb[56].mxu0 %v27242_v32  ;;  %v16735_v62 = vand.u32 4294901760, %v16734_v49  ;;  %v16741_v63 = vsub.f32 %v16739_v41, %v28836_v14 }
0x103f   :  { %24573 = vmatpush3.msra.mxu1 %v28825_v55  ;;  %24647 = vmatprep.mubr.f32.mxu0 %v27240_v31 }
0x1040   :  { %24575 = vmatmul.mubr.f32.vlgmr.msra.gmra.mrb[54].mxu1 %v27362_v53  ;;  %v25769_v1 = vpack.c.bf16 %v16735_v62, %v28717_v54  ;;  %v25793_v43 = vpack.c.bf16 %v16735_v62, %v28834_v56  ;;  %v16742_v44 = vand.u32 4294901760, %v16741_v63  ;;  %v25773_v54 = vpack.c.bf16 %v16732_v23, %v28692_v29 }
0x1041   :  { %24577 = vmatprep.mubr.f32.mxu1 %v27368_v3  ;;  %v25805_v29 = vpack.c.bf16 %v16733_v18, %v28812_v4 }
0x1042   :  { %25770 = vmatprep.subr.bf16.mxu1 %v25769_v1  ;;  %24648 = vmatmul.mubr.f32.gmra.mrb[58].mxu0 %v27245_v33 }
0x1043   :  { %25794 = vmatprep.subr.bf16.mxu0 %v25793_v43  ;;  %25772 = vmatpush3.bf16.msra.mxu1 %v25769_v1 }
0x1044   :  { %25796 = vmatpush3.bf16.msra.mxu0 %v25793_v43  ;;  %24578 = vmatmul.mubr.f32.gmra.mrb[56].mxu1 %v27374_v58 }
0x1045   :  { %24584 = vmatprep.subr.mxu1 %v16742_v44  ;;  %25798 = vmatprep.subr.bf16.mxu0 %v25797_v50 }
0x1046   :  { %24654 = vmatprep.mubr.f32.mxu0 %v27183_v9  ;;  %24586 = vmatprep.mubr.f32.mxu1 %v27285_v36 }
0x1047   :  { %24655 = vmatmul.mubr.f32.vlgmr.msra.gmra.mrb[56].mxu0 %v27191_v13  ;;  %24585 = vmatpush3.msra.mxu1 %v16742_v44 }
0x1048   :  { %25800 = vmatpush3.bf16.msra.mxu0 %v25797_v50  ;;  %24587 = vmatmul.mubr.f32.vlgmr.msra.gmra.mrb[54].mxu1 %v27315_v5 }
0x1049   :  { %25774 = vmatprep.subr.bf16.mxu1 %v25773_v54  ;;  %25802 = vmatprep.subr.bf16.mxu0 %v28822_v11 }
0x104a   :  { %25776 = vmatpush3.bf16.msra.mxu1 %v25773_v54  ;;  %24657 = vmatprep.mubr.f32.mxu0 %v27185_v10 }
0x104b   :  { %24596 = vmatprep.subr.mxu1 %v16739_v41  ;;  %24658 = vmatmul.mubr.f32.gmra.mrb[58].mxu0 %v27189_v12 }
0x104c   :  { %24589 = vmatprep.mubr.f32.mxu1 %v27317_v7  ;;  %24664 = vmatprep.mubr.f32.mxu0 %v27199_v15 }
0x104d   :  { %24590 = vmatmul.mubr.f32.gmra.mrb[56].mxu1 %v27325_v26 }
0x104e   :  { %24597 = vmatpush3.msra.mxu1 %v16739_v41  ;;  %24598 = vmatprep.mubr.f32.mxu1 %v27288_v37 }
0x104f   :  { %25778 = vmatprep.subr.bf16.mxu1 %v28819_v51  ;;  %24665 = vmatmul.mubr.f32.vlgmr.msra.gmra.mrb[56].mxu0 %v27206_v17 }
0x1050   :  { %25804 = vmatpush3.bf16.msra.mxu0 %v28822_v11  ;;  %24667 = vmatprep.mubr.f32.mxu0 %v27202_v16 }
0x1051   :  { %25806 = vmatprep.subr.bf16.mxu0 %v25805_v29  ;;  %24599 = vmatmul.mubr.f32.vlgmr.msra.gmra.mrb[54].mxu1 %v27323_v25 }
0x1052   :  { %25780 = vmatpush3.bf16.msra.mxu1 %v28819_v51  ;;  %24601 = vmatprep.mubr.f32.mxu1 %v27328_v27 }
0x1053   :  { %24608 = vmatprep.subr.mxu1 %v28825_v55  ;;  %24668 = vmatmul.mubr.f32.gmra.mrb[58].mxu0 %v27212_v19 }
0x1054   :  { %24674 = vmatprep.mubr.f32.mxu0 %v27215_v20 }
0x1055   :  { %24602 = vmatmul.mubr.f32.gmra.mrb[56].mxu1 %v27337_v39 }
0x1056   :  { %24609 = vmatpush3.msra.mxu1 %v28825_v55  ;;  %24610 = vmatprep.mubr.f32.mxu1 %v27291_v38 }
0x1057   :  { %25782 = vmatprep.subr.bf16.mxu1 %v25781_v2  ;;  %24675 = vmatmul.mubr.f32.vlgmr.msra.gmra.mrb[56].mxu0 %v27221_v22 }
0x1058   :  { %25808 = vmatpush3.bf16.msra.mxu0 %v25805_v29  ;;  %24677 = vmatprep.mubr.f32.mxu0 %v27218_v21 }
0x1059   :  { %25810 = vmatprep.subr.bf16.mxu0 %v28822_v11  ;;  %24611 = vmatmul.mubr.f32.vlgmr.msra.gmra.mrb[54].mxu1 %v27334_v35 }
0x105a   :  { %25784 = vmatpush3.bf16.msra.mxu1 %v25781_v2  ;;  %24613 = vmatprep.mubr.f32.mxu1 %v27340_v42 }
0x105b   :  { %24620 = vmatprep.subr.mxu1 %v28836_v14  ;;  %24678 = vmatmul.mubr.f32.gmra.mrb[58].mxu0 %v27226_v24 }
0x105c   :  { %24684 = vmatprep.mubr.f32.mxu0 %v27183_v9 }
0x105d   :  { %24614 = vmatmul.mubr.f32.gmra.mrb[56].mxu1 %v27348_v47 }
0x105e   :  { %24621 = vmatpush3.msra.mxu1 %v28836_v14  ;;  %24622 = vmatprep.mubr.f32.mxu1 %v27285_v36 }
0x105f   :  { %25786 = vmatprep.subr.bf16.mxu1 %v28819_v51  ;;  %24685 = vmatmul.mubr.f32.vlgmr.msra.gmra.mrb[56].mxu0 %v27191_v13 }
0x1060   :  { %25812 = vmatpush3.bf16.msra.mxu0 %v28822_v11  ;;  %24687 = vmatprep.mubr.f32.mxu0 %v27185_v10 }
0x1061   :  { %24623 = vmatmul.mubr.f32.vlgmr.msra.gmra.mrb[54].mxu1 %v27315_v5 }
0x1062   :  { %25788 = vmatpush3.bf16.msra.mxu1 %v28819_v51  ;;  %24625 = vmatprep.mubr.f32.mxu1 %v27317_v7 }
0x1063   :  { %24632 = vmatprep.subr.mxu1 %v28825_v55  ;;  %24688 = vmatmul.mubr.f32.gmra.mrb[58].mxu0 %v27189_v12 }
0x1064   :  { %24694 = vmatprep.mubr.f32.mxu0 %v27183_v9 }
0x1065   :  { %24626 = vmatmul.mubr.f32.gmra.mrb[56].mxu1 %v27325_v26 }
0x1066   :  { %24633 = vmatpush3.msra.mxu1 %v28825_v55  ;;  %24634 = vmatprep.mubr.f32.mxu1 %v27285_v36 }
0x1067   :  { %24695 = vmatmul.mubr.f32.vlgmr.msra.gmra.mrb[56].mxu0 %v27191_v13 }
0x1068   :  { %24697 = vmatprep.mubr.f32.mxu0 %v27185_v10 }
0x1069   :  { %24635 = vmatmul.mubr.f32.vlgmr.msra.gmra.mrb[54].mxu1 %v27315_v5 }
0x106a   :  { %24637 = vmatprep.mubr.f32.mxu1 %v27317_v7 }
0x106b   :  { %24698 = vmatmul.mubr.f32.gmra.mrb[58].mxu0 %v27189_v12 }
0x106c   :  { %24776 = vmatprep.mubr.f32.mxu0 %v27238_v30 }
0x106d   :  { %24638 = vmatmul.mubr.f32.gmra.mrb[56].mxu1 %v27325_v26 }
0x106e   :  { %24706 = vmatprep.mubr.f32.mxu1 %v27295_v40 }
0x113a   :  { %v24696_v57 = vpop.f32.mrb[56].mxu0 }
0x113b   :  { %v17827_v51 = vmul.f32 0.5, %v24696_v57  ;;  %v17804_v23 = vpop.f32.mrb[57].mxu0 }
0x113c   :  { %v17826_v11 = vmul.f32 0.5, %v17804_v23  ;;  %v24636_v55 = vpop.f32.mrb[54].mxu1 }
0x113d   :  { %26951 = vtanh.f32 %v17827_v51  ;;  %v17217_v41 = vmul.f32 0.5, %v24636_v55  ;;  %v17194_v18 = vpop.f32.mrb[55].mxu1 }
0x113e   :  { %26953 = vtanh.f32 %v17826_v11  ;;  %v17216_v49 = vmul.f32 0.5, %v17194_v18  ;;  %v24699_v14 = vpop.f32.mrb[58].mxu0 }
0x113f   :  { %26955 = vtanh.f32 %v17217_v41  ;;  %v17816_v62 = vpop.f32.mrb[59].mxu0 }
0x1140   :  { %26957 = vtanh.f32 %v17216_v49  ;;  %v24639_v63 = vpop.f32.mrb[56].mxu1  ;;  %v17828_v1 = vmul.f32 0.5, %v17816_v62 }
0x1141   :  { %v17206_v30 = vpop.f32.mrb[57].mxu1  ;;  %26959 = vtanh.f32 %v24699_v14 }
0x1142   :  { %26961 = vtanh.f32 %v24639_v63  ;;  %v17218_v44 = vmul.f32 0.5, %v17206_v30 }
0x1143   :  { %26963 = vtanh.f32 %v17828_v1  ;;  %v28915_v1 = vld [vmem:[%s29845_s0 + $0x78] sm:$0xff] }
0x1144   :  { %26965 = vtanh.f32 %v17218_v44 }
0x1147   :  { %v26952_v43 = vpop.eup %26951 }
0x1148   :  { %v26954_v50 = vpop.eup %26953  ;;  %v17833_v54 = vmul.f32 0.5, %v26952_v43 }
0x1149   :  { %v26956_v29 = vpop.eup %26955  ;;  %v17832_v2 = vmul.f32 0.5, %v26954_v50 }
0x114a   :  { %v26958_v57 = vpop.eup %26957  ;;  %v17836_v51 = vadd.f32 0.5, %v17833_v54  ;;  %v17223_v23 = vmul.f32 0.5, %v26956_v29 }
0x114b   :  { %v17835_v11 = vadd.f32 0.5, %v17832_v2  ;;  %v17222_v55 = vmul.f32 0.5, %v26958_v57  ;;  %v26960_v41 = vpop.eup %26959 }
0x114c   :  { %v17839_v18 = vmul.f32 %v17836_v51, %v28793_v60  ;;  %v17226_v49 = vadd.f32 0.5, %v17223_v23  ;;  %v26962_v62 = vpop.eup %26961  ;;  %v28921_v60 = vand.u32 4294901760, %v28915_v1 }
0x114d   :  { %v17225_v14 = vadd.f32 0.5, %v17222_v55  ;;  %v17840_v63 = vmul.f32 %v26960_v41, %v17835_v11  ;;  %v26964_v50 = vpop.eup %26963 }
0x114e   :  { %v17229_v30 = vmul.f32 %v17226_v49, %v28801_v6  ;;  %v26966_v54 = vpop.eup %26965  ;;  %v17834_v6 = vmul.f32 0.5, %v26964_v50  ;;  %v28926_v29 = vsub.f32 %v28915_v1, %v28921_v60 }
0x114f   :  { %v28910_v46 = vadd.f32 %v17840_v63, %v17839_v18  ;;  %v17230_v43 = vmul.f32 %v26962_v62, %v17225_v14  ;;  %v17224_v2 = vmul.f32 0.5, %v26966_v54 }
0x1150   :  { %v17837_v57 = vadd.f32 0.5, %v17834_v6  ;;  %v28929_v23 = vand.u32 4294901760, %v28926_v29 }
0x1151   :  { %26967 = vtanh.f32 %v28910_v46  ;;  %v28918_v44 = vadd.f32 %v17230_v43, %v17229_v30  ;;  %v17227_v55 = vadd.f32 0.5, %v17224_v2 }
0x1152   :  { %v18578_v14 = vsub.f32 %v28926_v29, %v28929_v23 }
0x1153   :  { %26969 = vtanh.f32 %v28918_v44 }
0x1154   :  { %v28951_v6 = vand.u32 4294901760, %v18578_v14 }
0x115b   :  { %v26968_v51 = vpop.eup %26967 }
0x115c   :  { %v17843_v11 = vmul.f32 %v26968_v51, %v17837_v57 }
0x115d   :  { %v26970_v41 = vpop.eup %26969 }
0x115e   :  { %v17848_v18 = vand.u32 4294901760, %v17843_v11  ;;  %v28931_v49 = vmul.f32 %v26970_v41, %v17227_v55 }
0x1160   :  { %v28936_v63 = vpack.c.bf16 %v17848_v18, %v28804_v52  ;;  %v17961_v62 = vsub.f32 %v17843_v11, %v17848_v18  ;;  %v28939_v30 = vpack.c.bf16 %v17848_v18, %v28921_v60  ;;  %v28942_v43 = vand.u32 4294901760, %v28931_v49 }
0x1162   :  { %v17968_v50 = vsub.f32 %v28931_v49, %v28942_v43  ;;  %25814 = vmatprep.subr.bf16.mxu1 %v28936_v63  ;;  %25838 = vmatprep.subr.bf16.mxu0 %v28939_v30  ;;  %v17962_v54 = vand.u32 4294901760, %v17961_v62  ;;  %v25845_v41 = vpack.c.bf16 %v17961_v62, %v28926_v29 }
0x1163   :  { %25816 = vmatpush3.bf16.msra.mxu1 %v28936_v63  ;;  %25840 = vmatpush3.bf16.msra.mxu0 %v28939_v30 }
0x1164   :  { %24704 = vmatprep.subr.mxu1 %v28942_v43  ;;  %v17963_v52 = vsub.f32 %v17961_v62, %v17962_v54  ;;  %v28953_v2 = vand.u32 4294901760, %v17968_v50 }
0x1166   :  { %24777 = vmatmul.mubr.f32.vlgmr.msra.gmra.mrb[60].mxu0 %v27242_v32  ;;  %v17964_v57 = vand.u32 4294901760, %v17963_v52  ;;  %v17970_v51 = vsub.f32 %v17968_v50, %v28953_v2 }
0x1167   :  { %24705 = vmatpush3.msra.mxu1 %v28942_v43  ;;  %24779 = vmatprep.mubr.f32.mxu0 %v27240_v31  ;;  %v25821_v31 = vpack.c.bf16 %v17961_v62, %v28809_v28 }
0x1168   :  { %24707 = vmatmul.mubr.f32.vlgmr.msra.gmra.mrb[58].mxu1 %v27362_v53  ;;  %v25817_v11 = vpack.c.bf16 %v17964_v57, %v28834_v56  ;;  %v25841_v55 = vpack.c.bf16 %v17964_v57, %v28951_v6  ;;  %v17971_v32 = vand.u32 4294901760, %v17970_v51 }
0x1169   :  { %24709 = vmatprep.mubr.f32.mxu1 %v27368_v3 }
0x116a   :  { %25818 = vmatprep.subr.bf16.mxu1 %v25817_v11  ;;  %24780 = vmatmul.mubr.f32.gmra.mrb[62].mxu0 %v27245_v33  ;;  %v25853_v33 = vpack.c.bf16 %v17962_v54, %v28929_v23 }
0x116b   :  { %25842 = vmatprep.subr.bf16.mxu0 %v25841_v55  ;;  %25820 = vmatpush3.bf16.msra.mxu1 %v25817_v11 }
0x116c   :  { %25844 = vmatpush3.bf16.msra.mxu0 %v25841_v55  ;;  %24710 = vmatmul.mubr.f32.gmra.mrb[60].mxu1 %v27374_v58 }
0x116d   :  { %24716 = vmatprep.subr.mxu1 %v17971_v32  ;;  %25846 = vmatprep.subr.bf16.mxu0 %v25845_v41 }
0x116e   :  { %24786 = vmatprep.mubr.f32.mxu0 %v27183_v9  ;;  %24718 = vmatprep.mubr.f32.mxu1 %v27285_v36 }
0x116f   :  { %24787 = vmatmul.mubr.f32.vlgmr.msra.gmra.mrb[60].mxu0 %v27191_v13  ;;  %24717 = vmatpush3.msra.mxu1 %v17971_v32 }
0x1170   :  { %25848 = vmatpush3.bf16.msra.mxu0 %v25845_v41  ;;  %24719 = vmatmul.mubr.f32.vlgmr.msra.gmra.mrb[58].mxu1 %v27315_v5 }
0x1171   :  { %25822 = vmatprep.subr.bf16.mxu1 %v25821_v31  ;;  %25850 = vmatprep.subr.bf16.mxu0 %v28939_v30 }
0x1172   :  { %25824 = vmatpush3.bf16.msra.mxu1 %v25821_v31  ;;  %24789 = vmatprep.mubr.f32.mxu0 %v27185_v10 }
0x1173   :  { %24728 = vmatprep.subr.mxu1 %v17968_v50  ;;  %24790 = vmatmul.mubr.f32.gmra.mrb[62].mxu0 %v27189_v12 }
0x1174   :  { %24721 = vmatprep.mubr.f32.mxu1 %v27317_v7  ;;  %24796 = vmatprep.mubr.f32.mxu0 %v27199_v15  ;;  %v25829_v15 = vpack.c.bf16 %v17962_v54, %v28812_v4 }
0x1175   :  { %24722 = vmatmul.mubr.f32.gmra.mrb[60].mxu1 %v27325_v26 }
0x1176   :  { %24729 = vmatpush3.msra.mxu1 %v17968_v50  ;;  %24730 = vmatprep.mubr.f32.mxu1 %v27288_v37 }
0x1177   :  { %25826 = vmatprep.subr.bf16.mxu1 %v28936_v63  ;;  %24797 = vmatmul.mubr.f32.vlgmr.msra.gmra.mrb[60].mxu0 %v27206_v17  ;;  %v29861_v17 = vmov 0.0|0.0  }
0x1178   :  { %25852 = vmatpush3.bf16.msra.mxu0 %v28939_v30  ;;  %24799 = vmatprep.mubr.f32.mxu0 %v27202_v16  ;;  %v27123_v16 = vmov 0  }
0x1179   :  { %25854 = vmatprep.subr.bf16.mxu0 %v25853_v33  ;;  %24731 = vmatmul.mubr.f32.vlgmr.msra.gmra.mrb[58].mxu1 %v27323_v25 }
0x117a   :  { %25828 = vmatpush3.bf16.msra.mxu1 %v28936_v63  ;;  %24733 = vmatprep.mubr.f32.mxu1 %v27328_v27 }
0x117b   :  { %24740 = vmatprep.subr.mxu1 %v28942_v43  ;;  %24800 = vmatmul.mubr.f32.gmra.mrb[62].mxu0 %v27212_v19  ;;  %v19883_v19 = vld [vmem:[%s29850_s5] sm:$0xff] }
0x117c   :  { %24806 = vmatprep.mubr.f32.mxu0 %v27215_v20  ;;  %26679 = vset.pattern.permute.xlu0 %v27123_v16  ;;  %v19900_v20 = vld [vmem:[%s29850_s5 + $0x88] sm:$0xff] }
0x117d   :  { %24734 = vmatmul.mubr.f32.gmra.mrb[60].mxu1 %v27337_v39  ;;  %26680 = vset.pattern.permute.xlu1 %v27123_v16 }
0x117e   :  { %24741 = vmatpush3.msra.mxu1 %v28942_v43  ;;  %24742 = vmatprep.mubr.f32.mxu1 %v27291_v38 }
0x117f   :  { %25830 = vmatprep.subr.bf16.mxu1 %v25829_v15  ;;  %24807 = vmatmul.mubr.f32.vlgmr.msra.gmra.mrb[60].mxu0 %v27221_v22 }
0x1180   :  { %25856 = vmatpush3.bf16.msra.mxu0 %v25853_v33  ;;  %24809 = vmatprep.mubr.f32.mxu0 %v27218_v21 }
0x1181   :  { %25858 = vmatprep.subr.bf16.mxu0 %v28939_v30  ;;  %24743 = vmatmul.mubr.f32.vlgmr.msra.gmra.mrb[58].mxu1 %v27334_v35 }
0x1182   :  { %25832 = vmatpush3.bf16.msra.mxu1 %v25829_v15  ;;  %24745 = vmatprep.mubr.f32.mxu1 %v27340_v42 }
0x1183   :  { %24752 = vmatprep.subr.mxu1 %v28953_v2  ;;  %24810 = vmatmul.mubr.f32.gmra.mrb[62].mxu0 %v27226_v24 }
0x1184   :  { %24816 = vmatprep.mubr.f32.mxu0 %v27183_v9  ;;  %19917 = vperm.xlu1 %26680, %v19883_v19  }
0x1185   :  { %24746 = vmatmul.mubr.f32.gmra.mrb[60].mxu1 %v27348_v47 }
0x1186   :  { %24753 = vmatpush3.msra.mxu1 %v28953_v2  ;;  %24754 = vmatprep.mubr.f32.mxu1 %v27285_v36 }
0x1187   :  { %25834 = vmatprep.subr.bf16.mxu1 %v28936_v63  ;;  %24817 = vmatmul.mubr.f32.vlgmr.msra.gmra.mrb[60].mxu0 %v27191_v13 }
0x1188   :  { %25860 = vmatpush3.bf16.msra.mxu0 %v28939_v30  ;;  %24819 = vmatprep.mubr.f32.mxu0 %v27185_v10 }
0x1189   :  { %24755 = vmatmul.mubr.f32.vlgmr.msra.gmra.mrb[58].mxu1 %v27315_v5  ;;  %25885 = vmatprep.subr.bf16.mxu0 %v29861_v17 }
0x118a   :  { %25836 = vmatpush3.bf16.msra.mxu1 %v28936_v63  ;;  %24757 = vmatprep.mubr.f32.mxu1 %v27317_v7 }
0x118b   :  { %24764 = vmatprep.subr.mxu1 %v28942_v43  ;;  %24820 = vmatmul.mubr.f32.gmra.mrb[62].mxu0 %v27189_v12 }
0x118c   :  { %24826 = vmatprep.mubr.f32.mxu0 %v27183_v9  ;;  %v19899_v9 = vld [vmem:[%s29850_s5 + $0x80] sm:$0xff] }
0x118d   :  { %24758 = vmatmul.mubr.f32.gmra.mrb[60].mxu1 %v27325_v26  ;;  %19997 = vperm.xlu0 %26679, %v19899_v9  }
0x118e   :  { %24765 = vmatpush3.msra.mxu1 %v28942_v43  ;;  %24766 = vmatprep.mubr.f32.mxu1 %v27285_v36 }
0x118f   :  { %24827 = vmatmul.mubr.f32.vlgmr.msra.gmra.mrb[60].mxu0 %v27191_v13  ;;  %v19710_v13 = vld [vmem:[%s29845_s0] sm:$0xff] }
0x1190   :  { %24829 = vmatprep.mubr.f32.mxu0 %v27185_v10  ;;  %v19711_v10 = vld [vmem:[%s29845_s0 + $0x8] sm:$0xff] }
0x1191   :  { %24767 = vmatmul.mubr.f32.vlgmr.msra.gmra.mrb[58].mxu1 %v27315_v5  ;;  %20002 = vperm.xlu0 %26679, %v19900_v20  }
0x1192   :  { %24769 = vmatprep.mubr.f32.mxu1 %v27317_v7 }
0x1193   :  { %24830 = vmatmul.mubr.f32.gmra.mrb[62].mxu0 %v27189_v12  ;;  %v25886_v12 = vpack.c.bf16 %v19711_v10, %v19710_v13 }
0x1195   :  { %24770 = vmatmul.mubr.f32.gmra.mrb[60].mxu1 %v27325_v26  ;;  %25887 = vmatpush3.bf16.msra.mxu0 %v25886_v12 }
0x1196   :  { %24838 = vmatprep.mubr.f32.mxu1 %v27295_v40  ;;  %25888 = vmatprep.subr.bf16.mxu0 %v29861_v17 }
0x1262   :  { %v24828_v21 = vpop.f32.mrb[60].mxu0 }
0x1263   :  { %v19056_v22 = vmul.f32 0.5, %v24828_v21  ;;  %v19033_v24 = vpop.f32.mrb[61].mxu0 }
0x1264   :  { %v19055_v40 = vmul.f32 0.5, %v19033_v24  ;;  %v24768_v28 = vpop.f32.mrb[58].mxu1 }
0x1265   :  { %26971 = vtanh.f32 %v19056_v22  ;;  %v18446_v4 = vmul.f32 0.5, %v24768_v28  ;;  %v18423_v56 = vpop.f32.mrb[59].mxu1 }
0x1266   :  { %26973 = vtanh.f32 %v19055_v40  ;;  %v18445_v18 = vmul.f32 0.5, %v18423_v56  ;;  %v24831_v14 = vpop.f32.mrb[62].mxu0 }
0x1267   :  { %26975 = vtanh.f32 %v18446_v4  ;;  %v19045_v63 = vpop.f32.mrb[63].mxu0 }
0x1268   :  { %26977 = vtanh.f32 %v18445_v18  ;;  %v24771_v62 = vpop.f32.mrb[60].mxu1  ;;  %v19057_v43 = vmul.f32 0.5, %v19045_v63 }
0x1269   :  { %v18435_v30 = vpop.f32.mrb[61].mxu1  ;;  %26979 = vtanh.f32 %v24831_v14 }
0x126a   :  { %26981 = vtanh.f32 %v24771_v62  ;;  %v18447_v54 = vmul.f32 0.5, %v18435_v30 }
0x126b   :  { %26983 = vtanh.f32 %v19057_v43 }
0x126c   :  { %26985 = vtanh.f32 %v18447_v54 }
0x126f   :  { %v26972_v50 = vpop.eup %26971 }
0x1270   :  { %v26974_v52 = vpop.eup %26973  ;;  %v19062_v2 = vmul.f32 0.5, %v26972_v50 }
0x1271   :  { %v26976_v57 = vpop.eup %26975  ;;  %v19061_v51 = vmul.f32 0.5, %v26974_v52 }
0x1272   :  { %v26978_v11 = vpop.eup %26977  ;;  %v19065_v55 = vadd.f32 0.5, %v19062_v2  ;;  %v18452_v32 = vmul.f32 0.5, %v26976_v57 }
0x1273   :  { %v19064_v41 = vadd.f32 0.5, %v19061_v51  ;;  %v18451_v31 = vmul.f32 0.5, %v26978_v11  ;;  %v26980_v33 = vpop.eup %26979 }
0x1274   :  { %v19068_v15 = vmul.f32 %v19065_v55, %v28910_v46  ;;  %v18455_v9 = vadd.f32 0.5, %v18452_v32  ;;  %v26982_v16 = vpop.eup %26981 }
0x1275   :  { %v18454_v13 = vadd.f32 0.5, %v18451_v31  ;;  %v19069_v10 = vmul.f32 %v26980_v33, %v19064_v41  ;;  %v26984_v22 = vpop.eup %26983  ;;  %v19718_v41 = vld [vmem:[%s29845_s0 + $0x40] sm:$0xff]  ;;  %v19719_v31 = vld [vmem:[%s29845_s0 + $0x48] sm:$0xff]  ;;  %v19886_v33 = vld [vmem:[%s29850_s5 + $0x18] sm:$0xff] }
0x1276   :  { %v18458_v12 = vmul.f32 %v18455_v9, %v28918_v44  ;;  %v26986_v24 = vpop.eup %26985  ;;  %v19063_v40 = vmul.f32 0.5, %v26984_v22  ;;  %v25898_v9 = vpack.c.bf16 %v19719_v31, %v19718_v41  ;;  %v19723_v22 = vld [vmem:[%s29845_s0 + $0x68] sm:$0xff]  ;;  %v20546_v41 = vld [vmem:[%s29850_s5 + $0x198] sm:$0xff]  ;;  %v19735_v31 = vld [vmem:[%s29850_s5 + $0x120] sm:$0xff] }
0x1277   :  { %v19070_v19 = vadd.f32 %v19069_v10, %v19068_v15  ;;  %v18459_v20 = vmul.f32 %v26982_v16, %v18454_v13  ;;  %v18453_v28 = vmul.f32 0.5, %v26986_v24  ;;  %v19903_v15 = vld [vmem:[%s29850_s5 + $0xa0] sm:$0xff]  ;;  %v19720_v13 = vld [vmem:[%s29845_s0 + $0x50] sm:$0xff]  ;;  %v19721_v10 = vld [vmem:[%s29845_s0 + $0x58] sm:$0xff] }
0x1278   :  { %v19066_v4 = vadd.f32 0.5, %v19063_v40  ;;  %v19904_v16 = vld [vmem:[%s29850_s5 + $0xa8] sm:$0xff]  ;;  %v19905_v40 = vld [vmem:[%s29850_s5 + $0xb0] sm:$0xff] }
0x1279   :  { %26987 = vtanh.f32 %v19070_v19  ;;  %v29043_v21 = vadd.f32 %v18459_v20, %v18458_v12  ;;  %v18456_v18 = vadd.f32 0.5, %v18453_v28  ;;  %v19887_v12 = vld [vmem:[%s29850_s5 + $0x20] sm:$0xff]  ;;  %v25901_v19 = vpack.c.bf16 %v19721_v10, %v19720_v13  ;;  %v19888_v24 = vld [vmem:[%s29850_s5 + $0x28] sm:$0xff]  ;;  %v20871_v13 = vld [vmem:[%s29850_s5 + $0x1b8] sm:$0xff] }
0x127a   :  { %v19722_v20 = vld [vmem:[%s29845_s0 + $0x60] sm:$0xff] }
0x127b   :  { %26989 = vtanh.f32 %v29043_v21  ;;  %v25904_v28 = vpack.c.bf16 %v19723_v22, %v19722_v20  ;;  %v20872_v10 = vld [vmem:[%s29850_s5 + $0x1c0] sm:$0xff]  ;;  %v21002_v22 = vld [vmem:[%s29850_s5 + $0x1e8] sm:$0xff] }
0x127c   :  { %v21001_v20 = vld [vmem:[%s29850_s5 + $0x1e0] sm:$0xff] }
0x1283   :  { %v26988_v56 = vpop.eup %26987 }
0x1284   :  { %v19072_v46 = vmul.f32 %v26988_v56, %v19066_v4  ;;  %v19906_v4 = vld [vmem:[%s29850_s5 + $0xb8] sm:$0xff]  ;;  %v19889_v56 = vld [vmem:[%s29850_s5 + $0x30] sm:$0xff] }
0x1285   :  { %v26990_v14 = vpop.eup %26989 }
0x1286   :  { %v19077_v63 = vand.u32 4294901760, %v19072_v46  ;;  %v29046_v62 = vmul.f32 %v26990_v14, %v18456_v18  ;;  %v29859_v14 = vmov 0.0  }
0x1287   :  { %24936 = vmatprep.mubr.msk.f32.mxu0 %vm27125_vm2, %v29859_v14 }
0x1288   :  { %v25861_v44 = vpack.c.bf16 %v19077_v63, %v28921_v60  ;;  %v19190_v30 = vsub.f32 %v19072_v46, %v19077_v63  ;;  %v19080_v43 = vand.u32 4294901760, %v29046_v62  ;;  %v29876_v46 = vld [vmem:[#allocation12_spill] sm:$0xff] }
0x1289   :  { %v25907_v18 = vpack.c.bf16 %v28915_v1, %v29876_v46  ;;  %v19890_v63 = vld [vmem:[%s29850_s5 + $0x38] sm:$0xff]  ;;  %v19726_v1 = vld [vmem:[%s29847_s2 + $0x100] sm:$0xff]  ;;  %v21132_v46 = vld [vmem:[%s29850_s5 + $0x208] sm:$0xff] }
0x128a   :  { %v19197_v50 = vsub.f32 %v29046_v62, %v19080_v43  ;;  %25862 = vmatprep.subr.bf16.mxu1 %v25861_v44  ;;  %v19191_v54 = vand.u32 4294901760, %v19190_v30  ;;  %v25869_v55 = vpack.c.bf16 %v19190_v30, %v28926_v29  ;;  %v19716_v29 = vld [vmem:[%s29845_s0 + $0x30] sm:$0xff] }
0x128b   :  { %25864 = vmatpush3.bf16.msra.mxu1 %v25861_v44 }
0x128c   :  { %24836 = vmatprep.subr.mxu1 %v19080_v43  ;;  %v19192_v52 = vsub.f32 %v19190_v30, %v19191_v54  ;;  %v19198_v2 = vand.u32 4294901760, %v19197_v50  ;;  %v19908_v30 = vld [vmem:[%s29850_s5 + $0xc8] sm:$0xff] }
0x128e   :  { %v19193_v57 = vand.u32 4294901760, %v19192_v52  ;;  %v19199_v51 = vsub.f32 %v19197_v50, %v19198_v2  ;;  %v19909_v52 = vld [vmem:[%s29850_s5 + $0xd0] sm:$0xff] }
0x128f   :  { %24837 = vmatpush3.msra.mxu1 %v19080_v43 }
0x1290   :  { %24839 = vmatmul.mubr.f32.vlgmr.msra.gmra.mrb[62].mxu1 %v27362_v53  ;;  %v25865_v11 = vpack.c.bf16 %v19193_v57, %v28951_v6  ;;  %v19200_v60 = vand.u32 4294901760, %v19199_v51  ;;  %v25877_v53 = vpack.c.bf16 %v19191_v54, %v28929_v23  ;;  %v19717_v23 = vld [vmem:[%s29845_s0 + $0x38] sm:$0xff]  ;;  %v19885_v6 = vld [vmem:[%s29850_s5 + $0x10] sm:$0xff]  ;;  %v19892_v54 = vld [vmem:[%s29850_s5 + $0x48] sm:$0xff] }
0x1291   :  { %24841 = vmatprep.mubr.f32.mxu1 %v27368_v3  ;;  %v25895_v32 = vpack.c.bf16 %v19717_v23, %v19716_v29  ;;  %v19910_v57 = vld [vmem:[%s29850_s5 + $0xd8] sm:$0xff]  ;;  %v19893_v51 = vld [vmem:[%s29850_s5 + $0x50] sm:$0xff]  ;;  %v19732_v29 = vld [vmem:[%s29850_s5 + $0x108] sm:$0xff] }
0x1292   :  { %25866 = vmatprep.subr.bf16.mxu1 %v25865_v11  ;;  %v20544_v23 = vld [vmem:[%s29850_s5 + $0x188] sm:$0xff] }
0x1293   :  { %25868 = vmatpush3.bf16.msra.mxu1 %v25865_v11  ;;  %v19729_v11 = vld [vmem:[%s29847_s2 + $0x118] sm:$0xff] }
0x1294   :  { %24842 = vmatmul.mubr.f32.gmra.mrb[64].mxu1 %v27374_v58  ;;  %24848 = vmatprep.subr.mxu1 %v19200_v60  ;;  %v19712_v58 = vld [vmem:[%s29845_s0 + $0x10] sm:$0xff] }
0x1295   :  { %24850 = vmatprep.mubr.f32.mxu1 %v27285_v36 }
0x1297   :  { %24849 = vmatpush3.msra.mxu1 %v19200_v60  ;;  %v19851_v60 = vld [vmem:[%s29847_s2] sm:$0xff] }
0x1298   :  { %24851 = vmatmul.mubr.f32.vlgmr.msra.gmra.mrb[62].mxu1 %v27315_v5  ;;  %25870 = vmatprep.subr.bf16.mxu1 %v25869_v55 }
0x1299   :  { %25872 = vmatpush3.bf16.msra.mxu1 %v25869_v55  ;;  %24853 = vmatprep.mubr.f32.mxu1 %v27317_v7  ;;  %v19894_v55 = vld [vmem:[%s29850_s5 + $0x58] sm:$0xff] }
0x129a   :  { %24860 = vmatprep.subr.mxu1 %v19197_v50 }
0x129c   :  { %24854 = vmatmul.mubr.f32.gmra.mrb[64].mxu1 %v27325_v26 }
0x129d   :  { %24861 = vmatpush3.msra.mxu1 %v19197_v50  ;;  %24862 = vmatprep.mubr.f32.mxu1 %v27288_v37  ;;  %v25909_v37 = vpack.c.bf16 %v27567_v45, %v27454_v59  ;;  %v19713_v59 = vld [vmem:[%s29845_s0 + $0x18] sm:$0xff]  ;;  %v19727_v50 = vld [vmem:[%s29847_s2 + $0x108] sm:$0xff] }
0x129e   :  { %25874 = vmatprep.subr.bf16.mxu1 %v25861_v44  ;;  %v25889_v45 = vpack.c.bf16 %v19713_v59, %v19712_v58  ;;  %v20357_v58 = vld [vmem:[%s29850_s5 + $0x150] sm:$0xff]  ;;  %v20358_v59 = vld [vmem:[%s29850_s5 + $0x158] sm:$0xff] }
0x12a0   :  { %24863 = vmatmul.mubr.f32.vlgmr.msra.gmra.mrb[62].mxu1 %v27323_v25  ;;  %v25917_v25 = vpack.c.bf16 %v28019_v0, %v27906_v34  ;;  %25890 = vmatpush3.bf16.msra.mxu0 %v25889_v45  ;;  %v19884_v34 = vld [vmem:[%s29850_s5 + $0x8] sm:$0xff]  ;;  %v19901_v0 = vld [vmem:[%s29850_s5 + $0x90] sm:$0xff]  ;;  %v20359_v45 = vld [vmem:[%s29850_s5 + $0x160] sm:$0xff] }
0x12a1   :  { %25876 = vmatpush3.bf16.msra.mxu1 %v25861_v44  ;;  %24865 = vmatprep.mubr.f32.mxu1 %v27328_v27  ;;  %v29870_v27 = vld [vmem:[#allocation6_spill] sm:$0xff] }
0x12a2   :  { %24872 = vmatprep.subr.mxu1 %v19080_v43  ;;  %25891 = vmatprep.subr.bf16.mxu0 %v29861_v17 }
0x12a3   :  { %19922 = vperm.xlu1 %26680, %v19884_v34   ;;  %20007 = vperm.xlu0 %26679, %v19901_v0   ;;  %v20542_v34 = vld [vmem:[%s29850_s5 + $0x178] sm:$0xff]  ;;  %v20543_v0 = vld [vmem:[%s29850_s5 + $0x180] sm:$0xff] }
0x12a4   :  { %24866 = vmatmul.mubr.f32.gmra.mrb[64].mxu1 %v27337_v39  ;;  %v29873_v39 = vld [vmem:[#allocation9_spill] sm:$0xff] }
0x12a5   :  { %24873 = vmatpush3.msra.mxu1 %v19080_v43  ;;  %24874 = vmatprep.mubr.f32.mxu1 %v27291_v38  ;;  %v25913_v38 = vpack.c.bf16 %v27793_v8, %v27680_v48  ;;  %v19714_v48 = vld [vmem:[%s29845_s0 + $0x20] sm:$0xff]  ;;  %v19715_v8 = vld [vmem:[%s29845_s0 + $0x28] sm:$0xff] }
0x12a6   :  { %25878 = vmatprep.subr.bf16.mxu1 %v25877_v53 }
0x12a7   :  { %19927 = vperm.xlu0 %26679, %v19885_v6   ;;  %v19733_v6 = vld [vmem:[%s29850_s5 + $0x110] sm:$0xff] }
0x12a8   :  { %24875 = vmatmul.mubr.f32.vlgmr.msra.gmra.mrb[62].mxu1 %v27334_v35  ;;  %v29871_v35 = vld [vmem:[#allocation7_spill] sm:$0xff] }
0x12a9   :  { %25880 = vmatpush3.bf16.msra.mxu1 %v25877_v53  ;;  %24877 = vmatprep.mubr.f32.mxu1 %v27340_v42  ;;  %v19911_v53 = vld [vmem:[%s29850_s5 + $0xe0] sm:$0xff] }
0x12aa   :  { %24884 = vmatprep.subr.mxu1 %v19198_v2 }
0x12ab   :  { %20017 = vperm.xlu0 %26679, %v19903_v15   ;;  %v20851_v15 = vld [vmem:[%s29850_s5 + $0x1a8] sm:$0xff] }
0x12ac   :  { %24878 = vmatmul.mubr.f32.gmra.mrb[64].mxu1 %v27348_v47  ;;  %v29874_v47 = vld [vmem:[#allocation10_spill] sm:$0xff] }
0x12ad   :  { %24885 = vmatpush3.msra.mxu1 %v19198_v2  ;;  %24886 = vmatprep.mubr.f32.mxu1 %v27285_v36  ;;  %v19728_v2 = vld [vmem:[%s29847_s2 + $0x110] sm:$0xff] }
0x12ae   :  { %25882 = vmatprep.subr.bf16.mxu1 %v25861_v44 }
0x12af   :  { %19937 = vperm.xlu0 %26679, %v19887_v12   ;;  %v20999_v12 = vld [vmem:[%s29850_s5 + $0x1d0] sm:$0xff] }
0x12b0   :  { %24887 = vmatmul.mubr.f32.vlgmr.msra.gmra.mrb[62].mxu1 %v27315_v5 }
0x12b1   :  { %25884 = vmatpush3.bf16.msra.mxu1 %v25861_v44  ;;  %24889 = vmatprep.mubr.f32.mxu1 %v27317_v7  ;;  %v19907_v44 = vld [vmem:[%s29850_s5 + $0xc0] sm:$0xff] }
0x12b2   :  { %24896 = vmatprep.subr.mxu1 %v19080_v43 }
0x12b3   :  { %20027 = vperm.xlu0 %26679, %v19905_v40   ;;  %v29343_v40 = vpop.permute.xlu0 %19997 }
0x12b4   :  { %24890 = vmatmul.mubr.f32.gmra.mrb[64].mxu1 %v27325_v26 }
0x12b5   :  { %24897 = vmatpush3.msra.mxu1 %v19080_v43  ;;  %24898 = vmatprep.mubr.f32.mxu1 %v27285_v36  ;;  %v25921_v36 = vpack.c.bf16 %v29871_v35, %v29870_v27  ;;  %v19891_v43 = vld [vmem:[%s29850_s5 + $0x40] sm:$0xff]  ;;  %v19896_v27 = vld [vmem:[%s29850_s5 + $0x68] sm:$0xff]  ;;  %v19913_v35 = vld [vmem:[%s29850_s5 + $0xf0] sm:$0xff] }
0x12b6   :  { %25910 = vmatprep.subr.bf16.mxu1 %v25909_v37 }
0x12b7   :  { %19947 = vperm.xlu0 %26679, %v19889_v56   ;;  %v29351_v56 = vpop.permute.xlu1 %19917 }
0x12b8   :  { %24899 = vmatmul.mubr.f32.vlgmr.msra.gmra.mrb[62].mxu1 %v27315_v5  ;;  %v29872_v5 = vld [vmem:[#allocation8_spill] sm:$0xff] }
0x12b9   :  { %25912 = vmatpush3.bf16.msra.mxu1 %v25909_v37  ;;  %24901 = vmatprep.mubr.f32.mxu1 %v27317_v7  ;;  %v25925_v42 = vpack.c.bf16 %v29873_v39, %v29872_v5  ;;  %v29875_v7 = vld [vmem:[#allocation11_spill] sm:$0xff]  ;;  %v19730_v37 = vld [vmem:[%s29847_s2 + $0x120] sm:$0xff]  ;;  %v19898_v39 = vld [vmem:[%s29850_s5 + $0x78] sm:$0xff] }
0x12ba   :  { %25914 = vmatprep.subr.bf16.mxu1 %v25913_v38  ;;  %v25929_v3 = vpack.c.bf16 %v29875_v7, %v29874_v47  ;;  %v19897_v5 = vld [vmem:[%s29850_s5 + $0x70] sm:$0xff]  ;;  %v20354_v7 = vld [vmem:[%s29850_s5 + $0x138] sm:$0xff] }
0x12bb   :  { %20037 = vperm.xlu0 %26679, %v19907_v44   ;;  %v20353_v47 = vld [vmem:[%s29850_s5 + $0x130] sm:$0xff]  ;;  %v29359_v44 = vpop.permute.xlu0 %20002 }
0x12bc   :  { %24902 = vmatmul.mubr.f32.gmra.mrb[64].mxu1 %v27325_v26  ;;  %v25933_v26 = vpack.c.bf16 %v28931_v49, %v28814_v61  ;;  %v25892_v61 = vpack.c.bf16 %v19715_v8, %v19714_v48  ;;  %v19902_v49 = vld [vmem:[%s29850_s5 + $0x98] sm:$0xff]  ;;  %v20360_v48 = vld [vmem:[%s29850_s5 + $0x168] sm:$0xff]  ;;  %v20361_v8 = vld [vmem:[%s29850_s5 + $0x170] sm:$0xff] }
0x12bd   :  { %25916 = vmatpush3.bf16.msra.mxu1 %v25913_v38  ;;  %20012 = vperm.xlu1 %26680, %v19902_v49   ;;  %v19912_v38 = vld [vmem:[%s29850_s5 + $0xe8] sm:$0xff]  ;;  %v20545_v49 = vld [vmem:[%s29850_s5 + $0x190] sm:$0xff] }
0x12be   :  { %25918 = vmatprep.subr.bf16.mxu1 %v25917_v25  ;;  %25893 = vmatpush3.bf16.msra.mxu0 %v25892_v61  ;;  %v19731_v61 = vld [vmem:[%s29850_s5 + $0x100] sm:$0xff] }
0x12bf   :  { %25894 = vmatprep.subr.bf16.mxu0 %v29861_v17  ;;  %19957 = vperm.xlu0 %26679, %v19891_v43  }
0x12c0   :  { %24983 = vmatprep.mubr.f32.mxu1 %v19851_v60 }
0x12c1   :  { %25920 = vmatpush3.bf16.msra.mxu1 %v25917_v25  ;;  %19932 = vperm.xlu1 %26680, %v19886_v33   ;;  %v19895_v25 = vld [vmem:[%s29850_s5 + $0x60] sm:$0xff] }
0x12c2   :  { %25922 = vmatprep.subr.bf16.mxu1 %v25921_v36  ;;  %25896 = vmatpush3.bf16.msra.mxu0 %v25895_v32  ;;  %v19734_v32 = vld [vmem:[%s29850_s5 + $0x118] sm:$0xff]  ;;  %v20850_v33 = vld [vmem:[%s29850_s5 + $0x1a0] sm:$0xff] }
0x12c3   :  { %25897 = vmatprep.subr.bf16.mxu0 %v29861_v17  ;;  %20047 = vperm.xlu0 %26679, %v19909_v52  }
0x12c5   :  { %25924 = vmatpush3.bf16.msra.mxu1 %v25921_v36  ;;  %20022 = vperm.xlu1 %26680, %v19904_v16   ;;  %v19914_v36 = vld [vmem:[%s29850_s5 + $0xf8] sm:$0xff]  ;;  %v20873_v16 = vld [vmem:[%s29850_s5 + $0x1c8] sm:$0xff] }
0x12c6   :  { %25926 = vmatprep.subr.bf16.mxu1 %v25925_v42  ;;  %25899 = vmatpush3.bf16.msra.mxu0 %v25898_v9  ;;  %v20870_v9 = vld [vmem:[%s29850_s5 + $0x1b0] sm:$0xff] }
0x12c7   :  { %25900 = vmatprep.subr.bf16.mxu0 %v29861_v17  ;;  %19967 = vperm.xlu0 %26679, %v19893_v51  }
0x12c9   :  { %25928 = vmatpush3.bf16.msra.mxu1 %v25925_v42  ;;  %19942 = vperm.xlu1 %26680, %v19888_v24   ;;  %v20352_v42 = vld [vmem:[%s29850_s5 + $0x128] sm:$0xff]  ;;  %v21129_v24 = vld [vmem:[%s29850_s5 + $0x1f0] sm:$0xff] }
0x12ca   :  { %25930 = vmatprep.subr.bf16.mxu1 %v25929_v3  ;;  %25902 = vmatpush3.bf16.msra.mxu0 %v25901_v19  ;;  %v21000_v19 = vld [vmem:[%s29850_s5 + $0x1d8] sm:$0xff] }
0x12cb   :  { %25903 = vmatprep.subr.bf16.mxu0 %v29861_v17  ;;  %20057 = vperm.xlu0 %26679, %v19911_v53  }
0x12cd   :  { %25932 = vmatpush3.bf16.msra.mxu1 %v25929_v3  ;;  %20032 = vperm.xlu1 %26680, %v19906_v4   ;;  %v20355_v3 = vld [vmem:[%s29850_s5 + $0x140] sm:$0xff] }
0x12ce   :  { %25934 = vmatprep.subr.bf16.mxu1 %v25933_v26  ;;  %25905 = vmatpush3.bf16.msra.mxu0 %v25904_v28  ;;  %v21130_v28 = vld [vmem:[%s29850_s5 + $0x1f8] sm:$0xff]  ;;  %v21131_v4 = vld [vmem:[%s29850_s5 + $0x200] sm:$0xff] }
0x12cf   :  { %25906 = vmatprep.subr.bf16.mxu0 %v29861_v17  ;;  %19977 = vperm.xlu0 %26679, %v19895_v25  }
0x12d1   :  { %25936 = vmatpush3.bf16.msra.mxu1 %v25933_v26  ;;  %19952 = vperm.xlu1 %26680, %v19890_v63   ;;  %v20356_v26 = vld [vmem:[%s29850_s5 + $0x148] sm:$0xff] }
0x12d2   :  { %25908 = vmatpush3.bf16.msra.mxu0 %v25907_v18  ;;  %v21255_v18 = vld [vmem:[%s29850_s5 + $0x210] sm:$0x1] }
0x12d3   :  { %20067 = vperm.xlu0 %26679, %v19913_v35  }
0x12d5   :  { %24937 = vmatmul.mubr.f32.vlgmr.msra.gmra.mrb[64].mxu0 %v19726_v1  ;;  %20042 = vperm.xlu1 %26680, %v19908_v30  }
0x12d6   :  { %24939 = vmatprep.mubr.msk.f32.mxu0 %vm27125_vm2, %v29859_v14 }
0x12d7   :  { %19987 = vperm.xlu0 %26679, %v19897_v5  }
0x12d9   :  { %24940 = vmatmul.mubr.f32.gmra.mrb[66].mxu0 %v19727_v50  ;;  %19962 = vperm.xlu1 %26680, %v19892_v54  }
0x12da   :  { %24942 = vmatprep.mubr.msk.f32.mxu0 %vm27125_vm2, %v29859_v14 }
0x12db   :  { %20364 = vperm.xlu0 %26679, %v20352_v42  }
0x12dd   :  { %24943 = vmatmul.mubr.f32.gmra.mrb[68].mxu0 %v19728_v2  ;;  %20052 = vperm.xlu1 %26680, %v19910_v57  }
0x12de   :  { %24945 = vmatprep.mubr.msk.f32.mxu0 %vm27125_vm2, %v29859_v14 }
0x12df   :  { %20374 = vperm.xlu0 %26679, %v20354_v7  }
0x12e1   :  { %24946 = vmatmul.mubr.f32.gmra.mrb[70].mxu0 %v19729_v11  ;;  %19972 = vperm.xlu1 %26680, %v19894_v55  }
0x12e2   :  { %24948 = vmatprep.mubr.msk.f32.mxu0 %vm27125_vm2, %v29859_v14 }
0x12e3   :  { %20384 = vperm.xlu0 %26679, %v20356_v26  }
0x12e5   :  { %24949 = vmatmul.mubr.f32.gmra.mrb[72].mxu0 %v19730_v37  ;;  %20062 = vperm.xlu1 %26680, %v19912_v38  }
0x12e7   :  { %20394 = vperm.xlu0 %26679, %v20358_v59  }
0x12e9   :  { %19982 = vperm.xlu1 %26680, %v19896_v27  }
0x12eb   :  { %20404 = vperm.xlu0 %26679, %v20360_v48  }
0x12ed   :  { %20072 = vperm.xlu1 %26680, %v19914_v36  }
0x12ef   :  { %20549 = vperm.xlu0 %26679, %v20542_v34  }
0x12f1   :  { %19992 = vperm.xlu1 %26680, %v19898_v39  }
0x12f3   :  { %19738 = vperm.xlu0 %26679, %v19731_v61  }
0x12f5   :  { %20369 = vperm.xlu1 %26680, %v20353_v47  }
0x12f7   :  { %20559 = vperm.xlu0 %26679, %v20544_v23  }
0x12f9   :  { %20379 = vperm.xlu1 %26680, %v20355_v3  }
0x12fb   :  { %19748 = vperm.xlu0 %26679, %v19733_v6  }
0x12fd   :  { %20389 = vperm.xlu1 %26680, %v20357_v58  }
0x12ff   :  { %20569 = vperm.xlu0 %26679, %v20546_v41   ;;  %v19853_v41 = vld [vmem:[%s29847_s2 + $0x10] sm:$0xff] }
0x1301   :  { %20399 = vperm.xlu1 %26680, %v20359_v45  }
0x1303   :  { %20854 = vperm.xlu0 %26679, %v20850_v33  }
0x1305   :  { %20409 = vperm.xlu1 %26680, %v20361_v8  }
0x1307   :  { %20876 = vperm.xlu0 %26679, %v20870_v9  }
0x1309   :  { %20554 = vperm.xlu1 %26680, %v20543_v0  }
0x130b   :  { %20886 = vperm.xlu0 %26679, %v20872_v10   ;;  %v19857_v10 = vld [vmem:[%s29847_s2 + $0x30] sm:$0xff] }
0x130d   :  { %19743 = vperm.xlu1 %26680, %v19732_v29  }
0x130f   :  { %21005 = vperm.xlu0 %26679, %v20999_v12   ;;  %v19858_v12 = vld [vmem:[%s29847_s2 + $0x38] sm:$0xff] }
0x1311   :  { %20564 = vperm.xlu1 %26680, %v20545_v49  }
0x1313   :  { %21015 = vperm.xlu0 %26679, %v21001_v20  }
0x1315   :  { %19753 = vperm.xlu1 %26680, %v19734_v32   ;;  %v19852_v32 = vld [vmem:[%s29847_s2 + $0x8] sm:$0xff] }
0x1317   :  { %21135 = vperm.xlu0 %26679, %v21129_v24   ;;  %v19860_v24 = vld [vmem:[%s29847_s2 + $0x48] sm:$0xff] }
0x1319   :  { %19758 = vperm.xlu1 %26680, %v19735_v31  }
0x131b   :  { %21145 = vperm.xlu0 %26679, %v21131_v4  }
0x131d   :  { %20859 = vperm.xlu1 %26680, %v20851_v15   ;;  %v19855_v15 = vld [vmem:[%s29847_s2 + $0x20] sm:$0xff] }
0x131f   :  { %21258 = vperm.xlu0 %26679, %v21255_v18   ;;  %v19863_v18 = vld [vmem:[%s29847_s2 + $0x60] sm:$0xff] }
0x1321   :  { %20881 = vperm.xlu1 %26680, %v20871_v13   ;;  %v19856_v13 = vld [vmem:[%s29847_s2 + $0x28] sm:$0xff] }
0x1322   :  { %v29361_v52 = vpop.permute.xlu1 %19922  ;;  %v29363_v2 = vpop.permute.xlu0 %20007 }
0x1325   :  { %20891 = vperm.xlu1 %26680, %v20873_v16  }
0x1326   :  { %v29367_v51 = vpop.permute.xlu0 %19927 }
0x1329   :  { %21010 = vperm.xlu1 %26680, %v21000_v19   ;;  %v19859_v19 = vld [vmem:[%s29847_s2 + $0x40] sm:$0xff] }
0x132a   :  { %v29371_v38 = vpop.permute.xlu0 %20017 }
0x132d   :  { %21020 = vperm.xlu1 %26680, %v21002_v22  }
0x132e   :  { %v29376_v42 = vpop.permute.xlu0 %19937 }
0x1331   :  { %21140 = vperm.xlu1 %26680, %v21130_v28   ;;  %v19861_v28 = vld [vmem:[%s29847_s2 + $0x50] sm:$0xff] }
0x1332   :  { %v29380_v26 = vpop.permute.xlu0 %20027 }
0x1335   :  { %21150 = vperm.xlu1 %26680, %v21132_v46   ;;  %v19862_v46 = vld [vmem:[%s29847_s2 + $0x58] sm:$0xff] }
0x1336   :  { %v29384_v45 = vpop.permute.xlu0 %19947 }
0x133a   :  { %v29388_v34 = vpop.permute.xlu0 %20037 }
0x133c   :  { %v29365_v57 = vpop.permute.xlu1 %20012 }
0x133e   :  { %v29392_v23 = vpop.permute.xlu0 %19957 }
0x1340   :  { %v29369_v55 = vpop.permute.xlu1 %19932 }
0x1342   :  { %v29403_v31 = vpop.permute.xlu0 %20047 }
0x1344   :  { %v29373_v36 = vpop.permute.xlu1 %20022 }
0x1346   :  { %v29414_v9 = vpop.permute.xlu0 %19967 }
0x1348   :  { %v29378_v3 = vpop.permute.xlu1 %19942 }
0x134a   :  { %v29430_v20 = vpop.permute.xlu0 %20057 }
0x134c   :  { %v29382_v59 = vpop.permute.xlu1 %20032 }
0x134e   :  { %v29440_v4 = vpop.permute.xlu0 %19977 }
0x1350   :  { %v29386_v8 = vpop.permute.xlu1 %19952 }
0x1354   :  { %v29390_v61 = vpop.permute.xlu1 %20042 }
0x1358   :  { %v29395_v6 = vpop.permute.xlu1 %19962 }
0x135c   :  { %v29406_v33 = vpop.permute.xlu1 %20052 }
0x1360   :  { %v29422_v16 = vpop.permute.xlu1 %19972 }
0x1364   :  { %v29432_v22 = vpop.permute.xlu1 %20062 }
0x138b   :  { %v24900_v63 = vpop.f32.mrb[62].mxu1 }
0x138c   :  { %v19675_v1 = vmul.f32 0.5, %v24900_v63  ;;  %v19652_v30 = vpop.f32.mrb[63].mxu1  ;;  %v29448_v63 = vpop.permute.xlu1 %19982 }
0x138d   :  { %v19674_v43 = vmul.f32 0.5, %v19652_v30  ;;  %v19865_v30 = vld [vmem:[%s29847_s2 + $0x70] sm:$0xff] }
0x138e   :  { %26991 = vtanh.f32 %v19675_v1  ;;  %v19864_v1 = vld [vmem:[%s29847_s2 + $0x68] sm:$0xff] }
0x138f   :  { %26993 = vtanh.f32 %v19674_v43  ;;  %v24903_v50 = vpop.f32.mrb[64].mxu1  ;;  %v29456_v43 = vpop.permute.xlu0 %20067 }
0x1390   :  { %v19664_v54 = vpop.f32.mrb[65].mxu1  ;;  %26995 = vtanh.f32 %v24903_v50  ;;  %v29458_v50 = vpop.permute.xlu1 %20072 }
0x1391   :  { %v19676_v11 = vmul.f32 0.5, %v19664_v54  ;;  %v19866_v54 = vld [vmem:[%s29847_s2 + $0x78] sm:$0xff] }
0x1393   :  { %26997 = vtanh.f32 %v19676_v11  ;;  %v19867_v11 = vld [vmem:[%s29847_s2 + $0x80] sm:$0xff] }
0x1398   :  { %v26992_v60 = vpop.eup %26991 }
0x1399   :  { %v26994_v53 = vpop.eup %26993  ;;  %v19681_v37 = vmul.f32 0.5, %v26992_v60  ;;  %v29466_v60 = vpop.permute.xlu0 %19987 }
0x139a   :  { %v19680_v25 = vmul.f32 0.5, %v26994_v53  ;;  %v26996_v5 = vpop.eup %26995  ;;  %v19868_v53 = vld [vmem:[%s29847_s2 + $0x88] sm:$0xff] }
0x139b   :  { %v19684_v27 = vadd.f32 0.5, %v19681_v37  ;;  %v19869_v37 = vld [vmem:[%s29847_s2 + $0x90] sm:$0xff] }
0x139c   :  { %v19683_v35 = vadd.f32 0.5, %v19680_v25  ;;  %v29474_v25 = vpop.permute.xlu1 %19992 }
0x139d   :  { %v19687_v39 = vmul.f32 %v19684_v27, %v29043_v21  ;;  %v26998_v58 = vpop.eup %26997  ;;  %v19870_v27 = vld [vmem:[%s29847_s2 + $0x98] sm:$0xff] }
0x139e   :  { %v19688_v47 = vmul.f32 %v26996_v5, %v19683_v35  ;;  %v19682_v48 = vmul.f32 0.5, %v26998_v58  ;;  %v19871_v35 = vld [vmem:[%s29847_s2 + $0xa0] sm:$0xff]  ;;  %v29482_v5 = vpop.permute.xlu0 %20364 }
0x13a0   :  { %v19689_v7 = vadd.f32 %v19688_v47, %v19687_v39  ;;  %v19685_v21 = vadd.f32 0.5, %v19682_v48  ;;  %v29484_v39 = vpop.permute.xlu1 %20369  ;;  %v19872_v47 = vld [vmem:[%s29847_s2 + $0xa8] sm:$0xff]  ;;  %v19874_v48 = vld [vmem:[%s29847_s2 + $0xb8] sm:$0xff] }
0x13a2   :  { %26999 = vtanh.f32 %v19689_v7  ;;  %v19873_v7 = vld [vmem:[%s29847_s2 + $0xb0] sm:$0xff]  ;;  %v29492_v58 = vpop.permute.xlu0 %20374 }
0x13ac   :  { %v27000_v0 = vpop.eup %26999 }
0x13ad   :  { %v19691_v29 = vmul.f32 %v27000_v0, %v19685_v21  ;;  %v19875_v21 = vld [vmem:[%s29847_s2 + $0xc0] sm:$0xff]  ;;  %v29500_v0 = vpop.permute.xlu1 %20379 }
0x13af   :  { %v25937_v49 = vpack.c.bf16 %v19691_v29, %v29046_v62  ;;  %v19854_v62 = vld [vmem:[%s29847_s2 + $0x18] sm:$0xff]  ;;  %v19876_v29 = vld [vmem:[%s29847_s2 + $0xc8] sm:$0xff] }
0x13b1   :  { %25938 = vmatprep.subr.bf16.mxu1 %v25937_v49 }
0x13b2   :  { %25940 = vmatpush3.bf16.msra.mxu1 %v25937_v49  ;;  %v19877_v49 = vld [vmem:[%s29847_s2 + $0xd0] sm:$0xff] }
0x13b3   :  { %25973 = vmatprep.subr.bf16.mxu1 %v29861_v17 }
0x13b5   :  { %24984 = vmatmul.mubr.f32.vlgmr.msra.gmra.mrb[66].mxu1 %v19852_v32  ;;  %v29508_v32 = vpop.permute.xlu0 %20384 }
0x13b6   :  { %24986 = vmatprep.mubr.f32.mxu1 %v19853_v41  ;;  %v29510_v41 = vpop.permute.xlu1 %20389 }
0x13b9   :  { %24987 = vmatmul.mubr.f32.gmra.mrb[68].mxu1 %v19854_v62  ;;  %v19878_v62 = vld [vmem:[%s29847_s2 + $0xd8] sm:$0xff] }
0x13ba   :  { %24989 = vmatprep.mubr.f32.mxu1 %v19855_v15  ;;  %v19879_v15 = vld [vmem:[%s29847_s2 + $0xe0] sm:$0xff] }
0x13bd   :  { %24990 = vmatmul.mubr.f32.gmra.mrb[70].mxu1 %v19856_v13  ;;  %v29518_v13 = vpop.permute.xlu0 %20394 }
0x13be   :  { %24992 = vmatprep.mubr.f32.mxu1 %v19857_v10  ;;  %v19880_v10 = vld [vmem:[%s29847_s2 + $0xe8] sm:$0xff] }
0x13c1   :  { %24993 = vmatmul.mubr.f32.gmra.mrb[72].mxu1 %v19858_v12  ;;  %v19881_v12 = vld [vmem:[%s29847_s2 + $0xf0] sm:$0xff] }
0x13c2   :  { %24995 = vmatprep.mubr.f32.mxu1 %v19859_v19  ;;  %v29526_v19 = vpop.permute.xlu1 %20399 }
0x13c5   :  { %24996 = vmatmul.mubr.f32.gmra.mrb[74].mxu1 %v19860_v24  ;;  %v19882_v24 = vld [vmem:[%s29847_s2 + $0xf8] sm:$0xff]  ;;  %s27099_s2 = scalar_lea.vmem %s21348_s19, 16 }
0x13c6   :  { %24998 = vmatprep.mubr.f32.mxu1 %v19861_v28  ;;  %v29531_v28 = vpop.permute.xlu0 %20404  ;;  %p27100_p0 = scmp.ne.s32.totalorder %s21348_s19, %s27099_s2  ;;  %p27105_p2 = scmp.lt.s32.totalorder %s27103_s20, %s27099_s2 }
0x13c8   :  { %p27106_p3 = por %p27105_p2, %p27104_p1 }
0x13c9   :  { %24999 = vmatmul.mubr.f32.gmra.mrb[76].mxu1 %v19862_v46  ;;  %v29533_v46 = vpop.permute.xlu1 %20409 }
0x13ca   :  { %25001 = vmatprep.mubr.f32.mxu1 %v19863_v18  ;;  %v29537_v18 = vpop.permute.xlu0 %20549  ;;  %p27107_p4 = pnand %p27106_p3, %p27100_p0 }
0x13cd   :  { %25002 = vmatmul.mubr.f32.gmra.mrb[78].mxu1 %v19864_v1  ;;  %v29539_v1 = vpop.permute.xlu1 %20554 }
0x13ce   :  { %25004 = vmatprep.mubr.f32.mxu1 %v19865_v30  ;;  %v19739_v30 = vpop.permute.xlu0 %19738 }
0x13d1   :  { %25005 = vmatmul.mubr.f32.gmra.mrb[80].mxu1 %v19866_v54  ;;  %v19744_v54 = vpop.permute.xlu1 %19743 }
0x13d2   :  { %25007 = vmatprep.mubr.f32.mxu1 %v19867_v11  ;;  %v19827_v11 = vpop.f32.mrb[64].mxu0 }
0x13d5   :  { %25008 = vmatmul.mubr.f32.gmra.mrb[82].mxu1 %v19868_v53  ;;  %v24938_v53 = vpop.f32.mrb[65].mxu0 }
0x13d6   :  { %25010 = vmatprep.mubr.f32.mxu1 %v19869_v37  ;;  %v19828_v37 = vadd.f32 %v19827_v11, %v19739_v30 }
0x13d9   :  { %25011 = vmatmul.mubr.f32.gmra.mrb[84].mxu1 %v19870_v27  ;;  %v29541_v27 = vpop.permute.xlu0 %20559 }
0x13da   :  { %25013 = vmatprep.mubr.f32.mxu1 %v19871_v35  ;;  %v19832_v35 = vpop.f32.mrb[66].mxu0 }
0x13dd   :  { %25014 = vmatmul.mubr.f32.gmra.mrb[86].mxu1 %v19872_v47  ;;  %v19833_v47 = vadd.f32 %v19832_v35, %v19744_v54  ;;  %v20333_v54 = vld [vmem:[%s29848_s3 + $0x8] sm:$0xff] }
0x13de   :  { %25016 = vmatprep.mubr.f32.mxu1 %v19873_v7  ;;  %v24941_v7 = vpop.f32.mrb[67].mxu0  ;;  %20476 = vmatprep.mubr.f32.mxu0 %v20333_v54 }
0x13e1   :  { %25017 = vmatmul.mubr.f32.gmra.mrb[88].mxu1 %v19874_v48  ;;  %v29543_v48 = vpop.permute.xlu1 %20564 }
0x13e2   :  { %25019 = vmatprep.mubr.f32.mxu1 %v19875_v21  ;;  %v29545_v21 = vpack.c.bf16 %v19833_v47, %v19828_v37 }
0x13e5   :  { %25020 = vmatmul.mubr.f32.gmra.mrb[90].mxu1 %v19876_v29  ;;  %v19837_v29 = vpop.f32.mrb[68].mxu0 }
0x13e6   :  { %25022 = vmatprep.mubr.f32.mxu1 %v19877_v49  ;;  %v24944_v49 = vpop.f32.mrb[69].mxu0 }
0x13e9   :  { %25023 = vmatmul.mubr.f32.gmra.mrb[92].mxu1 %v19878_v62  ;;  %v19749_v62 = vpop.permute.xlu0 %19748 }
0x13ea   :  { %25025 = vmatprep.mubr.f32.mxu1 %v19879_v15  ;;  %v19838_v15 = vadd.f32 %v19837_v29, %v19749_v62 }
0x13ed   :  { %25026 = vmatmul.mubr.f32.gmra.mrb[94].mxu1 %v19880_v10  ;;  %v19754_v10 = vpop.permute.xlu1 %19753 }
0x13ee   :  { %25028 = vmatprep.mubr.f32.mxu1 %v19881_v12  ;;  %v19842_v12 = vpop.f32.mrb[70].mxu0 }
0x13f1   :  { %25029 = vmatmul.mubr.f32.gmra.mrb[96].mxu1 %v19882_v24  ;;  %v19843_v24 = vadd.f32 %v19842_v12, %v19754_v10 }
0x13f2   :  { %25051 = vmatprep.mubr.msk.f32.mxu1 %vm27125_vm2, %v29859_v14  ;;  %v24947_v14 = vpop.f32.mrb[71].mxu0 }
0x13f3   :  { %v29547_v17 = vpack.c.bf16 %v19843_v24, %v19838_v15  ;;  %v29549_v30 = vpop.f32.mrb[72].mxu0 }
0x13f4   :  { %v24950_v11 = vpop.f32.mrb[73].mxu0 }
0x1488   :  { %v24985_v53 = vpop.f32.mrb[66].mxu1 }
0x1489   :  { %v20147_v37 = vadd.f32 %v24985_v53, %v29361_v52  ;;  %v20141_v35 = vpop.f32.mrb[67].mxu1 }
0x148a   :  { %v20142_v47 = vadd.f32 %v20141_v35, %v29351_v56 }
0x148b   :  { %27001 = vtanh.f32 %v20147_v37 }
0x148c   :  { %27003 = vtanh.f32 %v20142_v47  ;;  %v24988_v7 = vpop.f32.mrb[68].mxu1 }
0x148d   :  { %v20157_v14 = vadd.f32 %v24988_v7, %v29369_v55  ;;  %v20151_v29 = vpop.f32.mrb[69].mxu1 }
0x148e   :  { %v20152_v49 = vadd.f32 %v20151_v29, %v29367_v51 }
0x148f   :  { %27005 = vtanh.f32 %v20157_v14 }
0x1490   :  { %27007 = vtanh.f32 %v20152_v49  ;;  %v24991_v62 = vpop.f32.mrb[70].mxu1 }
0x1491   :  { %v20167_v15 = vadd.f32 %v24991_v62, %v29378_v3  ;;  %v20161_v10 = vpop.f32.mrb[71].mxu1 }
0x1492   :  { %v20162_v12 = vadd.f32 %v20161_v10, %v29376_v42 }
0x1493   :  { %27009 = vtanh.f32 %v20167_v15 }
0x1494   :  { %27011 = vtanh.f32 %v20162_v12  ;;  %v24994_v52 = vpop.f32.mrb[72].mxu1 }
0x1495   :  { %v29560_v56 = vpop.eup %27001  ;;  %v20177_v24 = vadd.f32 %v24994_v52, %v29386_v8  ;;  %v20171_v11 = vpop.f32.mrb[73].mxu1 }
0x1496   :  { %v29563_v55 = vpop.eup %27003  ;;  %v20172_v51 = vadd.f32 %v20171_v11, %v29384_v45 }
0x1497   :  { %27013 = vtanh.f32 %v20177_v24  ;;  %v25943_v54 = vpack.c.bf16 %v29560_v56, %v29563_v55 }
0x1498   :  { %27015 = vtanh.f32 %v20172_v51  ;;  %v24997_v3 = vpop.f32.mrb[74].mxu1 }
0x1499   :  { %v29568_v53 = vpop.eup %27005  ;;  %v20187_v42 = vadd.f32 %v24997_v3, %v29395_v6  ;;  %v20181_v37 = vpop.f32.mrb[75].mxu1 }
0x149a   :  { %v29571_v35 = vpop.eup %27007  ;;  %v20182_v8 = vadd.f32 %v20181_v37, %v29392_v23 }
0x149b   :  { %27017 = vtanh.f32 %v20187_v42  ;;  %v25947_v47 = vpack.c.bf16 %v29568_v53, %v29571_v35 }
0x149c   :  { %27019 = vtanh.f32 %v20182_v8  ;;  %v25000_v45 = vpop.f32.mrb[76].mxu1 }
0x149d   :  { %v29576_v7 = vpop.eup %27009  ;;  %v20197_v14 = vadd.f32 %v25000_v45, %v29422_v16  ;;  %v20191_v29 = vpop.f32.mrb[77].mxu1 }
0x149e   :  { %v29579_v49 = vpop.eup %27011  ;;  %v20192_v6 = vadd.f32 %v20191_v29, %v29414_v9 }
0x149f   :  { %27021 = vtanh.f32 %v20197_v14  ;;  %v25951_v62 = vpack.c.bf16 %v29576_v7, %v29579_v49 }
0x14a0   :  { %27023 = vtanh.f32 %v20192_v6  ;;  %v25003_v23 = vpop.f32.mrb[78].mxu1 }
0x14a1   :  { %v29584_v15 = vpop.eup %27013  ;;  %v20207_v10 = vadd.f32 %v25003_v23, %v29448_v63  ;;  %v20201_v12 = vpop.f32.mrb[79].mxu1 }
0x14a2   :  { %v29587_v52 = vpop.eup %27015  ;;  %v20202_v16 = vadd.f32 %v20201_v12, %v29440_v4 }
0x14a3   :  { %27025 = vtanh.f32 %v20207_v10  ;;  %v25955_v24 = vpack.c.bf16 %v29584_v15, %v29587_v52 }
0x14a4   :  { %27027 = vtanh.f32 %v20202_v16  ;;  %v25006_v9 = vpop.f32.mrb[80].mxu1 }
0x14a5   :  { %v29592_v11 = vpop.eup %27017  ;;  %v20217_v51 = vadd.f32 %v25006_v9, %v29474_v25  ;;  %v20211_v3 = vpop.f32.mrb[81].mxu1 }
0x14a6   :  { %v29595_v42 = vpop.eup %27019  ;;  %v20212_v63 = vadd.f32 %v20211_v3, %v29466_v60 }
0x14a7   :  { %27029 = vtanh.f32 %v20217_v51  ;;  %v25959_v37 = vpack.c.bf16 %v29592_v11, %v29595_v42  ;;  %v20332_v11 = vld [vmem:[%s29848_s3] sm:$0xff]  ;;  %v20335_v42 = vld [vmem:[%s29848_s3 + $0x18] sm:$0xff] }
0x14a8   :  { %27031 = vtanh.f32 %v20212_v63  ;;  %v25009_v4 = vpop.f32.mrb[82].mxu1 }
0x14a9   :  { %v29600_v8 = vpop.eup %27021  ;;  %v20227_v45 = vadd.f32 %v25009_v4, %v29359_v44  ;;  %v20221_v14 = vpop.f32.mrb[83].mxu1 }
0x14aa   :  { %v29603_v29 = vpop.eup %27023  ;;  %v20222_v25 = vadd.f32 %v20221_v14, %v29343_v40 }
0x14ab   :  { %27033 = vtanh.f32 %v20227_v45  ;;  %v25963_v6 = vpack.c.bf16 %v29600_v8, %v29603_v29  ;;  %v20337_v8 = vld [vmem:[%s29848_s3 + $0x28] sm:$0xff]  ;;  %v19759_v29 = vpop.permute.xlu1 %19758 }
0x14ac   :  { %27035 = vtanh.f32 %v20222_v25  ;;  %v25012_v60 = vpop.f32.mrb[84].mxu1 }
0x14ad   :  { %v29608_v23 = vpop.eup %27025  ;;  %v20237_v10 = vadd.f32 %v25012_v60, %v29365_v57  ;;  %v20231_v12 = vpop.f32.mrb[85].mxu1 }
0x14ae   :  { %v29611_v16 = vpop.eup %27027  ;;  %v20232_v44 = vadd.f32 %v20231_v12, %v29363_v2 }
0x14af   :  { %27037 = vtanh.f32 %v20237_v10  ;;  %v25967_v9 = vpack.c.bf16 %v29608_v23, %v29611_v16  ;;  %v20339_v23 = vld [vmem:[%s29848_s3 + $0x38] sm:$0xff]  ;;  %v20340_v16 = vld [vmem:[%s29848_s3 + $0x40] sm:$0xff] }
0x14b0   :  { %27039 = vtanh.f32 %v20232_v44  ;;  %v25015_v40 = vpop.f32.mrb[86].mxu1 }
0x14b1   :  { %v29616_v51 = vpop.eup %27029  ;;  %v20247_v3 = vadd.f32 %v25015_v40, %v29373_v36  ;;  %v20241_v63 = vpop.f32.mrb[87].mxu1 }
0x14b2   :  { %v29619_v4 = vpop.eup %27031  ;;  %v20242_v57 = vadd.f32 %v20241_v63, %v29371_v38 }
0x14b3   :  { %27041 = vtanh.f32 %v20247_v3  ;;  %v25971_v45 = vpack.c.bf16 %v29616_v51, %v29619_v4  ;;  %v20342_v51 = vld [vmem:[%s29848_s3 + $0x50] sm:$0xff]  ;;  %v20345_v4 = vld [vmem:[%s29848_s3 + $0x68] sm:$0xff] }
0x14b4   :  { %27043 = vtanh.f32 %v20242_v57  ;;  %v25018_v2 = vpop.f32.mrb[88].mxu1 }
0x14b5   :  { %v27034_v14 = vpop.eup %27033  ;;  %v20257_v25 = vadd.f32 %v25018_v2, %v29382_v59  ;;  %v20251_v60 = vpop.f32.mrb[89].mxu1 }
0x14b6   :  { %v27036_v10 = vpop.eup %27035  ;;  %v20252_v12 = vadd.f32 %v20251_v60, %v29380_v26 }
0x14b7   :  { %27045 = vtanh.f32 %v20257_v25  ;;  %v25941_v36 = vpack.c.bf16 %v27034_v14, %v27036_v10 }
0x14b8   :  { %27047 = vtanh.f32 %v20252_v12  ;;  %v25021_v44 = vpop.f32.mrb[90].mxu1 }
0x14b9   :  { %v27038_v40 = vpop.eup %27037  ;;  %v20267_v38 = vadd.f32 %v25021_v44, %v29390_v61  ;;  %v20261_v3 = vpop.f32.mrb[91].mxu1  ;;  %25942 = vmatprep.subr.bf16.mxu0 %v25941_v36 }
0x14ba   :  { %v27040_v63 = vpop.eup %27039  ;;  %v20262_v57 = vadd.f32 %v20261_v3, %v29388_v34  ;;  %25944 = vmatpush3.bf16.msra.mxu0 %v25943_v54  ;;  %v20346_v3 = vld [vmem:[%s29848_s3 + $0x70] sm:$0xff] }
0x14bb   :  { %27049 = vtanh.f32 %v20267_v38  ;;  %v25945_v59 = vpack.c.bf16 %v27038_v40, %v27040_v63  ;;  %v20347_v38 = vld [vmem:[%s29848_s3 + $0x78] sm:$0xff]  ;;  %v20349_v63 = vld [vmem:[%s29848_s3 + $0x88] sm:$0xff] }
0x14bc   :  { %27051 = vtanh.f32 %v20262_v57  ;;  %v25024_v26 = vpop.f32.mrb[92].mxu1  ;;  %v20348_v57 = vld [vmem:[%s29848_s3 + $0x80] sm:$0xff] }
0x14bd   :  { %v27042_v2 = vpop.eup %27041  ;;  %v20277_v14 = vadd.f32 %v25024_v26, %v29406_v33  ;;  %v20271_v25 = vpop.f32.mrb[93].mxu1  ;;  %25946 = vmatprep.subr.bf16.mxu0 %v25945_v59  ;;  %v20351_v59 = vld [vmem:[%s29848_s3 + $0x98] sm:$0xff]  ;;  %v20350_v26 = vld [vmem:[%s29848_s3 + $0x90] sm:$0xff] }
0x14be   :  { %v27044_v60 = vpop.eup %27043  ;;  %v20272_v61 = vadd.f32 %v20271_v25, %v29403_v31  ;;  %25948 = vmatpush3.bf16.msra.mxu0 %v25947_v47 }
0x14bf   :  { %27053 = vtanh.f32 %v20277_v14  ;;  %v25949_v34 = vpack.c.bf16 %v27042_v2, %v27044_v60 }
0x14c0   :  { %27055 = vtanh.f32 %v20272_v61  ;;  %v25027_v56 = vpop.f32.mrb[94].mxu1 }
0x14c1   :  { %v27046_v55 = vpop.eup %27045  ;;  %v20287_v54 = vadd.f32 %v25027_v56, %v29432_v22  ;;  %v20281_v10 = vpop.f32.mrb[95].mxu1  ;;  %25950 = vmatprep.subr.bf16.mxu0 %v25949_v34 }
0x14c2   :  { %v27048_v12 = vpop.eup %27047  ;;  %v20282_v33 = vadd.f32 %v20281_v10, %v29430_v20  ;;  %25952 = vmatpush3.bf16.msra.mxu0 %v25951_v62 }
0x14c3   :  { %27057 = vtanh.f32 %v20287_v54  ;;  %v25953_v31 = vpack.c.bf16 %v27046_v55, %v27048_v12 }
0x14c4   :  { %27059 = vtanh.f32 %v20282_v33  ;;  %v25030_v53 = vpop.f32.mrb[96].mxu1 }
0x14c5   :  { %v27050_v35 = vpop.eup %27049  ;;  %v20297_v47 = vadd.f32 %v25030_v53, %v29458_v50  ;;  %v20291_v36 = vpop.f32.mrb[97].mxu1  ;;  %25954 = vmatprep.subr.bf16.mxu0 %v25953_v31 }
0x14c6   :  { %v27052_v44 = vpop.eup %27051  ;;  %v20292_v22 = vadd.f32 %v20291_v36, %v29456_v43  ;;  %25956 = vmatpush3.bf16.msra.mxu0 %v25955_v24 }
0x14c7   :  { %27061 = vtanh.f32 %v20297_v47  ;;  %v25957_v20 = vpack.c.bf16 %v27050_v35, %v27052_v44 }
0x14c8   :  { %27063 = vtanh.f32 %v20292_v22 }
0x14c9   :  { %v27054_v7 = vpop.eup %27053  ;;  %25958 = vmatprep.subr.bf16.mxu0 %v25957_v20 }
0x14ca   :  { %v27056_v49 = vpop.eup %27055  ;;  %25960 = vmatpush3.bf16.msra.mxu0 %v25959_v37  ;;  %v20334_v37 = vld [vmem:[%s29848_s3 + $0x10] sm:$0xff] }
0x14cb   :  { %v25961_v50 = vpack.c.bf16 %v27054_v7, %v27056_v49 }
0x14cd   :  { %v27058_v62 = vpop.eup %27057  ;;  %25962 = vmatprep.subr.bf16.mxu0 %v25961_v50 }
0x14ce   :  { %v27060_v40 = vpop.eup %27059  ;;  %25964 = vmatpush3.bf16.msra.mxu0 %v25963_v6  ;;  %v19848_v6 = vadd.f32 %v29549_v30, %v19759_v29  ;;  %v20338_v30 = vld [vmem:[%s29848_s3 + $0x30] sm:$0xff] }
0x14cf   :  { %v25965_v43 = vpack.c.bf16 %v27058_v62, %v27060_v40 }
0x14d1   :  { %v27062_v15 = vpop.eup %27061  ;;  %25966 = vmatprep.subr.bf16.mxu0 %v25965_v43  ;;  %v29877_v43 = vmov 0.0|0.0  }
0x14d2   :  { %v27064_v52 = vpop.eup %27063  ;;  %25968 = vmatpush3.bf16.msra.mxu0 %v25967_v9  ;;  %v20343_v9 = vld [vmem:[%s29848_s3 + $0x58] sm:$0xff] }
0x14d3   :  { %v25969_v24 = vpack.c.bf16 %v27062_v15, %v27064_v52 }
0x14d5   :  { %25970 = vmatprep.subr.bf16.mxu0 %v25969_v24 }
0x14d6   :  { %25972 = vmatpush3.bf16.msra.mxu0 %v25971_v45  ;;  %v20344_v45 = vld [vmem:[%s29848_s3 + $0x60] sm:$0xff] }
0x14d7   :  { %25989 = vmatprep.subr.bf16.mxu0 %v29545_v21 }
0x14d9   :  { %20477 = vmatmul.mubr.f32.vlgmr.msra.gmra.mrb[74].mxu0 %v20332_v11 }
0x14da   :  { %25991 = vmatpush3.bf16.msra.mxu0 %v29545_v21  ;;  %20481 = vmatprep.mubr.f32.mxu0 %v20335_v42  ;;  %v20336_v21 = vld [vmem:[%s29848_s3 + $0x20] sm:$0xff] }
0x14db   :  { %25993 = vmatprep.subr.bf16.mxu0 %v29547_v17 }
0x14dd   :  { %20482 = vmatmul.mubr.f32.gmra.mrb[76].mxu0 %v20334_v37 }
0x14de   :  { %25995 = vmatpush3.bf16.msra.mxu0 %v29547_v17  ;;  %20486 = vmatprep.mubr.f32.mxu0 %v20337_v8  ;;  %v20341_v17 = vld [vmem:[%s29848_s3 + $0x48] sm:$0xff] }
0x14df   :  { %25074 = vmatprep.subr.mxu0 %v19848_v6 }
0x14e1   :  { %20487 = vmatmul.mubr.f32.gmra.mrb[78].mxu0 %v20336_v21 }
0x14e2   :  { %25075 = vmatpush3.msra.mxu0 %v19848_v6  ;;  %20491 = vmatprep.mubr.f32.mxu0 %v20339_v23 }
0x14e5   :  { %20492 = vmatmul.mubr.f32.gmra.mrb[80].mxu0 %v20338_v30 }
0x14e6   :  { %20496 = vmatprep.mubr.f32.mxu0 %v20341_v17 }
0x14e9   :  { %20497 = vmatmul.mubr.f32.gmra.mrb[82].mxu0 %v20340_v16 }
0x14ea   :  { %20501 = vmatprep.mubr.f32.mxu0 %v20343_v9 }
0x14ed   :  { %20502 = vmatmul.mubr.f32.gmra.mrb[84].mxu0 %v20342_v51 }
0x14ee   :  { %20506 = vmatprep.mubr.f32.mxu0 %v20345_v4 }
0x14f1   :  { %20507 = vmatmul.mubr.f32.gmra.mrb[86].mxu0 %v20344_v45 }
0x14f2   :  { %20511 = vmatprep.mubr.f32.mxu0 %v20347_v38 }
0x14f5   :  { %20512 = vmatmul.mubr.f32.gmra.mrb[88].mxu0 %v20346_v3 }
0x14f6   :  { %20516 = vmatprep.mubr.f32.mxu0 %v20349_v63 }
0x14f9   :  { %20517 = vmatmul.mubr.f32.gmra.mrb[90].mxu0 %v20348_v57 }
0x14fa   :  { %20521 = vmatprep.mubr.f32.mxu0 %v20351_v59  ;;  %v20538_v59 = vld [vmem:[%s29849_s4 + $0x8] sm:$0xff] }
0x14fd   :  { %20522 = vmatmul.mubr.f32.gmra.mrb[92].mxu0 %v20350_v26  ;;  %v20539_v26 = vld [vmem:[%s29849_s4 + $0x10] sm:$0xff] }
0x15ac   :  { %v22730_v2 = vpop.f32.mrb[74].mxu0 }
0x15ad   :  { %v22731_v14 = vpop.f32.mrb[75].mxu0 }
0x15ae   :  { %v22732_v25 = vadd.f32 %v22731_v14, %v22730_v2  ;;  %v20540_v2 = vld [vmem:[%s29849_s4 + $0x18] sm:$0xff]  ;;  %v20541_v14 = vld [vmem:[%s29849_s4 + $0x20] sm:$0xff] }
0x15b0   :  { %v22733_v60 = vpop.f32.mrb[76].mxu0  ;;  %v20479_v61 = vadd.f32 %v22732_v25, %v29482_v5  ;;  %v20685_v25 = vld [vmem:[%s29849_s4 + $0x38] sm:$0xff] }
0x15b1   :  { %v22734_v34 = vpop.f32.mrb[77].mxu0  ;;  %25076 = vmatprep.mubr.msk.f32.mxu0 %vm20687_vm4, %v20685_v25  ;;  %v21125_v25 = vld [vmem:[%s29849_s4 + $0x88] sm:$0xff] }
0x15b2   :  { %v22735_v56 = vadd.f32 %v22734_v34, %v22733_v60  ;;  %27065 = vtanh.f32 %v20479_v61  ;;  %v20686_v60 = vld [vmem:[%s29849_s4 + $0x40] sm:$0xff]  ;;  %v20683_v61 = vld [vmem:[%s29849_s4 + $0x28] sm:$0xff] }
0x15b3   :  { %25077 = vmatmul.mubr.msk.f32.vlgmr.msra.gmra.mrb[94].mxu0 %vm20687_vm4, %v20686_v60 }
0x15b4   :  { %v20484_v55 = vadd.f32 %v22735_v56, %v29484_v39  ;;  %v22736_v54 = vpop.f32.mrb[78].mxu0  ;;  %25089 = vmatprep.mubr.msk.f32.mxu0 %vm20687_vm4, %v20683_v61 }
0x15b5   :  { %v22737_v10 = vpop.f32.mrb[79].mxu0 }
0x15b6   :  { %27067 = vtanh.f32 %v20484_v55  ;;  %v22738_v12 = vadd.f32 %v22737_v10, %v22736_v54 }
0x15b8   :  { %v22739_v33 = vpop.f32.mrb[80].mxu0  ;;  %v20489_v31 = vadd.f32 %v22738_v12, %v29492_v58 }
0x15b9   :  { %v22740_v53 = vpop.f32.mrb[81].mxu0 }
0x15ba   :  { %v22741_v35 = vadd.f32 %v22740_v53, %v22739_v33  ;;  %27069 = vtanh.f32 %v20489_v31 }
0x15bc   :  { %v20494_v47 = vadd.f32 %v22741_v35, %v29500_v0  ;;  %v22742_v36 = vpop.f32.mrb[82].mxu0  ;;  %v27066_v22 = vpop.eup %27065 }
0x15bd   :  { %v22743_v44 = vpop.f32.mrb[83].mxu0 }
0x15be   :  { %27071 = vtanh.f32 %v20494_v47  ;;  %v22744_v5 = vadd.f32 %v22743_v44, %v22742_v36 }
0x15c0   :  { %v27068_v20 = vpop.eup %27067  ;;  %v22745_v39 = vpop.f32.mrb[84].mxu0  ;;  %v20499_v7 = vadd.f32 %v22744_v5, %v29508_v32 }
0x15c1   :  { %v22746_v49 = vpop.f32.mrb[85].mxu0  ;;  %v25974_v50 = vpack.c.bf16 %v27068_v20, %v27066_v22  ;;  %v20570_v5 = vpop.permute.xlu0 %20569 }
0x15c2   :  { %v22747_v62 = vadd.f32 %v22746_v49, %v22745_v39  ;;  %27073 = vtanh.f32 %v20499_v7 }
0x15c3   :  { %25975 = vmatpush3.bf16.msra.mxu1 %v25974_v50 }
0x15c4   :  { %v20504_v58 = vadd.f32 %v22747_v62, %v29510_v41  ;;  %v22748_v40 = vpop.f32.mrb[86].mxu0  ;;  %25976 = vmatprep.subr.bf16.mxu1 %v29877_v43  ;;  %v27070_v52 = vpop.eup %27069  ;;  %v20866_v62 = vld [vmem:[%s29849_s4 + $0x48] sm:$0xff] }
0x15c5   :  { %v22749_v0 = vpop.f32.mrb[87].mxu0 }
0x15c6   :  { %27075 = vtanh.f32 %v20504_v58  ;;  %v22750_v15 = vadd.f32 %v22749_v0, %v22748_v40  ;;  %v20860_v58 = vpop.permute.xlu1 %20859  ;;  %v20855_v0 = vpop.permute.xlu0 %20854 }
0x15c8   :  { %v27072_v24 = vpop.eup %27071  ;;  %v22751_v11 = vpop.f32.mrb[88].mxu0  ;;  %v20509_v42 = vadd.f32 %v22750_v15, %v29518_v13 }
0x15c9   :  { %v22752_v37 = vpop.f32.mrb[89].mxu0  ;;  %v25977_v32 = vpack.c.bf16 %v27072_v24, %v27070_v52 }
0x15ca   :  { %v22753_v8 = vadd.f32 %v22752_v37, %v22751_v11  ;;  %27077 = vtanh.f32 %v20509_v42 }
0x15cb   :  { %25978 = vmatpush3.bf16.msra.mxu1 %v25977_v32  ;;  %v20867_v32 = vld [vmem:[%s29849_s4 + $0x50] sm:$0xff] }
0x15cc   :  { %v20514_v29 = vadd.f32 %v22753_v8, %v29526_v19  ;;  %v22754_v6 = vpop.f32.mrb[90].mxu0  ;;  %25979 = vmatprep.subr.bf16.mxu1 %v29877_v43  ;;  %v27074_v23 = vpop.eup %27073  ;;  %v20868_v8 = vld [vmem:[%s29849_s4 + $0x58] sm:$0xff] }
0x15cd   :  { %v22755_v41 = vpop.f32.mrb[91].mxu0 }
0x15ce   :  { %27079 = vtanh.f32 %v20514_v29  ;;  %v22756_v21 = vadd.f32 %v22755_v41, %v22754_v6  ;;  %v20869_v29 = vld [vmem:[%s29849_s4 + $0x60] sm:$0xff]  ;;  %v20995_v6 = vld [vmem:[%s29849_s4 + $0x68] sm:$0xff]  ;;  %v20882_v41 = vpop.permute.xlu1 %20881 }
0x15d0   :  { %v27076_v30 = vpop.eup %27075  ;;  %v22757_v17 = vpop.f32.mrb[92].mxu0  ;;  %v20519_v16 = vadd.f32 %v22756_v21, %v29531_v28  ;;  %v20537_v28 = vld [vmem:[%s29849_s4] sm:$0xff] }
0x15d1   :  { %v22758_v9 = vpop.f32.mrb[93].mxu0  ;;  %v25980_v13 = vpack.c.bf16 %v27076_v30, %v27074_v23  ;;  %v20877_v21 = vpop.permute.xlu0 %20876 }
0x15d2   :  { %v22759_v51 = vadd.f32 %v22758_v9, %v22757_v17  ;;  %27081 = vtanh.f32 %v20519_v16 }
0x15d3   :  { %25981 = vmatpush3.bf16.msra.mxu1 %v25980_v13  ;;  %v20892_v13 = vpop.permute.xlu1 %20891 }
0x15d4   :  { %v20524_v4 = vadd.f32 %v22759_v51, %v29533_v46  ;;  %25982 = vmatprep.subr.bf16.mxu1 %v29877_v43  ;;  %v27078_v19 = vpop.eup %27077  ;;  %v29878_v46 = vmov 0.0  }
0x15d6   :  { %27083 = vtanh.f32 %v20524_v4 }
0x15d7   :  { %v21011_v60 = vpop.permute.xlu1 %21010 }
0x15d8   :  { %v27080_v45 = vpop.eup %27079 }
0x15d9   :  { %v25983_v38 = vpack.c.bf16 %v27080_v45, %v27078_v19  ;;  %v20887_v19 = vpop.permute.xlu0 %20886 }
0x15db   :  { %25984 = vmatpush3.bf16.msra.mxu1 %v25983_v38 }
0x15dc   :  { %25985 = vmatprep.subr.bf16.mxu1 %v29877_v43  ;;  %v27082_v3 = vpop.eup %27081 }
0x15dd   :  { %v21006_v61 = vpop.permute.xlu0 %21005 }
0x15e0   :  { %v27084_v63 = vpop.eup %27083 }
0x15e1   :  { %v25986_v57 = vpack.c.bf16 %v27084_v63, %v27082_v3 }
0x15e3   :  { %25987 = vmatpush3.bf16.msra.mxu1 %v25986_v57 }
0x15e6   :  { %25052 = vmatmul.mubr.msk.f32.vlgmr.msra.gmra.mrb[98].mxu1 %vm20572_vm3, %v20537_v28 }
0x15e7   :  { %25054 = vmatprep.mubr.msk.f32.mxu1 %vm27125_vm2, %v29878_v46 }
0x15ea   :  { %25055 = vmatmul.mubr.msk.f32.gmra.mrb[100].mxu1 %vm20572_vm3, %v20538_v59 }
0x15eb   :  { %25057 = vmatprep.mubr.msk.f32.mxu1 %vm27125_vm2, %v29878_v46 }
0x15ee   :  { %25058 = vmatmul.mubr.msk.f32.gmra.mrb[102].mxu1 %vm20572_vm3, %v20539_v26  ;;  %v20996_v26 = vld [vmem:[%s29849_s4 + $0x70] sm:$0xff] }
0x15ef   :  { %25060 = vmatprep.mubr.msk.f32.mxu1 %vm27125_vm2, %v29878_v46 }
0x15f2   :  { %25061 = vmatmul.mubr.msk.f32.gmra.mrb[104].mxu1 %vm20572_vm3, %v20540_v2  ;;  %v20997_v2 = vld [vmem:[%s29849_s4 + $0x78] sm:$0xff] }
0x15f3   :  { %25063 = vmatprep.mubr.msk.f32.mxu1 %vm27125_vm2, %v29878_v46 }
0x15f6   :  { %25064 = vmatmul.mubr.msk.f32.gmra.mrb[106].mxu1 %vm20572_vm3, %v20541_v14  ;;  %v20998_v14 = vld [vmem:[%s29849_s4 + $0x80] sm:$0xff] }
0x15f7   :  { %25110 = vmatprep.mubr.msk.f32.mxu1 %vm21023_vm5, %v20995_v6 }
0x16b9   :  { %v20654_v34 = vpop.f32.mrb[98].mxu1 }
0x16ba   :  { %v25053_v56 = vpop.f32.mrb[99].mxu1  ;;  %v20655_v55 = vadd.f32 %v20654_v34, %v29537_v18 }
0x16bc   :  { %27085 = vtanh.f32 %v20655_v55 }
0x16bd   :  { %v20659_v54 = vpop.f32.mrb[100].mxu1 }
0x16be   :  { %v20660_v10 = vadd.f32 %v20659_v54, %v29539_v1  ;;  %v25056_v12 = vpop.f32.mrb[101].mxu1 }
0x16bf   :  { %v21021_v12 = vpop.permute.xlu1 %21020 }
0x16c0   :  { %27087 = vtanh.f32 %v20660_v10 }
0x16c1   :  { %v20664_v33 = vpop.f32.mrb[102].mxu1 }
0x16c2   :  { %v25059_v31 = vpop.f32.mrb[103].mxu1  ;;  %v20665_v53 = vadd.f32 %v20664_v33, %v29541_v27 }
0x16c4   :  { %27089 = vtanh.f32 %v20665_v53  ;;  %v21016_v53 = vpop.permute.xlu0 %21015 }
0x16c5   :  { %v20669_v35 = vpop.f32.mrb[104].mxu1 }
0x16c6   :  { %v20670_v47 = vadd.f32 %v20669_v35, %v29543_v48  ;;  %v25062_v36 = vpop.f32.mrb[105].mxu1  ;;  %v27086_v44 = vpop.eup %27085  ;;  %v20684_v48 = vld [vmem:[%s29849_s4 + $0x30] sm:$0xff] }
0x16c8   :  { %27091 = vtanh.f32 %v20670_v47 }
0x16c9   :  { %v20674_v22 = vpop.f32.mrb[106].mxu1 }
0x16ca   :  { %v27088_v18 = vpop.eup %27087  ;;  %v20675_v20 = vadd.f32 %v20674_v22, %v20570_v5  ;;  %v25065_v39 = vpop.f32.mrb[107].mxu1 }
0x16cb   :  { %v25996_v1 = vpack.c.bf16 %v27088_v18, %v27086_v44  ;;  %v21126_v18 = vld [vmem:[%s29849_s4 + $0x90] sm:$0xff]  ;;  %v21128_v39 = vld [vmem:[%s29849_s4 + $0xa0] sm:$0xff] }
0x16cc   :  { %27093 = vtanh.f32 %v20675_v20  ;;  %v21127_v20 = vld [vmem:[%s29849_s4 + $0x98] sm:$0xff] }
0x16cd   :  { %25997 = vmatprep.subr.bf16.mxu0 %v25996_v1 }
0x16ce   :  { %25999 = vmatpush3.bf16.msra.mxu0 %v25996_v1  ;;  %v27090_v7 = vpop.eup %27089  ;;  %v21141_v1 = vpop.permute.xlu1 %21140 }
0x16d2   :  { %v27092_v49 = vpop.eup %27091 }
0x16d3   :  { %v26000_v50 = vpack.c.bf16 %v27092_v49, %v27090_v7  ;;  %v21136_v7 = vpop.permute.xlu0 %21135 }
0x16d5   :  { %26001 = vmatprep.subr.bf16.mxu0 %v26000_v50 }
0x16d6   :  { %v27094_v27 = vpop.eup %27093  ;;  %26003 = vmatpush3.bf16.msra.mxu0 %v26000_v50 }
0x16d7   :  { %25087 = vmatprep.subr.mxu0 %v27094_v27 }
0x16da   :  { %25088 = vmatpush3.msra.mxu0 %v27094_v27 }
0x16db   :  { %25090 = vmatmul.mubr.msk.f32.vlgmr.msra.gmra.mrb[94].mxu0 %vm20687_vm4, %v20684_v48 }
0x16dc   :  { %25096 = vmatprep.mubr.msk.f32.mxu0 %vm33_vm0, %v20866_v62 }
0x17ae   :  { %v25091_v40 = vpop.f32.mrb[94].mxu0 }
0x17af   :  { %v20863_v15 = vadd.f32 %v25091_v40, %v20860_v58  ;;  %v20841_v52 = vpop.f32.mrb[95].mxu0  ;;  %v21151_v58 = vpop.permute.xlu1 %21150 }
0x17b0   :  { %v20862_v24 = vadd.f32 %v20855_v0, %v20841_v52 }
0x17b1   :  { %v20865_v11 = vmax.f32 %v20863_v15, 0.0  ;;  %v21146_v15 = vpop.permute.xlu0 %21145 }
0x17b2   :  { %v20864_v42 = vmax.f32 %v20862_v24, 0.0 }
0x17b4   :  { %v26004_v37 = vpack.c.bf16 %v20865_v11, %v20864_v42 }
0x17b5   :  { %v21259_v6 = vpop.permute.xlu0 %21258 }
0x17b6   :  { %26005 = vmatprep.subr.bf16.mxu0 %v26004_v37 }
0x17b7   :  { %26007 = vmatpush3.bf16.msra.mxu0 %v26004_v37 }
0x17ba   :  { %25097 = vmatmul.mubr.msk.f32.vlgmr.msra.gmra.mrb[96].mxu0 %vm33_vm0, %v20867_v32 }
0x17bb   :  { %25099 = vmatprep.mubr.msk.f32.mxu0 %vm33_vm0, %v20868_v8 }
0x17be   :  { %25100 = vmatmul.mubr.msk.f32.gmra.mrb[98].mxu0 %vm33_vm0, %v20869_v29  ;;  %v21254_v29 = vld [vmem:[%s29849_s4 + $0xa8] sm:$0x1] }
0x17bf   :  { %25124 = vmatprep.mubr.msk.f32.mxu0 %vm21023_vm5, %v21125_v25 }
0x188d   :  { %v25098_v23 = vpop.f32.mrb[96].mxu0 }
0x188e   :  { %v20978_v30 = vadd.f32 %v25098_v23, %v20882_v41  ;;  %v20972_v17 = vpop.f32.mrb[97].mxu0 }
0x188f   :  { %v20973_v16 = vadd.f32 %v20972_v17, %v20877_v21 }
0x1890   :  { %v20992_v9 = vmax.f32 %v20978_v30, 0.0 }
0x1891   :  { %v20991_v51 = vmax.f32 %v20973_v16, 0.0  ;;  %v25101_v4 = vpop.f32.mrb[98].mxu0 }
0x1892   :  { %v20988_v45 = vadd.f32 %v25101_v4, %v20892_v13  ;;  %v20982_v38 = vpop.f32.mrb[99].mxu0 }
0x1893   :  { %v26008_v3 = vpack.c.bf16 %v20992_v9, %v20991_v51  ;;  %v20983_v63 = vadd.f32 %v20982_v38, %v20887_v19 }
0x1894   :  { %v20994_v57 = vmax.f32 %v20988_v45, 0.0 }
0x1895   :  { %v20993_v28 = vmax.f32 %v20983_v63, 0.0  ;;  %26009 = vmatprep.subr.bf16.mxu1 %v26008_v3 }
0x1896   :  { %26011 = vmatpush3.bf16.msra.mxu1 %v26008_v3 }
0x1897   :  { %v26012_v59 = vpack.c.bf16 %v20994_v57, %v20993_v28 }
0x1899   :  { %26013 = vmatprep.subr.bf16.mxu1 %v26012_v59 }
0x189a   :  { %26015 = vmatpush3.bf16.msra.mxu1 %v26012_v59 }
0x189b   :  { %26024 = vmatprep.subr.bf16.mxu1 %v29877_v43 }
0x189d   :  { %25111 = vmatmul.mubr.msk.f32.vlgmr.msra.gmra.mrb[108].mxu1 %vm21023_vm5, %v20996_v26 }
0x189e   :  { %25113 = vmatprep.mubr.msk.f32.mxu1 %vm21023_vm5, %v20997_v2 }
0x18a1   :  { %25114 = vmatmul.mubr.msk.f32.gmra.mrb[110].mxu1 %vm21023_vm5, %v20998_v14 }
0x18a2   :  { %25138 = vmatprep.mubr.msk.f32.mxu1 %vm27125_vm2, %v29878_v46 }
0x1970   :  { %v25112_v34 = vpop.f32.mrb[108].mxu1 }
0x1971   :  { %v21108_v56 = vadd.f32 %v25112_v34, %v21011_v60  ;;  %v21102_v55 = vpop.f32.mrb[109].mxu1 }
0x1972   :  { %v21103_v54 = vadd.f32 %v21102_v55, %v21006_v61 }
0x1973   :  { %v21122_v10 = vmax.f32 %v21108_v56, 0.0 }
0x1974   :  { %v21121_v33 = vmax.f32 %v21103_v54, 0.0  ;;  %v25115_v31 = vpop.f32.mrb[110].mxu1 }
0x1975   :  { %v21118_v35 = vadd.f32 %v25115_v31, %v21021_v12  ;;  %v21112_v47 = vpop.f32.mrb[111].mxu1 }
0x1976   :  { %v26016_v46 = vpack.c.bf16 %v21122_v10, %v21121_v33  ;;  %v21113_v36 = vadd.f32 %v21112_v47, %v21016_v53 }
0x1977   :  { %v21124_v44 = vmax.f32 %v21118_v35, 0.0 }
0x1978   :  { %v21123_v5 = vmax.f32 %v21113_v36, 0.0  ;;  %26017 = vmatprep.subr.bf16.mxu0 %v26016_v46 }
0x1979   :  { %26019 = vmatpush3.bf16.msra.mxu0 %v26016_v46 }
0x197a   :  { %v26020_v22 = vpack.c.bf16 %v21124_v44, %v21123_v5 }
0x197c   :  { %26021 = vmatprep.subr.bf16.mxu0 %v26020_v22 }
0x197d   :  { %26023 = vmatpush3.bf16.msra.mxu0 %v26020_v22 }
0x1980   :  { %25125 = vmatmul.mubr.msk.f32.vlgmr.msra.gmra.mrb[100].mxu0 %vm21023_vm5, %v21126_v18 }
0x1981   :  { %25127 = vmatprep.mubr.msk.f32.mxu0 %vm21023_vm5, %v21127_v20 }
0x1984   :  { %25128 = vmatmul.mubr.msk.f32.gmra.mrb[102].mxu0 %vm21023_vm5, %v21128_v39 }
0x1a53   :  { %v25126_v49 = vpop.f32.mrb[100].mxu0 }
0x1a54   :  { %v21237_v50 = vadd.f32 %v25126_v49, %v21141_v1  ;;  %v21231_v27 = vpop.f32.mrb[101].mxu0 }
0x1a55   :  { %v21232_v48 = vadd.f32 %v21231_v27, %v21136_v7 }
0x1a56   :  { %v21251_v62 = vmax.f32 %v21237_v50, 0.0 }
0x1a57   :  { %v21250_v40 = vmax.f32 %v21232_v48, 0.0  ;;  %v25129_v0 = vpop.f32.mrb[102].mxu0 }
0x1a58   :  { %v21247_v52 = vadd.f32 %v25129_v0, %v21151_v58  ;;  %v21241_v24 = vpop.f32.mrb[103].mxu0 }
0x1a59   :  { %v26025_v11 = vpack.c.bf16 %v21251_v62, %v21250_v40  ;;  %v21242_v42 = vadd.f32 %v21241_v24, %v21146_v15 }
0x1a5a   :  { %v21253_v37 = vmax.f32 %v21247_v52, 0.0 }
0x1a5b   :  { %v21252_v32 = vmax.f32 %v21242_v42, 0.0  ;;  %26026 = vmatpush3.bf16.msra.mxu1 %v26025_v11 }
0x1a5c   :  { %26027 = vmatprep.subr.bf16.mxu1 %v29877_v43 }
0x1a5d   :  { %v26028_v8 = vpack.c.bf16 %v21253_v37, %v21252_v32 }
0x1a5f   :  { %26029 = vmatpush3.bf16.msra.mxu1 %v26028_v8 }
0x1a62   :  { %25139 = vmatmul.mubr.msk.f32.vlgmr.msra.gmra.mrb[112].mxu1 %vm21023_vm5, %v21254_v29 }
0x1b35   :  { %v21330_v41 = vpop.f32.mrb[112].mxu1 }
0x1b36   :  { %v21331_v21 = vadd.f32 %v21330_v41, %v21259_v6  ;;  %v25140_v23 = vpop.f32.mrb[113].mxu1 }
0x1b38   :  { %v21392_v30 = vmul.f32 -1.442695, %v21331_v21 }
0x1b3a   :  { %27095 = vpow2.f32 %v21392_v30 }
0x1b44   :  { %v27096_v17 = vpop.eup %27095 }
0x1b45   :  { %v21337_v16 = vadd.f32 1.0, %v27096_v17 }
0x1b47   :  { %27097 = vrcp.f32 %v21337_v16 }
0x1b51   :  { %v27098_v43 = vpop.eup %27097 }
0x1b52   :  { %21340 = vst [vmem:[#allocation3] sm:$0x1] %v27098_v43 }
0x1b53   :  { %27110 = shalt.err (!%p27107_p4)
}
0x1b54   :  { %s27111_s22 = scalar_lea.hbm %s29851_s6, 16 }
0x1b55   :  { %p27112_p5 = scmp.ne.s32.totalorder %s29851_s6, %s27111_s22  ;;  %p27115_p6 = scmp.lt.u32.totalorder %s27111_s22, %s29851_s6 }
0x1b57   :  { %p27117_p7 = pnand %p27115_p6, %p27112_p5 }
0x1b59   :  { %27120 = shalt.err (!%p27117_p7)
}
0x1b5a   :  { %21350 = dma.vmem_to_hbm [thread:$0]  %s21348_s19, 16, %s29851_s6, [#allocation4]  }
0x1b5b   :  { %27121 = dma.done.wait [#allocation4], 16  }
0x1b5c   :  { %27122 = vsyncadd [#allocation4], 4294967280 }
0x1b5d   :  { %21354 = vsyncpa [#allocation4], 1 }

</bundles_post_ra>
